<compile_context>
chip_gen: v6e
topology: v6e:2x2x1
jax: 0.10.0
libtpu: 0.0.40
codegen_flags: <defaults>
</compile_context>

<pallas_src>
import math

import jax
import jax.numpy as jnp
from jax.experimental import pallas as pl
from jax.experimental.pallas import tpu as pltpu

# ----------------------------- model configuration -----------------------------
SEQ_LEN = 16
D_MODEL = 256          # fixed by conv4 out_channels in the reference module
NHEAD = 4
HEAD_DIM = D_MODEL // NHEAD      # 64
D_HID = 64
D_HID_PAD = 128                  # FFN hidden padded to a full 128-lane group (zeros)
NLAYERS = 2
N_REG = 1
N_CLS = 10
BATCH = 2
ROWS = BATCH * SEQ_LEN           # batch folded into the sublane dimension
LN_EPS = 1e-5
C1_PAD = 16                      # conv1 out-channels padded 12 -> 16

# ----------------------------- f32 slab layout [FSLAB_ROWS, 256] -----------------------------
R_PE = 0                         # rows 0 .. ROWS-1 : positional encoding tiled over batch
R_CW1 = R_PE + ROWS              # conv1 taps, col index = k*16 + co (co < 12)
R_CB1 = R_CW1 + 1                # cols 0:16 (12 valid)
R_CB2 = R_CB1 + 1                # cols 0:128
R_CB3 = R_CB2 + 1
R_CB4 = R_CB3 + 1
R_LNF_W = R_CB4 + 1
R_LNF_B = R_LNF_W + 1
R_HEAD_B = R_LNF_B + 1           # col 0: dec_b, cols 1:11: cls_b
R_LAYER0 = 48                    # per-layer rows:
#   +0 q_bias (pre-scaled), +1 k_bias, +2 v_bias, +3 out_proj bias,
#   +4 ff1 bias (cols 0:128, 64:128 zero), +5 ff2 bias, +6 ln1_w, +7 ln1_b, +8 ln2_w, +9 ln2_b
LAYER_STRIDE = 16
R_HEAD_W = R_LAYER0 + NLAYERS * LAYER_STRIDE       # rows 80..95 : [dec_w | cls_w] cols 0:11
FSLAB_ROWS = R_HEAD_W + SEQ_LEN                    # 96 rows

# ----------------------------- bf16 slab layout [BSLAB_ROWS, 768] -----------------------------
BS_COLS = 3 * D_MODEL            # 768
B_CW2 = 0                        # 16 rows (12 valid), cols 0:384
B_CW3 = 16                       # 128 rows, cols 0:768
B_CW4 = 144                      # 256 rows, cols 0:768
B_LAYER0 = 400
B_LAYER_STRIDE = 2 * D_MODEL     # 512 rows per layer
BSLAB_ROWS = B_LAYER0 + NLAYERS * B_LAYER_STRIDE   # 1424 rows (multiple of 16)


def _b_qkv(i):                   # qkv_w[i]: (256, 768)
    return B_LAYER0 + i * B_LAYER_STRIDE


def _b_misc(i):                  # cols 0:256 out_w, 256:384 ff1_w(pad), rows 0:128 cols 384:640 ff2_w(pad)
    return _b_qkv(i) + D_MODEL


# ----------------------------- in-kernel helpers -----------------------------
def _shift_down(y):
    """Row r gets y[r-1]; first row of every length-SEQ_LEN segment is zero (left pad)."""
    rolled = jnp.concatenate([y[-1:], y[:-1]], axis=0)
    r = jax.lax.broadcasted_iota(jnp.int32, y.shape, 0)
    return jnp.where(r % SEQ_LEN == 0, 0.0, rolled)


def _shift_up(y):
    """Row r gets y[r+1]; last row of every length-SEQ_LEN segment is zero (right pad)."""
    rolled = jnp.concatenate([y[1:], y[:1]], axis=0)
    r = jax.lax.broadcasted_iota(jnp.int32, y.shape, 0)
    return jnp.where(r % SEQ_LEN == SEQ_LEN - 1, 0.0, rolled)


def _layer_norm(x, w, b):
    mu = jnp.mean(x, axis=-1, keepdims=True)
    xc = x - mu
    var = jnp.mean(xc * xc, axis=-1, keepdims=True)
    return xc * jax.lax.rsqrt(var + LN_EPS) * w + b


def _softmax_attn(x):
    m = jnp.max(x, axis=-1, keepdims=True)
    e = jnp.exp(x - m)
    return e * pl.reciprocal(jnp.sum(e, axis=-1, keepdims=True), approx=True)


# ----------------------------- the Pallas kernel -----------------------------
def _model_kernel(x_ref, fs_ref, bs_ref, out_ref, hv_ref):
    f32 = jnp.float32
    bf16 = jnp.bfloat16

    def frow(r):                 # one (1, 256) f32 row of the parameter slab
        return fs_ref[r:r + 1, :]

    # ---- conv1 (Cin=1): broadcast multiply, then shift the per-tap outputs ----
    x = x_ref[...]                                               # (ROWS, 1) f32
    taps = fs_ref[R_CW1:R_CW1 + 1, 0:3 * C1_PAD]                 # (1, 48)
    y3 = x * taps                                                # (ROWS, 48)
    h = jnp.maximum(
        _shift_down(y3[:, 0:C1_PAD]) + y3[:, C1_PAD:2 * C1_PAD]
        + _shift_up(y3[:, 2 * C1_PAD:3 * C1_PAD]) + frow(R_CB1)[:, :C1_PAD], 0.0)

    # ---- conv2..4: one [ROWS, Cin] @ [Cin, 3*Cout] matmul, shift the output slices ----
    def conv_block(h_in, w, bias, cout):
        y = jnp.dot(h_in.astype(bf16), w, preferred_element_type=f32)     # (ROWS, 3*cout)
        y = (_shift_down(y[:, 0:cout]) + y[:, cout:2 * cout]
             + _shift_up(y[:, 2 * cout:3 * cout]) + bias)
        return jnp.maximum(y, 0.0)

    h = conv_block(h, bs_ref[B_CW2:B_CW2 + C1_PAD, 0:3 * 128], frow(R_CB2)[:, :128], 128)
    h = conv_block(h, bs_ref[B_CW3:B_CW3 + 128, :], frow(R_CB3), D_MODEL)
    h = conv_block(h, bs_ref[B_CW4:B_CW4 + D_MODEL, :], frow(R_CB4), D_MODEL)

    # ---- positional encoding (pre-tiled across the folded batch) ----
    h = h + fs_ref[R_PE:R_PE + ROWS, :]

    # ---- transformer encoder (post-norm, ReLU FFN, dropout = identity) ----
    for i in range(NLAYERS):
        fb = R_LAYER0 + i * LAYER_STRIDE

        qkv_w = bs_ref[_b_qkv(i):_b_qkv(i) + D_MODEL, :]                  # (256, 768) bf16
        qkv = jnp.dot(h.astype(bf16), qkv_w, preferred_element_type=f32)  # (ROWS, 768)
        q = qkv[:, 0:D_MODEL] + frow(fb + 0)        # 1/sqrt(head_dim) folded into Wq, bq
        k = qkv[:, D_MODEL:2 * D_MODEL] + frow(fb + 1)
        v = qkv[:, 2 * D_MODEL:3 * D_MODEL] + frow(fb + 2)

        # per-(batch, head) attention; PV results assembled into one (ROWS, 256) scratch
        for b in range(BATCH):
            rsl = slice(b * SEQ_LEN, (b + 1) * SEQ_LEN)
            for hh in range(NHEAD):
                csl = slice(hh * HEAD_DIM, (hh + 1) * HEAD_DIM)
                qh = q[rsl, csl].astype(bf16)
                kh = k[rsl, csl].astype(bf16)
                vh = v[rsl, csl].astype(bf16)
                s = jax.lax.dot_general(qh, kh, (((1,), (1,)), ((), ())),
                                        preferred_element_type=f32)       # (L, L)
                p = _softmax_attn(s)
                hv = jnp.dot(p.astype(bf16), vh, preferred_element_type=f32)  # (L, 64)
                hv_ref[rsl, csl] = hv

        # single fused K=256 output projection per layer
        out_w = bs_ref[_b_misc(i):_b_misc(i) + D_MODEL, 0:D_MODEL]        # (256, 256) bf16
        attn = jnp.dot(hv_ref[...].astype(bf16), out_w,
                       preferred_element_type=f32) + frow(fb + 3)

        h = _layer_norm(h + attn, frow(fb + 6), frow(fb + 7))

        ff1_w = bs_ref[_b_misc(i):_b_misc(i) + D_MODEL,
                       D_MODEL:D_MODEL + D_HID_PAD]                       # (256, 128) padded
        ff2_w = bs_ref[_b_misc(i):_b_misc(i) + D_HID_PAD,
                       D_MODEL + D_HID_PAD:2 * D_MODEL + D_HID_PAD]       # (128, 256) padded
        ff = jnp.maximum(
            jnp.dot(h.astype(bf16), ff1_w, preferred_element_type=f32)
            + frow(fb + 4)[:, :D_HID_PAD], 0.0)
        ff = jnp.dot(ff.astype(bf16), ff2_w, preferred_element_type=f32) + frow(fb + 5)

        h = _layer_norm(h + ff, frow(fb + 8), frow(fb + 9))

    # final encoder norm (TransformerEncoder(norm=layer_norm))
    h = _layer_norm(h, frow(R_LNF_W), frow(R_LNF_B))

    # ---- AdaptiveAvgPool1d(1) over d_model, then both linear heads (per batch segment) ----
    pooled = jnp.mean(h, axis=-1, keepdims=True)                          # (ROWS, 1)
    head_w = fs_ref[R_HEAD_W:R_HEAD_W + SEQ_LEN, 0:16]                    # (L, 16)
    head_b = fs_ref[R_HEAD_B:R_HEAD_B + 1, 0:16]                          # (1, 16)
    rows = []
    for b in range(BATCH):
        pb = pooled[b * SEQ_LEN:(b + 1) * SEQ_LEN, :]                     # (L, 1)
        hb = jnp.sum(pb * head_w, axis=0, keepdims=True) + head_b         # (1, 16)
        reg = hb[:, 0:N_REG]
        logits = hb[:, N_REG:N_REG + N_CLS]
        m = jnp.max(logits, axis=-1, keepdims=True)
        e = jnp.exp(logits - m)
        cls = e / jnp.sum(e, axis=-1, keepdims=True)                      # exact softmax
        rows.append(jnp.concatenate([reg, cls], axis=1))                  # (1, 11)
    out_ref[...] = jnp.concatenate(rows, axis=0)                          # (B, 11)


# ----------------------------- wrapper -----------------------------
def transformer_forward(x, params):
    """x: [B, L] float32.  Returns (x_reg [B, 1, N_REG], x_cls [B, N_CLS])."""
    x2d = x.reshape(ROWS, 1).astype(jnp.float32)

    out = pl.pallas_call(
        _model_kernel,
        out_shape=jax.ShapeDtypeStruct((BATCH, N_REG + N_CLS), jnp.float32),
        grid_spec=pltpu.PrefetchScalarGridSpec(
            num_scalar_prefetch=0,
            grid=(1,),                                  # single step: batch folded into M
            in_specs=[
                pl.BlockSpec((ROWS, 1), lambda i: (0, 0)),
                pl.BlockSpec((FSLAB_ROWS, D_MODEL), lambda i: (0, 0)),
                pl.BlockSpec((BSLAB_ROWS, BS_COLS), lambda i: (0, 0)),
            ],
            out_specs=pl.BlockSpec((BATCH, N_REG + N_CLS), lambda i: (0, 0)),
            scratch_shapes=[pltpu.VMEM((ROWS, D_MODEL), jnp.float32)],
        ),
    )(x2d, params["fslab"], params["bslab"])

    x_reg = out[:, 0:N_REG].reshape(BATCH, 1, N_REG)
    x_cls = out[:, N_REG:N_REG + N_CLS]
    return x_reg, x_cls


# ----------------------------- deterministic parameter setup -----------------------------
def _positional_encoding(L, d):
    position = jnp.arange(L, dtype=jnp.float32)[:, None]
    div_term = jnp.exp(jnp.arange(0, d, 2, dtype=jnp.float32) * (-math.log(10000.0) / d))
    pe = jnp.zeros((L, d), jnp.float32)
    pe = pe.at[:, 0::2].set(jnp.sin(position * div_term))
    pe = pe.at[:, 1::2].set(jnp.cos(position * div_term))
    return pe


def init_params(key):
    keys = iter(jax.random.split(key, 32))

    def take(shape, scale):
        return jax.random.normal(next(keys), shape, jnp.float32) * scale

    conv_dims = [(1, 12), (12, 128), (128, 256), (256, 256)]   # (Cin, Cout)
    conv_w, conv_b = [], []
    for ci, co in conv_dims:
        w = take((co, ci, 3), 1.0 / math.sqrt(ci * 3))          # torch layout [Co, Ci, K]
        # fused-conv layout [Cin, 3*Cout]: column block k holds w[:, :, k]^T
        conv_w.append(jnp.concatenate([w[:, :, kk].T for kk in range(3)], axis=1))
        conv_b.append(take((co,), 0.01))

    s_d = 1.0 / math.sqrt(D_MODEL)
    qkv_w = take((NLAYERS, D_MODEL, 3 * D_MODEL), s_d)           # pre-transposed: h @ W
    qkv_b = take((NLAYERS, 3 * D_MODEL), 0.01)
    out_w = take((NLAYERS, D_MODEL, D_MODEL), s_d)
    out_b = take((NLAYERS, D_MODEL), 0.01)
    ff1_w = take((NLAYERS, D_MODEL, D_HID), s_d)
    ff1_b = take((NLAYERS, D_HID), 0.01)
    ff2_w = take((NLAYERS, D_HID, D_MODEL), 1.0 / math.sqrt(D_HID))
    ff2_b = take((NLAYERS, D_MODEL), 0.01)

    # fold the attention scale 1/sqrt(head_dim) into the Q projection + bias
    scale = 1.0 / math.sqrt(HEAD_DIM)
    qkv_w = qkv_w.at[:, :, :D_MODEL].multiply(scale)
    qkv_b = qkv_b.at[:, :D_MODEL].multiply(scale)

    dec_w = take((SEQ_LEN, N_REG), 0.1)                          # Linear(seq_len -> n_reg)^T
    cls_w = take((SEQ_LEN, N_CLS), 0.1)                          # Linear(seq_len -> num_classes)^T
    # dec_b / cls_b initialised to zero (slab default)

    # ---- f32 slab ----
    fs = jnp.zeros((FSLAB_ROWS, D_MODEL), jnp.float32)
    pe = _positional_encoding(SEQ_LEN, D_MODEL)
    fs = fs.at[R_PE:R_PE + ROWS, :].set(jnp.tile(pe, (BATCH, 1)))
    w1 = conv_w[0].reshape(3, 12)                                # [k, co]
    taps = jnp.zeros((3, C1_PAD), jnp.float32).at[:, :12].set(w1).reshape(3 * C1_PAD)
    fs = fs.at[R_CW1, 0:3 * C1_PAD].set(taps)
    fs = fs.at[R_CB1, 0:12].set(conv_b[0])
    fs = fs.at[R_CB2, 0:128].set(conv_b[1])
    fs = fs.at[R_CB3, :].set(conv_b[2])
    fs = fs.at[R_CB4, :].set(conv_b[3])
    fs = fs.at[R_LNF_W, :].set(1.0)                              # final LN weight (bias = 0)
    for i in range(NLAYERS):
        base = R_LAYER0 + i * LAYER_STRIDE
        fs = fs.at[base + 0, :].set(qkv_b[i, 0:D_MODEL])
        fs = fs.at[base + 1, :].set(qkv_b[i, D_MODEL:2 * D_MODEL])
        fs = fs.at[base + 2, :].set(qkv_b[i, 2 * D_MODEL:])
        fs = fs.at[base + 3, :].set(out_b[i])
        fs = fs.at[base + 4, 0:D_HID].set(ff1_b[i])              # cols 64:128 stay zero
        fs = fs.at[base + 5, :].set(ff2_b[i])
        fs = fs.at[base + 6, :].set(1.0)                         # ln1 weight
        fs = fs.at[base + 8, :].set(1.0)                         # ln2 weight
    fs = fs.at[R_HEAD_W:R_HEAD_W + SEQ_LEN, 0:N_REG].set(dec_w)
    fs = fs.at[R_HEAD_W:R_HEAD_W + SEQ_LEN, N_REG:N_REG + N_CLS].set(cls_w)

    # ---- bf16 slab (single weight DMA) ----
    bs = jnp.zeros((BSLAB_ROWS, BS_COLS), jnp.float32)
    cw2 = jnp.zeros((C1_PAD, 3 * 128), jnp.float32).at[:12, :].set(conv_w[1])   # pad Cin 12->16
    bs = bs.at[B_CW2:B_CW2 + C1_PAD, 0:3 * 128].set(cw2)
    bs = bs.at[B_CW3:B_CW3 + 128, :].set(conv_w[2])
    bs = bs.at[B_CW4:B_CW4 + D_MODEL, :].set(conv_w[3])
    for i in range(NLAYERS):
        qb, mb = _b_qkv(i), _b_misc(i)
        bs = bs.at[qb:qb + D_MODEL, :].set(qkv_w[i])
        bs = bs.at[mb:mb + D_MODEL, 0:D_MODEL].set(out_w[i])
        bs = bs.at[mb:mb + D_MODEL, D_MODEL:D_MODEL + D_HID].set(ff1_w[i])      # cols pad zero
        bs = bs.at[mb:mb + D_HID,
                   D_MODEL + D_HID_PAD:D_MODEL + D_HID_PAD + D_MODEL].set(ff2_w[i])  # rows pad zero

    return {"fslab": fs, "bslab": bs.astype(jnp.bfloat16)}


if __name__ == "__main__":
    root = jax.random.PRNGKey(0)
    pkey, xkey = jax.random.split(root)
    params = init_params(pkey)

    # torch input [batch, seq_len] (Conv1d in_channels=1 after unsqueeze)
    x = jax.random.normal(xkey, (BATCH, SEQ_LEN), jnp.float32)

    x_reg, x_cls = transformer_forward(x, params)
    jax.block_until_ready((x_reg, x_cls))

    assert x_reg.shape == (BATCH, 1, N_REG)
    assert x_cls.shape == (BATCH, N_CLS)
    assert bool(jnp.all(jnp.isfinite(x_reg))) and bool(jnp.all(jnp.isfinite(x_cls)))
    print("KERNEL_OK")
</pallas_src>

<mosaic_0001>
module attributes {stable_mosaic.version = 11 : i64} {
  func.func @_model_kernel(%arg0: i32, %arg1: memref<32x1xf32, #tpu.memory_space<vmem>>, %arg2: memref<96x256xf32, #tpu.memory_space<vmem>>, %arg3: memref<1424x768xbf16, #tpu.memory_space<vmem>>, %arg4: memref<2x11xf32, #tpu.memory_space<vmem>>, %arg5: memref<32x256xf32, #tpu.memory_space<vmem>>) attributes {dimension_semantics = [#tpu.dimension_semantics<arbitrary>], iteration_bounds = array<i64: 1>, scalar_prefetch = 0 : i64, scratch_operands = 1 : i64, tpu.core_type = #tpu.core_type<tc>, window_params = [{pipeline_mode = #tpu.pipeline_mode<synchronous>, transform_indices = @transform_0, window_bounds = array<i64: 32, 1>}, {pipeline_mode = #tpu.pipeline_mode<synchronous>, transform_indices = @transform_1, window_bounds = array<i64: 96, 256>}, {pipeline_mode = #tpu.pipeline_mode<synchronous>, transform_indices = @transform_2, window_bounds = array<i64: 1424, 768>}, {pipeline_mode = #tpu.pipeline_mode<synchronous>, transform_indices = @transform_3, window_bounds = array<i64: 2, 11>}]} {
    %c0 = arith.constant 0 : index
    %c0_0 = arith.constant 0 : index
    %0 = vector.load %arg1[%c0, %c0_0] : memref<32x1xf32, #tpu.memory_space<vmem>>, vector<32x1xf32>
    %c32 = arith.constant 32 : index
    %c0_1 = arith.constant 0 : index
    %1 = vector.load %arg2[%c32, %c0_1] : memref<96x256xf32, #tpu.memory_space<vmem>>, vector<1x48xf32>
    %2 = vector.broadcast %0 : vector<32x1xf32> to vector<32x48xf32>
    %3 = vector.broadcast %1 : vector<1x48xf32> to vector<32x48xf32>
    %4 = arith.mulf %2, %3 : vector<32x48xf32>
    %5 = vector.extract_strided_slice %4 {offsets = [0, 0], sizes = [32, 16], strides = [1, 1]} : vector<32x48xf32> to vector<32x16xf32>
    %6 = vector.extract_strided_slice %5 {offsets = [31, 0], sizes = [1, 16], strides = [1, 1]} : vector<32x16xf32> to vector<1x16xf32>
    %7 = vector.extract_strided_slice %5 {offsets = [0, 0], sizes = [31, 16], strides = [1, 1]} : vector<32x16xf32> to vector<31x16xf32>
    %8 = tpu.concatenate %6, %7 in 0 : vector<1x16xf32>, vector<31x16xf32> -> vector<32x16xf32>
    %9 = tpu.iota {dimensions = array<i32: 0>} : vector<32x16xi32>
    %c16_i32 = arith.constant 16 : i32
    %c0_i32 = arith.constant 0 : i32
    %10 = arith.cmpi eq, %c16_i32, %c0_i32 : i32
    %c1_i32 = arith.constant 1 : i32
    %11 = arith.select %10, %c1_i32, %c16_i32 : i32
    %12 = vector.broadcast %11 : i32 to vector<32x16xi32>
    %13 = arith.remsi %9, %12 : vector<32x16xi32>
    %c0_i32_2 = arith.constant 0 : i32
    %14 = vector.broadcast %c0_i32_2 : i32 to vector<32x16xi32>
    %15 = arith.cmpi ne, %13, %14 : vector<32x16xi32>
    %c0_i32_3 = arith.constant 0 : i32
    %16 = vector.broadcast %c0_i32_3 : i32 to vector<32x16xi32>
    %17 = arith.cmpi slt, %13, %16 : vector<32x16xi32>
    %c0_i32_4 = arith.constant 0 : i32
    %18 = arith.cmpi slt, %11, %c0_i32_4 : i32
    %19 = vector.broadcast %18 : i1 to vector<32x16xi1>
    %20 = vector.broadcast %19 : vector<32x16xi1> to vector<32x16xi1>
    %21 = arith.xori %17, %20 : vector<32x16xi1>
    %22 = arith.andi %21, %15 : vector<32x16xi1>
    %23 = vector.broadcast %11 : i32 to vector<32x16xi32>
    %24 = arith.addi %13, %23 : vector<32x16xi32>
    %25 = arith.select %22, %24, %13 : vector<32x16xi1>, vector<32x16xi32>
    %c0_i32_5 = arith.constant 0 : i32
    %26 = vector.broadcast %c0_i32_5 : i32 to vector<32x16xi32>
    %27 = arith.cmpi eq, %25, %26 : vector<32x16xi32>
    %cst = arith.constant 0.000000e+00 : f32
    %28 = vector.broadcast %cst : f32 to vector<32x16xf32>
    %29 = arith.select %27, %28, %8 : vector<32x16xi1>, vector<32x16xf32>
    %30 = vector.extract_strided_slice %4 {offsets = [0, 16], sizes = [32, 16], strides = [1, 1]} : vector<32x48xf32> to vector<32x16xf32>
    %31 = arith.addf %29, %30 : vector<32x16xf32>
    %32 = vector.extract_strided_slice %4 {offsets = [0, 32], sizes = [32, 16], strides = [1, 1]} : vector<32x48xf32> to vector<32x16xf32>
    %33 = vector.extract_strided_slice %32 {offsets = [1, 0], sizes = [31, 16], strides = [1, 1]} : vector<32x16xf32> to vector<31x16xf32>
    %34 = vector.extract_strided_slice %32 {offsets = [0, 0], sizes = [1, 16], strides = [1, 1]} : vector<32x16xf32> to vector<1x16xf32>
    %35 = tpu.concatenate %33, %34 in 0 : vector<31x16xf32>, vector<1x16xf32> -> vector<32x16xf32>
    %36 = tpu.iota {dimensions = array<i32: 0>} : vector<32x16xi32>
    %c16_i32_6 = arith.constant 16 : i32
    %c0_i32_7 = arith.constant 0 : i32
    %37 = arith.cmpi eq, %c16_i32_6, %c0_i32_7 : i32
    %c1_i32_8 = arith.constant 1 : i32
    %38 = arith.select %37, %c1_i32_8, %c16_i32_6 : i32
    %39 = vector.broadcast %38 : i32 to vector<32x16xi32>
    %40 = arith.remsi %36, %39 : vector<32x16xi32>
    %c0_i32_9 = arith.constant 0 : i32
    %41 = vector.broadcast %c0_i32_9 : i32 to vector<32x16xi32>
    %42 = arith.cmpi ne, %40, %41 : vector<32x16xi32>
    %c0_i32_10 = arith.constant 0 : i32
    %43 = vector.broadcast %c0_i32_10 : i32 to vector<32x16xi32>
    %44 = arith.cmpi slt, %40, %43 : vector<32x16xi32>
    %c0_i32_11 = arith.constant 0 : i32
    %45 = arith.cmpi slt, %38, %c0_i32_11 : i32
    %46 = vector.broadcast %45 : i1 to vector<32x16xi1>
    %47 = vector.broadcast %46 : vector<32x16xi1> to vector<32x16xi1>
    %48 = arith.xori %44, %47 : vector<32x16xi1>
    %49 = arith.andi %48, %42 : vector<32x16xi1>
    %50 = vector.broadcast %38 : i32 to vector<32x16xi32>
    %51 = arith.addi %40, %50 : vector<32x16xi32>
    %52 = arith.select %49, %51, %40 : vector<32x16xi1>, vector<32x16xi32>
    %c15_i32 = arith.constant 15 : i32
    %53 = vector.broadcast %c15_i32 : i32 to vector<32x16xi32>
    %54 = arith.cmpi eq, %52, %53 : vector<32x16xi32>
    %cst_12 = arith.constant 0.000000e+00 : f32
    %55 = vector.broadcast %cst_12 : f32 to vector<32x16xf32>
    %56 = arith.select %54, %55, %35 : vector<32x16xi1>, vector<32x16xf32>
    %57 = arith.addf %31, %56 : vector<32x16xf32>
    %c33 = arith.constant 33 : index
    %c0_13 = arith.constant 0 : index
    %58 = vector.load %arg2[%c33, %c0_13] : memref<96x256xf32, #tpu.memory_space<vmem>>, vector<1x256xf32>
    %59 = vector.extract_strided_slice %58 {offsets = [0, 0], sizes = [1, 16], strides = [1, 1]} : vector<1x256xf32> to vector<1x16xf32>
    %60 = vector.broadcast %59 : vector<1x16xf32> to vector<32x16xf32>
    %61 = arith.addf %57, %60 : vector<32x16xf32>
    %cst_14 = arith.constant 0.000000e+00 : f32
    %62 = vector.broadcast %cst_14 : f32 to vector<32x16xf32>
    %63 = arith.maximumf %61, %62 : vector<32x16xf32>
    %c0_15 = arith.constant 0 : index
    %c0_16 = arith.constant 0 : index
    %64 = vector.load %arg3[%c0_15, %c0_16] : memref<1424x768xbf16, #tpu.memory_space<vmem>>, vector<16x384xbf16>
    %c34 = arith.constant 34 : index
    %c0_17 = arith.constant 0 : index
    %65 = vector.load %arg2[%c34, %c0_17] : memref<96x256xf32, #tpu.memory_space<vmem>>, vector<1x256xf32>
    %66 = vector.extract_strided_slice %65 {offsets = [0, 0], sizes = [1, 128], strides = [1, 1]} : vector<1x256xf32> to vector<1x128xf32>
    %67 = arith.truncf %63 : vector<32x16xf32> to vector<32x16xbf16>
    %cst_18 = arith.constant dense<0.000000e+00> : vector<32x384xf32>
    %68 = tpu.matmul %67, %64, %cst_18 {dimension_numbers = #tpu.dot_dimension_numbers<[1], [0], [0], [1], [0, 0, 1, 1], [], []>} : vector<32x16xbf16>, vector<16x384xbf16>, vector<32x384xf32> -> vector<32x384xf32>
    %69 = vector.extract_strided_slice %68 {offsets = [0, 0], sizes = [32, 128], strides = [1, 1]} : vector<32x384xf32> to vector<32x128xf32>
    %70 = vector.extract_strided_slice %69 {offsets = [31, 0], sizes = [1, 128], strides = [1, 1]} : vector<32x128xf32> to vector<1x128xf32>
    %71 = vector.extract_strided_slice %69 {offsets = [0, 0], sizes = [31, 128], strides = [1, 1]} : vector<32x128xf32> to vector<31x128xf32>
    %72 = tpu.concatenate %70, %71 in 0 : vector<1x128xf32>, vector<31x128xf32> -> vector<32x128xf32>
    %73 = tpu.iota {dimensions = array<i32: 0>} : vector<32x128xi32>
    %c16_i32_19 = arith.constant 16 : i32
    %c0_i32_20 = arith.constant 0 : i32
    %74 = arith.cmpi eq, %c16_i32_19, %c0_i32_20 : i32
    %c1_i32_21 = arith.constant 1 : i32
    %75 = arith.select %74, %c1_i32_21, %c16_i32_19 : i32
    %76 = vector.broadcast %75 : i32 to vector<32x128xi32>
    %77 = arith.remsi %73, %76 : vector<32x128xi32>
    %c0_i32_22 = arith.constant 0 : i32
    %78 = vector.broadcast %c0_i32_22 : i32 to vector<32x128xi32>
    %79 = arith.cmpi ne, %77, %78 : vector<32x128xi32>
    %c0_i32_23 = arith.constant 0 : i32
    %80 = vector.broadcast %c0_i32_23 : i32 to vector<32x128xi32>
    %81 = arith.cmpi slt, %77, %80 : vector<32x128xi32>
    %c0_i32_24 = arith.constant 0 : i32
    %82 = arith.cmpi slt, %75, %c0_i32_24 : i32
    %83 = vector.broadcast %82 : i1 to vector<32x128xi1>
    %84 = vector.broadcast %83 : vector<32x128xi1> to vector<32x128xi1>
    %85 = arith.xori %81, %84 : vector<32x128xi1>
    %86 = arith.andi %85, %79 : vector<32x128xi1>
    %87 = vector.broadcast %75 : i32 to vector<32x128xi32>
    %88 = arith.addi %77, %87 : vector<32x128xi32>
    %89 = arith.select %86, %88, %77 : vector<32x128xi1>, vector<32x128xi32>
    %c0_i32_25 = arith.constant 0 : i32
    %90 = vector.broadcast %c0_i32_25 : i32 to vector<32x128xi32>
    %91 = arith.cmpi eq, %89, %90 : vector<32x128xi32>
    %cst_26 = arith.constant 0.000000e+00 : f32
    %92 = vector.broadcast %cst_26 : f32 to vector<32x128xf32>
    %93 = arith.select %91, %92, %72 : vector<32x128xi1>, vector<32x128xf32>
    %94 = vector.extract_strided_slice %68 {offsets = [0, 128], sizes = [32, 128], strides = [1, 1]} : vector<32x384xf32> to vector<32x128xf32>
    %95 = arith.addf %93, %94 : vector<32x128xf32>
    %96 = vector.extract_strided_slice %68 {offsets = [0, 256], sizes = [32, 128], strides = [1, 1]} : vector<32x384xf32> to vector<32x128xf32>
    %97 = vector.extract_strided_slice %96 {offsets = [1, 0], sizes = [31, 128], strides = [1, 1]} : vector<32x128xf32> to vector<31x128xf32>
    %98 = vector.extract_strided_slice %96 {offsets = [0, 0], sizes = [1, 128], strides = [1, 1]} : vector<32x128xf32> to vector<1x128xf32>
    %99 = tpu.concatenate %97, %98 in 0 : vector<31x128xf32>, vector<1x128xf32> -> vector<32x128xf32>
    %100 = tpu.iota {dimensions = array<i32: 0>} : vector<32x128xi32>
    %c16_i32_27 = arith.constant 16 : i32
    %c0_i32_28 = arith.constant 0 : i32
    %101 = arith.cmpi eq, %c16_i32_27, %c0_i32_28 : i32
    %c1_i32_29 = arith.constant 1 : i32
    %102 = arith.select %101, %c1_i32_29, %c16_i32_27 : i32
    %103 = vector.broadcast %102 : i32 to vector<32x128xi32>
    %104 = arith.remsi %100, %103 : vector<32x128xi32>
    %c0_i32_30 = arith.constant 0 : i32
    %105 = vector.broadcast %c0_i32_30 : i32 to vector<32x128xi32>
    %106 = arith.cmpi ne, %104, %105 : vector<32x128xi32>
    %c0_i32_31 = arith.constant 0 : i32
    %107 = vector.broadcast %c0_i32_31 : i32 to vector<32x128xi32>
    %108 = arith.cmpi slt, %104, %107 : vector<32x128xi32>
    %c0_i32_32 = arith.constant 0 : i32
    %109 = arith.cmpi slt, %102, %c0_i32_32 : i32
    %110 = vector.broadcast %109 : i1 to vector<32x128xi1>
    %111 = vector.broadcast %110 : vector<32x128xi1> to vector<32x128xi1>
    %112 = arith.xori %108, %111 : vector<32x128xi1>
    %113 = arith.andi %112, %106 : vector<32x128xi1>
    %114 = vector.broadcast %102 : i32 to vector<32x128xi32>
    %115 = arith.addi %104, %114 : vector<32x128xi32>
    %116 = arith.select %113, %115, %104 : vector<32x128xi1>, vector<32x128xi32>
    %c15_i32_33 = arith.constant 15 : i32
    %117 = vector.broadcast %c15_i32_33 : i32 to vector<32x128xi32>
    %118 = arith.cmpi eq, %116, %117 : vector<32x128xi32>
    %cst_34 = arith.constant 0.000000e+00 : f32
    %119 = vector.broadcast %cst_34 : f32 to vector<32x128xf32>
    %120 = arith.select %118, %119, %99 : vector<32x128xi1>, vector<32x128xf32>
    %121 = arith.addf %95, %120 : vector<32x128xf32>
    %122 = vector.broadcast %66 : vector<1x128xf32> to vector<32x128xf32>
    %123 = arith.addf %121, %122 : vector<32x128xf32>
    %cst_35 = arith.constant 0.000000e+00 : f32
    %124 = vector.broadcast %cst_35 : f32 to vector<32x128xf32>
    %125 = arith.maximumf %123, %124 : vector<32x128xf32>
    %c16 = arith.constant 16 : index
    %c0_36 = arith.constant 0 : index
    %126 = vector.load %arg3[%c16, %c0_36] : memref<1424x768xbf16, #tpu.memory_space<vmem>>, vector<128x768xbf16>
    %c35 = arith.constant 35 : index
    %c0_37 = arith.constant 0 : index
    %127 = vector.load %arg2[%c35, %c0_37] : memref<96x256xf32, #tpu.memory_space<vmem>>, vector<1x256xf32>
    %128 = arith.truncf %125 : vector<32x128xf32> to vector<32x128xbf16>
    %cst_38 = arith.constant dense<0.000000e+00> : vector<32x768xf32>
    %129 = tpu.matmul %128, %126, %cst_38 {dimension_numbers = #tpu.dot_dimension_numbers<[1], [0], [0], [1], [0, 0, 1, 1], [], []>} : vector<32x128xbf16>, vector<128x768xbf16>, vector<32x768xf32> -> vector<32x768xf32>
    %130 = vector.extract_strided_slice %129 {offsets = [0, 0], sizes = [32, 256], strides = [1, 1]} : vector<32x768xf32> to vector<32x256xf32>
    %131 = vector.extract_strided_slice %130 {offsets = [31, 0], sizes = [1, 256], strides = [1, 1]} : vector<32x256xf32> to vector<1x256xf32>
    %132 = vector.extract_strided_slice %130 {offsets = [0, 0], sizes = [31, 256], strides = [1, 1]} : vector<32x256xf32> to vector<31x256xf32>
    %133 = tpu.concatenate %131, %132 in 0 : vector<1x256xf32>, vector<31x256xf32> -> vector<32x256xf32>
    %134 = tpu.iota {dimensions = array<i32: 0>} : vector<32x256xi32>
    %c16_i32_39 = arith.constant 16 : i32
    %c0_i32_40 = arith.constant 0 : i32
    %135 = arith.cmpi eq, %c16_i32_39, %c0_i32_40 : i32
    %c1_i32_41 = arith.constant 1 : i32
    %136 = arith.select %135, %c1_i32_41, %c16_i32_39 : i32
    %137 = vector.broadcast %136 : i32 to vector<32x256xi32>
    %138 = arith.remsi %134, %137 : vector<32x256xi32>
    %c0_i32_42 = arith.constant 0 : i32
    %139 = vector.broadcast %c0_i32_42 : i32 to vector<32x256xi32>
    %140 = arith.cmpi ne, %138, %139 : vector<32x256xi32>
    %c0_i32_43 = arith.constant 0 : i32
    %141 = vector.broadcast %c0_i32_43 : i32 to vector<32x256xi32>
    %142 = arith.cmpi slt, %138, %141 : vector<32x256xi32>
    %c0_i32_44 = arith.constant 0 : i32
    %143 = arith.cmpi slt, %136, %c0_i32_44 : i32
    %144 = vector.broadcast %143 : i1 to vector<32x256xi1>
    %145 = vector.broadcast %144 : vector<32x256xi1> to vector<32x256xi1>
    %146 = arith.xori %142, %145 : vector<32x256xi1>
    %147 = arith.andi %146, %140 : vector<32x256xi1>
    %148 = vector.broadcast %136 : i32 to vector<32x256xi32>
    %149 = arith.addi %138, %148 : vector<32x256xi32>
    %150 = arith.select %147, %149, %138 : vector<32x256xi1>, vector<32x256xi32>
    %c0_i32_45 = arith.constant 0 : i32
    %151 = vector.broadcast %c0_i32_45 : i32 to vector<32x256xi32>
    %152 = arith.cmpi eq, %150, %151 : vector<32x256xi32>
    %cst_46 = arith.constant 0.000000e+00 : f32
    %153 = vector.broadcast %cst_46 : f32 to vector<32x256xf32>
    %154 = arith.select %152, %153, %133 : vector<32x256xi1>, vector<32x256xf32>
    %155 = vector.extract_strided_slice %129 {offsets = [0, 256], sizes = [32, 256], strides = [1, 1]} : vector<32x768xf32> to vector<32x256xf32>
    %156 = arith.addf %154, %155 : vector<32x256xf32>
    %157 = vector.extract_strided_slice %129 {offsets = [0, 512], sizes = [32, 256], strides = [1, 1]} : vector<32x768xf32> to vector<32x256xf32>
    %158 = vector.extract_strided_slice %157 {offsets = [1, 0], sizes = [31, 256], strides = [1, 1]} : vector<32x256xf32> to vector<31x256xf32>
    %159 = vector.extract_strided_slice %157 {offsets = [0, 0], sizes = [1, 256], strides = [1, 1]} : vector<32x256xf32> to vector<1x256xf32>
    %160 = tpu.concatenate %158, %159 in 0 : vector<31x256xf32>, vector<1x256xf32> -> vector<32x256xf32>
    %161 = tpu.iota {dimensions = array<i32: 0>} : vector<32x256xi32>
    %c16_i32_47 = arith.constant 16 : i32
    %c0_i32_48 = arith.constant 0 : i32
    %162 = arith.cmpi eq, %c16_i32_47, %c0_i32_48 : i32
    %c1_i32_49 = arith.constant 1 : i32
    %163 = arith.select %162, %c1_i32_49, %c16_i32_47 : i32
    %164 = vector.broadcast %163 : i32 to vector<32x256xi32>
    %165 = arith.remsi %161, %164 : vector<32x256xi32>
    %c0_i32_50 = arith.constant 0 : i32
    %166 = vector.broadcast %c0_i32_50 : i32 to vector<32x256xi32>
    %167 = arith.cmpi ne, %165, %166 : vector<32x256xi32>
    %c0_i32_51 = arith.constant 0 : i32
    %168 = vector.broadcast %c0_i32_51 : i32 to vector<32x256xi32>
    %169 = arith.cmpi slt, %165, %168 : vector<32x256xi32>
    %c0_i32_52 = arith.constant 0 : i32
    %170 = arith.cmpi slt, %163, %c0_i32_52 : i32
    %171 = vector.broadcast %170 : i1 to vector<32x256xi1>
    %172 = vector.broadcast %171 : vector<32x256xi1> to vector<32x256xi1>
    %173 = arith.xori %169, %172 : vector<32x256xi1>
    %174 = arith.andi %173, %167 : vector<32x256xi1>
    %175 = vector.broadcast %163 : i32 to vector<32x256xi32>
    %176 = arith.addi %165, %175 : vector<32x256xi32>
    %177 = arith.select %174, %176, %165 : vector<32x256xi1>, vector<32x256xi32>
    %c15_i32_53 = arith.constant 15 : i32
    %178 = vector.broadcast %c15_i32_53 : i32 to vector<32x256xi32>
    %179 = arith.cmpi eq, %177, %178 : vector<32x256xi32>
    %cst_54 = arith.constant 0.000000e+00 : f32
    %180 = vector.broadcast %cst_54 : f32 to vector<32x256xf32>
    %181 = arith.select %179, %180, %160 : vector<32x256xi1>, vector<32x256xf32>
    %182 = arith.addf %156, %181 : vector<32x256xf32>
    %183 = vector.broadcast %127 : vector<1x256xf32> to vector<32x256xf32>
    %184 = arith.addf %182, %183 : vector<32x256xf32>
    %cst_55 = arith.constant 0.000000e+00 : f32
    %185 = vector.broadcast %cst_55 : f32 to vector<32x256xf32>
    %186 = arith.maximumf %184, %185 : vector<32x256xf32>
    %c144 = arith.constant 144 : index
    %c0_56 = arith.constant 0 : index
    %187 = vector.load %arg3[%c144, %c0_56] : memref<1424x768xbf16, #tpu.memory_space<vmem>>, vector<256x768xbf16>
    %c36 = arith.constant 36 : index
    %c0_57 = arith.constant 0 : index
    %188 = vector.load %arg2[%c36, %c0_57] : memref<96x256xf32, #tpu.memory_space<vmem>>, vector<1x256xf32>
    %189 = arith.truncf %186 : vector<32x256xf32> to vector<32x256xbf16>
    %cst_58 = arith.constant dense<0.000000e+00> : vector<32x768xf32>
    %190 = tpu.matmul %189, %187, %cst_58 {dimension_numbers = #tpu.dot_dimension_numbers<[1], [0], [0], [1], [0, 0, 1, 1], [], []>} : vector<32x256xbf16>, vector<256x768xbf16>, vector<32x768xf32> -> vector<32x768xf32>
    %191 = vector.extract_strided_slice %190 {offsets = [0, 0], sizes = [32, 256], strides = [1, 1]} : vector<32x768xf32> to vector<32x256xf32>
    %192 = vector.extract_strided_slice %191 {offsets = [31, 0], sizes = [1, 256], strides = [1, 1]} : vector<32x256xf32> to vector<1x256xf32>
    %193 = vector.extract_strided_slice %191 {offsets = [0, 0], sizes = [31, 256], strides = [1, 1]} : vector<32x256xf32> to vector<31x256xf32>
    %194 = tpu.concatenate %192, %193 in 0 : vector<1x256xf32>, vector<31x256xf32> -> vector<32x256xf32>
    %195 = tpu.iota {dimensions = array<i32: 0>} : vector<32x256xi32>
    %c16_i32_59 = arith.constant 16 : i32
    %c0_i32_60 = arith.constant 0 : i32
    %196 = arith.cmpi eq, %c16_i32_59, %c0_i32_60 : i32
    %c1_i32_61 = arith.constant 1 : i32
    %197 = arith.select %196, %c1_i32_61, %c16_i32_59 : i32
    %198 = vector.broadcast %197 : i32 to vector<32x256xi32>
    %199 = arith.remsi %195, %198 : vector<32x256xi32>
    %c0_i32_62 = arith.constant 0 : i32
    %200 = vector.broadcast %c0_i32_62 : i32 to vector<32x256xi32>
    %201 = arith.cmpi ne, %199, %200 : vector<32x256xi32>
    %c0_i32_63 = arith.constant 0 : i32
    %202 = vector.broadcast %c0_i32_63 : i32 to vector<32x256xi32>
    %203 = arith.cmpi slt, %199, %202 : vector<32x256xi32>
    %c0_i32_64 = arith.constant 0 : i32
    %204 = arith.cmpi slt, %197, %c0_i32_64 : i32
    %205 = vector.broadcast %204 : i1 to vector<32x256xi1>
    %206 = vector.broadcast %205 : vector<32x256xi1> to vector<32x256xi1>
    %207 = arith.xori %203, %206 : vector<32x256xi1>
    %208 = arith.andi %207, %201 : vector<32x256xi1>
    %209 = vector.broadcast %197 : i32 to vector<32x256xi32>
    %210 = arith.addi %199, %209 : vector<32x256xi32>
    %211 = arith.select %208, %210, %199 : vector<32x256xi1>, vector<32x256xi32>
    %c0_i32_65 = arith.constant 0 : i32
    %212 = vector.broadcast %c0_i32_65 : i32 to vector<32x256xi32>
    %213 = arith.cmpi eq, %211, %212 : vector<32x256xi32>
    %cst_66 = arith.constant 0.000000e+00 : f32
    %214 = vector.broadcast %cst_66 : f32 to vector<32x256xf32>
    %215 = arith.select %213, %214, %194 : vector<32x256xi1>, vector<32x256xf32>
    %216 = vector.extract_strided_slice %190 {offsets = [0, 256], sizes = [32, 256], strides = [1, 1]} : vector<32x768xf32> to vector<32x256xf32>
    %217 = arith.addf %215, %216 : vector<32x256xf32>
    %218 = vector.extract_strided_slice %190 {offsets = [0, 512], sizes = [32, 256], strides = [1, 1]} : vector<32x768xf32> to vector<32x256xf32>
    %219 = vector.extract_strided_slice %218 {offsets = [1, 0], sizes = [31, 256], strides = [1, 1]} : vector<32x256xf32> to vector<31x256xf32>
    %220 = vector.extract_strided_slice %218 {offsets = [0, 0], sizes = [1, 256], strides = [1, 1]} : vector<32x256xf32> to vector<1x256xf32>
    %221 = tpu.concatenate %219, %220 in 0 : vector<31x256xf32>, vector<1x256xf32> -> vector<32x256xf32>
    %222 = tpu.iota {dimensions = array<i32: 0>} : vector<32x256xi32>
    %c16_i32_67 = arith.constant 16 : i32
    %c0_i32_68 = arith.constant 0 : i32
    %223 = arith.cmpi eq, %c16_i32_67, %c0_i32_68 : i32
    %c1_i32_69 = arith.constant 1 : i32
    %224 = arith.select %223, %c1_i32_69, %c16_i32_67 : i32
    %225 = vector.broadcast %224 : i32 to vector<32x256xi32>
    %226 = arith.remsi %222, %225 : vector<32x256xi32>
    %c0_i32_70 = arith.constant 0 : i32
    %227 = vector.broadcast %c0_i32_70 : i32 to vector<32x256xi32>
    %228 = arith.cmpi ne, %226, %227 : vector<32x256xi32>
    %c0_i32_71 = arith.constant 0 : i32
    %229 = vector.broadcast %c0_i32_71 : i32 to vector<32x256xi32>
    %230 = arith.cmpi slt, %226, %229 : vector<32x256xi32>
    %c0_i32_72 = arith.constant 0 : i32
    %231 = arith.cmpi slt, %224, %c0_i32_72 : i32
    %232 = vector.broadcast %231 : i1 to vector<32x256xi1>
    %233 = vector.broadcast %232 : vector<32x256xi1> to vector<32x256xi1>
    %234 = arith.xori %230, %233 : vector<32x256xi1>
    %235 = arith.andi %234, %228 : vector<32x256xi1>
    %236 = vector.broadcast %224 : i32 to vector<32x256xi32>
    %237 = arith.addi %226, %236 : vector<32x256xi32>
    %238 = arith.select %235, %237, %226 : vector<32x256xi1>, vector<32x256xi32>
    %c15_i32_73 = arith.constant 15 : i32
    %239 = vector.broadcast %c15_i32_73 : i32 to vector<32x256xi32>
    %240 = arith.cmpi eq, %238, %239 : vector<32x256xi32>
    %cst_74 = arith.constant 0.000000e+00 : f32
    %241 = vector.broadcast %cst_74 : f32 to vector<32x256xf32>
    %242 = arith.select %240, %241, %221 : vector<32x256xi1>, vector<32x256xf32>
    %243 = arith.addf %217, %242 : vector<32x256xf32>
    %244 = vector.broadcast %188 : vector<1x256xf32> to vector<32x256xf32>
    %245 = arith.addf %243, %244 : vector<32x256xf32>
    %cst_75 = arith.constant 0.000000e+00 : f32
    %246 = vector.broadcast %cst_75 : f32 to vector<32x256xf32>
    %247 = arith.maximumf %245, %246 : vector<32x256xf32>
    %c0_76 = arith.constant 0 : index
    %c0_77 = arith.constant 0 : index
    %248 = vector.load %arg2[%c0_76, %c0_77] : memref<96x256xf32, #tpu.memory_space<vmem>>, vector<32x256xf32>
    %249 = arith.addf %247, %248 : vector<32x256xf32>
    %c400 = arith.constant 400 : index
    %c0_78 = arith.constant 0 : index
    %250 = vector.load %arg3[%c400, %c0_78] : memref<1424x768xbf16, #tpu.memory_space<vmem>>, vector<256x768xbf16>
    %251 = arith.truncf %249 : vector<32x256xf32> to vector<32x256xbf16>
    %cst_79 = arith.constant dense<0.000000e+00> : vector<32x768xf32>
    %252 = tpu.matmul %251, %250, %cst_79 {dimension_numbers = #tpu.dot_dimension_numbers<[1], [0], [0], [1], [0, 0, 1, 1], [], []>} : vector<32x256xbf16>, vector<256x768xbf16>, vector<32x768xf32> -> vector<32x768xf32>
    %253 = vector.extract_strided_slice %252 {offsets = [0, 0], sizes = [32, 256], strides = [1, 1]} : vector<32x768xf32> to vector<32x256xf32>
    %c48 = arith.constant 48 : index
    %c0_80 = arith.constant 0 : index
    %254 = vector.load %arg2[%c48, %c0_80] : memref<96x256xf32, #tpu.memory_space<vmem>>, vector<1x256xf32>
    %255 = vector.broadcast %254 : vector<1x256xf32> to vector<32x256xf32>
    %256 = arith.addf %253, %255 : vector<32x256xf32>
    %257 = vector.extract_strided_slice %252 {offsets = [0, 256], sizes = [32, 256], strides = [1, 1]} : vector<32x768xf32> to vector<32x256xf32>
    %c49 = arith.constant 49 : index
    %c0_81 = arith.constant 0 : index
    %258 = vector.load %arg2[%c49, %c0_81] : memref<96x256xf32, #tpu.memory_space<vmem>>, vector<1x256xf32>
    %259 = vector.broadcast %258 : vector<1x256xf32> to vector<32x256xf32>
    %260 = arith.addf %257, %259 : vector<32x256xf32>
    %261 = vector.extract_strided_slice %252 {offsets = [0, 512], sizes = [32, 256], strides = [1, 1]} : vector<32x768xf32> to vector<32x256xf32>
    %c50 = arith.constant 50 : index
    %c0_82 = arith.constant 0 : index
    %262 = vector.load %arg2[%c50, %c0_82] : memref<96x256xf32, #tpu.memory_space<vmem>>, vector<1x256xf32>
    %263 = vector.broadcast %262 : vector<1x256xf32> to vector<32x256xf32>
    %264 = arith.addf %261, %263 : vector<32x256xf32>
    %265 = vector.extract_strided_slice %256 {offsets = [0, 0], sizes = [16, 64], strides = [1, 1]} : vector<32x256xf32> to vector<16x64xf32>
    %266 = arith.truncf %265 : vector<16x64xf32> to vector<16x64xbf16>
    %267 = vector.extract_strided_slice %260 {offsets = [0, 0], sizes = [16, 64], strides = [1, 1]} : vector<32x256xf32> to vector<16x64xf32>
    %268 = arith.truncf %267 : vector<16x64xf32> to vector<16x64xbf16>
    %269 = vector.extract_strided_slice %264 {offsets = [0, 0], sizes = [16, 64], strides = [1, 1]} : vector<32x256xf32> to vector<16x64xf32>
    %270 = arith.truncf %269 : vector<16x64xf32> to vector<16x64xbf16>
    %cst_83 = arith.constant dense<0.000000e+00> : vector<16x16xf32>
    %271 = tpu.matmul %266, %268, %cst_83 {dimension_numbers = #tpu.dot_dimension_numbers<[1], [1], [0], [0], [0, 0, 1, 0], [], []>} : vector<16x64xbf16>, vector<16x64xbf16>, vector<16x16xf32> -> vector<16x16xf32>
    %cst_84 = arith.constant dense<0xFF800000> : vector<16xf32>
    %272 = vector.multi_reduction <maximumf>, %271, %cst_84 [1] : vector<16x16xf32> to vector<16xf32>
    %273 = vector.shape_cast %272 : vector<16xf32> to vector<16x1xf32>
    %274 = vector.broadcast %273 : vector<16x1xf32> to vector<16x16xf32>
    %275 = arith.subf %271, %274 : vector<16x16xf32>
    %276 = math.exp %275 : vector<16x16xf32>
    %cst_85 = arith.constant dense<0.000000e+00> : vector<16xf32>
    %277 = vector.multi_reduction <add>, %276, %cst_85 [1] : vector<16x16xf32> to vector<16xf32>
    %278 = vector.shape_cast %277 : vector<16xf32> to vector<16x1xf32>
    %279 = tpu.reciprocal %278 {approx = true} : vector<16x1xf32> -> vector<16x1xf32>
    %280 = vector.broadcast %279 : vector<16x1xf32> to vector<16x16xf32>
    %281 = arith.mulf %276, %280 : vector<16x16xf32>
    %282 = arith.truncf %281 : vector<16x16xf32> to vector<16x16xbf16>
    %cst_86 = arith.constant dense<0.000000e+00> : vector<16x64xf32>
    %283 = tpu.matmul %282, %270, %cst_86 {dimension_numbers = #tpu.dot_dimension_numbers<[1], [0], [0], [1], [0, 0, 1, 1], [], []>} : vector<16x16xbf16>, vector<16x64xbf16>, vector<16x64xf32> -> vector<16x64xf32>
    %c0_87 = arith.constant 0 : index
    %c0_88 = arith.constant 0 : index
    %284 = vector.load %arg5[%c0_87, %c0_88] : memref<32x256xf32, #tpu.memory_space<vmem>>, vector<16x64xf32>
    tpu.vector_store %arg5[%c0_87, %c0_88], %283 {strides = array<i32>} : memref<32x256xf32, #tpu.memory_space<vmem>>, vector<16x64xf32>,
    %285 = vector.extract_strided_slice %256 {offsets = [0, 64], sizes = [16, 64], strides = [1, 1]} : vector<32x256xf32> to vector<16x64xf32>
    %286 = arith.truncf %285 : vector<16x64xf32> to vector<16x64xbf16>
    %287 = vector.extract_strided_slice %260 {offsets = [0, 64], sizes = [16, 64], strides = [1, 1]} : vector<32x256xf32> to vector<16x64xf32>
    %288 = arith.truncf %287 : vector<16x64xf32> to vector<16x64xbf16>
    %289 = vector.extract_strided_slice %264 {offsets = [0, 64], sizes = [16, 64], strides = [1, 1]} : vector<32x256xf32> to vector<16x64xf32>
    %290 = arith.truncf %289 : vector<16x64xf32> to vector<16x64xbf16>
    %cst_89 = arith.constant dense<0.000000e+00> : vector<16x16xf32>
    %291 = tpu.matmul %286, %288, %cst_89 {dimension_numbers = #tpu.dot_dimension_numbers<[1], [1], [0], [0], [0, 0, 1, 0], [], []>} : vector<16x64xbf16>, vector<16x64xbf16>, vector<16x16xf32> -> vector<16x16xf32>
    %cst_90 = arith.constant dense<0xFF800000> : vector<16xf32>
    %292 = vector.multi_reduction <maximumf>, %291, %cst_90 [1] : vector<16x16xf32> to vector<16xf32>
    %293 = vector.shape_cast %292 : vector<16xf32> to vector<16x1xf32>
    %294 = vector.broadcast %293 : vector<16x1xf32> to vector<16x16xf32>
    %295 = arith.subf %291, %294 : vector<16x16xf32>
    %296 = math.exp %295 : vector<16x16xf32>
    %cst_91 = arith.constant dense<0.000000e+00> : vector<16xf32>
    %297 = vector.multi_reduction <add>, %296, %cst_91 [1] : vector<16x16xf32> to vector<16xf32>
    %298 = vector.shape_cast %297 : vector<16xf32> to vector<16x1xf32>
    %299 = tpu.reciprocal %298 {approx = true} : vector<16x1xf32> -> vector<16x1xf32>
    %300 = vector.broadcast %299 : vector<16x1xf32> to vector<16x16xf32>
    %301 = arith.mulf %296, %300 : vector<16x16xf32>
    %302 = arith.truncf %301 : vector<16x16xf32> to vector<16x16xbf16>
    %cst_92 = arith.constant dense<0.000000e+00> : vector<16x64xf32>
    %303 = tpu.matmul %302, %290, %cst_92 {dimension_numbers = #tpu.dot_dimension_numbers<[1], [0], [0], [1], [0, 0, 1, 1], [], []>} : vector<16x16xbf16>, vector<16x64xbf16>, vector<16x64xf32> -> vector<16x64xf32>
    %c0_93 = arith.constant 0 : index
    %c64 = arith.constant 64 : index
    %304 = vector.load %arg5[%c0_93, %c64] : memref<32x256xf32, #tpu.memory_space<vmem>>, vector<16x64xf32>
    tpu.vector_store %arg5[%c0_93, %c64], %303 {strides = array<i32>} : memref<32x256xf32, #tpu.memory_space<vmem>>, vector<16x64xf32>,
    %305 = vector.extract_strided_slice %256 {offsets = [0, 128], sizes = [16, 64], strides = [1, 1]} : vector<32x256xf32> to vector<16x64xf32>
    %306 = arith.truncf %305 : vector<16x64xf32> to vector<16x64xbf16>
    %307 = vector.extract_strided_slice %260 {offsets = [0, 128], sizes = [16, 64], strides = [1, 1]} : vector<32x256xf32> to vector<16x64xf32>
    %308 = arith.truncf %307 : vector<16x64xf32> to vector<16x64xbf16>
    %309 = vector.extract_strided_slice %264 {offsets = [0, 128], sizes = [16, 64], strides = [1, 1]} : vector<32x256xf32> to vector<16x64xf32>
    %310 = arith.truncf %309 : vector<16x64xf32> to vector<16x64xbf16>
    %cst_94 = arith.constant dense<0.000000e+00> : vector<16x16xf32>
    %311 = tpu.matmul %306, %308, %cst_94 {dimension_numbers = #tpu.dot_dimension_numbers<[1], [1], [0], [0], [0, 0, 1, 0], [], []>} : vector<16x64xbf16>, vector<16x64xbf16>, vector<16x16xf32> -> vector<16x16xf32>
    %cst_95 = arith.constant dense<0xFF800000> : vector<16xf32>
    %312 = vector.multi_reduction <maximumf>, %311, %cst_95 [1] : vector<16x16xf32> to vector<16xf32>
    %313 = vector.shape_cast %312 : vector<16xf32> to vector<16x1xf32>
    %314 = vector.broadcast %313 : vector<16x1xf32> to vector<16x16xf32>
    %315 = arith.subf %311, %314 : vector<16x16xf32>
    %316 = math.exp %315 : vector<16x16xf32>
    %cst_96 = arith.constant dense<0.000000e+00> : vector<16xf32>
    %317 = vector.multi_reduction <add>, %316, %cst_96 [1] : vector<16x16xf32> to vector<16xf32>
    %318 = vector.shape_cast %317 : vector<16xf32> to vector<16x1xf32>
    %319 = tpu.reciprocal %318 {approx = true} : vector<16x1xf32> -> vector<16x1xf32>
    %320 = vector.broadcast %319 : vector<16x1xf32> to vector<16x16xf32>
    %321 = arith.mulf %316, %320 : vector<16x16xf32>
    %322 = arith.truncf %321 : vector<16x16xf32> to vector<16x16xbf16>
    %cst_97 = arith.constant dense<0.000000e+00> : vector<16x64xf32>
    %323 = tpu.matmul %322, %310, %cst_97 {dimension_numbers = #tpu.dot_dimension_numbers<[1], [0], [0], [1], [0, 0, 1, 1], [], []>} : vector<16x16xbf16>, vector<16x64xbf16>, vector<16x64xf32> -> vector<16x64xf32>
    %c0_98 = arith.constant 0 : index
    %c128 = arith.constant 128 : index
    %324 = vector.load %arg5[%c0_98, %c128] : memref<32x256xf32, #tpu.memory_space<vmem>>, vector<16x64xf32>
    tpu.vector_store %arg5[%c0_98, %c128], %323 {strides = array<i32>} : memref<32x256xf32, #tpu.memory_space<vmem>>, vector<16x64xf32>,
    %325 = vector.extract_strided_slice %256 {offsets = [0, 192], sizes = [16, 64], strides = [1, 1]} : vector<32x256xf32> to vector<16x64xf32>
    %326 = arith.truncf %325 : vector<16x64xf32> to vector<16x64xbf16>
    %327 = vector.extract_strided_slice %260 {offsets = [0, 192], sizes = [16, 64], strides = [1, 1]} : vector<32x256xf32> to vector<16x64xf32>
    %328 = arith.truncf %327 : vector<16x64xf32> to vector<16x64xbf16>
    %329 = vector.extract_strided_slice %264 {offsets = [0, 192], sizes = [16, 64], strides = [1, 1]} : vector<32x256xf32> to vector<16x64xf32>
    %330 = arith.truncf %329 : vector<16x64xf32> to vector<16x64xbf16>
    %cst_99 = arith.constant dense<0.000000e+00> : vector<16x16xf32>
    %331 = tpu.matmul %326, %328, %cst_99 {dimension_numbers = #tpu.dot_dimension_numbers<[1], [1], [0], [0], [0, 0, 1, 0], [], []>} : vector<16x64xbf16>, vector<16x64xbf16>, vector<16x16xf32> -> vector<16x16xf32>
    %cst_100 = arith.constant dense<0xFF800000> : vector<16xf32>
    %332 = vector.multi_reduction <maximumf>, %331, %cst_100 [1] : vector<16x16xf32> to vector<16xf32>
    %333 = vector.shape_cast %332 : vector<16xf32> to vector<16x1xf32>
    %334 = vector.broadcast %333 : vector<16x1xf32> to vector<16x16xf32>
    %335 = arith.subf %331, %334 : vector<16x16xf32>
    %336 = math.exp %335 : vector<16x16xf32>
    %cst_101 = arith.constant dense<0.000000e+00> : vector<16xf32>
    %337 = vector.multi_reduction <add>, %336, %cst_101 [1] : vector<16x16xf32> to vector<16xf32>
    %338 = vector.shape_cast %337 : vector<16xf32> to vector<16x1xf32>
    %339 = tpu.reciprocal %338 {approx = true} : vector<16x1xf32> -> vector<16x1xf32>
    %340 = vector.broadcast %339 : vector<16x1xf32> to vector<16x16xf32>
    %341 = arith.mulf %336, %340 : vector<16x16xf32>
    %342 = arith.truncf %341 : vector<16x16xf32> to vector<16x16xbf16>
    %cst_102 = arith.constant dense<0.000000e+00> : vector<16x64xf32>
    %343 = tpu.matmul %342, %330, %cst_102 {dimension_numbers = #tpu.dot_dimension_numbers<[1], [0], [0], [1], [0, 0, 1, 1], [], []>} : vector<16x16xbf16>, vector<16x64xbf16>, vector<16x64xf32> -> vector<16x64xf32>
    %c0_103 = arith.constant 0 : index
    %c192 = arith.constant 192 : index
    %344 = vector.load %arg5[%c0_103, %c192] : memref<32x256xf32, #tpu.memory_space<vmem>>, vector<16x64xf32>
    tpu.vector_store %arg5[%c0_103, %c192], %343 {strides = array<i32>} : memref<32x256xf32, #tpu.memory_space<vmem>>, vector<16x64xf32>,
    %345 = vector.extract_strided_slice %256 {offsets = [16, 0], sizes = [16, 64], strides = [1, 1]} : vector<32x256xf32> to vector<16x64xf32>
    %346 = arith.truncf %345 : vector<16x64xf32> to vector<16x64xbf16>
    %347 = vector.extract_strided_slice %260 {offsets = [16, 0], sizes = [16, 64], strides = [1, 1]} : vector<32x256xf32> to vector<16x64xf32>
    %348 = arith.truncf %347 : vector<16x64xf32> to vector<16x64xbf16>
    %349 = vector.extract_strided_slice %264 {offsets = [16, 0], sizes = [16, 64], strides = [1, 1]} : vector<32x256xf32> to vector<16x64xf32>
    %350 = arith.truncf %349 : vector<16x64xf32> to vector<16x64xbf16>
    %cst_104 = arith.constant dense<0.000000e+00> : vector<16x16xf32>
    %351 = tpu.matmul %346, %348, %cst_104 {dimension_numbers = #tpu.dot_dimension_numbers<[1], [1], [0], [0], [0, 0, 1, 0], [], []>} : vector<16x64xbf16>, vector<16x64xbf16>, vector<16x16xf32> -> vector<16x16xf32>
    %cst_105 = arith.constant dense<0xFF800000> : vector<16xf32>
    %352 = vector.multi_reduction <maximumf>, %351, %cst_105 [1] : vector<16x16xf32> to vector<16xf32>
    %353 = vector.shape_cast %352 : vector<16xf32> to vector<16x1xf32>
    %354 = vector.broadcast %353 : vector<16x1xf32> to vector<16x16xf32>
    %355 = arith.subf %351, %354 : vector<16x16xf32>
    %356 = math.exp %355 : vector<16x16xf32>
    %cst_106 = arith.constant dense<0.000000e+00> : vector<16xf32>
    %357 = vector.multi_reduction <add>, %356, %cst_106 [1] : vector<16x16xf32> to vector<16xf32>
    %358 = vector.shape_cast %357 : vector<16xf32> to vector<16x1xf32>
    %359 = tpu.reciprocal %358 {approx = true} : vector<16x1xf32> -> vector<16x1xf32>
    %360 = vector.broadcast %359 : vector<16x1xf32> to vector<16x16xf32>
    %361 = arith.mulf %356, %360 : vector<16x16xf32>
    %362 = arith.truncf %361 : vector<16x16xf32> to vector<16x16xbf16>
    %cst_107 = arith.constant dense<0.000000e+00> : vector<16x64xf32>
    %363 = tpu.matmul %362, %350, %cst_107 {dimension_numbers = #tpu.dot_dimension_numbers<[1], [0], [0], [1], [0, 0, 1, 1], [], []>} : vector<16x16xbf16>, vector<16x64xbf16>, vector<16x64xf32> -> vector<16x64xf32>
    %c16_108 = arith.constant 16 : index
    %c0_109 = arith.constant 0 : index
    %364 = vector.load %arg5[%c16_108, %c0_109] : memref<32x256xf32, #tpu.memory_space<vmem>>, vector<16x64xf32>
    tpu.vector_store %arg5[%c16_108, %c0_109], %363 {strides = array<i32>} : memref<32x256xf32, #tpu.memory_space<vmem>>, vector<16x64xf32>,
    %365 = vector.extract_strided_slice %256 {offsets = [16, 64], sizes = [16, 64], strides = [1, 1]} : vector<32x256xf32> to vector<16x64xf32>
    %366 = arith.truncf %365 : vector<16x64xf32> to vector<16x64xbf16>
    %367 = vector.extract_strided_slice %260 {offsets = [16, 64], sizes = [16, 64], strides = [1, 1]} : vector<32x256xf32> to vector<16x64xf32>
    %368 = arith.truncf %367 : vector<16x64xf32> to vector<16x64xbf16>
    %369 = vector.extract_strided_slice %264 {offsets = [16, 64], sizes = [16, 64], strides = [1, 1]} : vector<32x256xf32> to vector<16x64xf32>
    %370 = arith.truncf %369 : vector<16x64xf32> to vector<16x64xbf16>
    %cst_110 = arith.constant dense<0.000000e+00> : vector<16x16xf32>
    %371 = tpu.matmul %366, %368, %cst_110 {dimension_numbers = #tpu.dot_dimension_numbers<[1], [1], [0], [0], [0, 0, 1, 0], [], []>} : vector<16x64xbf16>, vector<16x64xbf16>, vector<16x16xf32> -> vector<16x16xf32>
    %cst_111 = arith.constant dense<0xFF800000> : vector<16xf32>
    %372 = vector.multi_reduction <maximumf>, %371, %cst_111 [1] : vector<16x16xf32> to vector<16xf32>
    %373 = vector.shape_cast %372 : vector<16xf32> to vector<16x1xf32>
    %374 = vector.broadcast %373 : vector<16x1xf32> to vector<16x16xf32>
    %375 = arith.subf %371, %374 : vector<16x16xf32>
    %376 = math.exp %375 : vector<16x16xf32>
    %cst_112 = arith.constant dense<0.000000e+00> : vector<16xf32>
    %377 = vector.multi_reduction <add>, %376, %cst_112 [1] : vector<16x16xf32> to vector<16xf32>
    %378 = vector.shape_cast %377 : vector<16xf32> to vector<16x1xf32>
    %379 = tpu.reciprocal %378 {approx = true} : vector<16x1xf32> -> vector<16x1xf32>
    %380 = vector.broadcast %379 : vector<16x1xf32> to vector<16x16xf32>
    %381 = arith.mulf %376, %380 : vector<16x16xf32>
    %382 = arith.truncf %381 : vector<16x16xf32> to vector<16x16xbf16>
    %cst_113 = arith.constant dense<0.000000e+00> : vector<16x64xf32>
    %383 = tpu.matmul %382, %370, %cst_113 {dimension_numbers = #tpu.dot_dimension_numbers<[1], [0], [0], [1], [0, 0, 1, 1], [], []>} : vector<16x16xbf16>, vector<16x64xbf16>, vector<16x64xf32> -> vector<16x64xf32>
    %c16_114 = arith.constant 16 : index
    %c64_115 = arith.constant 64 : index
    %384 = vector.load %arg5[%c16_114, %c64_115] : memref<32x256xf32, #tpu.memory_space<vmem>>, vector<16x64xf32>
    tpu.vector_store %arg5[%c16_114, %c64_115], %383 {strides = array<i32>} : memref<32x256xf32, #tpu.memory_space<vmem>>, vector<16x64xf32>,
    %385 = vector.extract_strided_slice %256 {offsets = [16, 128], sizes = [16, 64], strides = [1, 1]} : vector<32x256xf32> to vector<16x64xf32>
    %386 = arith.truncf %385 : vector<16x64xf32> to vector<16x64xbf16>
    %387 = vector.extract_strided_slice %260 {offsets = [16, 128], sizes = [16, 64], strides = [1, 1]} : vector<32x256xf32> to vector<16x64xf32>
    %388 = arith.truncf %387 : vector<16x64xf32> to vector<16x64xbf16>
    %389 = vector.extract_strided_slice %264 {offsets = [16, 128], sizes = [16, 64], strides = [1, 1]} : vector<32x256xf32> to vector<16x64xf32>
    %390 = arith.truncf %389 : vector<16x64xf32> to vector<16x64xbf16>
    %cst_116 = arith.constant dense<0.000000e+00> : vector<16x16xf32>
    %391 = tpu.matmul %386, %388, %cst_116 {dimension_numbers = #tpu.dot_dimension_numbers<[1], [1], [0], [0], [0, 0, 1, 0], [], []>} : vector<16x64xbf16>, vector<16x64xbf16>, vector<16x16xf32> -> vector<16x16xf32>
    %cst_117 = arith.constant dense<0xFF800000> : vector<16xf32>
    %392 = vector.multi_reduction <maximumf>, %391, %cst_117 [1] : vector<16x16xf32> to vector<16xf32>
    %393 = vector.shape_cast %392 : vector<16xf32> to vector<16x1xf32>
    %394 = vector.broadcast %393 : vector<16x1xf32> to vector<16x16xf32>
    %395 = arith.subf %391, %394 : vector<16x16xf32>
    %396 = math.exp %395 : vector<16x16xf32>
    %cst_118 = arith.constant dense<0.000000e+00> : vector<16xf32>
    %397 = vector.multi_reduction <add>, %396, %cst_118 [1] : vector<16x16xf32> to vector<16xf32>
    %398 = vector.shape_cast %397 : vector<16xf32> to vector<16x1xf32>
    %399 = tpu.reciprocal %398 {approx = true} : vector<16x1xf32> -> vector<16x1xf32>
    %400 = vector.broadcast %399 : vector<16x1xf32> to vector<16x16xf32>
    %401 = arith.mulf %396, %400 : vector<16x16xf32>
    %402 = arith.truncf %401 : vector<16x16xf32> to vector<16x16xbf16>
    %cst_119 = arith.constant dense<0.000000e+00> : vector<16x64xf32>
    %403 = tpu.matmul %402, %390, %cst_119 {dimension_numbers = #tpu.dot_dimension_numbers<[1], [0], [0], [1], [0, 0, 1, 1], [], []>} : vector<16x16xbf16>, vector<16x64xbf16>, vector<16x64xf32> -> vector<16x64xf32>
    %c16_120 = arith.constant 16 : index
    %c128_121 = arith.constant 128 : index
    %404 = vector.load %arg5[%c16_120, %c128_121] : memref<32x256xf32, #tpu.memory_space<vmem>>, vector<16x64xf32>
    tpu.vector_store %arg5[%c16_120, %c128_121], %403 {strides = array<i32>} : memref<32x256xf32, #tpu.memory_space<vmem>>, vector<16x64xf32>,
    %405 = vector.extract_strided_slice %256 {offsets = [16, 192], sizes = [16, 64], strides = [1, 1]} : vector<32x256xf32> to vector<16x64xf32>
    %406 = arith.truncf %405 : vector<16x64xf32> to vector<16x64xbf16>
    %407 = vector.extract_strided_slice %260 {offsets = [16, 192], sizes = [16, 64], strides = [1, 1]} : vector<32x256xf32> to vector<16x64xf32>
    %408 = arith.truncf %407 : vector<16x64xf32> to vector<16x64xbf16>
    %409 = vector.extract_strided_slice %264 {offsets = [16, 192], sizes = [16, 64], strides = [1, 1]} : vector<32x256xf32> to vector<16x64xf32>
    %410 = arith.truncf %409 : vector<16x64xf32> to vector<16x64xbf16>
    %cst_122 = arith.constant dense<0.000000e+00> : vector<16x16xf32>
    %411 = tpu.matmul %406, %408, %cst_122 {dimension_numbers = #tpu.dot_dimension_numbers<[1], [1], [0], [0], [0, 0, 1, 0], [], []>} : vector<16x64xbf16>, vector<16x64xbf16>, vector<16x16xf32> -> vector<16x16xf32>
    %cst_123 = arith.constant dense<0xFF800000> : vector<16xf32>
    %412 = vector.multi_reduction <maximumf>, %411, %cst_123 [1] : vector<16x16xf32> to vector<16xf32>
    %413 = vector.shape_cast %412 : vector<16xf32> to vector<16x1xf32>
    %414 = vector.broadcast %413 : vector<16x1xf32> to vector<16x16xf32>
    %415 = arith.subf %411, %414 : vector<16x16xf32>
    %416 = math.exp %415 : vector<16x16xf32>
    %cst_124 = arith.constant dense<0.000000e+00> : vector<16xf32>
    %417 = vector.multi_reduction <add>, %416, %cst_124 [1] : vector<16x16xf32> to vector<16xf32>
    %418 = vector.shape_cast %417 : vector<16xf32> to vector<16x1xf32>
    %419 = tpu.reciprocal %418 {approx = true} : vector<16x1xf32> -> vector<16x1xf32>
    %420 = vector.broadcast %419 : vector<16x1xf32> to vector<16x16xf32>
    %421 = arith.mulf %416, %420 : vector<16x16xf32>
    %422 = arith.truncf %421 : vector<16x16xf32> to vector<16x16xbf16>
    %cst_125 = arith.constant dense<0.000000e+00> : vector<16x64xf32>
    %423 = tpu.matmul %422, %410, %cst_125 {dimension_numbers = #tpu.dot_dimension_numbers<[1], [0], [0], [1], [0, 0, 1, 1], [], []>} : vector<16x16xbf16>, vector<16x64xbf16>, vector<16x64xf32> -> vector<16x64xf32>
    %c16_126 = arith.constant 16 : index
    %c192_127 = arith.constant 192 : index
    %424 = vector.load %arg5[%c16_126, %c192_127] : memref<32x256xf32, #tpu.memory_space<vmem>>, vector<16x64xf32>
    tpu.vector_store %arg5[%c16_126, %c192_127], %423 {strides = array<i32>} : memref<32x256xf32, #tpu.memory_space<vmem>>, vector<16x64xf32>,
    %c656 = arith.constant 656 : index
    %c0_128 = arith.constant 0 : index
    %425 = vector.load %arg3[%c656, %c0_128] : memref<1424x768xbf16, #tpu.memory_space<vmem>>, vector<256x256xbf16>
    %c0_129 = arith.constant 0 : index
    %c0_130 = arith.constant 0 : index
    %426 = vector.load %arg5[%c0_129, %c0_130] : memref<32x256xf32, #tpu.memory_space<vmem>>, vector<32x256xf32>
    %427 = arith.truncf %426 : vector<32x256xf32> to vector<32x256xbf16>
    %cst_131 = arith.constant dense<0.000000e+00> : vector<32x256xf32>
    %428 = tpu.matmul %427, %425, %cst_131 {dimension_numbers = #tpu.dot_dimension_numbers<[1], [0], [0], [1], [0, 0, 1, 1], [], []>} : vector<32x256xbf16>, vector<256x256xbf16>, vector<32x256xf32> -> vector<32x256xf32>
    %c51 = arith.constant 51 : index
    %c0_132 = arith.constant 0 : index
    %429 = vector.load %arg2[%c51, %c0_132] : memref<96x256xf32, #tpu.memory_space<vmem>>, vector<1x256xf32>
    %430 = vector.broadcast %429 : vector<1x256xf32> to vector<32x256xf32>
    %431 = arith.addf %428, %430 : vector<32x256xf32>
    %432 = arith.addf %249, %431 : vector<32x256xf32>
    %c54 = arith.constant 54 : index
    %c0_133 = arith.constant 0 : index
    %433 = vector.load %arg2[%c54, %c0_133] : memref<96x256xf32, #tpu.memory_space<vmem>>, vector<1x256xf32>
    %c55 = arith.constant 55 : index
    %c0_134 = arith.constant 0 : index
    %434 = vector.load %arg2[%c55, %c0_134] : memref<96x256xf32, #tpu.memory_space<vmem>>, vector<1x256xf32>
    %cst_135 = arith.constant dense<0.000000e+00> : vector<32xf32>
    %435 = vector.multi_reduction <add>, %432, %cst_135 [1] : vector<32x256xf32> to vector<32xf32>
    %436 = vector.shape_cast %435 : vector<32xf32> to vector<32x1xf32>
    %cst_136 = arith.constant 2.560000e+02 : f32
    %437 = vector.broadcast %cst_136 : f32 to vector<32x1xf32>
    %438 = arith.divf %436, %437 : vector<32x1xf32>
    %439 = vector.broadcast %438 : vector<32x1xf32> to vector<32x256xf32>
    %440 = arith.subf %432, %439 : vector<32x256xf32>
    %441 = arith.mulf %440, %440 : vector<32x256xf32>
    %cst_137 = arith.constant dense<0.000000e+00> : vector<32xf32>
    %442 = vector.multi_reduction <add>, %441, %cst_137 [1] : vector<32x256xf32> to vector<32xf32>
    %443 = vector.shape_cast %442 : vector<32xf32> to vector<32x1xf32>
    %cst_138 = arith.constant 2.560000e+02 : f32
    %444 = vector.broadcast %cst_138 : f32 to vector<32x1xf32>
    %445 = arith.divf %443, %444 : vector<32x1xf32>
    %cst_139 = arith.constant 9.99999974E-6 : f32
    %446 = vector.broadcast %cst_139 : f32 to vector<32x1xf32>
    %447 = arith.addf %445, %446 : vector<32x1xf32>
    %448 = math.rsqrt %447 : vector<32x1xf32>
    %449 = vector.broadcast %448 : vector<32x1xf32> to vector<32x256xf32>
    %450 = arith.mulf %440, %449 : vector<32x256xf32>
    %451 = vector.broadcast %433 : vector<1x256xf32> to vector<32x256xf32>
    %452 = arith.mulf %450, %451 : vector<32x256xf32>
    %453 = vector.broadcast %434 : vector<1x256xf32> to vector<32x256xf32>
    %454 = arith.addf %452, %453 : vector<32x256xf32>
    %c656_140 = arith.constant 656 : index
    %c256 = arith.constant 256 : index
    %455 = vector.load %arg3[%c656_140, %c256] : memref<1424x768xbf16, #tpu.memory_space<vmem>>, vector<256x128xbf16>
    %c656_141 = arith.constant 656 : index
    %c384 = arith.constant 384 : index
    %456 = vector.load %arg3[%c656_141, %c384] : memref<1424x768xbf16, #tpu.memory_space<vmem>>, vector<128x256xbf16>
    %457 = arith.truncf %454 : vector<32x256xf32> to vector<32x256xbf16>
    %cst_142 = arith.constant dense<0.000000e+00> : vector<32x128xf32>
    %458 = tpu.matmul %457, %455, %cst_142 {dimension_numbers = #tpu.dot_dimension_numbers<[1], [0], [0], [1], [0, 0, 1, 1], [], []>} : vector<32x256xbf16>, vector<256x128xbf16>, vector<32x128xf32> -> vector<32x128xf32>
    %c52 = arith.constant 52 : index
    %c0_143 = arith.constant 0 : index
    %459 = vector.load %arg2[%c52, %c0_143] : memref<96x256xf32, #tpu.memory_space<vmem>>, vector<1x256xf32>
    %460 = vector.extract_strided_slice %459 {offsets = [0, 0], sizes = [1, 128], strides = [1, 1]} : vector<1x256xf32> to vector<1x128xf32>
    %461 = vector.broadcast %460 : vector<1x128xf32> to vector<32x128xf32>
    %462 = arith.addf %458, %461 : vector<32x128xf32>
    %cst_144 = arith.constant 0.000000e+00 : f32
    %463 = vector.broadcast %cst_144 : f32 to vector<32x128xf32>
    %464 = arith.maximumf %462, %463 : vector<32x128xf32>
    %465 = arith.truncf %464 : vector<32x128xf32> to vector<32x128xbf16>
    %cst_145 = arith.constant dense<0.000000e+00> : vector<32x256xf32>
    %466 = tpu.matmul %465, %456, %cst_145 {dimension_numbers = #tpu.dot_dimension_numbers<[1], [0], [0], [1], [0, 0, 1, 1], [], []>} : vector<32x128xbf16>, vector<128x256xbf16>, vector<32x256xf32> -> vector<32x256xf32>
    %c53 = arith.constant 53 : index
    %c0_146 = arith.constant 0 : index
    %467 = vector.load %arg2[%c53, %c0_146] : memref<96x256xf32, #tpu.memory_space<vmem>>, vector<1x256xf32>
    %468 = vector.broadcast %467 : vector<1x256xf32> to vector<32x256xf32>
    %469 = arith.addf %466, %468 : vector<32x256xf32>
    %470 = arith.addf %454, %469 : vector<32x256xf32>
    %c56 = arith.constant 56 : index
    %c0_147 = arith.constant 0 : index
    %471 = vector.load %arg2[%c56, %c0_147] : memref<96x256xf32, #tpu.memory_space<vmem>>, vector<1x256xf32>
    %c57 = arith.constant 57 : index
    %c0_148 = arith.constant 0 : index
    %472 = vector.load %arg2[%c57, %c0_148] : memref<96x256xf32, #tpu.memory_space<vmem>>, vector<1x256xf32>
    %cst_149 = arith.constant dense<0.000000e+00> : vector<32xf32>
    %473 = vector.multi_reduction <add>, %470, %cst_149 [1] : vector<32x256xf32> to vector<32xf32>
    %474 = vector.shape_cast %473 : vector<32xf32> to vector<32x1xf32>
    %cst_150 = arith.constant 2.560000e+02 : f32
    %475 = vector.broadcast %cst_150 : f32 to vector<32x1xf32>
    %476 = arith.divf %474, %475 : vector<32x1xf32>
    %477 = vector.broadcast %476 : vector<32x1xf32> to vector<32x256xf32>
    %478 = arith.subf %470, %477 : vector<32x256xf32>
    %479 = arith.mulf %478, %478 : vector<32x256xf32>
    %cst_151 = arith.constant dense<0.000000e+00> : vector<32xf32>
    %480 = vector.multi_reduction <add>, %479, %cst_151 [1] : vector<32x256xf32> to vector<32xf32>
    %481 = vector.shape_cast %480 : vector<32xf32> to vector<32x1xf32>
    %cst_152 = arith.constant 2.560000e+02 : f32
    %482 = vector.broadcast %cst_152 : f32 to vector<32x1xf32>
    %483 = arith.divf %481, %482 : vector<32x1xf32>
    %cst_153 = arith.constant 9.99999974E-6 : f32
    %484 = vector.broadcast %cst_153 : f32 to vector<32x1xf32>
    %485 = arith.addf %483, %484 : vector<32x1xf32>
    %486 = math.rsqrt %485 : vector<32x1xf32>
    %487 = vector.broadcast %486 : vector<32x1xf32> to vector<32x256xf32>
    %488 = arith.mulf %478, %487 : vector<32x256xf32>
    %489 = vector.broadcast %471 : vector<1x256xf32> to vector<32x256xf32>
    %490 = arith.mulf %488, %489 : vector<32x256xf32>
    %491 = vector.broadcast %472 : vector<1x256xf32> to vector<32x256xf32>
    %492 = arith.addf %490, %491 : vector<32x256xf32>
    %c912 = arith.constant 912 : index
    %c0_154 = arith.constant 0 : index
    %493 = vector.load %arg3[%c912, %c0_154] : memref<1424x768xbf16, #tpu.memory_space<vmem>>, vector<256x768xbf16>
    %494 = arith.truncf %492 : vector<32x256xf32> to vector<32x256xbf16>
    %cst_155 = arith.constant dense<0.000000e+00> : vector<32x768xf32>
    %495 = tpu.matmul %494, %493, %cst_155 {dimension_numbers = #tpu.dot_dimension_numbers<[1], [0], [0], [1], [0, 0, 1, 1], [], []>} : vector<32x256xbf16>, vector<256x768xbf16>, vector<32x768xf32> -> vector<32x768xf32>
    %496 = vector.extract_strided_slice %495 {offsets = [0, 0], sizes = [32, 256], strides = [1, 1]} : vector<32x768xf32> to vector<32x256xf32>
    %c64_156 = arith.constant 64 : index
    %c0_157 = arith.constant 0 : index
    %497 = vector.load %arg2[%c64_156, %c0_157] : memref<96x256xf32, #tpu.memory_space<vmem>>, vector<1x256xf32>
    %498 = vector.broadcast %497 : vector<1x256xf32> to vector<32x256xf32>
    %499 = arith.addf %496, %498 : vector<32x256xf32>
    %500 = vector.extract_strided_slice %495 {offsets = [0, 256], sizes = [32, 256], strides = [1, 1]} : vector<32x768xf32> to vector<32x256xf32>
    %c65 = arith.constant 65 : index
    %c0_158 = arith.constant 0 : index
    %501 = vector.load %arg2[%c65, %c0_158] : memref<96x256xf32, #tpu.memory_space<vmem>>, vector<1x256xf32>
    %502 = vector.broadcast %501 : vector<1x256xf32> to vector<32x256xf32>
    %503 = arith.addf %500, %502 : vector<32x256xf32>
    %504 = vector.extract_strided_slice %495 {offsets = [0, 512], sizes = [32, 256], strides = [1, 1]} : vector<32x768xf32> to vector<32x256xf32>
    %c66 = arith.constant 66 : index
    %c0_159 = arith.constant 0 : index
    %505 = vector.load %arg2[%c66, %c0_159] : memref<96x256xf32, #tpu.memory_space<vmem>>, vector<1x256xf32>
    %506 = vector.broadcast %505 : vector<1x256xf32> to vector<32x256xf32>
    %507 = arith.addf %504, %506 : vector<32x256xf32>
    %508 = vector.extract_strided_slice %499 {offsets = [0, 0], sizes = [16, 64], strides = [1, 1]} : vector<32x256xf32> to vector<16x64xf32>
    %509 = arith.truncf %508 : vector<16x64xf32> to vector<16x64xbf16>
    %510 = vector.extract_strided_slice %503 {offsets = [0, 0], sizes = [16, 64], strides = [1, 1]} : vector<32x256xf32> to vector<16x64xf32>
    %511 = arith.truncf %510 : vector<16x64xf32> to vector<16x64xbf16>
    %512 = vector.extract_strided_slice %507 {offsets = [0, 0], sizes = [16, 64], strides = [1, 1]} : vector<32x256xf32> to vector<16x64xf32>
    %513 = arith.truncf %512 : vector<16x64xf32> to vector<16x64xbf16>
    %cst_160 = arith.constant dense<0.000000e+00> : vector<16x16xf32>
    %514 = tpu.matmul %509, %511, %cst_160 {dimension_numbers = #tpu.dot_dimension_numbers<[1], [1], [0], [0], [0, 0, 1, 0], [], []>} : vector<16x64xbf16>, vector<16x64xbf16>, vector<16x16xf32> -> vector<16x16xf32>
    %cst_161 = arith.constant dense<0xFF800000> : vector<16xf32>
    %515 = vector.multi_reduction <maximumf>, %514, %cst_161 [1] : vector<16x16xf32> to vector<16xf32>
    %516 = vector.shape_cast %515 : vector<16xf32> to vector<16x1xf32>
    %517 = vector.broadcast %516 : vector<16x1xf32> to vector<16x16xf32>
    %518 = arith.subf %514, %517 : vector<16x16xf32>
    %519 = math.exp %518 : vector<16x16xf32>
    %cst_162 = arith.constant dense<0.000000e+00> : vector<16xf32>
    %520 = vector.multi_reduction <add>, %519, %cst_162 [1] : vector<16x16xf32> to vector<16xf32>
    %521 = vector.shape_cast %520 : vector<16xf32> to vector<16x1xf32>
    %522 = tpu.reciprocal %521 {approx = true} : vector<16x1xf32> -> vector<16x1xf32>
    %523 = vector.broadcast %522 : vector<16x1xf32> to vector<16x16xf32>
    %524 = arith.mulf %519, %523 : vector<16x16xf32>
    %525 = arith.truncf %524 : vector<16x16xf32> to vector<16x16xbf16>
    %cst_163 = arith.constant dense<0.000000e+00> : vector<16x64xf32>
    %526 = tpu.matmul %525, %513, %cst_163 {dimension_numbers = #tpu.dot_dimension_numbers<[1], [0], [0], [1], [0, 0, 1, 1], [], []>} : vector<16x16xbf16>, vector<16x64xbf16>, vector<16x64xf32> -> vector<16x64xf32>
    %c0_164 = arith.constant 0 : index
    %c0_165 = arith.constant 0 : index
    %527 = vector.load %arg5[%c0_164, %c0_165] : memref<32x256xf32, #tpu.memory_space<vmem>>, vector<16x64xf32>
    tpu.vector_store %arg5[%c0_164, %c0_165], %526 {strides = array<i32>} : memref<32x256xf32, #tpu.memory_space<vmem>>, vector<16x64xf32>,
    %528 = vector.extract_strided_slice %499 {offsets = [0, 64], sizes = [16, 64], strides = [1, 1]} : vector<32x256xf32> to vector<16x64xf32>
    %529 = arith.truncf %528 : vector<16x64xf32> to vector<16x64xbf16>
    %530 = vector.extract_strided_slice %503 {offsets = [0, 64], sizes = [16, 64], strides = [1, 1]} : vector<32x256xf32> to vector<16x64xf32>
    %531 = arith.truncf %530 : vector<16x64xf32> to vector<16x64xbf16>
    %532 = vector.extract_strided_slice %507 {offsets = [0, 64], sizes = [16, 64], strides = [1, 1]} : vector<32x256xf32> to vector<16x64xf32>
    %533 = arith.truncf %532 : vector<16x64xf32> to vector<16x64xbf16>
    %cst_166 = arith.constant dense<0.000000e+00> : vector<16x16xf32>
    %534 = tpu.matmul %529, %531, %cst_166 {dimension_numbers = #tpu.dot_dimension_numbers<[1], [1], [0], [0], [0, 0, 1, 0], [], []>} : vector<16x64xbf16>, vector<16x64xbf16>, vector<16x16xf32> -> vector<16x16xf32>
    %cst_167 = arith.constant dense<0xFF800000> : vector<16xf32>
    %535 = vector.multi_reduction <maximumf>, %534, %cst_167 [1] : vector<16x16xf32> to vector<16xf32>
    %536 = vector.shape_cast %535 : vector<16xf32> to vector<16x1xf32>
    %537 = vector.broadcast %536 : vector<16x1xf32> to vector<16x16xf32>
    %538 = arith.subf %534, %537 : vector<16x16xf32>
    %539 = math.exp %538 : vector<16x16xf32>
    %cst_168 = arith.constant dense<0.000000e+00> : vector<16xf32>
    %540 = vector.multi_reduction <add>, %539, %cst_168 [1] : vector<16x16xf32> to vector<16xf32>
    %541 = vector.shape_cast %540 : vector<16xf32> to vector<16x1xf32>
    %542 = tpu.reciprocal %541 {approx = true} : vector<16x1xf32> -> vector<16x1xf32>
    %543 = vector.broadcast %542 : vector<16x1xf32> to vector<16x16xf32>
    %544 = arith.mulf %539, %543 : vector<16x16xf32>
    %545 = arith.truncf %544 : vector<16x16xf32> to vector<16x16xbf16>
    %cst_169 = arith.constant dense<0.000000e+00> : vector<16x64xf32>
    %546 = tpu.matmul %545, %533, %cst_169 {dimension_numbers = #tpu.dot_dimension_numbers<[1], [0], [0], [1], [0, 0, 1, 1], [], []>} : vector<16x16xbf16>, vector<16x64xbf16>, vector<16x64xf32> -> vector<16x64xf32>
    %c0_170 = arith.constant 0 : index
    %c64_171 = arith.constant 64 : index
    %547 = vector.load %arg5[%c0_170, %c64_171] : memref<32x256xf32, #tpu.memory_space<vmem>>, vector<16x64xf32>
    tpu.vector_store %arg5[%c0_170, %c64_171], %546 {strides = array<i32>} : memref<32x256xf32, #tpu.memory_space<vmem>>, vector<16x64xf32>,
    %548 = vector.extract_strided_slice %499 {offsets = [0, 128], sizes = [16, 64], strides = [1, 1]} : vector<32x256xf32> to vector<16x64xf32>
    %549 = arith.truncf %548 : vector<16x64xf32> to vector<16x64xbf16>
    %550 = vector.extract_strided_slice %503 {offsets = [0, 128], sizes = [16, 64], strides = [1, 1]} : vector<32x256xf32> to vector<16x64xf32>
    %551 = arith.truncf %550 : vector<16x64xf32> to vector<16x64xbf16>
    %552 = vector.extract_strided_slice %507 {offsets = [0, 128], sizes = [16, 64], strides = [1, 1]} : vector<32x256xf32> to vector<16x64xf32>
    %553 = arith.truncf %552 : vector<16x64xf32> to vector<16x64xbf16>
    %cst_172 = arith.constant dense<0.000000e+00> : vector<16x16xf32>
    %554 = tpu.matmul %549, %551, %cst_172 {dimension_numbers = #tpu.dot_dimension_numbers<[1], [1], [0], [0], [0, 0, 1, 0], [], []>} : vector<16x64xbf16>, vector<16x64xbf16>, vector<16x16xf32> -> vector<16x16xf32>
    %cst_173 = arith.constant dense<0xFF800000> : vector<16xf32>
    %555 = vector.multi_reduction <maximumf>, %554, %cst_173 [1] : vector<16x16xf32> to vector<16xf32>
    %556 = vector.shape_cast %555 : vector<16xf32> to vector<16x1xf32>
    %557 = vector.broadcast %556 : vector<16x1xf32> to vector<16x16xf32>
    %558 = arith.subf %554, %557 : vector<16x16xf32>
    %559 = math.exp %558 : vector<16x16xf32>
    %cst_174 = arith.constant dense<0.000000e+00> : vector<16xf32>
    %560 = vector.multi_reduction <add>, %559, %cst_174 [1] : vector<16x16xf32> to vector<16xf32>
    %561 = vector.shape_cast %560 : vector<16xf32> to vector<16x1xf32>
    %562 = tpu.reciprocal %561 {approx = true} : vector<16x1xf32> -> vector<16x1xf32>
    %563 = vector.broadcast %562 : vector<16x1xf32> to vector<16x16xf32>
    %564 = arith.mulf %559, %563 : vector<16x16xf32>
    %565 = arith.truncf %564 : vector<16x16xf32> to vector<16x16xbf16>
    %cst_175 = arith.constant dense<0.000000e+00> : vector<16x64xf32>
    %566 = tpu.matmul %565, %553, %cst_175 {dimension_numbers = #tpu.dot_dimension_numbers<[1], [0], [0], [1], [0, 0, 1, 1], [], []>} : vector<16x16xbf16>, vector<16x64xbf16>, vector<16x64xf32> -> vector<16x64xf32>
    %c0_176 = arith.constant 0 : index
    %c128_177 = arith.constant 128 : index
    %567 = vector.load %arg5[%c0_176, %c128_177] : memref<32x256xf32, #tpu.memory_space<vmem>>, vector<16x64xf32>
    tpu.vector_store %arg5[%c0_176, %c128_177], %566 {strides = array<i32>} : memref<32x256xf32, #tpu.memory_space<vmem>>, vector<16x64xf32>,
    %568 = vector.extract_strided_slice %499 {offsets = [0, 192], sizes = [16, 64], strides = [1, 1]} : vector<32x256xf32> to vector<16x64xf32>
    %569 = arith.truncf %568 : vector<16x64xf32> to vector<16x64xbf16>
    %570 = vector.extract_strided_slice %503 {offsets = [0, 192], sizes = [16, 64], strides = [1, 1]} : vector<32x256xf32> to vector<16x64xf32>
    %571 = arith.truncf %570 : vector<16x64xf32> to vector<16x64xbf16>
    %572 = vector.extract_strided_slice %507 {offsets = [0, 192], sizes = [16, 64], strides = [1, 1]} : vector<32x256xf32> to vector<16x64xf32>
    %573 = arith.truncf %572 : vector<16x64xf32> to vector<16x64xbf16>
    %cst_178 = arith.constant dense<0.000000e+00> : vector<16x16xf32>
    %574 = tpu.matmul %569, %571, %cst_178 {dimension_numbers = #tpu.dot_dimension_numbers<[1], [1], [0], [0], [0, 0, 1, 0], [], []>} : vector<16x64xbf16>, vector<16x64xbf16>, vector<16x16xf32> -> vector<16x16xf32>
    %cst_179 = arith.constant dense<0xFF800000> : vector<16xf32>
    %575 = vector.multi_reduction <maximumf>, %574, %cst_179 [1] : vector<16x16xf32> to vector<16xf32>
    %576 = vector.shape_cast %575 : vector<16xf32> to vector<16x1xf32>
    %577 = vector.broadcast %576 : vector<16x1xf32> to vector<16x16xf32>
    %578 = arith.subf %574, %577 : vector<16x16xf32>
    %579 = math.exp %578 : vector<16x16xf32>
    %cst_180 = arith.constant dense<0.000000e+00> : vector<16xf32>
    %580 = vector.multi_reduction <add>, %579, %cst_180 [1] : vector<16x16xf32> to vector<16xf32>
    %581 = vector.shape_cast %580 : vector<16xf32> to vector<16x1xf32>
    %582 = tpu.reciprocal %581 {approx = true} : vector<16x1xf32> -> vector<16x1xf32>
    %583 = vector.broadcast %582 : vector<16x1xf32> to vector<16x16xf32>
    %584 = arith.mulf %579, %583 : vector<16x16xf32>
    %585 = arith.truncf %584 : vector<16x16xf32> to vector<16x16xbf16>
    %cst_181 = arith.constant dense<0.000000e+00> : vector<16x64xf32>
    %586 = tpu.matmul %585, %573, %cst_181 {dimension_numbers = #tpu.dot_dimension_numbers<[1], [0], [0], [1], [0, 0, 1, 1], [], []>} : vector<16x16xbf16>, vector<16x64xbf16>, vector<16x64xf32> -> vector<16x64xf32>
    %c0_182 = arith.constant 0 : index
    %c192_183 = arith.constant 192 : index
    %587 = vector.load %arg5[%c0_182, %c192_183] : memref<32x256xf32, #tpu.memory_space<vmem>>, vector<16x64xf32>
    tpu.vector_store %arg5[%c0_182, %c192_183], %586 {strides = array<i32>} : memref<32x256xf32, #tpu.memory_space<vmem>>, vector<16x64xf32>,
    %588 = vector.extract_strided_slice %499 {offsets = [16, 0], sizes = [16, 64], strides = [1, 1]} : vector<32x256xf32> to vector<16x64xf32>
    %589 = arith.truncf %588 : vector<16x64xf32> to vector<16x64xbf16>
    %590 = vector.extract_strided_slice %503 {offsets = [16, 0], sizes = [16, 64], strides = [1, 1]} : vector<32x256xf32> to vector<16x64xf32>
    %591 = arith.truncf %590 : vector<16x64xf32> to vector<16x64xbf16>
    %592 = vector.extract_strided_slice %507 {offsets = [16, 0], sizes = [16, 64], strides = [1, 1]} : vector<32x256xf32> to vector<16x64xf32>
    %593 = arith.truncf %592 : vector<16x64xf32> to vector<16x64xbf16>
    %cst_184 = arith.constant dense<0.000000e+00> : vector<16x16xf32>
    %594 = tpu.matmul %589, %591, %cst_184 {dimension_numbers = #tpu.dot_dimension_numbers<[1], [1], [0], [0], [0, 0, 1, 0], [], []>} : vector<16x64xbf16>, vector<16x64xbf16>, vector<16x16xf32> -> vector<16x16xf32>
    %cst_185 = arith.constant dense<0xFF800000> : vector<16xf32>
    %595 = vector.multi_reduction <maximumf>, %594, %cst_185 [1] : vector<16x16xf32> to vector<16xf32>
    %596 = vector.shape_cast %595 : vector<16xf32> to vector<16x1xf32>
    %597 = vector.broadcast %596 : vector<16x1xf32> to vector<16x16xf32>
    %598 = arith.subf %594, %597 : vector<16x16xf32>
    %599 = math.exp %598 : vector<16x16xf32>
    %cst_186 = arith.constant dense<0.000000e+00> : vector<16xf32>
    %600 = vector.multi_reduction <add>, %599, %cst_186 [1] : vector<16x16xf32> to vector<16xf32>
    %601 = vector.shape_cast %600 : vector<16xf32> to vector<16x1xf32>
    %602 = tpu.reciprocal %601 {approx = true} : vector<16x1xf32> -> vector<16x1xf32>
    %603 = vector.broadcast %602 : vector<16x1xf32> to vector<16x16xf32>
    %604 = arith.mulf %599, %603 : vector<16x16xf32>
    %605 = arith.truncf %604 : vector<16x16xf32> to vector<16x16xbf16>
    %cst_187 = arith.constant dense<0.000000e+00> : vector<16x64xf32>
    %606 = tpu.matmul %605, %593, %cst_187 {dimension_numbers = #tpu.dot_dimension_numbers<[1], [0], [0], [1], [0, 0, 1, 1], [], []>} : vector<16x16xbf16>, vector<16x64xbf16>, vector<16x64xf32> -> vector<16x64xf32>
    %c16_188 = arith.constant 16 : index
    %c0_189 = arith.constant 0 : index
    %607 = vector.load %arg5[%c16_188, %c0_189] : memref<32x256xf32, #tpu.memory_space<vmem>>, vector<16x64xf32>
    tpu.vector_store %arg5[%c16_188, %c0_189], %606 {strides = array<i32>} : memref<32x256xf32, #tpu.memory_space<vmem>>, vector<16x64xf32>,
    %608 = vector.extract_strided_slice %499 {offsets = [16, 64], sizes = [16, 64], strides = [1, 1]} : vector<32x256xf32> to vector<16x64xf32>
    %609 = arith.truncf %608 : vector<16x64xf32> to vector<16x64xbf16>
    %610 = vector.extract_strided_slice %503 {offsets = [16, 64], sizes = [16, 64], strides = [1, 1]} : vector<32x256xf32> to vector<16x64xf32>
    %611 = arith.truncf %610 : vector<16x64xf32> to vector<16x64xbf16>
    %612 = vector.extract_strided_slice %507 {offsets = [16, 64], sizes = [16, 64], strides = [1, 1]} : vector<32x256xf32> to vector<16x64xf32>
    %613 = arith.truncf %612 : vector<16x64xf32> to vector<16x64xbf16>
    %cst_190 = arith.constant dense<0.000000e+00> : vector<16x16xf32>
    %614 = tpu.matmul %609, %611, %cst_190 {dimension_numbers = #tpu.dot_dimension_numbers<[1], [1], [0], [0], [0, 0, 1, 0], [], []>} : vector<16x64xbf16>, vector<16x64xbf16>, vector<16x16xf32> -> vector<16x16xf32>
    %cst_191 = arith.constant dense<0xFF800000> : vector<16xf32>
    %615 = vector.multi_reduction <maximumf>, %614, %cst_191 [1] : vector<16x16xf32> to vector<16xf32>
    %616 = vector.shape_cast %615 : vector<16xf32> to vector<16x1xf32>
    %617 = vector.broadcast %616 : vector<16x1xf32> to vector<16x16xf32>
    %618 = arith.subf %614, %617 : vector<16x16xf32>
    %619 = math.exp %618 : vector<16x16xf32>
    %cst_192 = arith.constant dense<0.000000e+00> : vector<16xf32>
    %620 = vector.multi_reduction <add>, %619, %cst_192 [1] : vector<16x16xf32> to vector<16xf32>
    %621 = vector.shape_cast %620 : vector<16xf32> to vector<16x1xf32>
    %622 = tpu.reciprocal %621 {approx = true} : vector<16x1xf32> -> vector<16x1xf32>
    %623 = vector.broadcast %622 : vector<16x1xf32> to vector<16x16xf32>
    %624 = arith.mulf %619, %623 : vector<16x16xf32>
    %625 = arith.truncf %624 : vector<16x16xf32> to vector<16x16xbf16>
    %cst_193 = arith.constant dense<0.000000e+00> : vector<16x64xf32>
    %626 = tpu.matmul %625, %613, %cst_193 {dimension_numbers = #tpu.dot_dimension_numbers<[1], [0], [0], [1], [0, 0, 1, 1], [], []>} : vector<16x16xbf16>, vector<16x64xbf16>, vector<16x64xf32> -> vector<16x64xf32>
    %c16_194 = arith.constant 16 : index
    %c64_195 = arith.constant 64 : index
    %627 = vector.load %arg5[%c16_194, %c64_195] : memref<32x256xf32, #tpu.memory_space<vmem>>, vector<16x64xf32>
    tpu.vector_store %arg5[%c16_194, %c64_195], %626 {strides = array<i32>} : memref<32x256xf32, #tpu.memory_space<vmem>>, vector<16x64xf32>,
    %628 = vector.extract_strided_slice %499 {offsets = [16, 128], sizes = [16, 64], strides = [1, 1]} : vector<32x256xf32> to vector<16x64xf32>
    %629 = arith.truncf %628 : vector<16x64xf32> to vector<16x64xbf16>
    %630 = vector.extract_strided_slice %503 {offsets = [16, 128], sizes = [16, 64], strides = [1, 1]} : vector<32x256xf32> to vector<16x64xf32>
    %631 = arith.truncf %630 : vector<16x64xf32> to vector<16x64xbf16>
    %632 = vector.extract_strided_slice %507 {offsets = [16, 128], sizes = [16, 64], strides = [1, 1]} : vector<32x256xf32> to vector<16x64xf32>
    %633 = arith.truncf %632 : vector<16x64xf32> to vector<16x64xbf16>
    %cst_196 = arith.constant dense<0.000000e+00> : vector<16x16xf32>
    %634 = tpu.matmul %629, %631, %cst_196 {dimension_numbers = #tpu.dot_dimension_numbers<[1], [1], [0], [0], [0, 0, 1, 0], [], []>} : vector<16x64xbf16>, vector<16x64xbf16>, vector<16x16xf32> -> vector<16x16xf32>
    %cst_197 = arith.constant dense<0xFF800000> : vector<16xf32>
    %635 = vector.multi_reduction <maximumf>, %634, %cst_197 [1] : vector<16x16xf32> to vector<16xf32>
    %636 = vector.shape_cast %635 : vector<16xf32> to vector<16x1xf32>
    %637 = vector.broadcast %636 : vector<16x1xf32> to vector<16x16xf32>
    %638 = arith.subf %634, %637 : vector<16x16xf32>
    %639 = math.exp %638 : vector<16x16xf32>
    %cst_198 = arith.constant dense<0.000000e+00> : vector<16xf32>
    %640 = vector.multi_reduction <add>, %639, %cst_198 [1] : vector<16x16xf32> to vector<16xf32>
    %641 = vector.shape_cast %640 : vector<16xf32> to vector<16x1xf32>
    %642 = tpu.reciprocal %641 {approx = true} : vector<16x1xf32> -> vector<16x1xf32>
    %643 = vector.broadcast %642 : vector<16x1xf32> to vector<16x16xf32>
    %644 = arith.mulf %639, %643 : vector<16x16xf32>
    %645 = arith.truncf %644 : vector<16x16xf32> to vector<16x16xbf16>
    %cst_199 = arith.constant dense<0.000000e+00> : vector<16x64xf32>
    %646 = tpu.matmul %645, %633, %cst_199 {dimension_numbers = #tpu.dot_dimension_numbers<[1], [0], [0], [1], [0, 0, 1, 1], [], []>} : vector<16x16xbf16>, vector<16x64xbf16>, vector<16x64xf32> -> vector<16x64xf32>
    %c16_200 = arith.constant 16 : index
    %c128_201 = arith.constant 128 : index
    %647 = vector.load %arg5[%c16_200, %c128_201] : memref<32x256xf32, #tpu.memory_space<vmem>>, vector<16x64xf32>
    tpu.vector_store %arg5[%c16_200, %c128_201], %646 {strides = array<i32>} : memref<32x256xf32, #tpu.memory_space<vmem>>, vector<16x64xf32>,
    %648 = vector.extract_strided_slice %499 {offsets = [16, 192], sizes = [16, 64], strides = [1, 1]} : vector<32x256xf32> to vector<16x64xf32>
    %649 = arith.truncf %648 : vector<16x64xf32> to vector<16x64xbf16>
    %650 = vector.extract_strided_slice %503 {offsets = [16, 192], sizes = [16, 64], strides = [1, 1]} : vector<32x256xf32> to vector<16x64xf32>
    %651 = arith.truncf %650 : vector<16x64xf32> to vector<16x64xbf16>
    %652 = vector.extract_strided_slice %507 {offsets = [16, 192], sizes = [16, 64], strides = [1, 1]} : vector<32x256xf32> to vector<16x64xf32>
    %653 = arith.truncf %652 : vector<16x64xf32> to vector<16x64xbf16>
    %cst_202 = arith.constant dense<0.000000e+00> : vector<16x16xf32>
    %654 = tpu.matmul %649, %651, %cst_202 {dimension_numbers = #tpu.dot_dimension_numbers<[1], [1], [0], [0], [0, 0, 1, 0], [], []>} : vector<16x64xbf16>, vector<16x64xbf16>, vector<16x16xf32> -> vector<16x16xf32>
    %cst_203 = arith.constant dense<0xFF800000> : vector<16xf32>
    %655 = vector.multi_reduction <maximumf>, %654, %cst_203 [1] : vector<16x16xf32> to vector<16xf32>
    %656 = vector.shape_cast %655 : vector<16xf32> to vector<16x1xf32>
    %657 = vector.broadcast %656 : vector<16x1xf32> to vector<16x16xf32>
    %658 = arith.subf %654, %657 : vector<16x16xf32>
    %659 = math.exp %658 : vector<16x16xf32>
    %cst_204 = arith.constant dense<0.000000e+00> : vector<16xf32>
    %660 = vector.multi_reduction <add>, %659, %cst_204 [1] : vector<16x16xf32> to vector<16xf32>
    %661 = vector.shape_cast %660 : vector<16xf32> to vector<16x1xf32>
    %662 = tpu.reciprocal %661 {approx = true} : vector<16x1xf32> -> vector<16x1xf32>
    %663 = vector.broadcast %662 : vector<16x1xf32> to vector<16x16xf32>
    %664 = arith.mulf %659, %663 : vector<16x16xf32>
    %665 = arith.truncf %664 : vector<16x16xf32> to vector<16x16xbf16>
    %cst_205 = arith.constant dense<0.000000e+00> : vector<16x64xf32>
    %666 = tpu.matmul %665, %653, %cst_205 {dimension_numbers = #tpu.dot_dimension_numbers<[1], [0], [0], [1], [0, 0, 1, 1], [], []>} : vector<16x16xbf16>, vector<16x64xbf16>, vector<16x64xf32> -> vector<16x64xf32>
    %c16_206 = arith.constant 16 : index
    %c192_207 = arith.constant 192 : index
    %667 = vector.load %arg5[%c16_206, %c192_207] : memref<32x256xf32, #tpu.memory_space<vmem>>, vector<16x64xf32>
    tpu.vector_store %arg5[%c16_206, %c192_207], %666 {strides = array<i32>} : memref<32x256xf32, #tpu.memory_space<vmem>>, vector<16x64xf32>,
    %c1168 = arith.constant 1168 : index
    %c0_208 = arith.constant 0 : index
    %668 = vector.load %arg3[%c1168, %c0_208] : memref<1424x768xbf16, #tpu.memory_space<vmem>>, vector<256x256xbf16>
    %c0_209 = arith.constant 0 : index
    %c0_210 = arith.constant 0 : index
    %669 = vector.load %arg5[%c0_209, %c0_210] : memref<32x256xf32, #tpu.memory_space<vmem>>, vector<32x256xf32>
    %670 = arith.truncf %669 : vector<32x256xf32> to vector<32x256xbf16>
    %cst_211 = arith.constant dense<0.000000e+00> : vector<32x256xf32>
    %671 = tpu.matmul %670, %668, %cst_211 {dimension_numbers = #tpu.dot_dimension_numbers<[1], [0], [0], [1], [0, 0, 1, 1], [], []>} : vector<32x256xbf16>, vector<256x256xbf16>, vector<32x256xf32> -> vector<32x256xf32>
    %c67 = arith.constant 67 : index
    %c0_212 = arith.constant 0 : index
    %672 = vector.load %arg2[%c67, %c0_212] : memref<96x256xf32, #tpu.memory_space<vmem>>, vector<1x256xf32>
    %673 = vector.broadcast %672 : vector<1x256xf32> to vector<32x256xf32>
    %674 = arith.addf %671, %673 : vector<32x256xf32>
    %675 = arith.addf %492, %674 : vector<32x256xf32>
    %c70 = arith.constant 70 : index
    %c0_213 = arith.constant 0 : index
    %676 = vector.load %arg2[%c70, %c0_213] : memref<96x256xf32, #tpu.memory_space<vmem>>, vector<1x256xf32>
    %c71 = arith.constant 71 : index
    %c0_214 = arith.constant 0 : index
    %677 = vector.load %arg2[%c71, %c0_214] : memref<96x256xf32, #tpu.memory_space<vmem>>, vector<1x256xf32>
    %cst_215 = arith.constant dense<0.000000e+00> : vector<32xf32>
    %678 = vector.multi_reduction <add>, %675, %cst_215 [1] : vector<32x256xf32> to vector<32xf32>
    %679 = vector.shape_cast %678 : vector<32xf32> to vector<32x1xf32>
    %cst_216 = arith.constant 2.560000e+02 : f32
    %680 = vector.broadcast %cst_216 : f32 to vector<32x1xf32>
    %681 = arith.divf %679, %680 : vector<32x1xf32>
    %682 = vector.broadcast %681 : vector<32x1xf32> to vector<32x256xf32>
    %683 = arith.subf %675, %682 : vector<32x256xf32>
    %684 = arith.mulf %683, %683 : vector<32x256xf32>
    %cst_217 = arith.constant dense<0.000000e+00> : vector<32xf32>
    %685 = vector.multi_reduction <add>, %684, %cst_217 [1] : vector<32x256xf32> to vector<32xf32>
    %686 = vector.shape_cast %685 : vector<32xf32> to vector<32x1xf32>
    %cst_218 = arith.constant 2.560000e+02 : f32
    %687 = vector.broadcast %cst_218 : f32 to vector<32x1xf32>
    %688 = arith.divf %686, %687 : vector<32x1xf32>
    %cst_219 = arith.constant 9.99999974E-6 : f32
    %689 = vector.broadcast %cst_219 : f32 to vector<32x1xf32>
    %690 = arith.addf %688, %689 : vector<32x1xf32>
    %691 = math.rsqrt %690 : vector<32x1xf32>
    %692 = vector.broadcast %691 : vector<32x1xf32> to vector<32x256xf32>
    %693 = arith.mulf %683, %692 : vector<32x256xf32>
    %694 = vector.broadcast %676 : vector<1x256xf32> to vector<32x256xf32>
    %695 = arith.mulf %693, %694 : vector<32x256xf32>
    %696 = vector.broadcast %677 : vector<1x256xf32> to vector<32x256xf32>
    %697 = arith.addf %695, %696 : vector<32x256xf32>
    %c1168_220 = arith.constant 1168 : index
    %c256_221 = arith.constant 256 : index
    %698 = vector.load %arg3[%c1168_220, %c256_221] : memref<1424x768xbf16, #tpu.memory_space<vmem>>, vector<256x128xbf16>
    %c1168_222 = arith.constant 1168 : index
    %c384_223 = arith.constant 384 : index
    %699 = vector.load %arg3[%c1168_222, %c384_223] : memref<1424x768xbf16, #tpu.memory_space<vmem>>, vector<128x256xbf16>
    %700 = arith.truncf %697 : vector<32x256xf32> to vector<32x256xbf16>
    %cst_224 = arith.constant dense<0.000000e+00> : vector<32x128xf32>
    %701 = tpu.matmul %700, %698, %cst_224 {dimension_numbers = #tpu.dot_dimension_numbers<[1], [0], [0], [1], [0, 0, 1, 1], [], []>} : vector<32x256xbf16>, vector<256x128xbf16>, vector<32x128xf32> -> vector<32x128xf32>
    %c68 = arith.constant 68 : index
    %c0_225 = arith.constant 0 : index
    %702 = vector.load %arg2[%c68, %c0_225] : memref<96x256xf32, #tpu.memory_space<vmem>>, vector<1x256xf32>
    %703 = vector.extract_strided_slice %702 {offsets = [0, 0], sizes = [1, 128], strides = [1, 1]} : vector<1x256xf32> to vector<1x128xf32>
    %704 = vector.broadcast %703 : vector<1x128xf32> to vector<32x128xf32>
    %705 = arith.addf %701, %704 : vector<32x128xf32>
    %cst_226 = arith.constant 0.000000e+00 : f32
    %706 = vector.broadcast %cst_226 : f32 to vector<32x128xf32>
    %707 = arith.maximumf %705, %706 : vector<32x128xf32>
    %708 = arith.truncf %707 : vector<32x128xf32> to vector<32x128xbf16>
    %cst_227 = arith.constant dense<0.000000e+00> : vector<32x256xf32>
    %709 = tpu.matmul %708, %699, %cst_227 {dimension_numbers = #tpu.dot_dimension_numbers<[1], [0], [0], [1], [0, 0, 1, 1], [], []>} : vector<32x128xbf16>, vector<128x256xbf16>, vector<32x256xf32> -> vector<32x256xf32>
    %c69 = arith.constant 69 : index
    %c0_228 = arith.constant 0 : index
    %710 = vector.load %arg2[%c69, %c0_228] : memref<96x256xf32, #tpu.memory_space<vmem>>, vector<1x256xf32>
    %711 = vector.broadcast %710 : vector<1x256xf32> to vector<32x256xf32>
    %712 = arith.addf %709, %711 : vector<32x256xf32>
    %713 = arith.addf %697, %712 : vector<32x256xf32>
    %c72 = arith.constant 72 : index
    %c0_229 = arith.constant 0 : index
    %714 = vector.load %arg2[%c72, %c0_229] : memref<96x256xf32, #tpu.memory_space<vmem>>, vector<1x256xf32>
    %c73 = arith.constant 73 : index
    %c0_230 = arith.constant 0 : index
    %715 = vector.load %arg2[%c73, %c0_230] : memref<96x256xf32, #tpu.memory_space<vmem>>, vector<1x256xf32>
    %cst_231 = arith.constant dense<0.000000e+00> : vector<32xf32>
    %716 = vector.multi_reduction <add>, %713, %cst_231 [1] : vector<32x256xf32> to vector<32xf32>
    %717 = vector.shape_cast %716 : vector<32xf32> to vector<32x1xf32>
    %cst_232 = arith.constant 2.560000e+02 : f32
    %718 = vector.broadcast %cst_232 : f32 to vector<32x1xf32>
    %719 = arith.divf %717, %718 : vector<32x1xf32>
    %720 = vector.broadcast %719 : vector<32x1xf32> to vector<32x256xf32>
    %721 = arith.subf %713, %720 : vector<32x256xf32>
    %722 = arith.mulf %721, %721 : vector<32x256xf32>
    %cst_233 = arith.constant dense<0.000000e+00> : vector<32xf32>
    %723 = vector.multi_reduction <add>, %722, %cst_233 [1] : vector<32x256xf32> to vector<32xf32>
    %724 = vector.shape_cast %723 : vector<32xf32> to vector<32x1xf32>
    %cst_234 = arith.constant 2.560000e+02 : f32
    %725 = vector.broadcast %cst_234 : f32 to vector<32x1xf32>
    %726 = arith.divf %724, %725 : vector<32x1xf32>
    %cst_235 = arith.constant 9.99999974E-6 : f32
    %727 = vector.broadcast %cst_235 : f32 to vector<32x1xf32>
    %728 = arith.addf %726, %727 : vector<32x1xf32>
    %729 = math.rsqrt %728 : vector<32x1xf32>
    %730 = vector.broadcast %729 : vector<32x1xf32> to vector<32x256xf32>
    %731 = arith.mulf %721, %730 : vector<32x256xf32>
    %732 = vector.broadcast %714 : vector<1x256xf32> to vector<32x256xf32>
    %733 = arith.mulf %731, %732 : vector<32x256xf32>
    %734 = vector.broadcast %715 : vector<1x256xf32> to vector<32x256xf32>
    %735 = arith.addf %733, %734 : vector<32x256xf32>
    %c37 = arith.constant 37 : index
    %c0_236 = arith.constant 0 : index
    %736 = vector.load %arg2[%c37, %c0_236] : memref<96x256xf32, #tpu.memory_space<vmem>>, vector<1x256xf32>
    %c38 = arith.constant 38 : index
    %c0_237 = arith.constant 0 : index
    %737 = vector.load %arg2[%c38, %c0_237] : memref<96x256xf32, #tpu.memory_space<vmem>>, vector<1x256xf32>
    %cst_238 = arith.constant dense<0.000000e+00> : vector<32xf32>
    %738 = vector.multi_reduction <add>, %735, %cst_238 [1] : vector<32x256xf32> to vector<32xf32>
    %739 = vector.shape_cast %738 : vector<32xf32> to vector<32x1xf32>
    %cst_239 = arith.constant 2.560000e+02 : f32
    %740 = vector.broadcast %cst_239 : f32 to vector<32x1xf32>
    %741 = arith.divf %739, %740 : vector<32x1xf32>
    %742 = vector.broadcast %741 : vector<32x1xf32> to vector<32x256xf32>
    %743 = arith.subf %735, %742 : vector<32x256xf32>
    %744 = arith.mulf %743, %743 : vector<32x256xf32>
    %cst_240 = arith.constant dense<0.000000e+00> : vector<32xf32>
    %745 = vector.multi_reduction <add>, %744, %cst_240 [1] : vector<32x256xf32> to vector<32xf32>
    %746 = vector.shape_cast %745 : vector<32xf32> to vector<32x1xf32>
    %cst_241 = arith.constant 2.560000e+02 : f32
    %747 = vector.broadcast %cst_241 : f32 to vector<32x1xf32>
    %748 = arith.divf %746, %747 : vector<32x1xf32>
    %cst_242 = arith.constant 9.99999974E-6 : f32
    %749 = vector.broadcast %cst_242 : f32 to vector<32x1xf32>
    %750 = arith.addf %748, %749 : vector<32x1xf32>
    %751 = math.rsqrt %750 : vector<32x1xf32>
    %752 = vector.broadcast %751 : vector<32x1xf32> to vector<32x256xf32>
    %753 = arith.mulf %743, %752 : vector<32x256xf32>
    %754 = vector.broadcast %736 : vector<1x256xf32> to vector<32x256xf32>
    %755 = arith.mulf %753, %754 : vector<32x256xf32>
    %756 = vector.broadcast %737 : vector<1x256xf32> to vector<32x256xf32>
    %757 = arith.addf %755, %756 : vector<32x256xf32>
    %cst_243 = arith.constant dense<0.000000e+00> : vector<32xf32>
    %758 = vector.multi_reduction <add>, %757, %cst_243 [1] : vector<32x256xf32> to vector<32xf32>
    %759 = vector.shape_cast %758 : vector<32xf32> to vector<32x1xf32>
    %cst_244 = arith.constant 2.560000e+02 : f32
    %760 = vector.broadcast %cst_244 : f32 to vector<32x1xf32>
    %761 = arith.divf %759, %760 : vector<32x1xf32>
    %c80 = arith.constant 80 : index
    %c0_245 = arith.constant 0 : index
    %762 = vector.load %arg2[%c80, %c0_245] : memref<96x256xf32, #tpu.memory_space<vmem>>, vector<16x16xf32>
    %c39 = arith.constant 39 : index
    %c0_246 = arith.constant 0 : index
    %763 = vector.load %arg2[%c39, %c0_246] : memref<96x256xf32, #tpu.memory_space<vmem>>, vector<1x16xf32>
    %764 = vector.extract_strided_slice %761 {offsets = [0, 0], sizes = [16, 1], strides = [1, 1]} : vector<32x1xf32> to vector<16x1xf32>
    %765 = vector.broadcast %764 : vector<16x1xf32> to vector<16x16xf32>
    %766 = arith.mulf %765, %762 : vector<16x16xf32>
    %cst_247 = arith.constant dense<0.000000e+00> : vector<16xf32>
    %767 = vector.multi_reduction <add>, %766, %cst_247 [0] : vector<16x16xf32> to vector<16xf32>
    %768 = vector.shape_cast %767 : vector<16xf32> to vector<1x16xf32>
    %769 = arith.addf %768, %763 : vector<1x16xf32>
    %770 = vector.extract_strided_slice %769 {offsets = [0, 0], sizes = [1, 1], strides = [1, 1]} : vector<1x16xf32> to vector<1x1xf32>
    %771 = vector.extract_strided_slice %769 {offsets = [0, 1], sizes = [1, 10], strides = [1, 1]} : vector<1x16xf32> to vector<1x10xf32>
    %cst_248 = arith.constant dense<0xFF800000> : vector<1xf32>
    %772 = vector.multi_reduction <maximumf>, %771, %cst_248 [1] : vector<1x10xf32> to vector<1xf32>
    %773 = vector.shape_cast %772 : vector<1xf32> to vector<1x1xf32>
    %774 = vector.broadcast %773 : vector<1x1xf32> to vector<1x10xf32>
    %775 = arith.subf %771, %774 : vector<1x10xf32>
    %776 = math.exp %775 : vector<1x10xf32>
    %cst_249 = arith.constant dense<0.000000e+00> : vector<1xf32>
    %777 = vector.multi_reduction <add>, %776, %cst_249 [1] : vector<1x10xf32> to vector<1xf32>
    %778 = vector.shape_cast %777 : vector<1xf32> to vector<1x1xf32>
    %779 = vector.broadcast %778 : vector<1x1xf32> to vector<1x10xf32>
    %780 = arith.divf %776, %779 : vector<1x10xf32>
    %781 = tpu.concatenate %770, %780 in 1 : vector<1x1xf32>, vector<1x10xf32> -> vector<1x11xf32>
    %782 = vector.extract_strided_slice %761 {offsets = [16, 0], sizes = [16, 1], strides = [1, 1]} : vector<32x1xf32> to vector<16x1xf32>
    %783 = vector.broadcast %782 : vector<16x1xf32> to vector<16x16xf32>
    %784 = arith.mulf %783, %762 : vector<16x16xf32>
    %cst_250 = arith.constant dense<0.000000e+00> : vector<16xf32>
    %785 = vector.multi_reduction <add>, %784, %cst_250 [0] : vector<16x16xf32> to vector<16xf32>
    %786 = vector.shape_cast %785 : vector<16xf32> to vector<1x16xf32>
    %787 = arith.addf %786, %763 : vector<1x16xf32>
    %788 = vector.extract_strided_slice %787 {offsets = [0, 0], sizes = [1, 1], strides = [1, 1]} : vector<1x16xf32> to vector<1x1xf32>
    %789 = vector.extract_strided_slice %787 {offsets = [0, 1], sizes = [1, 10], strides = [1, 1]} : vector<1x16xf32> to vector<1x10xf32>
    %cst_251 = arith.constant dense<0xFF800000> : vector<1xf32>
    %790 = vector.multi_reduction <maximumf>, %789, %cst_251 [1] : vector<1x10xf32> to vector<1xf32>
    %791 = vector.shape_cast %790 : vector<1xf32> to vector<1x1xf32>
    %792 = vector.broadcast %791 : vector<1x1xf32> to vector<1x10xf32>
    %793 = arith.subf %789, %792 : vector<1x10xf32>
    %794 = math.exp %793 : vector<1x10xf32>
    %cst_252 = arith.constant dense<0.000000e+00> : vector<1xf32>
    %795 = vector.multi_reduction <add>, %794, %cst_252 [1] : vector<1x10xf32> to vector<1xf32>
    %796 = vector.shape_cast %795 : vector<1xf32> to vector<1x1xf32>
    %797 = vector.broadcast %796 : vector<1x1xf32> to vector<1x10xf32>
    %798 = arith.divf %794, %797 : vector<1x10xf32>
    %799 = tpu.concatenate %788, %798 in 1 : vector<1x1xf32>, vector<1x10xf32> -> vector<1x11xf32>
    %800 = tpu.concatenate %781, %799 in 0 : vector<1x11xf32>, vector<1x11xf32> -> vector<2x11xf32>
    %c0_253 = arith.constant 0 : index
    %c0_254 = arith.constant 0 : index
    %801 = vector.load %arg4[%c0_253, %c0_254] : memref<2x11xf32, #tpu.memory_space<vmem>>, vector<2x11xf32>
    tpu.vector_store %arg4[%c0_253, %c0_254], %800 {strides = array<i32>} : memref<2x11xf32, #tpu.memory_space<vmem>>, vector<2x11xf32>,
    return
  }
  func.func @transform_0(%arg0: i32) -> (i32, i32) {
    %c0_i32 = arith.constant 0 : i32
    %c0_i32_0 = arith.constant 0 : i32
    %c0_i32_1 = arith.constant 0 : i32
    return %c0_i32, %c0_i32_0 : i32, i32
  }
  func.func @transform_1(%arg0: i32) -> (i32, i32) {
    %c0_i32 = arith.constant 0 : i32
    %c0_i32_0 = arith.constant 0 : i32
    %c0_i32_1 = arith.constant 0 : i32
    return %c0_i32, %c0_i32_0 : i32, i32
  }
  func.func @transform_2(%arg0: i32) -> (i32, i32) {
    %c0_i32 = arith.constant 0 : i32
    %c0_i32_0 = arith.constant 0 : i32
    %c0_i32_1 = arith.constant 0 : i32
    return %c0_i32, %c0_i32_0 : i32, i32
  }
  func.func @transform_3(%arg0: i32) -> (i32, i32) {
    %c0_i32 = arith.constant 0 : i32
    %c0_i32_0 = arith.constant 0 : i32
    %c0_i32_1 = arith.constant 0 : i32
    return %c0_i32, %c0_i32_0 : i32, i32
  }
}

</mosaic_0001>

<bundles_post_ra>
// kernel: tpu_custom_call.1
= control target key start
LH: loop header
LB: loop body
LE: loop exit
PB: predicated region body
PF: predicated region fallthrough
CT: control target
= control target key end

     0   :  { %8 = vsyncpa [#allocation4], 0  ;;  %s10330_s0 = inlined_call_operand.vmem [shape: f32[32,1], index: 0, kind: input, shape index: {}]   ;;  %s10331_s1 = inlined_call_operand.hbm [shape: f32[96,256], index: 1, kind: input, shape index: {}]   ;;  %s10332_s2 = inlined_call_operand.hbm [shape: bf16[1424,768], index: 2, kind: input, shape index: {}]   ;;  %s10333_s3 = inlined_call_operand.hbm [shape: f32[2,11], index: 3, kind: output, shape index: {}]  }
   0x1   :  { %9 = vsyncpa [#allocation7], 0 }
   0x2   :  { %10 = vsyncpa [#allocation5], 0  ;;  %s9198_s12 = smov [#allocation3]  }
   0x3   :  { %s18_s13 = sshll.u32 %s9198_s12, 4  ;;  %s19_s13 = int_to_ptr.vmem [resolvable:$true] %s18_s13 }
   0x4   :  { %s9140_s14 = scalar_lea.vmem %s19_s13, 3072  ;;  %p9145_p1 = scmp.lt.s32.totalorder %s19_s13, %s19_s13 }
   0x5   :  { %p9141_p0 = scmp.ne.s32.totalorder %s19_s13, %s9140_s14  ;;  %p9146_p2 = scmp.lt.s32.totalorder %s9140_s14, %s9140_s14 }
   0x7   :  { %p9147_p3 = por %p9146_p2, %p9145_p1 }
   0x9   :  { %p9148_p4 = pnand %p9147_p3, %p9141_p0 }
   0xb   :  { %9151 = shalt.err (!%p9148_p4)
}
   0xc   :  { %s9199_s15 = smov 256   ;;  %s9200_s16 = smov 16  }
   0xd   :  { %24 = dma.hbm_to_vmem [thread:$0]  %s10331_s1, 3072, %s19_s13, [#allocation4], %s9199_s15, %s9199_s15, %s9200_s16  }
   0xe   :  { %s9201_s19 = smov [#allocation6]  }
   0xf   :  { %s30_s20 = sshll.u32 %s9201_s19, 4  ;;  %s31_s20 = int_to_ptr.vmem [resolvable:$true] %s30_s20 }
  0x10   :  { %s9160_s21 = scalar_lea.vmem %s31_s20, 68352  ;;  %p9165_p6 = scmp.lt.s32.totalorder %s31_s20, %s31_s20 }
  0x11   :  { %p9161_p5 = scmp.ne.s32.totalorder %s31_s20, %s9160_s21  ;;  %p9166_p7 = scmp.lt.s32.totalorder %s9160_s21, %s9160_s21 }
  0x13   :  { %p9167_p8 = por %p9166_p7, %p9165_p6 }
  0x15   :  { %p9168_p9 = pnand %p9167_p8, %p9161_p5 }
  0x17   :  { %9171 = shalt.err (!%p9168_p9)
}
  0x18   :  { %s9202_s22 = smov 384   ;;  %s9203_s23 = smov 24  }
  0x19   :  { %36 = dma.hbm_to_vmem [thread:$0]  %s10332_s2, 68352, %s31_s20, [#allocation7], %s9202_s22, %s9202_s22, %s9203_s23  }
  0x1a   :  { %9192 = dma.done.wait [#allocation4], 3072  }
  0x1b   :  { %9193 = vsyncadd [#allocation4], 4294964224 }
  0x1c   :  { %9194 = dma.done.wait [#allocation7], 68352  }
  0x1d   :  { %9195 = vsyncadd [#allocation7], 4294898944  ;;  %v9204_v0 = vmov 0   ;;  %v45_v1 = vld [vmem:[%s10330_s0 + $0x8] sm:$0xff]  ;;  %v44_v2 = vld [vmem:[%s10330_s0] sm:$0xff]  ;;  %v91_v5 = vlaneseq  ;;  %vm168_vm0 = vcmask 1046528  }
  0x1e   :  { %8271 = vset.pattern.permute.xlu1 %v9204_v0  ;;  %8270 = vset.pattern.permute.xlu0 %v9204_v0  ;;  %v46_v3 = vld [vmem:[%s10330_s0 + $0x10] sm:$0xff]  ;;  %v47_v4 = vld [vmem:[%s10330_s0 + $0x18] sm:$0xff]  ;;  %v48_v7 = vld [vmem:[#allocation3 + $0x40] ss:$0 sm:$0xff]  ;;  %vm79_vm1 = vcmask 1040384   ;;  %s9205_s5 = smov 112  }
  0x1f   :  { %289 = vmatprep.mubr.bf16.mxu0 %v9204_v0  ;;  %56 = vperm.xlu0 %8270, %v45_v1   ;;  %v9253_v6 = vshrl.u32 %v91_v5, 7  ;;  %v8272_v14 = vld [vmem:[#allocation6 + $0x4] ss:$24 sps:$4 sm:$0xff]   ;;  %v8274_v19 = vld [vmem:[#allocation6] ss:$24 sps:$4 sm:$0xff]   ;;  %s9206_s0 = smov 96  }
  0x20   :  { %51 = vperm.xlu1 %8271, %v44_v2   ;;  %271 = vmatprep.subr.bf16.mxu0 %v8272_v14  ;;  %v8275_v36 = vld [vmem:[#allocation6 + $0x8] ss:$24 sps:$4 sm:$0xff]   ;;  %v8278_v40 = vld [vmem:[#allocation6 + $0x184] ss:$24 sps:$4 sm:$0xff]   ;;  %vm250_vm6 = vcmask 130048   ;;  %vm9208_vm7 = vmmov 0  }
  0x21   :  { %v93_v8 = vadd.s32 8, %v9253_v6  ;;  %272 = vmatpush1.bf16.msra.mxu0 %v8274_v19  ;;  %v95_v26 = vadd.s32 24, %v9253_v6  ;;  %8058 = vmatprep.subr.bf16.mxu1 %v8275_v36  ;;  %v8281_v43 = vld [vmem:[#allocation6 + $0x18c] ss:$24 sps:$4 sm:$0xff]   ;;  %v100_v45 = vand.u32 15, %v9253_v6  ;;  %v94_v47 = vadd.s32 16, %v9253_v6 }
  0x22   :  { %8059 = vmatpush3.bf16.msra.mxu1 %v8275_v36  ;;  %715 = vmatprep.subr.bf16.mxu0 %v8278_v40  ;;  %v9288_v49 = vsub.s32 0, %v9253_v6  ;;  %v211_v51 = vld [vmem:[#allocation3 + $0x41] ss:$8 sm:$0x3]  ;;  %v8305_v36 = vld [vmem:[#allocation6 + $0xcc] ss:$24 sps:$4 sm:$0xff]  }
  0x23   :  { %61 = vperm.xlu0 %8270, %v46_v3   ;;  %v107_v13 = vand.u32 15, %v93_v8  ;;  %v121_v37 = vand.u32 15, %v95_v26  ;;  %768 = vmatprep.subr.bf16.mxu1 %v8281_v43  ;;  %vm9282_vm4 = vcmp.eq.s32.totalorder %v100_v45, 0  ;;  %v114_v53 = vand.u32 15, %v94_v47  ;;  %v8290_v26 = vld [vmem:[#allocation6 + $0x124] ss:$24 sps:$4 sm:$0xff]  }
  0x24   :  { %66 = vperm.xlu1 %8271, %v47_v4   ;;  %v216_v56 = vrot.slane %v211_v51, %v9288_v49  ;;  %v8311_v40 = vld [vmem:[#allocation6 + $0x9c] ss:$24 sps:$4 sm:$0xff]   ;;  %v8317_v45 = vld [vmem:[#allocation6 + $0x6c] ss:$24 sps:$4 sm:$0xff]   ;;  %v8315_v47 = vld [vmem:[#allocation6 + $0x68] ss:$24 sps:$4 sm:$0xff]  }
  0x25   :  { %vm9261_vm2 = vcmp.eq.s32.totalorder %v107_v13, 15  ;;  %vm9275_vm3 = vcmp.eq.s32.totalorder %v121_v37, 15  ;;  %vm9293_vm5 = vcmp.eq.s32.totalorder %v114_v53, 0  ;;  %v8284_v13 = vld [vmem:[#allocation6 + $0x154] ss:$24 sps:$4 sm:$0xff]   ;;  %vm2690_vm8 = vcmask 523264  }
  0x26   :  { %v8303_v37 = vld [vmem:[#allocation6 + $0xc8] ss:$24 sps:$4 sm:$0xff]   ;;  %v8314_v43 = vld [vmem:[#allocation6 + $0x64] ss:$24 sps:$4 sm:$0xff]   ;;  %v8326_v53 = vld [vmem:[#allocation6 + $0x194] ss:$24 sps:$4 sm:$0xff]  }
  0x27   :  { %v8323_v51 = vld [vmem:[#allocation6 + $0x3c] ss:$24 sps:$4 sm:$0xff]   ;;  %s9209_s6 = smov 64   ;;  %vm2939_vm9 = vcmask 1048064   ;;  %vm7363_vm10 = vcmask 89096   ;;  %s9210_s7 = smov 127  }
  0x28   :  { %vm7374_vm11 = vcmask 80896   ;;  %vm7380_vm12 = vcmask 7168   ;;  %s9211_s8 = smov [#allocation8]   ;;  %vm7414_vm13 = vcmask 82944  }
  0x29   :  { %s7422_s9 = sshll.u32 %s9211_s8, 4  ;;  %s7423_s9 = int_to_ptr.vmem [resolvable:$true] %s7422_s9 }
  0x2a   :  { %s9172_s10 = scalar_lea.vmem %s7423_s9, 32  ;;  %p9177_p11 = scmp.lt.s32.totalorder %s7423_s9, %s7423_s9 }
  0x2b   :  { %p9173_p10 = scmp.ne.s32.totalorder %s7423_s9, %s9172_s10  ;;  %p9178_p12 = scmp.lt.s32.totalorder %s9172_s10, %s9172_s10 }
  0x2d   :  { %p9179_p13 = por %p9178_p12, %p9177_p11 }
  0x2f   :  { %p9180_p0 = pnand %p9179_p13, %p9173_p10 }
  0x9a   :  { %v57_v9 = vpop.permute.xlu0 %56 }
  0x9b   :  { %v52_v10 = vpop.permute.xlu1 %51  ;;  %v70_v11 = vmul.f32 %v57_v9, %v48_v7 }
  0x9c   :  { %v69_v12 = vmul.f32 %v52_v10, %v48_v7  ;;  %v8276_v10 = vld [vmem:[#allocation6 + $0x180] ss:$24 sps:$4 sm:$0xff]  }
  0x9d   :  { %v81_v15 = vrot.slane %v70_v11, 7  ;;  %154 = vrot.lane.b32.xlu1 %v70_v11, %s9205_s5  ;;  %v170_v18 = vrot.slane %v70_v11, 1 }
  0x9e   :  { %v80_v16 = vrot.slane %v69_v12, 7  ;;  %152 = vrot.lane.b32.xlu0 %v69_v12, %s9205_s5  ;;  %v169_v17 = vrot.slane %v69_v12, 1  ;;  %v62_v20 = vpop.permute.xlu0 %61 }
  0x9f   :  { %v67_v21 = vpop.permute.xlu1 %66  ;;  %v71_v22 = vmul.f32 %v62_v20, %v48_v7 }
  0xa0   :  { %v72_v23 = vmul.f32 %v67_v21, %v48_v7  ;;  %v171_v24 = vsel %vm168_vm0, %v169_v17, %v170_v18  ;;  %v82_v25 = vsel %vm79_vm1, %v80_v16, %v81_v15  ;;  %v8279_v21 = vld [vmem:[#allocation6 + $0x188] ss:$24 sps:$4 sm:$0xff]  }
  0xa1   :  { %v83_v27 = vrot.slane %v71_v22, 7  ;;  %v172_v28 = vrot.slane %v71_v22, 1 }
  0xa2   :  { %v74_v29 = vrot.slane %v72_v23, 7  ;;  %194 = vrot.lane.b32.xlu0 %v171_v24, %s9206_s0  ;;  %v174_v34 = vrot.slane %v72_v23, 1  ;;  %v8285_v24 = vld [vmem:[#allocation6 + $0x158] ss:$24 sps:$4 sm:$0xff]  }
  0xa3   :  { %v173_v31 = vsel %vm168_vm0, %v170_v18, %v172_v28  ;;  %v84_v35 = vsel %vm79_vm1, %v81_v15, %v83_v27 }
  0xa4   :  { %v90_v32 = vsel %vm79_vm1, %v74_v29, %v80_v16  ;;  %v187_v33 = vsel %vm9261_vm2, 0.0, %v173_v31  ;;  %v85_v38 = vsel %vm79_vm1, %v83_v27, %v74_v29  ;;  %v175_v39 = vsel %vm168_vm0, %v172_v28, %v174_v34  ;;  %v8291_v27 = vld [vmem:[#allocation6 + $0x128] ss:$24 sps:$4 sm:$0xff]   ;;  %v8293_v28 = vld [vmem:[#allocation6 + $0x12c] ss:$24 sps:$4 sm:$0xff]  }
  0xa5   :  { %196 = vrot.lane.b32.xlu1 %v187_v33, %s9206_s0  ;;  %v181_v41 = vsel %vm168_vm0, %v174_v34, %v169_v17  ;;  %v148_v50 = vsel %vm9282_vm4, 0.0, %v90_v32  ;;  %v150_v1 = vsel %vm9293_vm5, 0.0, %v84_v35  ;;  %v8282_v17 = vld [vmem:[#allocation6 + $0x150] ss:$24 sps:$4 sm:$0xff]   ;;  %v8296_v29 = vld [vmem:[#allocation6 + $0xf4] ss:$24 sps:$4 sm:$0xff]  }
  0xa6   :  { %156 = vrot.lane.b32.xlu0 %v71_v22, %s9205_s5  ;;  %v189_v44 = vsel %vm9275_vm3, 0.0, %v181_v41  ;;  %v8294_v31 = vld [vmem:[#allocation6 + $0xf0] ss:$24 sps:$4 sm:$0xff]   ;;  %v8299_v32 = vld [vmem:[#allocation6 + $0xfc] ss:$24 sps:$4 sm:$0xff]  }
  0xa7   :  { %v8297_v33 = vld [vmem:[#allocation6 + $0xf8] ss:$24 sps:$4 sm:$0xff]   ;;  %v8302_v34 = vld [vmem:[#allocation6 + $0xc4] ss:$24 sps:$4 sm:$0xff]  }
  0xa8   :  { %v8300_v35 = vld [vmem:[#allocation6 + $0xc0] ss:$24 sps:$4 sm:$0xff]  }
  0xa9   :  { %158 = vrot.lane.b32.xlu1 %v72_v23, %s9205_s5  ;;  %v8287_v23 = vld [vmem:[#allocation6 + $0x15c] ss:$24 sps:$4 sm:$0xff]   ;;  %v8309_v41 = vld [vmem:[#allocation6 + $0x98] ss:$24 sps:$4 sm:$0xff]  }
  0xaa   :  { %198 = vrot.lane.b32.xlu0 %v175_v39, %s9206_s0  ;;  %v8306_v39 = vld [vmem:[#allocation6 + $0x90] ss:$24 sps:$4 sm:$0xff]  }
  0xad   :  { %200 = vrot.lane.b32.xlu1 %v189_v44, %s9206_s0  ;;  %v8312_v44 = vld [vmem:[#allocation6 + $0x60] ss:$24 sps:$4 sm:$0xff]  }
 0x10f   :  { %v155_v54 = vpop.permute.xlu1 %154 }
 0x110   :  { %v153_v48 = vpop.permute.xlu0 %152  ;;  %v165_v58 = vadd.f32 %v155_v54, %v82_v25  ;;  %v8288_v25 = vld [vmem:[#allocation6 + $0x120] ss:$24 sps:$4 sm:$0xff]   ;;  %v8350_v54 = vld [vmem:[#allocation6 + $0x304] ss:$24 sps:$4 sm:$0xff]  }
 0x111   :  { %v164_v52 = vadd.f32 %v153_v48, %v148_v50  ;;  %v8320_v48 = vld [vmem:[#allocation6 + $0x34] ss:$24 sps:$4 sm:$0xff]   ;;  %v8318_v50 = vld [vmem:[#allocation6 + $0x30] ss:$24 sps:$4 sm:$0xff]  }
 0x114   :  { %v195_v55 = vpop.permute.xlu0 %194 }
 0x115   :  { %v206_v57 = vadd.f32 %v195_v55, %v164_v52  ;;  %v8321_v52 = vld [vmem:[#allocation6 + $0x38] ss:$24 sps:$4 sm:$0xff]  }
 0x117   :  { %v197_v61 = vpop.permute.xlu1 %196  ;;  %v218_v62 = vadd.f32 %v216_v56, %v206_v57 }
 0x118   :  { %v157_v60 = vpop.permute.xlu0 %156  ;;  %v207_v63 = vadd.f32 %v197_v61, %v165_v58 }
 0x119   :  { %v166_v2 = vadd.f32 %v157_v60, %v150_v1  ;;  %v222_v7 = vmax.f32 %v218_v62, 0.0 }
 0x11a   :  { %v219_v3 = vadd.f32 %v216_v56, %v207_v63 }
 0x11b   :  { %v159_v5 = vpop.permute.xlu1 %158 }
 0x11c   :  { %v199_v4 = vpop.permute.xlu0 %198  ;;  %v223_v8 = vmax.f32 %v219_v3, 0.0  ;;  %v167_v12 = vadd.f32 %v159_v5, %v85_v38  ;;  %v8308_v38 = vld [vmem:[#allocation6 + $0x94] ss:$24 sps:$4 sm:$0xff]  }
 0x11d   :  { %v208_v9 = vadd.f32 %v199_v4, %v166_v2 }
 0x11e   :  { %v232_v11 = vpack.c.bf16 %v223_v8, %v222_v7 }
 0x11f   :  { %v201_v14 = vpop.permute.xlu1 %200  ;;  %v220_v15 = vadd.f32 %v216_v56, %v208_v9 }
 0x120   :  { %v209_v16 = vadd.f32 %v201_v14, %v167_v12  ;;  %7435 = vmatmul.mubr.msk.bf16.vlgmr.msra.gmra.mxu0 %vm250_vm6, %v232_v11  ;;  %8060 = vmatprep.mubr.msk.bf16.mxu1 %vm250_vm6, %v232_v11 }
 0x121   :  { %299 = vmatprep.mubr.bf16.mxu0 %v9204_v0  ;;  %716 = vmatpush1.bf16.msra.mxu0 %v8276_v10  ;;  %v224_v19 = vmax.f32 %v220_v15, 0.0 }
 0x122   :  { %v221_v18 = vadd.f32 %v216_v56, %v209_v16  ;;  %717 = vmatprep.subr.bf16.mxu0 %v8284_v13 }
 0x124   :  { %v225_v20 = vmax.f32 %v221_v18, 0.0 }
 0x125   :  { %718 = vmatpush1.bf16.msra.mxu0 %v8282_v17 }
 0x126   :  { %v233_v22 = vpack.c.bf16 %v225_v20, %v224_v19  ;;  %719 = vmatprep.subr.bf16.mxu0 %v8290_v26  ;;  %v231_v20 = vld [vmem:[#allocation3 + $0x42] ss:$8 sm:$0x3] }
 0x128   :  { %7436 = vmatmul.mubr.msk.bf16.gmra.mxu0 %vm250_vm6, %v233_v22  ;;  %8061 = vmatmul.mubr.msk.bf16.vlgmr.msra.gmra.mxu1 %vm250_vm6, %v233_v22 }
 0x129   :  { %769 = vmatpush1.bf16.msra.mxu1 %v8279_v21  ;;  %747 = vmatprep.mubr.bf16.mxu0 %v9204_v0 }
 0x12a   :  { %770 = vmatprep.subr.bf16.mxu1 %v8287_v23  ;;  %800 = vmatprep.mubr.bf16.mxu1 %v9204_v0 }
 0x12b   :  { %720 = vmatpush1.bf16.msra.mxu0 %v8288_v25 }
 0x12c   :  { %721 = vmatprep.subr.bf16.mxu0 %v8296_v29 }
 0x12d   :  { %771 = vmatpush1.bf16.msra.mxu1 %v8285_v24 }
 0x12e   :  { %772 = vmatprep.subr.bf16.mxu1 %v8293_v28  ;;  %v413_v28 = vrot.slane %v231_v20, %v9288_v49  ;;  %v8372_v20 = vld [vmem:[#allocation6 + $0x240] ss:$24 sps:$4 sm:$0xff]  }
 0x12f   :  { %722 = vmatpush1.bf16.msra.mxu0 %v8294_v31 }
 0x130   :  { %723 = vmatprep.subr.bf16.mxu0 %v8302_v34 }
 0x131   :  { %773 = vmatpush1.bf16.msra.mxu1 %v8291_v27 }
 0x132   :  { %774 = vmatprep.subr.bf16.mxu1 %v8299_v32 }
 0x133   :  { %724 = vmatpush1.bf16.msra.mxu0 %v8300_v35 }
 0x134   :  { %725 = vmatprep.subr.bf16.mxu0 %v8308_v38 }
 0x135   :  { %775 = vmatpush1.bf16.msra.mxu1 %v8297_v33 }
 0x136   :  { %776 = vmatprep.subr.bf16.mxu1 %v8305_v36 }
 0x137   :  { %726 = vmatpush1.bf16.msra.mxu0 %v8306_v39 }
 0x138   :  { %727 = vmatprep.subr.bf16.mxu0 %v8314_v43 }
 0x139   :  { %777 = vmatpush1.bf16.msra.mxu1 %v8303_v37 }
 0x13a   :  { %778 = vmatprep.subr.bf16.mxu1 %v8311_v40 }
 0x13b   :  { %728 = vmatpush1.bf16.msra.mxu0 %v8312_v44 }
 0x13c   :  { %729 = vmatprep.subr.bf16.mxu0 %v8320_v48 }
 0x13d   :  { %779 = vmatpush1.bf16.msra.mxu1 %v8309_v41  ;;  %v8324_v41 = vld [vmem:[#allocation6 + $0x190] ss:$24 sps:$4 sm:$0xff]  }
 0x13e   :  { %780 = vmatprep.subr.bf16.mxu1 %v8317_v45  ;;  %v8329_v45 = vld [vmem:[#allocation6 + $0x164] ss:$24 sps:$4 sm:$0xff]  }
 0x13f   :  { %730 = vmatpush1.bf16.msra.mxu0 %v8318_v50  ;;  %v8356_v50 = vld [vmem:[#allocation6 + $0x2d4] ss:$24 sps:$4 sm:$0xff]  }
 0x140   :  { %821 = vmatprep.subr.bf16.mxu0 %v8326_v53 }
 0x141   :  { %781 = vmatpush1.bf16.msra.mxu1 %v8315_v47  ;;  %v8348_v47 = vld [vmem:[#allocation6 + $0x300] ss:$24 sps:$4 sm:$0xff]  }
 0x142   :  { %782 = vmatprep.subr.bf16.mxu1 %v8323_v51  ;;  %v8327_v51 = vld [vmem:[#allocation6 + $0x160] ss:$24 sps:$4 sm:$0xff]  }
 0x145   :  { %783 = vmatpush1.bf16.msra.mxu1 %v8321_v52  ;;  %v8332_v52 = vld [vmem:[#allocation6 + $0x134] ss:$24 sps:$4 sm:$0xff]  }
 0x146   :  { %1583 = vmatprep.subr.bf16.mxu1 %v8350_v54  ;;  %v8354_v54 = vld [vmem:[#allocation6 + $0x2d0] ss:$24 sps:$4 sm:$0xff]  }
 0x1e0   :  { %v291_v55 = vpop.f32.mrf.mxu0 }
 0x1e1   :  { %v365_v5 = vrot.slane %v291_v55, 7 }
 0x1e2   :  { %v293_v56 = vpop.f32.mrf.mxu0 }
 0x1e4   :  { %v295_v57 = vpop.f32.mrf.mxu0 }
 0x1e5   :  { %v366_v2 = vrot.slane %v295_v57, 7 }
 0x1e6   :  { %v297_v58 = vpop.f32.mrf.mxu0 }
 0x1e7   :  { %v367_v13 = vsel %vm79_vm1, %v365_v5, %v366_v2 }
 0x1e8   :  { %v301_v60 = vpop.f32.mrf.mxu0  ;;  %v8062_v61 = vpop.f32.mrf.mxu1  ;;  %v381_v23 = vadd.f32 %v367_v13, %v297_v58  ;;  %v8335_v58 = vld [vmem:[#allocation6 + $0x104] ss:$24 sps:$4 sm:$0xff]  }
 0x1e9   :  { %v368_v1 = vrot.slane %v301_v60, 7  ;;  %v391_v17 = vrot.slane %v8062_v61, 1  ;;  %v8362_v60 = vld [vmem:[#allocation6 + $0x2a4] ss:$24 sps:$4 sm:$0xff]   ;;  %v8360_v61 = vld [vmem:[#allocation6 + $0x2a0] ss:$24 sps:$4 sm:$0xff]  }
 0x1ea   :  { %v303_v62 = vpop.f32.mrf.mxu0  ;;  %v344_v63 = vpop.f32.mrf.mxu1  ;;  %v8365_v13 = vld [vmem:[#allocation6 + $0x2ac] ss:$24 sps:$4 sm:$0xff]  }
 0x1eb   :  { %v369_v10 = vsel %vm79_vm1, %v366_v2, %v368_v1  ;;  %v388_v11 = vrot.slane %v344_v63, 1  ;;  %v8338_v63 = vld [vmem:[#allocation6 + $0xd4] ss:$24 sps:$4 sm:$0xff]   ;;  %v8341_v2 = vld [vmem:[#allocation6 + $0xa4] ss:$24 sps:$4 sm:$0xff]  }
 0x1ec   :  { %v305_v3 = vpop.f32.mrf.mxu0  ;;  %v8063_v4 = vpop.f32.mrf.mxu1  ;;  %v378_v22 = vsel %vm9293_vm5, 0.0, %v369_v10  ;;  %v8351_v10 = vld [vmem:[#allocation6 + $0x308] ss:$24 sps:$4 sm:$0xff]  }
 0x1ed   :  { %v360_v7 = vrot.slane %v305_v3, 7  ;;  %v393_v8 = vrot.slane %v8063_v4, 1  ;;  %v382_v32 = vadd.f32 %v378_v22, %v303_v62  ;;  %v8333_v62 = vld [vmem:[#allocation6 + $0x100] ss:$24 sps:$4 sm:$0xff]   ;;  %v8344_v4 = vld [vmem:[#allocation6 + $0x74] ss:$24 sps:$4 sm:$0xff]  }
 0x1ee   :  { %v347_v9 = vpop.f32.mrf.mxu1  ;;  %v307_v15 = vpop.f32.mrf.mxu0  ;;  %v8339_v3 = vld [vmem:[#allocation6 + $0xa0] ss:$24 sps:$4 sm:$0xff]  }
 0x1ef   :  { %v375_v12 = vsel %vm79_vm1, %v360_v7, %v365_v5  ;;  %v370_v16 = vsel %vm79_vm1, %v368_v1, %v360_v7  ;;  %v400_v19 = vsel %vm168_vm0, %v393_v8, %v388_v11  ;;  %v389_v21 = vrot.slane %v347_v9, 1  ;;  %v8336_v1 = vld [vmem:[#allocation6 + $0xd0] ss:$24 sps:$4 sm:$0xff]   ;;  %v8347_v7 = vld [vmem:[#allocation6 + $0x44] ss:$24 sps:$4 sm:$0xff]  }
 0x1f0   :  { %v376_v14 = vsel %vm9282_vm4, 0.0, %v375_v12  ;;  %v383_v24 = vadd.f32 %v370_v16, %v307_v15  ;;  %v404_v27 = vsel %vm9275_vm3, 0.0, %v400_v19  ;;  %v394_v34 = vsel %vm168_vm0, %v391_v17, %v393_v8  ;;  %v8342_v5 = vld [vmem:[#allocation6 + $0x70] ss:$24 sps:$4 sm:$0xff]   ;;  %v8345_v8 = vld [vmem:[#allocation6 + $0x40] ss:$24 sps:$4 sm:$0xff]  }
 0x1f1   :  { %v380_v18 = vadd.f32 %v376_v14, %v293_v56  ;;  %v390_v25 = vsel %vm168_vm0, %v388_v11, %v389_v21  ;;  %v392_v26 = vsel %vm168_vm0, %v389_v21, %v391_v17  ;;  %v407_v39 = vadd.f32 %v394_v34, %v382_v32  ;;  %v8330_v56 = vld [vmem:[#allocation6 + $0x130] ss:$24 sps:$4 sm:$0xff]   ;;  %v8353_v9 = vld [vmem:[#allocation6 + $0x30c] ss:$24 sps:$4 sm:$0xff]   ;;  %v8359_v11 = vld [vmem:[#allocation6 + $0x2dc] ss:$24 sps:$4 sm:$0xff]  }
 0x1f2   :  { %v402_v29 = vsel %vm9261_vm2, 0.0, %v392_v26  ;;  %v408_v36 = vadd.f32 %v404_v27, %v383_v24  ;;  %v8357_v12 = vld [vmem:[#allocation6 + $0x2d8] ss:$24 sps:$4 sm:$0xff]   ;;  %v8363_v14 = vld [vmem:[#allocation6 + $0x2a8] ss:$24 sps:$4 sm:$0xff]  }
 0x1f3   :  { %v405_v31 = vadd.f32 %v390_v25, %v380_v18  ;;  %v406_v33 = vadd.f32 %v402_v29, %v381_v23  ;;  %v417_v48 = vadd.f32 %v413_v28, %v407_v39  ;;  %v8368_v15 = vld [vmem:[#allocation6 + $0x274] ss:$24 sps:$4 sm:$0xff]   ;;  %v8366_v16 = vld [vmem:[#allocation6 + $0x270] ss:$24 sps:$4 sm:$0xff]   ;;  %v8374_v19 = vld [vmem:[#allocation6 + $0x244] ss:$24 sps:$4 sm:$0xff]  }
 0x1f4   :  { %v418_v43 = vadd.f32 %v413_v28, %v408_v36  ;;  %v8371_v17 = vld [vmem:[#allocation6 + $0x27c] ss:$24 sps:$4 sm:$0xff]   ;;  %v8369_v18 = vld [vmem:[#allocation6 + $0x278] ss:$24 sps:$4 sm:$0xff]   ;;  %v8377_v21 = vld [vmem:[#allocation6 + $0x24c] ss:$24 sps:$4 sm:$0xff]  }
 0x1f5   :  { %v415_v35 = vadd.f32 %v413_v28, %v405_v31  ;;  %v416_v37 = vadd.f32 %v413_v28, %v406_v33  ;;  %v421_v55 = vmax.f32 %v417_v48, 0.0  ;;  %v8375_v22 = vld [vmem:[#allocation6 + $0x248] ss:$24 sps:$4 sm:$0xff]   ;;  %v8380_v23 = vld [vmem:[#allocation6 + $0x214] ss:$24 sps:$4 sm:$0xff]  }
 0x1f6   :  { %v422_v53 = vmax.f32 %v418_v43, 0.0  ;;  %v8378_v24 = vld [vmem:[#allocation6 + $0x210] ss:$24 sps:$4 sm:$0xff]   ;;  %v8383_v25 = vld [vmem:[#allocation6 + $0x21c] ss:$24 sps:$4 sm:$0xff]  }
 0x1f7   :  { %v419_v38 = vmax.f32 %v415_v35, 0.0  ;;  %v420_v40 = vmax.f32 %v416_v37, 0.0  ;;  %v8381_v26 = vld [vmem:[#allocation6 + $0x218] ss:$24 sps:$4 sm:$0xff]   ;;  %v8386_v27 = vld [vmem:[#allocation6 + $0x1e4] ss:$24 sps:$4 sm:$0xff]  }
 0x1f8   :  { %v474_v57 = vpack.c.bf16 %v422_v53, %v421_v55  ;;  %v8384_v28 = vld [vmem:[#allocation6 + $0x1e0] ss:$24 sps:$4 sm:$0xff]   ;;  %v8389_v29 = vld [vmem:[#allocation6 + $0x1ec] ss:$24 sps:$4 sm:$0xff]   ;;  %v8390_v33 = vld [vmem:[#allocation6 + $0x1b0] ss:$24 sps:$4 sm:$0xff]  }
 0x1f9   :  { %v473_v44 = vpack.c.bf16 %v420_v40, %v419_v38  ;;  %v8387_v31 = vld [vmem:[#allocation6 + $0x1e8] ss:$24 sps:$4 sm:$0xff]   ;;  %v8392_v32 = vld [vmem:[#allocation6 + $0x1b4] ss:$24 sps:$4 sm:$0xff]   ;;  %v8393_v35 = vld [vmem:[#allocation6 + $0x1b8] ss:$24 sps:$4 sm:$0xff]  }
 0x1fa   :  { %v8395_v34 = vld [vmem:[#allocation6 + $0x1bc] ss:$24 sps:$4 sm:$0xff]   ;;  %v8396_v37 = vld [vmem:[#allocation6 + $0x480] ss:$24 sps:$4 sm:$0xff]   ;;  %v8401_v38 = vld [vmem:[#allocation6 + $0x48c] ss:$24 sps:$4 sm:$0xff]  }
 0x1fb   :  { %748 = vmatmul.mubr.bf16.vlgmr.msra.gmra.mxu0 %v473_v44  ;;  %801 = vmatmul.mubr.bf16.vlgmr.msra.gmra.mxu1 %v473_v44  ;;  %v8398_v36 = vld [vmem:[#allocation6 + $0x484] ss:$24 sps:$4 sm:$0xff]   ;;  %v8399_v39 = vld [vmem:[#allocation6 + $0x488] ss:$24 sps:$4 sm:$0xff]   ;;  %v8404_v40 = vld [vmem:[#allocation6 + $0x454] ss:$24 sps:$4 sm:$0xff]  }
 0x1fc   :  { %822 = vmatpush1.bf16.msra.mxu0 %v8324_v41  ;;  %757 = vmatprep.mubr.bf16.mxu0 %v9204_v0  ;;  %v8407_v41 = vld [vmem:[#allocation6 + $0x45c] ss:$24 sps:$4 sm:$0xff]   ;;  %v8402_v43 = vld [vmem:[#allocation6 + $0x450] ss:$24 sps:$4 sm:$0xff]   ;;  %v8413_v48 = vld [vmem:[#allocation6 + $0x42c] ss:$24 sps:$4 sm:$0xff]  }
 0x1fd   :  { %823 = vmatprep.subr.bf16.mxu0 %v8329_v45  ;;  %810 = vmatprep.mubr.bf16.mxu1 %v9204_v0  ;;  %v8410_v45 = vld [vmem:[#allocation6 + $0x424] ss:$24 sps:$4 sm:$0xff]  }
 0x1fe   :  { %1584 = vmatpush1.bf16.msra.mxu1 %v8348_v47  ;;  %v8408_v47 = vld [vmem:[#allocation6 + $0x420] ss:$24 sps:$4 sm:$0xff]   ;;  %v8419_v53 = vld [vmem:[#allocation6 + $0x3fc] ss:$24 sps:$4 sm:$0xff]  }
 0x1ff   :  { %1585 = vmatprep.subr.bf16.mxu1 %v8356_v50  ;;  %v8411_v50 = vld [vmem:[#allocation6 + $0x428] ss:$24 sps:$4 sm:$0xff]   ;;  %v8422_v55 = vld [vmem:[#allocation6 + $0x3c4] ss:$24 sps:$4 sm:$0xff]  }
 0x200   :  { %824 = vmatpush1.bf16.msra.mxu0 %v8327_v51  ;;  %v8416_v51 = vld [vmem:[#allocation6 + $0x3f4] ss:$24 sps:$4 sm:$0xff]  }
 0x201   :  { %825 = vmatprep.subr.bf16.mxu0 %v8332_v52  ;;  %v8414_v52 = vld [vmem:[#allocation6 + $0x3f0] ss:$24 sps:$4 sm:$0xff]  }
 0x202   :  { %1586 = vmatpush1.bf16.msra.mxu1 %v8354_v54  ;;  %v8417_v54 = vld [vmem:[#allocation6 + $0x3f8] ss:$24 sps:$4 sm:$0xff]  }
 0x203   :  { %758 = vmatmul.mubr.bf16.gmra.mxu0 %v474_v57  ;;  %811 = vmatmul.mubr.bf16.gmra.mxu1 %v474_v57 }
 0x204   :  { %826 = vmatpush1.bf16.msra.mxu0 %v8330_v56  ;;  %853 = vmatprep.mubr.bf16.mxu0 %v9204_v0  ;;  %v8420_v56 = vld [vmem:[#allocation6 + $0x3c0] ss:$24 sps:$4 sm:$0xff]  }
 0x205   :  { %827 = vmatprep.subr.bf16.mxu0 %v8335_v58  ;;  %1587 = vmatprep.subr.bf16.mxu1 %v8362_v60  ;;  %v8423_v58 = vld [vmem:[#allocation6 + $0x3c8] ss:$24 sps:$4 sm:$0xff]   ;;  %v8428_v60 = vld [vmem:[#allocation6 + $0x394] ss:$24 sps:$4 sm:$0xff]  }
 0x206   :  { %1588 = vmatpush1.bf16.msra.mxu1 %v8360_v61  ;;  %v8426_v61 = vld [vmem:[#allocation6 + $0x390] ss:$24 sps:$4 sm:$0xff]  }
 0x207   :  { %1589 = vmatprep.subr.bf16.mxu1 %v8368_v15 }
 0x208   :  { %828 = vmatpush1.bf16.msra.mxu0 %v8333_v62  ;;  %v8431_v62 = vld [vmem:[#allocation6 + $0x39c] ss:$24 sps:$4 sm:$0xff]  }
 0x209   :  { %829 = vmatprep.subr.bf16.mxu0 %v8338_v63  ;;  %v8429_v63 = vld [vmem:[#allocation6 + $0x398] ss:$24 sps:$4 sm:$0xff]  }
 0x20a   :  { %1590 = vmatpush1.bf16.msra.mxu1 %v8366_v16 }
 0x20b   :  { %1591 = vmatprep.subr.bf16.mxu1 %v8374_v19 }
 0x20c   :  { %830 = vmatpush1.bf16.msra.mxu0 %v8336_v1  ;;  %v8434_v1 = vld [vmem:[#allocation6 + $0x364] ss:$24 sps:$4 sm:$0xff]  }
 0x20d   :  { %831 = vmatprep.subr.bf16.mxu0 %v8341_v2  ;;  %v8432_v2 = vld [vmem:[#allocation6 + $0x360] ss:$24 sps:$4 sm:$0xff]  }
 0x20e   :  { %1592 = vmatpush1.bf16.msra.mxu1 %v8372_v20 }
 0x20f   :  { %1593 = vmatprep.subr.bf16.mxu1 %v8380_v23 }
 0x210   :  { %832 = vmatpush1.bf16.msra.mxu0 %v8339_v3  ;;  %v8437_v3 = vld [vmem:[#allocation6 + $0x36c] ss:$24 sps:$4 sm:$0xff]  }
 0x211   :  { %833 = vmatprep.subr.bf16.mxu0 %v8344_v4  ;;  %v8435_v4 = vld [vmem:[#allocation6 + $0x368] ss:$24 sps:$4 sm:$0xff]  }
 0x212   :  { %1594 = vmatpush1.bf16.msra.mxu1 %v8378_v24 }
 0x213   :  { %1595 = vmatprep.subr.bf16.mxu1 %v8386_v27 }
 0x214   :  { %834 = vmatpush1.bf16.msra.mxu0 %v8342_v5  ;;  %v8440_v5 = vld [vmem:[#allocation6 + $0x334] ss:$24 sps:$4 sm:$0xff]  }
 0x215   :  { %835 = vmatprep.subr.bf16.mxu0 %v8347_v7  ;;  %v8438_v7 = vld [vmem:[#allocation6 + $0x330] ss:$24 sps:$4 sm:$0xff]  }
 0x216   :  { %1596 = vmatpush1.bf16.msra.mxu1 %v8384_v28 }
 0x217   :  { %1597 = vmatprep.subr.bf16.mxu1 %v8392_v32 }
 0x218   :  { %836 = vmatpush1.bf16.msra.mxu0 %v8345_v8  ;;  %v8443_v8 = vld [vmem:[#allocation6 + $0x33c] ss:$24 sps:$4 sm:$0xff]  }
 0x219   :  { %1636 = vmatprep.subr.bf16.mxu0 %v8353_v9  ;;  %v8441_v9 = vld [vmem:[#allocation6 + $0x338] ss:$24 sps:$4 sm:$0xff]  }
 0x21a   :  { %1598 = vmatpush1.bf16.msra.mxu1 %v8390_v33 }
 0x21b   :  { %854 = vmatmul.mubr.bf16.vlgmr.msra.gmra.mxu0 %v473_v44  ;;  %1599 = vmatprep.subr.bf16.mxu1 %v8398_v36  ;;  %v8405_v44 = vld [vmem:[#allocation6 + $0x458] ss:$24 sps:$4 sm:$0xff]  }
 0x21c   :  { %863 = vmatprep.mubr.bf16.mxu0 %v9204_v0  ;;  %1637 = vmatpush1.bf16.msra.mxu0 %v8351_v10  ;;  %v8446_v10 = vld [vmem:[#allocation6 + $0x314] ss:$24 sps:$4 sm:$0xff]  }
 0x21d   :  { %1638 = vmatprep.subr.bf16.mxu0 %v8359_v11 }
 0x21e   :  { %1600 = vmatpush2.bf16.msra.mxu1 %v8396_v37 }
 0x21f   :  { %1601 = vmatprep.subr.bf16.mxu1 %v8404_v40 }
 0x220   :  { %1639 = vmatpush1.bf16.msra.mxu0 %v8357_v12 }
 0x221   :  { %1640 = vmatprep.subr.bf16.mxu0 %v8365_v13 }
 0x222   :  { %1602 = vmatpush2.bf16.msra.mxu1 %v8402_v43  ;;  %v472_v43 = vld [vmem:[#allocation3 + $0x43] ss:$8 sm:$0x3] }
 0x223   :  { %864 = vmatmul.mubr.bf16.gmra.mxu0 %v474_v57  ;;  %1603 = vmatprep.subr.bf16.mxu1 %v8410_v45  ;;  %v8425_v57 = vld [vmem:[#allocation6 + $0x3cc] ss:$24 sps:$4 sm:$0xff]  }
 0x224   :  { %1641 = vmatpush1.bf16.msra.mxu0 %v8363_v14 }
 0x225   :  { %1642 = vmatprep.subr.bf16.mxu0 %v8371_v17 }
 0x226   :  { %1604 = vmatpush2.bf16.msra.mxu1 %v8408_v47 }
 0x227   :  { %1605 = vmatprep.subr.bf16.mxu1 %v8416_v51 }
 0x228   :  { %1643 = vmatpush1.bf16.msra.mxu0 %v8369_v18 }
 0x229   :  { %1644 = vmatprep.subr.bf16.mxu0 %v8377_v21 }
 0x22a   :  { %1606 = vmatpush2.bf16.msra.mxu1 %v8414_v52 }
 0x22b   :  { %1607 = vmatprep.subr.bf16.mxu1 %v8422_v55 }
 0x22c   :  { %1645 = vmatpush1.bf16.msra.mxu0 %v8375_v22 }
 0x22d   :  { %1646 = vmatprep.subr.bf16.mxu0 %v8383_v25 }
 0x22e   :  { %1608 = vmatpush2.bf16.msra.mxu1 %v8420_v56 }
 0x22f   :  { %1609 = vmatprep.subr.bf16.mxu1 %v8428_v60 }
 0x230   :  { %1647 = vmatpush1.bf16.msra.mxu0 %v8381_v26 }
 0x231   :  { %1648 = vmatprep.subr.bf16.mxu0 %v8389_v29 }
 0x232   :  { %1610 = vmatpush2.bf16.msra.mxu1 %v8426_v61  ;;  %v978_v61 = vrot.slane %v472_v43, %v9288_v49 }
 0x233   :  { %1611 = vmatprep.subr.bf16.mxu1 %v8434_v1 }
 0x234   :  { %1649 = vmatpush1.bf16.msra.mxu0 %v8387_v31 }
 0x235   :  { %1650 = vmatprep.subr.bf16.mxu0 %v8395_v34 }
 0x236   :  { %1612 = vmatpush2.bf16.msra.mxu1 %v8432_v2 }
 0x237   :  { %1613 = vmatprep.subr.bf16.mxu1 %v8440_v5 }
 0x238   :  { %1651 = vmatpush1.bf16.msra.mxu0 %v8393_v35 }
 0x239   :  { %1652 = vmatprep.subr.bf16.mxu0 %v8401_v38 }
 0x23a   :  { %1614 = vmatpush2.bf16.msra.mxu1 %v8438_v7 }
 0x23b   :  { %1689 = vmatprep.subr.bf16.mxu1 %v8446_v10 }
 0x23c   :  { %1653 = vmatpush2.bf16.msra.mxu0 %v8399_v39  ;;  %v9334_v39 = vsub.s32 1, %v9253_v6 }
 0x23d   :  { %1654 = vmatprep.subr.bf16.mxu0 %v8407_v41 }
 0x23e   :  { %v982_v1 = vrot.slane %v472_v43, %v9334_v39 }
 0x240   :  { %1655 = vmatpush2.bf16.msra.mxu0 %v8405_v44 }
 0x241   :  { %1656 = vmatprep.subr.bf16.mxu0 %v8413_v48 }
 0x244   :  { %1657 = vmatpush2.bf16.msra.mxu0 %v8411_v50 }
 0x245   :  { %1658 = vmatprep.subr.bf16.mxu0 %v8419_v53 }
 0x248   :  { %1659 = vmatpush2.bf16.msra.mxu0 %v8417_v54 }
 0x249   :  { %1660 = vmatprep.subr.bf16.mxu0 %v8425_v57 }
 0x24c   :  { %1661 = vmatpush2.bf16.msra.mxu0 %v8423_v58 }
 0x24d   :  { %1662 = vmatprep.subr.bf16.mxu0 %v8431_v62 }
 0x250   :  { %1663 = vmatpush2.bf16.msra.mxu0 %v8429_v63 }
 0x251   :  { %1664 = vmatprep.subr.bf16.mxu0 %v8437_v3 }
 0x254   :  { %1665 = vmatpush2.bf16.msra.mxu0 %v8435_v4 }
 0x255   :  { %1666 = vmatprep.subr.bf16.mxu0 %v8443_v8 }
 0x258   :  { %1667 = vmatpush2.bf16.msra.mxu0 %v8441_v9 }
 0x2bb   :  { %v749_v11 = vpop.f32.mrf.mxu0  ;;  %v802_v17 = vpop.f32.mrf.mxu1 }
 0x2bc   :  { %v886_v27 = vrot.slane %v749_v11, 7 }
 0x2bd   :  { %v751_v12 = vpop.f32.mrf.mxu0  ;;  %v804_v19 = vpop.f32.mrf.mxu1 }
 0x2be   :  { %v887_v23 = vrot.slane %v751_v12, 7 }
 0x2bf   :  { %v753_v13 = vpop.f32.mrf.mxu0  ;;  %v806_v21 = vpop.f32.mrf.mxu1 }
 0x2c0   :  { %v888_v32 = vrot.slane %v753_v13, 7 }
 0x2c1   :  { %v755_v14 = vpop.f32.mrf.mxu0  ;;  %v808_v24 = vpop.f32.mrf.mxu1 }
 0x2c2   :  { %v890_v33 = vrot.slane %v755_v14, 7  ;;  %v889_v51 = vsel %vm79_vm1, %v886_v27, %v888_v32 }
 0x2c3   :  { %v759_v15 = vpop.f32.mrf.mxu0  ;;  %v812_v34 = vpop.f32.mrf.mxu1  ;;  %v918_v2 = vadd.f32 %v889_v51, %v806_v21 }
 0x2c4   :  { %v892_v28 = vrot.slane %v759_v15, 7  ;;  %v891_v52 = vsel %vm79_vm1, %v887_v23, %v890_v33 }
 0x2c5   :  { %v761_v16 = vpop.f32.mrf.mxu0  ;;  %v814_v53 = vpop.f32.mrf.mxu1  ;;  %v919_v7 = vadd.f32 %v891_v52, %v808_v24  ;;  %v8444_v52 = vld [vmem:[#allocation6 + $0x310] ss:$24 sps:$4 sm:$0xff]  }
 0x2c6   :  { %v893_v40 = vsel %vm79_vm1, %v888_v32, %v892_v28  ;;  %v894_v41 = vrot.slane %v761_v16, 7 }
 0x2c7   :  { %v763_v18 = vpop.f32.mrf.mxu0  ;;  %v912_v55 = vsel %vm9293_vm5, 0.0, %v893_v40  ;;  %v816_v9 = vpop.f32.mrf.mxu1 }
 0x2c8   :  { %v876_v25 = vrot.slane %v763_v18, 7  ;;  %v895_v3 = vsel %vm79_vm1, %v890_v33, %v894_v41  ;;  %v920_v8 = vadd.f32 %v912_v55, %v812_v34  ;;  %v8449_v55 = vld [vmem:[#allocation6 + $0x2e4] ss:$24 sps:$4 sm:$0xff]  }
 0x2c9   :  { %v765_v20 = vpop.f32.mrf.mxu0 }
 0x2ca   :  { %v877_v22 = vrot.slane %v765_v20, 7  ;;  %v906_v35 = vsel %vm79_vm1, %v876_v25, %v886_v27  ;;  %v896_v13 = vsel %vm79_vm1, %v892_v28, %v876_v25  ;;  %v818_v28 = vpop.f32.mrf.mxu1 }
 0x2cb   :  { %v908_v45 = vsel %vm9282_vm4, 0.0, %v906_v35  ;;  %v922_v27 = vadd.f32 %v896_v13, %v816_v9  ;;  %v8461_v9 = vld [vmem:[#allocation6 + $0x224] ss:$24 sps:$4 sm:$0xff]  }
 0x2cc   :  { %v907_v29 = vsel %vm79_vm1, %v877_v22, %v887_v23  ;;  %v916_v60 = vadd.f32 %v908_v45, %v802_v17  ;;  %v913_v17 = vsel %vm9293_vm5, 0.0, %v895_v3  ;;  %v897_v18 = vsel %vm79_vm1, %v894_v41, %v877_v22  ;;  %v8467_v13 = vld [vmem:[#allocation6 + $0x1c4] ss:$24 sps:$4 sm:$0xff]  }
 0x2cd   :  { %v909_v37 = vsel %vm9282_vm4, 0.0, %v907_v29  ;;  %v921_v33 = vadd.f32 %v913_v17, %v814_v53  ;;  %v923_v22 = vadd.f32 %v897_v18, %v818_v28  ;;  %v8473_v17 = vld [vmem:[#allocation6 + $0x464] ss:$24 sps:$4 sm:$0xff]   ;;  %v8471_v18 = vld [vmem:[#allocation6 + $0x460] ss:$24 sps:$4 sm:$0xff]  }
 0x2ce   :  { %v917_v54 = vadd.f32 %v909_v37, %v804_v19  ;;  %v8488_v28 = vld [vmem:[#allocation6 + $0x374] ss:$24 sps:$4 sm:$0xff]  }
 0x2db   :  { %v855_v26 = vpop.f32.mrf.mxu0 }
 0x2dc   :  { %v932_v47 = vrot.slane %v855_v26, 1 }
 0x2dd   :  { %v9328_v31 = vpop.f32.mrf.mxu0 }
 0x2de   :  { %v935_v48 = vrot.slane %v9328_v31, 1 }
 0x2df   :  { %v859_v36 = vpop.f32.mrf.mxu0 }
 0x2e0   :  { %v933_v38 = vrot.slane %v859_v36, 1 }
 0x2e1   :  { %v861_v44 = vpop.f32.mrf.mxu0 }
 0x2e2   :  { %v936_v50 = vrot.slane %v861_v44, 1  ;;  %v934_v56 = vsel %vm168_vm0, %v932_v47, %v933_v38 }
 0x2e3   :  { %v865_v6 = vpop.f32.mrf.mxu0  ;;  %v966_v10 = vadd.f32 %v934_v56, %v916_v60  ;;  %v8447_v60 = vld [vmem:[#allocation6 + $0x2e0] ss:$24 sps:$4 sm:$0xff]  }
 0x2e4   :  { %v937_v57 = vsel %vm168_vm0, %v935_v48, %v936_v50  ;;  %v938_v58 = vrot.slane %v865_v6, 1 }
 0x2e5   :  { %v967_v62 = vadd.f32 %v937_v57, %v917_v54  ;;  %v867_v63 = vpop.f32.mrf.mxu0  ;;  %v985_v29 = vadd.f32 %v978_v61, %v966_v10  ;;  %v8459_v10 = vld [vmem:[#allocation6 + $0x220] ss:$24 sps:$4 sm:$0xff]  }
 0x2e6   :  { %v939_v4 = vsel %vm168_vm0, %v933_v38, %v938_v58  ;;  %v940_v5 = vrot.slane %v867_v63, 1  ;;  %v8452_v63 = vld [vmem:[#allocation6 + $0x2b4] ss:$24 sps:$4 sm:$0xff]  }
 0x2e7   :  { %v960_v11 = vsel %vm9261_vm2, 0.0, %v939_v4  ;;  %v869_v12 = vpop.f32.mrf.mxu0  ;;  %v986_v21 = vadd.f32 %v982_v1, %v967_v62  ;;  %v8455_v4 = vld [vmem:[#allocation6 + $0x284] ss:$24 sps:$4 sm:$0xff]  }
 0x2e8   :  { %v968_v14 = vadd.f32 %v960_v11, %v918_v2  ;;  %v941_v15 = vsel %vm168_vm0, %v936_v50, %v940_v5  ;;  %v942_v16 = vrot.slane %v869_v12, 1  ;;  %v8464_v11 = vld [vmem:[#allocation6 + $0x1f4] ss:$24 sps:$4 sm:$0xff]   ;;  %v8462_v12 = vld [vmem:[#allocation6 + $0x1f0] ss:$24 sps:$4 sm:$0xff]  }
 0x2e9   :  { %v961_v19 = vsel %vm9261_vm2, 0.0, %v941_v15  ;;  %v871_v20 = vpop.f32.mrf.mxu0  ;;  %v994_v44 = vmax.f32 %v986_v21, 0.0  ;;  %v8470_v15 = vld [vmem:[#allocation6 + $0x494] ss:$24 sps:$4 sm:$0xff]   ;;  %v8479_v21 = vld [vmem:[#allocation6 + $0x404] ss:$24 sps:$4 sm:$0xff]  }
 0x2ea   :  { %v987_v23 = vadd.f32 %v978_v61, %v968_v14  ;;  %v969_v24 = vadd.f32 %v961_v19, %v919_v7  ;;  %v943_v26 = vsel %vm168_vm0, %v938_v58, %v942_v16  ;;  %v956_v25 = vsel %vm168_vm0, %v942_v16, %v932_v47  ;;  %v8458_v7 = vld [vmem:[#allocation6 + $0x254] ss:$24 sps:$4 sm:$0xff]   ;;  %v8465_v14 = vld [vmem:[#allocation6 + $0x1c0] ss:$24 sps:$4 sm:$0xff]   ;;  %v8468_v16 = vld [vmem:[#allocation6 + $0x490] ss:$24 sps:$4 sm:$0xff]  }
 0x2eb   :  { %v964_v31 = vsel %vm9275_vm3, 0.0, %v956_v25  ;;  %v944_v32 = vrot.slane %v871_v20, 1  ;;  %v970_v34 = vadd.f32 %v943_v26, %v920_v8  ;;  %v993_v47 = vmax.f32 %v985_v29, 0.0  ;;  %v8456_v8 = vld [vmem:[#allocation6 + $0x250] ss:$24 sps:$4 sm:$0xff]  }
 0x2ec   :  { %v988_v35 = vadd.f32 %v982_v1, %v969_v24  ;;  %v995_v36 = vmax.f32 %v987_v23, 0.0  ;;  %v972_v37 = vadd.f32 %v964_v31, %v922_v27  ;;  %v8476_v19 = vld [vmem:[#allocation6 + $0x434] ss:$24 sps:$4 sm:$0xff]   ;;  %v8474_v20 = vld [vmem:[#allocation6 + $0x430] ss:$24 sps:$4 sm:$0xff]  }
 0x2ed   :  { %v945_v38 = vsel %vm168_vm0, %v940_v5, %v944_v32  ;;  %v957_v40 = vsel %vm168_vm0, %v944_v32, %v935_v48  ;;  %v989_v56 = vadd.f32 %v978_v61, %v970_v34  ;;  %v8453_v5 = vld [vmem:[#allocation6 + $0x280] ss:$24 sps:$4 sm:$0xff]   ;;  %v8482_v24 = vld [vmem:[#allocation6 + $0x3d4] ss:$24 sps:$4 sm:$0xff]   ;;  %v8480_v26 = vld [vmem:[#allocation6 + $0x3d0] ss:$24 sps:$4 sm:$0xff]  }
 0x2ee   :  { %v965_v41 = vsel %vm9275_vm3, 0.0, %v957_v40  ;;  %v971_v43 = vadd.f32 %v945_v38, %v921_v33  ;;  %v996_v45 = vmax.f32 %v988_v35, 0.0  ;;  %v9367_v54 = vpack.c.bf16 %v995_v36, %v993_v47  ;;  %v8477_v23 = vld [vmem:[#allocation6 + $0x400] ss:$24 sps:$4 sm:$0xff]   ;;  %v8485_v25 = vld [vmem:[#allocation6 + $0x3a4] ss:$24 sps:$4 sm:$0xff]  }
 0x2ef   :  { %v973_v50 = vadd.f32 %v965_v41, %v923_v22  ;;  %v991_v57 = vadd.f32 %v978_v61, %v972_v37  ;;  %v997_v2 = vmax.f32 %v989_v56, 0.0  ;;  %v8450_v61 = vld [vmem:[#allocation6 + $0x2b0] ss:$24 sps:$4 sm:$0xff]   ;;  %v8483_v27 = vld [vmem:[#allocation6 + $0x3a0] ss:$24 sps:$4 sm:$0xff]  }
 0x2f0   :  { %v1100_v51 = vpack.c.bf16 %v996_v45, %v994_v44  ;;  %v990_v53 = vadd.f32 %v982_v1, %v971_v43  ;;  %v8486_v29 = vld [vmem:[#allocation6 + $0x370] ss:$24 sps:$4 sm:$0xff]   ;;  %v8491_v31 = vld [vmem:[#allocation6 + $0x344] ss:$24 sps:$4 sm:$0xff]   ;;  %v8489_v32 = vld [vmem:[#allocation6 + $0x340] ss:$24 sps:$4 sm:$0xff]  }
 0x2f1   :  { %v992_v6 = vadd.f32 %v982_v1, %v973_v50  ;;  %v999_v3 = vmax.f32 %v991_v57, 0.0  ;;  %v8492_v33 = vld [vmem:[#allocation6 + $0x600] ss:$24 sps:$4 sm:$0xff]   ;;  %v8494_v22 = vld [vmem:[#allocation6 + $0x604] ss:$24 sps:$4 sm:$0xff]  }
 0x2f2   :  { %1615 = vmatprep.mubr.bf16.mxu1 %v1100_v51  ;;  %1668 = vmatprep.mubr.bf16.mxu0 %v1100_v51  ;;  %v998_v48 = vmax.f32 %v990_v53, 0.0  ;;  %v8495_v34 = vld [vmem:[#allocation6 + $0x608] ss:$24 sps:$4 sm:$0xff]   ;;  %v8497_v35 = vld [vmem:[#allocation6 + $0x60c] ss:$24 sps:$4 sm:$0xff]  }
 0x2f3   :  { %1616 = vmatmul.mubr.bf16.vlgmr.msra.gmra.mxu1 %v9367_v54  ;;  %1669 = vmatmul.mubr.bf16.vlgmr.msra.gmra.mxu0 %v9367_v54  ;;  %v1000_v58 = vmax.f32 %v992_v6, 0.0  ;;  %v1101_v1 = vpack.c.bf16 %v999_v3, %v997_v2  ;;  %v8500_v36 = vld [vmem:[#allocation6 + $0x5d4] ss:$24 sps:$4 sm:$0xff]   ;;  %v8498_v38 = vld [vmem:[#allocation6 + $0x5d0] ss:$24 sps:$4 sm:$0xff]  }
 0x2f4   :  { %1690 = vmatpush1.bf16.msra.mxu1 %v8444_v52  ;;  %2465 = vmatprep.subr.bf16.mxu0 %v8494_v22  ;;  %v8503_v37 = vld [vmem:[#allocation6 + $0x5dc] ss:$24 sps:$4 sm:$0xff]   ;;  %v8501_v40 = vld [vmem:[#allocation6 + $0x5d8] ss:$24 sps:$4 sm:$0xff]   ;;  %v8509_v43 = vld [vmem:[#allocation6 + $0x5ac] ss:$24 sps:$4 sm:$0xff]  }
 0x2f5   :  { %v9371_v62 = vpack.c.bf16 %v1000_v58, %v998_v48  ;;  %1691 = vmatprep.subr.bf16.mxu1 %v8449_v55  ;;  %2466 = vmatpush1.bf16.msra.mxu0 %v8492_v33  ;;  %v8506_v41 = vld [vmem:[#allocation6 + $0x5a4] ss:$24 sps:$4 sm:$0xff]   ;;  %v8504_v44 = vld [vmem:[#allocation6 + $0x5a0] ss:$24 sps:$4 sm:$0xff]   ;;  %v8512_v47 = vld [vmem:[#allocation6 + $0x574] ss:$24 sps:$4 sm:$0xff]  }
 0x2f6   :  { %2467 = vmatprep.subr.bf16.mxu0 %v8500_v36  ;;  %v8507_v45 = vld [vmem:[#allocation6 + $0x5a8] ss:$24 sps:$4 sm:$0xff]   ;;  %v8515_v50 = vld [vmem:[#allocation6 + $0x57c] ss:$24 sps:$4 sm:$0xff]   ;;  %v8513_v52 = vld [vmem:[#allocation6 + $0x578] ss:$24 sps:$4 sm:$0xff]  }
 0x2f7   :  { %1625 = vmatprep.mubr.bf16.mxu1 %v9371_v62  ;;  %1678 = vmatprep.mubr.bf16.mxu0 %v9371_v62  ;;  %v8518_v53 = vld [vmem:[#allocation6 + $0x544] ss:$24 sps:$4 sm:$0xff]   ;;  %v8516_v6 = vld [vmem:[#allocation6 + $0x540] ss:$24 sps:$4 sm:$0xff]   ;;  %v8524_v56 = vld [vmem:[#allocation6 + $0x514] ss:$24 sps:$4 sm:$0xff]  }
 0x2f8   :  { %1692 = vmatpush1.bf16.msra.mxu1 %v8447_v60  ;;  %v8519_v55 = vld [vmem:[#allocation6 + $0x548] ss:$24 sps:$4 sm:$0xff]   ;;  %v8527_v57 = vld [vmem:[#allocation6 + $0x51c] ss:$24 sps:$4 sm:$0xff]   ;;  %v8525_v58 = vld [vmem:[#allocation6 + $0x518] ss:$24 sps:$4 sm:$0xff]  }
 0x2f9   :  { %1693 = vmatprep.subr.bf16.mxu1 %v8452_v63  ;;  %2468 = vmatpush1.bf16.msra.mxu0 %v8498_v38  ;;  %v8522_v48 = vld [vmem:[#allocation6 + $0x510] ss:$24 sps:$4 sm:$0xff]   ;;  %v8530_v60 = vld [vmem:[#allocation6 + $0x4e4] ss:$24 sps:$4 sm:$0xff]   ;;  %v8528_v63 = vld [vmem:[#allocation6 + $0x4e0] ss:$24 sps:$4 sm:$0xff]  }
 0x2fa   :  { %2469 = vmatprep.subr.bf16.mxu0 %v8506_v41  ;;  %v8531_v2 = vld [vmem:[#allocation6 + $0x4e8] ss:$24 sps:$4 sm:$0xff]   ;;  %v8536_v3 = vld [vmem:[#allocation6 + $0x4b4] ss:$24 sps:$4 sm:$0xff]  }
 0x2fb   :  { %1626 = vmatmul.mubr.bf16.gmra.mxu1 %v1101_v1  ;;  %1679 = vmatmul.mubr.bf16.gmra.mxu0 %v1101_v1  ;;  %v8576_v33 = vld [vmem:[#allocation6 + $0x660] ss:$24 sps:$4 sm:$0xff]   ;;  %v8581_v22 = vld [vmem:[#allocation6 + $0x66c] ss:$24 sps:$4 sm:$0xff]   ;;  %v8587_v38 = vld [vmem:[#allocation6 + $0x63c] ss:$24 sps:$4 sm:$0xff]  }
 0x2fc   :  { %1694 = vmatpush1.bf16.msra.mxu1 %v8450_v61  ;;  %1721 = vmatprep.mubr.bf16.mxu1 %v1100_v51  ;;  %v8510_v51 = vld [vmem:[#allocation6 + $0x570] ss:$24 sps:$4 sm:$0xff]   ;;  %v8539_v61 = vld [vmem:[#allocation6 + $0x4bc] ss:$24 sps:$4 sm:$0xff]  }
 0x2fd   :  { %1695 = vmatprep.subr.bf16.mxu1 %v8455_v4  ;;  %2470 = vmatpush1.bf16.msra.mxu0 %v8504_v44  ;;  %v8537_v4 = vld [vmem:[#allocation6 + $0x4b8] ss:$24 sps:$4 sm:$0xff]   ;;  %v8584_v36 = vld [vmem:[#allocation6 + $0x634] ss:$24 sps:$4 sm:$0xff]  }
 0x2fe   :  { %2471 = vmatprep.subr.bf16.mxu0 %v8512_v47 }
 0x300   :  { %1696 = vmatpush1.bf16.msra.mxu1 %v8453_v5  ;;  %v8542_v5 = vld [vmem:[#allocation6 + $0x784] ss:$24 sps:$4 sm:$0xff]  }
 0x301   :  { %1697 = vmatprep.subr.bf16.mxu1 %v8458_v7  ;;  %2472 = vmatpush1.bf16.msra.mxu0 %v8510_v51  ;;  %v8545_v7 = vld [vmem:[#allocation6 + $0x78c] ss:$24 sps:$4 sm:$0xff]  }
 0x302   :  { %2473 = vmatprep.subr.bf16.mxu0 %v8518_v53 }
 0x304   :  { %1698 = vmatpush1.bf16.msra.mxu1 %v8456_v8  ;;  %v8540_v8 = vld [vmem:[#allocation6 + $0x780] ss:$24 sps:$4 sm:$0xff]  }
 0x305   :  { %1699 = vmatprep.subr.bf16.mxu1 %v8461_v9  ;;  %2474 = vmatpush1.bf16.msra.mxu0 %v8516_v6  ;;  %v8543_v9 = vld [vmem:[#allocation6 + $0x788] ss:$24 sps:$4 sm:$0xff]  }
 0x306   :  { %2475 = vmatprep.subr.bf16.mxu0 %v8524_v56 }
 0x308   :  { %1700 = vmatpush1.bf16.msra.mxu1 %v8459_v10  ;;  %v8548_v10 = vld [vmem:[#allocation6 + $0x754] ss:$24 sps:$4 sm:$0xff]  }
 0x309   :  { %1701 = vmatprep.subr.bf16.mxu1 %v8464_v11  ;;  %2476 = vmatpush1.bf16.msra.mxu0 %v8522_v48  ;;  %v8551_v11 = vld [vmem:[#allocation6 + $0x75c] ss:$24 sps:$4 sm:$0xff]  }
 0x30a   :  { %2477 = vmatprep.subr.bf16.mxu0 %v8530_v60 }
 0x30c   :  { %1702 = vmatpush1.bf16.msra.mxu1 %v8462_v12  ;;  %v8546_v12 = vld [vmem:[#allocation6 + $0x750] ss:$24 sps:$4 sm:$0xff]  }
 0x30d   :  { %1703 = vmatprep.subr.bf16.mxu1 %v8467_v13  ;;  %2478 = vmatpush1.bf16.msra.mxu0 %v8528_v63  ;;  %v8549_v13 = vld [vmem:[#allocation6 + $0x758] ss:$24 sps:$4 sm:$0xff]  }
 0x30e   :  { %2479 = vmatprep.subr.bf16.mxu0 %v8536_v3 }
 0x310   :  { %1704 = vmatpush1.bf16.msra.mxu1 %v8465_v14  ;;  %v8554_v14 = vld [vmem:[#allocation6 + $0x724] ss:$24 sps:$4 sm:$0xff]  }
 0x311   :  { %1705 = vmatprep.subr.bf16.mxu1 %v8470_v15  ;;  %v8552_v15 = vld [vmem:[#allocation6 + $0x720] ss:$24 sps:$4 sm:$0xff]  }
 0x314   :  { %1706 = vmatpush2.bf16.msra.mxu1 %v8468_v16  ;;  %v8557_v16 = vld [vmem:[#allocation6 + $0x72c] ss:$24 sps:$4 sm:$0xff]  }
 0x315   :  { %1707 = vmatprep.subr.bf16.mxu1 %v8473_v17  ;;  %v8555_v17 = vld [vmem:[#allocation6 + $0x728] ss:$24 sps:$4 sm:$0xff]  }
 0x318   :  { %1708 = vmatpush2.bf16.msra.mxu1 %v8471_v18  ;;  %v8560_v18 = vld [vmem:[#allocation6 + $0x6f4] ss:$24 sps:$4 sm:$0xff]  }
 0x319   :  { %1709 = vmatprep.subr.bf16.mxu1 %v8476_v19  ;;  %v8558_v19 = vld [vmem:[#allocation6 + $0x6f0] ss:$24 sps:$4 sm:$0xff]  }
 0x31c   :  { %1710 = vmatpush2.bf16.msra.mxu1 %v8474_v20  ;;  %v8563_v20 = vld [vmem:[#allocation6 + $0x6fc] ss:$24 sps:$4 sm:$0xff]  }
 0x31d   :  { %1711 = vmatprep.subr.bf16.mxu1 %v8479_v21  ;;  %v8561_v21 = vld [vmem:[#allocation6 + $0x6f8] ss:$24 sps:$4 sm:$0xff]  }
 0x320   :  { %1712 = vmatpush2.bf16.msra.mxu1 %v8477_v23  ;;  %v8566_v23 = vld [vmem:[#allocation6 + $0x6c4] ss:$24 sps:$4 sm:$0xff]  }
 0x321   :  { %1713 = vmatprep.subr.bf16.mxu1 %v8482_v24  ;;  %v8564_v24 = vld [vmem:[#allocation6 + $0x6c0] ss:$24 sps:$4 sm:$0xff]  }
 0x324   :  { %1714 = vmatpush2.bf16.msra.mxu1 %v8480_v26  ;;  %v8569_v26 = vld [vmem:[#allocation6 + $0x6cc] ss:$24 sps:$4 sm:$0xff]  }
 0x325   :  { %1715 = vmatprep.subr.bf16.mxu1 %v8485_v25  ;;  %v8567_v25 = vld [vmem:[#allocation6 + $0x6c8] ss:$24 sps:$4 sm:$0xff]  }
 0x328   :  { %1716 = vmatpush2.bf16.msra.mxu1 %v8483_v27  ;;  %v8572_v27 = vld [vmem:[#allocation6 + $0x694] ss:$24 sps:$4 sm:$0xff]  }
 0x329   :  { %1717 = vmatprep.subr.bf16.mxu1 %v8488_v28  ;;  %v8570_v28 = vld [vmem:[#allocation6 + $0x690] ss:$24 sps:$4 sm:$0xff]  }
 0x32c   :  { %1718 = vmatpush2.bf16.msra.mxu1 %v8486_v29  ;;  %v8575_v29 = vld [vmem:[#allocation6 + $0x69c] ss:$24 sps:$4 sm:$0xff]  }
 0x32d   :  { %1719 = vmatprep.subr.bf16.mxu1 %v8491_v31  ;;  %v8573_v31 = vld [vmem:[#allocation6 + $0x698] ss:$24 sps:$4 sm:$0xff]  }
 0x330   :  { %1720 = vmatpush2.bf16.msra.mxu1 %v8489_v32  ;;  %v8578_v32 = vld [vmem:[#allocation6 + $0x664] ss:$24 sps:$4 sm:$0xff]  }
 0x331   :  { %2518 = vmatprep.subr.bf16.mxu1 %v8497_v35  ;;  %v8582_v35 = vld [vmem:[#allocation6 + $0x630] ss:$24 sps:$4 sm:$0xff]  }
 0x333   :  { %1722 = vmatmul.mubr.bf16.vlgmr.msra.gmra.mxu1 %v9367_v54  ;;  %v8521_v54 = vld [vmem:[#allocation6 + $0x54c] ss:$24 sps:$4 sm:$0xff]  }
 0x334   :  { %1731 = vmatprep.mubr.bf16.mxu1 %v9371_v62  ;;  %2519 = vmatpush1.bf16.msra.mxu1 %v8495_v34  ;;  %v8533_v62 = vld [vmem:[#allocation6 + $0x4ec] ss:$24 sps:$4 sm:$0xff]   ;;  %v8579_v34 = vld [vmem:[#allocation6 + $0x668] ss:$24 sps:$4 sm:$0xff]  }
 0x335   :  { %2520 = vmatprep.subr.bf16.mxu1 %v8503_v37  ;;  %v8585_v37 = vld [vmem:[#allocation6 + $0x638] ss:$24 sps:$4 sm:$0xff]  }
 0x338   :  { %2521 = vmatpush1.bf16.msra.mxu1 %v8501_v40  ;;  %v8590_v40 = vld [vmem:[#allocation6 + $0x614] ss:$24 sps:$4 sm:$0xff]  }
 0x339   :  { %2522 = vmatprep.subr.bf16.mxu1 %v8509_v43 }
 0x33b   :  { %1732 = vmatmul.mubr.bf16.gmra.mxu1 %v1101_v1  ;;  %v8534_v1 = vld [vmem:[#allocation6 + $0x4b0] ss:$24 sps:$4 sm:$0xff]  }
 0x33c   :  { %2523 = vmatpush1.bf16.msra.mxu1 %v8507_v45  ;;  %2480 = vmatpush1.bf16.msra.mxu0 %v8534_v1 }
 0x33d   :  { %2524 = vmatprep.subr.bf16.mxu1 %v8515_v50  ;;  %2481 = vmatprep.subr.bf16.mxu0 %v8542_v5 }
 0x340   :  { %2525 = vmatpush1.bf16.msra.mxu1 %v8513_v52  ;;  %2482 = vmatpush2.bf16.msra.mxu0 %v8540_v8 }
 0x341   :  { %2526 = vmatprep.subr.bf16.mxu1 %v8521_v54  ;;  %2483 = vmatprep.subr.bf16.mxu0 %v8548_v10 }
 0x344   :  { %2527 = vmatpush1.bf16.msra.mxu1 %v8519_v55  ;;  %2484 = vmatpush2.bf16.msra.mxu0 %v8546_v12 }
 0x345   :  { %2528 = vmatprep.subr.bf16.mxu1 %v8527_v57  ;;  %2485 = vmatprep.subr.bf16.mxu0 %v8554_v14 }
 0x348   :  { %2529 = vmatpush1.bf16.msra.mxu1 %v8525_v58  ;;  %2486 = vmatpush2.bf16.msra.mxu0 %v8552_v15 }
 0x349   :  { %2530 = vmatprep.subr.bf16.mxu1 %v8533_v62  ;;  %2487 = vmatprep.subr.bf16.mxu0 %v8560_v18 }
 0x34c   :  { %2531 = vmatpush1.bf16.msra.mxu1 %v8531_v2  ;;  %2488 = vmatpush2.bf16.msra.mxu0 %v8558_v19 }
 0x34d   :  { %2532 = vmatprep.subr.bf16.mxu1 %v8539_v61  ;;  %2489 = vmatprep.subr.bf16.mxu0 %v8566_v23 }
 0x350   :  { %2533 = vmatpush1.bf16.msra.mxu1 %v8537_v4  ;;  %2490 = vmatpush2.bf16.msra.mxu0 %v8564_v24 }
 0x351   :  { %2534 = vmatprep.subr.bf16.mxu1 %v8545_v7  ;;  %2491 = vmatprep.subr.bf16.mxu0 %v8572_v27 }
 0x354   :  { %2535 = vmatpush2.bf16.msra.mxu1 %v8543_v9  ;;  %2492 = vmatpush2.bf16.msra.mxu0 %v8570_v28 }
 0x355   :  { %2536 = vmatprep.subr.bf16.mxu1 %v8551_v11  ;;  %2493 = vmatprep.subr.bf16.mxu0 %v8578_v32 }
 0x358   :  { %2537 = vmatpush2.bf16.msra.mxu1 %v8549_v13  ;;  %2494 = vmatpush2.bf16.msra.mxu0 %v8576_v33  ;;  %v1098_v13 = vld [vmem:[#allocation3 + $0x44] ss:$8 sm:$0x3] }
 0x359   :  { %2538 = vmatprep.subr.bf16.mxu1 %v8557_v16  ;;  %2495 = vmatprep.subr.bf16.mxu0 %v8584_v36  ;;  %v9392_v18 = vrot.slane %v1098_v13, %v9334_v39 }
 0x35c   :  { %2539 = vmatpush2.bf16.msra.mxu1 %v8555_v17  ;;  %2496 = vmatpush2.bf16.msra.mxu0 %v8582_v35 }
 0x35d   :  { %2540 = vmatprep.subr.bf16.mxu1 %v8563_v20  ;;  %2571 = vmatprep.subr.bf16.mxu0 %v8590_v40 }
 0x360   :  { %2541 = vmatpush2.bf16.msra.mxu1 %v8561_v21 }
 0x361   :  { %2542 = vmatprep.subr.bf16.mxu1 %v8569_v26 }
 0x364   :  { %2543 = vmatpush2.bf16.msra.mxu1 %v8567_v25 }
 0x365   :  { %2544 = vmatprep.subr.bf16.mxu1 %v8575_v29 }
 0x368   :  { %2545 = vmatpush2.bf16.msra.mxu1 %v8573_v31  ;;  %v1846_v31 = vrot.slane %v1098_v13, %v9288_v49 }
 0x369   :  { %2546 = vmatprep.subr.bf16.mxu1 %v8581_v22 }
 0x36c   :  { %2547 = vmatpush2.bf16.msra.mxu1 %v8579_v34 }
 0x36d   :  { %2548 = vmatprep.subr.bf16.mxu1 %v8587_v38 }
 0x370   :  { %2549 = vmatpush2.bf16.msra.mxu1 %v8585_v37 }
 0x3b3   :  { %v1617_v41 = vpop.f32.mrf.mxu1  ;;  %v1670_v51 = vpop.f32.mrf.mxu0 }
 0x3b4   :  { %v1754_v57 = vrot.slane %v1617_v41, 7 }
 0x3b5   :  { %v1619_v43 = vpop.f32.mrf.mxu1  ;;  %v1672_v53 = vpop.f32.mrf.mxu0 }
 0x3b6   :  { %v1755_v48 = vrot.slane %v1619_v43, 7 }
 0x3b7   :  { %v1621_v44 = vpop.f32.mrf.mxu1  ;;  %v1674_v6 = vpop.f32.mrf.mxu0 }
 0x3b8   :  { %v1756_v61 = vrot.slane %v1621_v44, 7 }
 0x3b9   :  { %v1623_v45 = vpop.f32.mrf.mxu1  ;;  %v1676_v60 = vpop.f32.mrf.mxu0 }
 0x3ba   :  { %v1758_v1 = vrot.slane %v1623_v45, 7  ;;  %v1757_v19 = vsel %vm79_vm1, %v1754_v57, %v1756_v61 }
 0x3bb   :  { %v1627_v47 = vpop.f32.mrf.mxu1  ;;  %v1680_v7 = vpop.f32.mrf.mxu0  ;;  %v1786_v22 = vadd.f32 %v1757_v19, %v1674_v6 }
 0x3bc   :  { %v1760_v62 = vrot.slane %v1627_v47, 7  ;;  %v1759_v20 = vsel %vm79_vm1, %v1755_v48, %v1758_v1 }
 0x3bd   :  { %v9377_v50 = vpop.f32.mrf.mxu1  ;;  %v1682_v26 = vpop.f32.mrf.mxu0  ;;  %v1787_v37 = vadd.f32 %v1759_v20, %v1676_v60 }
 0x3be   :  { %v1762_v4 = vrot.slane %v9377_v50, 7  ;;  %v1761_v12 = vsel %vm79_vm1, %v1756_v61, %v1760_v62 }
 0x3bf   :  { %v1631_v52 = vpop.f32.mrf.mxu1  ;;  %v1780_v24 = vsel %vm9293_vm5, 0.0, %v1761_v12  ;;  %v1684_v44 = vpop.f32.mrf.mxu0  ;;  %v1869_v12 = vld [vmem:[#allocation3] sm:$0xff] }
 0x3c0   :  { %v1744_v55 = vrot.slane %v1631_v52, 7  ;;  %v1763_v25 = vsel %vm79_vm1, %v1758_v1, %v1762_v4  ;;  %v1788_v38 = vadd.f32 %v1780_v24, %v1680_v7 }
 0x3c1   :  { %v1633_v54 = vpop.f32.mrf.mxu1  ;;  %v1781_v40 = vsel %vm9293_vm5, 0.0, %v1763_v25  ;;  %v1874_v25 = vld [vmem:[#allocation3 + $0x28] sm:$0xff] }
 0x3c2   :  { %v1745_v56 = vrot.slane %v1633_v54, 7  ;;  %v1774_v63 = vsel %vm79_vm1, %v1744_v55, %v1754_v57  ;;  %v1764_v34 = vsel %vm79_vm1, %v1760_v62, %v1744_v55  ;;  %v1789_v60 = vadd.f32 %v1781_v40, %v1682_v26 }
 0x3c3   :  { %v1776_v8 = vsel %vm9282_vm4, 0.0, %v1774_v63  ;;  %v1790_v52 = vadd.f32 %v1764_v34, %v1684_v44 }
 0x3c4   :  { %v1775_v2 = vsel %vm79_vm1, %v1745_v56, %v1755_v48  ;;  %v1784_v46 = vadd.f32 %v1776_v8, %v1670_v51 }
 0x3c5   :  { %v1777_v9 = vsel %vm9282_vm4, 0.0, %v1775_v2 }
 0x3c6   :  { %v1785_v21 = vadd.f32 %v1777_v9, %v1672_v53  ;;  %v1765_v53 = vsel %vm79_vm1, %v1762_v4, %v1745_v56  ;;  %v1871_v56 = vld [vmem:[#allocation3 + $0x10] sm:$0xff] }
 0x3f3   :  { %v1723_v58 = vpop.f32.mrf.mxu1 }
 0x3f4   :  { %v1800_v10 = vrot.slane %v1723_v58, 1 }
 0x3f5   :  { %v9381_v3 = vpop.f32.mrf.mxu1 }
 0x3f6   :  { %v1803_v15 = vrot.slane %v9381_v3, 1  ;;  %v1686_v3 = vpop.f32.mrf.mxu0 }
 0x3f7   :  { %v1727_v5 = vpop.f32.mrf.mxu1 }
 0x3f8   :  { %v1801_v11 = vrot.slane %v1727_v5, 1  ;;  %v1791_v5 = vadd.f32 %v1765_v53, %v1686_v3  ;;  %v8600_v53 = vld [vmem:[#allocation6 + $0x550] ss:$24 sps:$4 sm:$0xff]  }
 0x3f9   :  { %v1729_v14 = vpop.f32.mrf.mxu1  ;;  %v8618_v3 = vld [vmem:[#allocation6 + $0x730] ss:$24 sps:$4 sm:$0xff]  }
 0x3fa   :  { %v1802_v16 = vsel %vm168_vm0, %v1800_v10, %v1801_v11  ;;  %v1804_v17 = vrot.slane %v1729_v14, 1 }
 0x3fb   :  { %v1733_v23 = vpop.f32.mrf.mxu1  ;;  %v1834_v29 = vadd.f32 %v1802_v16, %v1784_v46 }
 0x3fc   :  { %v1805_v27 = vsel %vm168_vm0, %v1803_v15, %v1804_v17  ;;  %v1806_v28 = vrot.slane %v1733_v23, 1 }
 0x3fd   :  { %v1835_v32 = vadd.f32 %v1805_v27, %v1785_v21  ;;  %v1735_v33 = vpop.f32.mrf.mxu1  ;;  %v1853_v54 = vadd.f32 %v1846_v31, %v1834_v29  ;;  %v8588_v27 = vld [vmem:[#allocation6 + $0x610] ss:$24 sps:$4 sm:$0xff]   ;;  %v1876_v29 = vld [vmem:[#allocation3 + $0x38] sm:$0xff] }
 0x3fe   :  { %v1807_v35 = vsel %vm168_vm0, %v1801_v11, %v1806_v28  ;;  %v1808_v36 = vrot.slane %v1735_v33, 1  ;;  %v1872_v11 = vld [vmem:[#allocation3 + $0x18] sm:$0xff] }
 0x3ff   :  { %v1828_v41 = vsel %vm9261_vm2, 0.0, %v1807_v35  ;;  %v1737_v43 = vpop.f32.mrf.mxu1  ;;  %v1854_v51 = vadd.f32 %v9392_v18, %v1835_v32  ;;  %v1861_v7 = vmax.f32 %v1853_v54, 0.0  ;;  %v8593_v33 = vld [vmem:[#allocation6 + $0x5e4] ss:$24 sps:$4 sm:$0xff]  }
 0x400   :  { %v1836_v45 = vadd.f32 %v1828_v41, %v1786_v22  ;;  %v1809_v47 = vsel %vm168_vm0, %v1804_v17, %v1808_v36  ;;  %v1810_v50 = vrot.slane %v1737_v43, 1  ;;  %v8596_v41 = vld [vmem:[#allocation6 + $0x5b4] ss:$24 sps:$4 sm:$0xff]   ;;  %v8605_v54 = vld [vmem:[#allocation6 + $0x524] ss:$24 sps:$4 sm:$0xff]  }
 0x401   :  { %v1829_v6 = vsel %vm9261_vm2, 0.0, %v1809_v47  ;;  %v1739_v59 = vpop.f32.mrf.mxu1  ;;  %v1862_v4 = vmax.f32 %v1854_v51, 0.0  ;;  %v8597_v51 = vld [vmem:[#allocation6 + $0x580] ss:$24 sps:$4 sm:$0xff]  }
 0x402   :  { %v1855_v55 = vadd.f32 %v1846_v31, %v1836_v45  ;;  %v1837_v57 = vadd.f32 %v1829_v6, %v1787_v37  ;;  %v1811_v48 = vsel %vm168_vm0, %v1806_v28, %v1810_v50  ;;  %v1824_v58 = vsel %vm168_vm0, %v1810_v50, %v1800_v10  ;;  %v1870_v10 = vld [vmem:[#allocation3 + $0x8] sm:$0xff]  ;;  %v8599_v50 = vld [vmem:[#allocation6 + $0x584] ss:$24 sps:$4 sm:$0xff]   ;;  %v8603_v6 = vld [vmem:[#allocation6 + $0x520] ss:$24 sps:$4 sm:$0xff]  }
 0x403   :  { %v1832_v62 = vsel %vm9275_vm3, 0.0, %v1824_v58  ;;  %v1838_v63 = vadd.f32 %v1811_v48, %v1788_v38  ;;  %v1812_v2 = vrot.slane %v1739_v59, 1  ;;  %v9423_v21 = vadd.f32 %v1870_v10, %v1862_v4  ;;  %v8591_v38 = vld [vmem:[#allocation6 + $0x5e0] ss:$24 sps:$4 sm:$0xff]   ;;  %v8594_v45 = vld [vmem:[#allocation6 + $0x5b0] ss:$24 sps:$4 sm:$0xff]  }
 0x404   :  { %v1863_v61 = vmax.f32 %v1855_v55, 0.0  ;;  %v1840_v1 = vadd.f32 %v1832_v62, %v1790_v52  ;;  %v1856_v30 = vadd.f32 %v9392_v18, %v1837_v57  ;;  %v8602_v52 = vld [vmem:[#allocation6 + $0x554] ss:$24 sps:$4 sm:$0xff]   ;;  %v8606_v55 = vld [vmem:[#allocation6 + $0x4f0] ss:$24 sps:$4 sm:$0xff]  }
 0x405   :  { %v1813_v8 = vsel %vm168_vm0, %v1808_v36, %v1812_v2  ;;  %v1825_v9 = vsel %vm168_vm0, %v1812_v2, %v1803_v15  ;;  %v1857_v19 = vadd.f32 %v1846_v31, %v1838_v63  ;;  %v9428_v15 = vadd.f32 %v1869_v12, %v1861_v7  ;;  %v1875_v36 = vld [vmem:[#allocation3 + $0x30] sm:$0xff]  ;;  %v8611_v57 = vld [vmem:[#allocation6 + $0x4c4] ss:$24 sps:$4 sm:$0xff]   ;;  %v8609_v48 = vld [vmem:[#allocation6 + $0x4c0] ss:$24 sps:$4 sm:$0xff]  }
 0x406   :  { %v1833_v13 = vsel %vm9275_vm3, 0.0, %v1825_v9  ;;  %v1839_v14 = vadd.f32 %v1813_v8, %v1789_v60  ;;  %v1864_v16 = vmax.f32 %v1856_v30, 0.0  ;;  %v9421_v17 = vadd.f32 %v1871_v56, %v1863_v61  ;;  %v8608_v59 = vld [vmem:[#allocation6 + $0x4f4] ss:$24 sps:$4 sm:$0xff]   ;;  %v8612_v60 = vld [vmem:[#allocation6 + $0x790] ss:$24 sps:$4 sm:$0xff]  }
 0x407   :  { %v1841_v20 = vadd.f32 %v1833_v13, %v1791_v5  ;;  %v1859_v46 = vadd.f32 %v1846_v31, %v1840_v1  ;;  %v1865_v22 = vmax.f32 %v1857_v19, 0.0  ;;  %v8614_v58 = vld [vmem:[#allocation6 + $0x794] ss:$24 sps:$4 sm:$0xff]   ;;  %v8617_v62 = vld [vmem:[#allocation6 + $0x764] ss:$24 sps:$4 sm:$0xff]  }
 0x408   :  { %v9425_v23 = vadd.f32 %v1872_v11, %v1864_v16  ;;  %v1858_v24 = vadd.f32 %v9392_v18, %v1839_v14  ;;  %v9435_v31 = vpack.c.bf16 %v9421_v17, %v9428_v15  ;;  %v8615_v63 = vld [vmem:[#allocation6 + $0x760] ss:$24 sps:$4 sm:$0xff]   ;;  %v8620_v2 = vld [vmem:[#allocation6 + $0x734] ss:$24 sps:$4 sm:$0xff]   ;;  %v8623_v61 = vld [vmem:[#allocation6 + $0x704] ss:$24 sps:$4 sm:$0xff]  }
 0x409   :  { %v1860_v26 = vadd.f32 %v9392_v18, %v1841_v20  ;;  %v1867_v34 = vmax.f32 %v1859_v46, 0.0  ;;  %v1873_v18 = vld [vmem:[#allocation3 + $0x20] sm:$0xff]  ;;  %v8626_v1 = vld [vmem:[#allocation6 + $0x6d4] ss:$24 sps:$4 sm:$0xff]   ;;  %v8624_v30 = vld [vmem:[#allocation6 + $0x6d0] ss:$24 sps:$4 sm:$0xff]  }
 0x40a   :  { %v1982_v42 = vpack.c.bf16 %v9425_v23, %v9423_v21  ;;  %v1866_v28 = vmax.f32 %v1858_v24, 0.0  ;;  %v9447_v43 = vadd.f32 %v1873_v18, %v1865_v22  ;;  %v8621_v56 = vld [vmem:[#allocation6 + $0x700] ss:$24 sps:$4 sm:$0xff]   ;;  %v8629_v4 = vld [vmem:[#allocation6 + $0x6a4] ss:$24 sps:$4 sm:$0xff]   ;;  %v9207_v11 = vmov 0.0  }
 0x40b   :  { %v1868_v32 = vmax.f32 %v1860_v26, 0.0  ;;  %v9449_v44 = vadd.f32 %v1875_v36, %v1867_v34  ;;  %v8627_v5 = vld [vmem:[#allocation6 + $0x6a0] ss:$24 sps:$4 sm:$0xff]   ;;  %v8632_v7 = vld [vmem:[#allocation6 + $0x674] ss:$24 sps:$4 sm:$0xff]   ;;  %8064 = vmatprep.subr.bf16.mxu1 %v9207_v11 }
 0x40c   :  { %2497 = vmatprep.mubr.bf16.mxu0 %v1982_v42  ;;  %2550 = vmatprep.mubr.bf16.mxu1 %v1982_v42  ;;  %v9437_v35 = vadd.f32 %v1874_v25, %v1866_v28  ;;  %v8630_v8 = vld [vmem:[#allocation6 + $0x670] ss:$24 sps:$4 sm:$0xff]   ;;  %v8635_v9 = vld [vmem:[#allocation6 + $0x644] ss:$24 sps:$4 sm:$0xff]   ;;  %v8633_v10 = vld [vmem:[#allocation6 + $0x640] ss:$24 sps:$4 sm:$0xff]  }
 0x40d   :  { %2498 = vmatmul.mubr.bf16.vlgmr.msra.gmra.mxu0 %v9435_v31  ;;  %2551 = vmatmul.mubr.bf16.vlgmr.msra.gmra.mxu1 %v9435_v31  ;;  %v9441_v37 = vadd.f32 %v1876_v29, %v1868_v32  ;;  %v1983_v47 = vpack.c.bf16 %v9449_v44, %v9447_v43  ;;  %v2646_v12 = vld [vmem:[#allocation3 + $0x61] ss:$8 sm:$0x3]  ;;  %v2625_v46 = vld [vmem:[#allocation3 + $0x60] ss:$8 sm:$0x3] }
 0x40e   :  { %2572 = vmatpush1.bf16.msra.mxu0 %v8588_v27  ;;  %v2651_v16 = vrot.slane %v2646_v12, %v9288_v49  ;;  %v2655_v24 = vrot.slane %v2646_v12, %v9334_v39  ;;  %v2630_v28 = vrot.slane %v2625_v46, %v9288_v49  ;;  %v2634_v36 = vrot.slane %v2625_v46, %v9334_v39 }
 0x40f   :  { %v9445_v40 = vpack.c.bf16 %v9441_v37, %v9437_v35  ;;  %2573 = vmatprep.subr.bf16.mxu0 %v8593_v33 }
 0x411   :  { %2507 = vmatprep.mubr.bf16.mxu0 %v9445_v40  ;;  %2560 = vmatprep.mubr.bf16.mxu1 %v9445_v40 }
 0x412   :  { %2574 = vmatpush1.bf16.msra.mxu0 %v8591_v38 }
 0x413   :  { %2575 = vmatprep.subr.bf16.mxu0 %v8596_v41 }
 0x415   :  { %2508 = vmatmul.mubr.bf16.gmra.mxu0 %v1983_v47  ;;  %2561 = vmatmul.mubr.bf16.gmra.mxu1 %v1983_v47 }
 0x416   :  { %2576 = vmatpush1.bf16.msra.mxu0 %v8594_v45  ;;  %2603 = vmatprep.mubr.bf16.mxu0 %v1982_v42 }
 0x417   :  { %2577 = vmatprep.subr.bf16.mxu0 %v8599_v50  ;;  %8066 = vmatprep.mubr.msk.bf16.mxu1 %vm9208_vm7, %v9207_v11 }
 0x41a   :  { %2578 = vmatpush1.bf16.msra.mxu0 %v8597_v51 }
 0x41b   :  { %2579 = vmatprep.subr.bf16.mxu0 %v8602_v52 }
 0x41e   :  { %2580 = vmatpush1.bf16.msra.mxu0 %v8600_v53 }
 0x41f   :  { %2581 = vmatprep.subr.bf16.mxu0 %v8605_v54 }
 0x422   :  { %2582 = vmatpush1.bf16.msra.mxu0 %v8603_v6 }
 0x423   :  { %2583 = vmatprep.subr.bf16.mxu0 %v8608_v59 }
 0x426   :  { %2584 = vmatpush1.bf16.msra.mxu0 %v8606_v55 }
 0x427   :  { %2585 = vmatprep.subr.bf16.mxu0 %v8611_v57 }
 0x42a   :  { %2586 = vmatpush1.bf16.msra.mxu0 %v8609_v48 }
 0x42b   :  { %2587 = vmatprep.subr.bf16.mxu0 %v8614_v58 }
 0x42e   :  { %2588 = vmatpush2.bf16.msra.mxu0 %v8612_v60 }
 0x42f   :  { %2589 = vmatprep.subr.bf16.mxu0 %v8617_v62 }
 0x432   :  { %2590 = vmatpush2.bf16.msra.mxu0 %v8615_v63 }
 0x433   :  { %2591 = vmatprep.subr.bf16.mxu0 %v8620_v2 }
 0x436   :  { %2592 = vmatpush2.bf16.msra.mxu0 %v8618_v3 }
 0x437   :  { %2593 = vmatprep.subr.bf16.mxu0 %v8623_v61 }
 0x43a   :  { %2594 = vmatpush2.bf16.msra.mxu0 %v8621_v56 }
 0x43b   :  { %2595 = vmatprep.subr.bf16.mxu0 %v8626_v1 }
 0x43e   :  { %2596 = vmatpush2.bf16.msra.mxu0 %v8624_v30 }
 0x43f   :  { %2597 = vmatprep.subr.bf16.mxu0 %v8629_v4 }
 0x442   :  { %2598 = vmatpush2.bf16.msra.mxu0 %v8627_v5 }
 0x443   :  { %2599 = vmatprep.subr.bf16.mxu0 %v8632_v7  ;;  %v2667_v7 = vld [vmem:[#allocation3 + $0x62] ss:$8 sm:$0x3] }
 0x446   :  { %2600 = vmatpush2.bf16.msra.mxu0 %v8630_v8  ;;  %v2676_v8 = vrot.slane %v2667_v7, %v9334_v39 }
 0x447   :  { %2601 = vmatprep.subr.bf16.mxu0 %v8635_v9 }
 0x44a   :  { %2602 = vmatpush2.bf16.msra.mxu0 %v8633_v10  ;;  %v2672_v10 = vrot.slane %v2667_v7, %v9288_v49 }
 0x44b   :  { %8088 = vmatprep.subr.bf16.mxu0 %v9207_v11 }
 0x44d   :  { %2604 = vmatmul.mubr.bf16.vlgmr.msra.gmra.mxu0 %v9435_v31 }
 0x44e   :  { %2613 = vmatprep.mubr.bf16.mxu0 %v9445_v40 }
 0x455   :  { %2614 = vmatmul.mubr.bf16.gmra.mxu0 %v1983_v47 }
 0x456   :  { %8090 = vmatprep.mubr.msk.bf16.mxu0 %vm9208_vm7, %v9207_v11 }
 0x4cd   :  { %v2499_v13 = vpop.f32.mrf.mxu0  ;;  %v2552_v14 = vpop.f32.mrf.mxu1 }
 0x4ce   :  { %v2658_v42 = vadd.f32 %v2651_v16, %v2552_v14  ;;  %v2637_v58 = vadd.f32 %v2630_v28, %v2499_v13 }
 0x4cf   :  { %v2501_v19 = vpop.f32.mrf.mxu0  ;;  %v2554_v20 = vpop.f32.mrf.mxu1 }
 0x4d0   :  { %v2659_v32 = vadd.f32 %v2655_v24, %v2554_v20  ;;  %v2638_v60 = vadd.f32 %v2634_v36, %v2501_v19 }
 0x4d1   :  { %v2503_v26 = vpop.f32.mrf.mxu0  ;;  %v2556_v25 = vpop.f32.mrf.mxu1 }
 0x4d2   :  { %v2660_v27 = vadd.f32 %v2651_v16, %v2556_v25  ;;  %v2639_v54 = vadd.f32 %v2630_v28, %v2503_v26 }
 0x4d3   :  { %v2505_v29 = vpop.f32.mrf.mxu0  ;;  %v2558_v31 = vpop.f32.mrf.mxu1 }
 0x4d4   :  { %v9466_v33 = vpack.c.bf16 %v2660_v27, %v2658_v42  ;;  %v2661_v22 = vadd.f32 %v2655_v24, %v2558_v31  ;;  %v2640_v55 = vadd.f32 %v2634_v36, %v2505_v29  ;;  %v9481_v1 = vpack.c.bf16 %v2639_v54, %v2637_v58 }
 0x4d5   :  { %v2509_v34 = vpop.f32.mrf.mxu0  ;;  %v2562_v18 = vpop.f32.mrf.mxu1 }
 0x4d6   :  { %v9469_v38 = vpack.c.bf16 %v2661_v22, %v2659_v32  ;;  %v2641_v40 = vadd.f32 %v2630_v28, %v2509_v34  ;;  %v2662_v41 = vadd.f32 %v2651_v16, %v2562_v18  ;;  %v2695_v50 = vsel %vm2690_vm8, %v9466_v33, 0 }
 0x4d7   :  { %v2511_v45 = vpop.f32.mrf.mxu0  ;;  %v2564_v47 = vpop.f32.mrf.mxu1  ;;  %8065 = vmatpush3.bf16.xpose.msra.mxu1 %v2695_v50  ;;  %v2942_v30 = vpack.c.bf16 %v2640_v55, %v2638_v60 }
 0x4d8   :  { %v2642_v51 = vadd.f32 %v2634_v36, %v2511_v45  ;;  %v2663_v52 = vadd.f32 %v2655_v24, %v2564_v47  ;;  %v2949_v53 = vsel %vm2690_vm8, %v9469_v38, 0  ;;  %8070 = vmatprep.subr.bf16.mxu1 %v9207_v11 }
 0x4d9   :  { %v2513_v6 = vpop.f32.mrf.mxu0  ;;  %v2566_v59 = vpop.f32.mrf.mxu1  ;;  %8089 = vmatpush3.bf16.xpose.msra.mxu0 %v2949_v53 }
 0x4da   :  { %v2643_v57 = vadd.f32 %v2630_v28, %v2513_v6  ;;  %v2664_v48 = vadd.f32 %v2651_v16, %v2566_v59  ;;  %8100 = vmatprep.subr.bf16.mxu0 %v9207_v11 }
 0x4db   :  { %v2515_v62 = vpop.f32.mrf.mxu0  ;;  %v2568_v63 = vpop.f32.mrf.mxu1 }
 0x4dc   :  { %v9477_v2 = vpack.c.bf16 %v2643_v57, %v2641_v40  ;;  %v9479_v3 = vpack.c.bf16 %v2664_v48, %v2662_v41  ;;  %v2644_v61 = vadd.f32 %v2634_v36, %v2515_v62  ;;  %v2665_v56 = vadd.f32 %v2655_v24, %v2568_v63 }
 0x4de   :  { %v9483_v4 = vpack.c.bf16 %v2644_v61, %v2642_v51  ;;  %v9485_v5 = vpack.c.bf16 %v2665_v56, %v2663_v52  ;;  %8067 = vmatmul.mubr.msk.bf16.vlgmr.msra.gmra.mxu1 %vm2690_vm8, %v9481_v1  ;;  %v3202_v56 = vsel %vm2690_vm8, %v9479_v3, 0 }
 0x4df   :  { %8072 = vmatprep.mubr.msk.bf16.mxu1 %vm9208_vm7, %v9207_v11 }
 0x4e0   :  { %8091 = vmatmul.mubr.msk.bf16.vlgmr.msra.gmra.mxu0 %vm2690_vm8, %v2942_v30 }
 0x4e1   :  { %8102 = vmatprep.mubr.msk.bf16.mxu0 %vm9208_vm7, %v9207_v11 }
 0x50d   :  { %v2605_v9 = vpop.f32.mrf.mxu0 }
 0x50e   :  { %v2679_v16 = vadd.f32 %v2672_v10, %v2605_v9 }
 0x50f   :  { %v2607_v12 = vpop.f32.mrf.mxu0 }
 0x510   :  { %v2680_v13 = vadd.f32 %v2676_v8, %v2607_v12 }
 0x511   :  { %v2609_v14 = vpop.f32.mrf.mxu0 }
 0x512   :  { %v2681_v19 = vadd.f32 %v2672_v10, %v2609_v14 }
 0x513   :  { %v2611_v20 = vpop.f32.mrf.mxu0 }
 0x514   :  { %v9496_v46 = vpack.c.bf16 %v2681_v19, %v2679_v16  ;;  %v2682_v24 = vadd.f32 %v2676_v8, %v2611_v20 }
 0x515   :  { %v2615_v26 = vpop.f32.mrf.mxu0 }
 0x516   :  { %v9498_v25 = vpack.c.bf16 %v2682_v24, %v2680_v13  ;;  %v2683_v42 = vadd.f32 %v2672_v10, %v2615_v26  ;;  %8071 = vmatpush3.bf16.msra.mxu1 %v9496_v46 }
 0x517   :  { %v2617_v27 = vpop.f32.mrf.mxu0  ;;  %8076 = vmatprep.subr.bf16.mxu1 %v9207_v11 }
 0x518   :  { %v2684_v28 = vadd.f32 %v2676_v8, %v2617_v27 }
 0x519   :  { %v2619_v29 = vpop.f32.mrf.mxu0 }
 0x51a   :  { %v2685_v31 = vadd.f32 %v2672_v10, %v2619_v29 }
 0x51b   :  { %v2621_v32 = vpop.f32.mrf.mxu0 }
 0x51c   :  { %v9502_v22 = vpack.c.bf16 %v2685_v31, %v2683_v42  ;;  %v2686_v34 = vadd.f32 %v2676_v8, %v2621_v32 }
 0x51e   :  { %v9504_v18 = vpack.c.bf16 %v2686_v34, %v2684_v28 }
 0x59e   :  { %v2731_v36 = vpop.f32.mrf.mxu1 }
 0x59f   :  { %v2738_v40 = vsel %vm250_vm6, %v2731_v36, -inf }
 0x5a0   :  { %v9507_v41 = vpop.f32.mrf.mxu0  ;;  %2739 = vmax.xlane.f32.xlu0 %v2738_v40  ;;  %v8068_v45 = vpop.f32.mrf.mxu1 }
 0x5a2   :  { %v8092_v47 = vpop.f32.mrf.mxu0  ;;  %v2734_v50 = vpop.f32.mrf.mxu1 }
 0x5a3   :  { %v2741_v51 = vsel %vm250_vm6, %v2734_v50, -inf }
 0x5a4   :  { %v9510_v52 = vpop.f32.mrf.mxu0  ;;  %2742 = vmax.xlane.f32.xlu1 %v2741_v51  ;;  %v8069_v53 = vpop.f32.mrf.mxu1 }
 0x5a6   :  { %v8093_v54 = vpop.f32.mrf.mxu0 }
 0x5b5   :  { %2811 = vrot.lane.b32.xlu1 %v9466_v33, %s9209_s6 }
 0x5b9   :  { %3065 = vrot.lane.b32.xlu1 %v9469_v38, %s9209_s6 }
 0x5bd   :  { %3062 = vrot.lane.b32.xlu1 %v2942_v30, %s9209_s6 }
 0x5c1   :  { %3315 = vrot.lane.b32.xlu1 %v9477_v2, %s9209_s6 }
 0x5c5   :  { %3568 = vrot.lane.b32.xlu1 %v9483_v4, %s9209_s6 }
 0x629   :  { %v2740_v6 = vpop.xlane.xlu0 %2739 }
 0x62a   :  { %v2744_v59 = vsub.f32 %v2731_v36, %v2740_v6 }
 0x62c   :  { %v2746_v55 = vmul.f32 1.442695, %v2744_v59 }
 0x62d   :  { %v2743_v57 = vpop.xlane.xlu1 %2742 }
 0x62e   :  { %8956 = vpow2.f32 %v2746_v55  ;;  %v2745_v48 = vsub.f32 %v2734_v50, %v2743_v57 }
 0x630   :  { %v2748_v58 = vmul.f32 1.442695, %v2745_v48 }
 0x631   :  { %v2812_v60 = vpop.permute.xlu1 %2811 }
 0x632   :  { %8958 = vpow2.f32 %v2748_v58  ;;  %v2817_v24 = vsel %vm2690_vm8, %v2812_v60, 0 }
 0x635   :  { %v3066_v33 = vpop.permute.xlu1 %3065 }
 0x636   :  { %v3071_v38 = vsel %vm2690_vm8, %v3066_v33, 0 }
 0x637   :  { %8101 = vmatpush3.bf16.xpose.msra.mxu0 %v3071_v38 }
 0x638   :  { %8112 = vmatprep.subr.bf16.mxu0 %v9207_v11 }
 0x639   :  { %v3063_v61 = vpop.permute.xlu1 %3062 }
 0x63b   :  { %v8957_v62 = vpop.eup %8956 }
 0x63c   :  { %v2750_v63 = vsel %vm250_vm6, %v8957_v62, 0.0 }
 0x63d   :  { %2751 = vadd.xlane.f32.xlu0 %v2750_v63  ;;  %v3316_v19 = vpop.permute.xlu1 %3315  ;;  %v2992_v63 = vsel %vm250_vm6, %v9507_v41, -inf }
 0x63e   :  { %8103 = vmatmul.mubr.msk.bf16.vlgmr.msra.gmra.mxu0 %vm2690_vm8, %v3063_v61 }
 0x63f   :  { %v8959_v30 = vpop.eup %8958  ;;  %8113 = vmatpush3.bf16.xpose.msra.mxu0 %v3202_v56  ;;  %8114 = vmatprep.mubr.msk.bf16.mxu0 %vm9208_vm7, %v9207_v11 }
 0x640   :  { %v2753_v7 = vsel %vm250_vm6, %v8959_v30, 0.0  ;;  %8124 = vmatprep.subr.bf16.mxu0 %v9207_v11 }
 0x641   :  { %2754 = vadd.xlane.f32.xlu0 %v2753_v7  ;;  %v3569_v42 = vpop.permute.xlu1 %3568  ;;  %v2995_v7 = vsel %vm250_vm6, %v9510_v52, -inf }
 0x646   :  { %8115 = vmatmul.mubr.msk.bf16.vlgmr.msra.gmra.mxu0 %vm2690_vm8, %v9477_v2 }
 0x647   :  { %8126 = vmatprep.mubr.msk.bf16.mxu0 %vm9208_vm7, %v9207_v11 }
 0x657   :  { %2808 = vrot.lane.b32.xlu0 %v9481_v1, %s9209_s6 }
 0x65b   :  { %3318 = vrot.lane.b32.xlu0 %v9479_v3, %s9209_s6  ;;  %v3455_v3 = vsel %vm2690_vm8, %v9485_v5, 0 }
 0x65f   :  { %3571 = vrot.lane.b32.xlu0 %v9485_v5, %s9209_s6 }
 0x6c6   :  { %v2752_v8 = vpop.xlane.xlu0 %2751 }
 0x6c7   :  { %8960 = vrcp.f32 %v2752_v8 }
 0x6ca   :  { %v2755_v9 = vpop.xlane.xlu0 %2754 }
 0x6cb   :  { %8962 = vrcp.f32 %v2755_v9 }
 0x6ce   :  { %v2809_v10 = vpop.permute.xlu0 %2808 }
 0x6d2   :  { %v3319_v12 = vpop.permute.xlu0 %3318 }
 0x6d3   :  { %v3324_v2 = vsel %vm2690_vm8, %v3319_v12, 0 }
 0x6d4   :  { %8125 = vmatpush3.bf16.xpose.msra.mxu0 %v3324_v2  ;;  %v8961_v13 = vpop.eup %8960 }
 0x6d5   :  { %8136 = vmatprep.subr.bf16.mxu0 %v9207_v11  ;;  %v2758_v1 = vmul.f32 %v8961_v13, %v8957_v62 }
 0x6d6   :  { %v3572_v26 = vpop.permute.xlu0 %3571 }
 0x6d7   :  { %v3577_v5 = vsel %vm2690_vm8, %v3572_v26, 0 }
 0x6d8   :  { %v8963_v14 = vpop.eup %8962 }
 0x6d9   :  { %v2759_v16 = vmul.f32 %v8963_v14, %v8959_v30 }
 0x6db   :  { %8127 = vmatmul.mubr.msk.bf16.vlgmr.msra.gmra.mxu0 %vm2690_vm8, %v3316_v19  ;;  %v2760_v20 = vpack.c.bf16 %v2759_v16, %v2758_v1 }
 0x6dc   :  { %8137 = vmatpush3.bf16.xpose.msra.mxu0 %v3455_v3  ;;  %8138 = vmatprep.mubr.msk.bf16.mxu0 %vm9208_vm7, %v9207_v11 }
 0x6dd   :  { %8073 = vmatmul.mubr.msk.bf16.vlgmr.msra.gmra.mxu1 %vm250_vm6, %v2760_v20  ;;  %8148 = vmatprep.subr.bf16.mxu0 %v9207_v11 }
 0x6de   :  { %8077 = vmatpush3.bf16.xpose.msra.mxu1 %v2817_v24  ;;  %8078 = vmatprep.mubr.msk.bf16.mxu1 %vm9208_vm7, %v9207_v11 }
 0x6df   :  { %8082 = vmatprep.subr.bf16.mxu1 %v9207_v11 }
 0x6e3   :  { %8139 = vmatmul.mubr.msk.bf16.vlgmr.msra.gmra.mxu0 %vm2690_vm8, %v9483_v4 }
 0x6e4   :  { %8149 = vmatpush3.bf16.xpose.msra.mxu0 %v3577_v5  ;;  %8150 = vmatprep.mubr.msk.bf16.mxu0 %vm9208_vm7, %v9207_v11 }
 0x6e5   :  { %8079 = vmatmul.mubr.msk.bf16.vlgmr.msra.gmra.mxu1 %vm2690_vm8, %v2809_v10 }
 0x6e6   :  { %8084 = vmatprep.mubr.msk.bf16.mxu1 %vm9208_vm7, %v9207_v11 }
 0x6eb   :  { %8151 = vmatmul.mubr.msk.bf16.vlgmr.msra.gmra.mxu0 %vm2690_vm8, %v3569_v42 }
 0x6fe   :  { %v3107_v27 = vpop.f32.mrf.mxu0 }
 0x6ff   :  { %v3114_v8 = vsel %vm250_vm6, %v3107_v27, -inf }
 0x700   :  { %v8104_v28 = vpop.f32.mrf.mxu0 }
 0x702   :  { %v3110_v29 = vpop.f32.mrf.mxu0 }
 0x703   :  { %v3117_v12 = vsel %vm250_vm6, %v3110_v29, -inf }
 0x704   :  { %v8105_v31 = vpop.f32.mrf.mxu0 }
 0x706   :  { %v9563_v32 = vpop.f32.mrf.mxu0 }
 0x708   :  { %v8116_v34 = vpop.f32.mrf.mxu0 }
 0x70a   :  { %v9565_v4 = vpop.f32.mrf.mxu0 }
 0x70c   :  { %v8117_v36 = vpop.f32.mrf.mxu0 }
 0x79b   :  { %v9567_v40 = vpop.f32.mrf.mxu0 }
 0x79d   :  { %v2798_v45 = vpop.f32.mrf.mxu1  ;;  %v8128_v47 = vpop.f32.mrf.mxu0 }
 0x79e   :  { %2805 = vst.msk [vmem:[#allocation2] sm:$0xff] %vm2690_vm8, %v2798_v45 }
 0x79f   :  { %v8074_v50 = vpop.f32.mrf.mxu1  ;;  %v9570_v51 = vpop.f32.mrf.mxu0 }
 0x7a1   :  { %v2801_v53 = vpop.f32.mrf.mxu1  ;;  %v8129_v54 = vpop.f32.mrf.mxu0 }
 0x7a2   :  { %2806 = vst.msk [vmem:[#allocation2 + $0x10] sm:$0xff] %vm2690_vm8, %v2801_v53 }
 0x7a3   :  { %v8075_v6 = vpop.f32.mrf.mxu1  ;;  %v9573_v59 = vpop.f32.mrf.mxu0 }
 0x7a5   :  { %v2853_v55 = vpop.f32.mrf.mxu1  ;;  %v8140_v57 = vpop.f32.mrf.mxu0 }
 0x7a6   :  { %v2860_v48 = vsel %vm250_vm6, %v2853_v55, -inf }
 0x7a7   :  { %2861 = vmax.xlane.f32.xlu0 %v2860_v48  ;;  %v8080_v58 = vpop.f32.mrf.mxu1  ;;  %v9576_v60 = vpop.f32.mrf.mxu0 }
 0x7a9   :  { %v2856_v33 = vpop.f32.mrf.mxu1  ;;  %v8141_v38 = vpop.f32.mrf.mxu0 }
 0x7aa   :  { %v2863_v62 = vsel %vm250_vm6, %v2856_v33, -inf  ;;  %v3248_v38 = vsel %vm250_vm6, %v9565_v4, -inf }
 0x7ab   :  { %2864 = vmax.xlane.f32.xlu1 %v2863_v62  ;;  %v8081_v61 = vpop.f32.mrf.mxu1  ;;  %2993 = vmax.xlane.f32.xlu0 %v2992_v63  ;;  %v9581_v56 = vpop.f32.mrf.mxu0  ;;  %v3367_v62 = vsel %vm250_vm6, %v9567_v40, -inf  ;;  %v3370_v63 = vsel %vm250_vm6, %v9570_v51, -inf }
 0x7ac   :  { %v3501_v61 = vsel %vm250_vm6, %v9576_v60, -inf }
 0x7ad   :  { %v8152_v30 = vpop.f32.mrf.mxu0 }
 0x7ae   :  { %v3620_v30 = vsel %vm250_vm6, %v9581_v56, -inf }
 0x7af   :  { %2996 = vmax.xlane.f32.xlu0 %v2995_v7  ;;  %3115 = vmax.xlane.f32.xlu1 %v3114_v8  ;;  %v9586_v9 = vpop.f32.mrf.mxu0 }
 0x7b0   :  { %v3623_v7 = vsel %vm250_vm6, %v9586_v9, -inf }
 0x7b1   :  { %v8153_v10 = vpop.f32.mrf.mxu0 }
 0x7b3   :  { %3118 = vmax.xlane.f32.xlu0 %v3117_v12 }
 0x830   :  { %v2862_v2 = vpop.xlane.xlu0 %2861 }
 0x831   :  { %v2866_v13 = vsub.f32 %v2853_v55, %v2862_v2 }
 0x833   :  { %v2868_v14 = vmul.f32 1.442695, %v2866_v13 }
 0x834   :  { %v2865_v1 = vpop.xlane.xlu1 %2864  ;;  %v2994_v16 = vpop.xlane.xlu0 %2993 }
 0x835   :  { %8964 = vpow2.f32 %v2868_v14  ;;  %v2867_v19 = vsub.f32 %v2856_v33, %v2865_v1  ;;  %v2998_v3 = vsub.f32 %v9507_v41, %v2994_v16  ;;  %v3245_v33 = vsel %vm250_vm6, %v9563_v32, -inf }
 0x837   :  { %v2870_v20 = vmul.f32 1.442695, %v2867_v19  ;;  %v3000_v24 = vmul.f32 1.442695, %v2998_v3 }
 0x838   :  { %v2997_v26 = vpop.xlane.xlu0 %2996  ;;  %v3116_v5 = vpop.xlane.xlu1 %3115 }
 0x839   :  { %8966 = vpow2.f32 %v2870_v20  ;;  %v2999_v42 = vsub.f32 %v9510_v52, %v2997_v26  ;;  %v3120_v28 = vsub.f32 %v3107_v27, %v3116_v5 }
 0x83a   :  { %8968 = vpow2.f32 %v3000_v24 }
 0x83b   :  { %v3002_v31 = vmul.f32 1.442695, %v2999_v42  ;;  %v3122_v34 = vmul.f32 1.442695, %v3120_v28 }
 0x83c   :  { %v3119_v36 = vpop.xlane.xlu0 %3118 }
 0x83d   :  { %8970 = vpow2.f32 %v3002_v31  ;;  %v3121_v45 = vsub.f32 %v3110_v29, %v3119_v36 }
 0x83e   :  { %8972 = vpow2.f32 %v3122_v34 }
 0x83f   :  { %v3124_v47 = vmul.f32 1.442695, %v3121_v45 }
 0x841   :  { %8974 = vpow2.f32 %v3124_v47 }
 0x842   :  { %v8965_v50 = vpop.eup %8964 }
 0x843   :  { %v2872_v41 = vsel %vm250_vm6, %v8965_v50, 0.0 }
 0x844   :  { %2873 = vadd.xlane.f32.xlu1 %v2872_v41 }
 0x846   :  { %v8967_v53 = vpop.eup %8966 }
 0x847   :  { %v8969_v54 = vpop.eup %8968  ;;  %v2875_v6 = vsel %vm250_vm6, %v8967_v53, 0.0 }
 0x848   :  { %v3004_v52 = vsel %vm250_vm6, %v8969_v54, 0.0  ;;  %2876 = vadd.xlane.f32.xlu0 %v2875_v6 }
 0x849   :  { %3005 = vadd.xlane.f32.xlu1 %v3004_v52 }
 0x84a   :  { %v8971_v27 = vpop.eup %8970 }
 0x84b   :  { %v9594_v55 = vpop.eup %8972  ;;  %v3007_v29 = vsel %vm250_vm6, %v8971_v27, 0.0 }
 0x84c   :  { %v3126_v57 = vsel %vm250_vm6, %v9594_v55, 0.0  ;;  %3008 = vadd.xlane.f32.xlu0 %v3007_v29 }
 0x84d   :  { %3127 = vadd.xlane.f32.xlu1 %v3126_v57 }
 0x84e   :  { %v8975_v48 = vpop.eup %8974 }
 0x84f   :  { %v3129_v58 = vsel %vm250_vm6, %v8975_v48, 0.0 }
 0x850   :  { %3130 = vadd.xlane.f32.xlu0 %v3129_v58 }
 0x85e   :  { %2884 = vrot.lane.b32.xlu1 %v9496_v46, %s9209_s6  ;;  %v3498_v46 = vsel %vm250_vm6, %v9573_v59, -inf }
 0x866   :  { %3138 = vrot.lane.b32.xlu0 %v9498_v25, %s9209_s6 }
 0x882   :  { %3246 = vmax.xlane.f32.xlu1 %v3245_v33 }
 0x885   :  { %3249 = vmax.xlane.f32.xlu0 %v3248_v38 }
 0x886   :  { %3368 = vmax.xlane.f32.xlu1 %v3367_v62 }
 0x889   :  { %3371 = vmax.xlane.f32.xlu0 %v3370_v63 }
 0x88a   :  { %3499 = vmax.xlane.f32.xlu1 %v3498_v46 }
 0x88d   :  { %3502 = vmax.xlane.f32.xlu0 %v3501_v61 }
 0x88e   :  { %3621 = vmax.xlane.f32.xlu1 %v3620_v30 }
 0x891   :  { %3624 = vmax.xlane.f32.xlu0 %v3623_v7 }
 0x8cd   :  { %v2874_v8 = vpop.xlane.xlu1 %2873 }
 0x8ce   :  { %8976 = vrcp.f32 %v2874_v8 }
 0x8d1   :  { %v2877_v10 = vpop.xlane.xlu0 %2876 }
 0x8d2   :  { %v3006_v12 = vpop.xlane.xlu1 %3005  ;;  %8978 = vrcp.f32 %v2877_v10 }
 0x8d5   :  { %v3009_v2 = vpop.xlane.xlu0 %3008 }
 0x8d6   :  { %v3128_v13 = vpop.xlane.xlu1 %3127  ;;  %8980 = vrcp.f32 %v3009_v2 }
 0x8d7   :  { %8982 = vrcp.f32 %v3006_v12 }
 0x8d9   :  { %v3131_v1 = vpop.xlane.xlu0 %3130 }
 0x8da   :  { %v2885_v14 = vpop.permute.xlu1 %2884  ;;  %8984 = vrcp.f32 %v3131_v1 }
 0x8db   :  { %8083 = vmatpush3.bf16.msra.mxu1 %v2885_v14  ;;  %v8977_v16 = vpop.eup %8976  ;;  %8986 = vrcp.f32 %v3128_v13 }
 0x8dc   :  { %8094 = vmatprep.subr.bf16.mxu1 %v9207_v11  ;;  %v2880_v3 = vmul.f32 %v8977_v16, %v8965_v50 }
 0x8dd   :  { %v3139_v36 = vpop.permute.xlu0 %3138 }
 0x8df   :  { %v8979_v19 = vpop.eup %8978 }
 0x8e0   :  { %v2881_v20 = vmul.f32 %v8979_v19, %v8967_v53 }
 0x8e2   :  { %v2882_v24 = vpack.c.bf16 %v2881_v20, %v2880_v3 }
 0x8e3   :  { %v8981_v26 = vpop.eup %8980 }
 0x8e4   :  { %8085 = vmatmul.mubr.msk.bf16.vlgmr.msra.gmra.mxu1 %vm250_vm6, %v2882_v24  ;;  %v8983_v5 = vpop.eup %8982  ;;  %v3013_v42 = vmul.f32 %v8981_v26, %v8971_v27 }
 0x8e5   :  { %8095 = vmatpush3.bf16.msra.mxu1 %v9498_v25  ;;  %8096 = vmatprep.mubr.msk.bf16.mxu1 %vm9208_vm7, %v9207_v11  ;;  %v3012_v28 = vmul.f32 %v8983_v5, %v8969_v54  ;;  %v8636_v5 = vld [vmem:[#allocation6 + $0x900] ss:$24 sps:$4 sm:$0xff]  }
 0x8e6   :  { %8106 = vmatprep.subr.bf16.mxu1 %v9207_v11 }
 0x8e7   :  { %v3014_v31 = vpack.c.bf16 %v3013_v42, %v3012_v28  ;;  %v8985_v34 = vpop.eup %8984  ;;  %v8638_v42 = vld [vmem:[#allocation6 + $0x904] ss:$24 sps:$4 sm:$0xff]   ;;  %v8641_v28 = vld [vmem:[#allocation6 + $0x8d4] ss:$24 sps:$4 sm:$0xff]  }
 0x8e8   :  { %v8987_v45 = vpop.eup %8986  ;;  %v3135_v25 = vmul.f32 %v8985_v34, %v8975_v48  ;;  %3918 = vmatprep.subr.bf16.mxu0 %v8638_v42  ;;  %v8644_v34 = vld [vmem:[#allocation6 + $0x8a4] ss:$24 sps:$4 sm:$0xff]   ;;  %v8681_v42 = vld [vmem:[#allocation6 + $0x930] ss:$24 sps:$4 sm:$0xff]  }
 0x8e9   :  { %v3134_v47 = vmul.f32 %v8987_v45, %v9594_v55  ;;  %3919 = vmatpush1.bf16.msra.mxu0 %v8636_v5  ;;  %v8647_v45 = vld [vmem:[#allocation6 + $0x874] ss:$24 sps:$4 sm:$0xff]  }
 0x8ea   :  { %3920 = vmatprep.subr.bf16.mxu0 %v8641_v28 }
 0x8eb   :  { %v3136_v50 = vpack.c.bf16 %v3135_v25, %v3134_v47  ;;  %v8645_v25 = vld [vmem:[#allocation6 + $0x870] ss:$24 sps:$4 sm:$0xff]   ;;  %v8650_v47 = vld [vmem:[#allocation6 + $0x844] ss:$24 sps:$4 sm:$0xff]  }
 0x8ec   :  { %8097 = vmatmul.mubr.msk.bf16.vlgmr.msra.gmra.mxu1 %vm250_vm6, %v3014_v31  ;;  %v8639_v31 = vld [vmem:[#allocation6 + $0x8d0] ss:$24 sps:$4 sm:$0xff]  }
 0x8ed   :  { %8107 = vmatpush3.bf16.msra.mxu1 %v3139_v36  ;;  %8108 = vmatprep.mubr.msk.bf16.mxu1 %vm9208_vm7, %v9207_v11  ;;  %v8642_v36 = vld [vmem:[#allocation6 + $0x8a0] ss:$24 sps:$4 sm:$0xff]  }
 0x8ee   :  { %8118 = vmatprep.subr.bf16.mxu1 %v9207_v11  ;;  %3921 = vmatpush1.bf16.msra.mxu0 %v8639_v31 }
 0x8ef   :  { %3922 = vmatprep.subr.bf16.mxu0 %v8644_v34 }
 0x8f2   :  { %3923 = vmatpush1.bf16.msra.mxu0 %v8642_v36 }
 0x8f3   :  { %3924 = vmatprep.subr.bf16.mxu0 %v8647_v45 }
 0x8f4   :  { %8109 = vmatmul.mubr.msk.bf16.vlgmr.msra.gmra.mxu1 %vm250_vm6, %v3136_v50  ;;  %v8653_v50 = vld [vmem:[#allocation6 + $0x814] ss:$24 sps:$4 sm:$0xff]  }
 0x8f5   :  { %8119 = vmatpush3.bf16.msra.mxu1 %v9502_v22  ;;  %8120 = vmatprep.mubr.msk.bf16.mxu1 %vm9208_vm7, %v9207_v11 }
 0x8f6   :  { %8130 = vmatprep.subr.bf16.mxu1 %v9207_v11  ;;  %3925 = vmatpush1.bf16.msra.mxu0 %v8645_v25 }
 0x8f7   :  { %3926 = vmatprep.subr.bf16.mxu0 %v8650_v47 }
 0x90b   :  { %v3247_v41 = vpop.xlane.xlu1 %3246 }
 0x90c   :  { %v3251_v53 = vsub.f32 %v9563_v32, %v3247_v41  ;;  %v8651_v41 = vld [vmem:[#allocation6 + $0x810] ss:$24 sps:$4 sm:$0xff]  }
 0x90e   :  { %v3253_v54 = vmul.f32 1.442695, %v3251_v53  ;;  %v3250_v6 = vpop.xlane.xlu0 %3249  ;;  %v8656_v53 = vld [vmem:[#allocation6 + $0x7e4] ss:$24 sps:$4 sm:$0xff]  }
 0x90f   :  { %v3252_v52 = vsub.f32 %v9565_v4, %v3250_v6  ;;  %v3369_v27 = vpop.xlane.xlu1 %3368  ;;  %v8659_v6 = vld [vmem:[#allocation6 + $0x7b4] ss:$24 sps:$4 sm:$0xff]  }
 0x910   :  { %8988 = vpow2.f32 %v3253_v54  ;;  %v3373_v55 = vsub.f32 %v9567_v40, %v3369_v27  ;;  %v8654_v54 = vld [vmem:[#allocation6 + $0x7e0] ss:$24 sps:$4 sm:$0xff]  }
 0x911   :  { %v3255_v29 = vmul.f32 1.442695, %v3252_v52  ;;  %v8657_v52 = vld [vmem:[#allocation6 + $0x7b0] ss:$24 sps:$4 sm:$0xff]   ;;  %v8660_v27 = vld [vmem:[#allocation6 + $0xa80] ss:$24 sps:$4 sm:$0xff]  }
 0x912   :  { %v3375_v57 = vmul.f32 1.442695, %v3373_v55  ;;  %v3372_v48 = vpop.xlane.xlu0 %3371  ;;  %v8662_v55 = vld [vmem:[#allocation6 + $0xa84] ss:$24 sps:$4 sm:$0xff]  }
 0x913   :  { %8990 = vpow2.f32 %v3255_v29  ;;  %v3374_v58 = vsub.f32 %v9570_v51, %v3372_v48  ;;  %v3500_v33 = vpop.xlane.xlu1 %3499  ;;  %v8665_v29 = vld [vmem:[#allocation6 + $0xa54] ss:$24 sps:$4 sm:$0xff]   ;;  %v8668_v48 = vld [vmem:[#allocation6 + $0xa24] ss:$24 sps:$4 sm:$0xff]  }
 0x914   :  { %8992 = vpow2.f32 %v3375_v57  ;;  %v3504_v38 = vsub.f32 %v9573_v59, %v3500_v33  ;;  %v8663_v57 = vld [vmem:[#allocation6 + $0xa50] ss:$24 sps:$4 sm:$0xff]   ;;  %v8671_v33 = vld [vmem:[#allocation6 + $0x9f4] ss:$24 sps:$4 sm:$0xff]  }
 0x915   :  { %v3377_v62 = vmul.f32 1.442695, %v3374_v58  ;;  %v8666_v58 = vld [vmem:[#allocation6 + $0xa20] ss:$24 sps:$4 sm:$0xff]  }
 0x916   :  { %v3506_v32 = vmul.f32 1.442695, %v3504_v38  ;;  %v3503_v63 = vpop.xlane.xlu0 %3502  ;;  %v8669_v38 = vld [vmem:[#allocation6 + $0x9f0] ss:$24 sps:$4 sm:$0xff]  }
 0x917   :  { %8994 = vpow2.f32 %v3377_v62  ;;  %v3505_v4 = vsub.f32 %v9576_v60, %v3503_v63  ;;  %v3622_v46 = vpop.xlane.xlu1 %3621 }
 0x918   :  { %8996 = vpow2.f32 %v3506_v32  ;;  %v3626_v40 = vsub.f32 %v9581_v56, %v3622_v46  ;;  %v8672_v46 = vld [vmem:[#allocation6 + $0x9c0] ss:$24 sps:$4 sm:$0xff]  }
 0x919   :  { %v3508_v61 = vmul.f32 1.442695, %v3505_v4 }
 0x91a   :  { %v3628_v30 = vmul.f32 1.442695, %v3626_v40  ;;  %v3625_v7 = vpop.xlane.xlu0 %3624  ;;  %v8674_v40 = vld [vmem:[#allocation6 + $0x9c4] ss:$24 sps:$4 sm:$0xff]  }
 0x91b   :  { %8998 = vpow2.f32 %v3508_v61  ;;  %v3627_v51 = vsub.f32 %v9586_v9, %v3625_v7 }
 0x91c   :  { %9000 = vpow2.f32 %v3628_v30 }
 0x91d   :  { %v9644_v8 = vpop.eup %8988  ;;  %v3630_v59 = vmul.f32 1.442695, %v3627_v51 }
 0x91e   :  { %v3257_v10 = vsel %vm250_vm6, %v9644_v8, 0.0 }
 0x91f   :  { %9002 = vpow2.f32 %v3630_v59  ;;  %3258 = vadd.xlane.f32.xlu1 %v3257_v10  ;;  %v8675_v59 = vld [vmem:[#allocation6 + $0x990] ss:$24 sps:$4 sm:$0xff]   ;;  %v8677_v10 = vld [vmem:[#allocation6 + $0x994] ss:$24 sps:$4 sm:$0xff]  }
 0x920   :  { %v9648_v60 = vpop.eup %8990 }
 0x921   :  { %v9650_v12 = vpop.eup %8992  ;;  %v3260_v56 = vsel %vm250_vm6, %v9648_v60, 0.0 }
 0x922   :  { %v3379_v2 = vsel %vm250_vm6, %v9650_v12, 0.0  ;;  %3261 = vadd.xlane.f32.xlu0 %v3260_v56 }
 0x923   :  { %3380 = vadd.xlane.f32.xlu1 %v3379_v2 }
 0x924   :  { %v9656_v9 = vpop.eup %8994 }
 0x925   :  { %v9658_v13 = vpop.eup %8996  ;;  %v3382_v14 = vsel %vm250_vm6, %v9656_v9, 0.0 }
 0x926   :  { %v3510_v1 = vsel %vm250_vm6, %v9658_v13, 0.0  ;;  %3383 = vadd.xlane.f32.xlu0 %v3382_v14 }
 0x927   :  { %3511 = vadd.xlane.f32.xlu1 %v3510_v1  ;;  %v8678_v1 = vld [vmem:[#allocation6 + $0x960] ss:$24 sps:$4 sm:$0xff]  }
 0x928   :  { %v9664_v16 = vpop.eup %8998 }
 0x929   :  { %v9666_v19 = vpop.eup %9000  ;;  %v3513_v3 = vsel %vm250_vm6, %v9664_v16, 0.0 }
 0x92a   :  { %v3632_v20 = vsel %vm250_vm6, %v9666_v19, 0.0  ;;  %3514 = vadd.xlane.f32.xlu0 %v3513_v3  ;;  %v8680_v3 = vld [vmem:[#allocation6 + $0x964] ss:$24 sps:$4 sm:$0xff]  }
 0x92b   :  { %3633 = vadd.xlane.f32.xlu1 %v3632_v20  ;;  %v8683_v20 = vld [vmem:[#allocation6 + $0x934] ss:$24 sps:$4 sm:$0xff]  }
 0x92c   :  { %v9672_v24 = vpop.eup %9002 }
 0x92d   :  { %v3635_v26 = vsel %vm250_vm6, %v9672_v24, 0.0 }
 0x92e   :  { %3636 = vadd.xlane.f32.xlu0 %v3635_v26 }
 0x93c   :  { %3391 = vrot.lane.b32.xlu1 %v9502_v22, %s9209_s6  ;;  %v8648_v22 = vld [vmem:[#allocation6 + $0x840] ss:$24 sps:$4 sm:$0xff]  }
 0x93d   :  { %3927 = vmatpush1.bf16.msra.mxu0 %v8648_v22 }
 0x93e   :  { %3928 = vmatprep.subr.bf16.mxu0 %v8653_v50 }
 0x941   :  { %3929 = vmatpush1.bf16.msra.mxu0 %v8651_v41 }
 0x942   :  { %3930 = vmatprep.subr.bf16.mxu0 %v8656_v53 }
 0x944   :  { %3644 = vrot.lane.b32.xlu0 %v9504_v18, %s9209_s6 }
 0x945   :  { %3931 = vmatpush1.bf16.msra.mxu0 %v8654_v54 }
 0x946   :  { %3932 = vmatprep.subr.bf16.mxu0 %v8659_v6 }
 0x949   :  { %3933 = vmatpush1.bf16.msra.mxu0 %v8657_v52 }
 0x94a   :  { %3934 = vmatprep.subr.bf16.mxu0 %v8662_v55 }
 0x94d   :  { %3935 = vmatpush2.bf16.msra.mxu0 %v8660_v27 }
 0x94e   :  { %3936 = vmatprep.subr.bf16.mxu0 %v8665_v29 }
 0x951   :  { %3937 = vmatpush2.bf16.msra.mxu0 %v8663_v57 }
 0x952   :  { %3938 = vmatprep.subr.bf16.mxu0 %v8668_v48 }
 0x955   :  { %3939 = vmatpush2.bf16.msra.mxu0 %v8666_v58 }
 0x956   :  { %3940 = vmatprep.subr.bf16.mxu0 %v8671_v33 }
 0x959   :  { %3941 = vmatpush2.bf16.msra.mxu0 %v8669_v38 }
 0x95a   :  { %3942 = vmatprep.subr.bf16.mxu0 %v8674_v40 }
 0x95d   :  { %3943 = vmatpush2.bf16.msra.mxu0 %v8672_v46 }
 0x95e   :  { %3944 = vmatprep.subr.bf16.mxu0 %v8677_v10 }
 0x961   :  { %3945 = vmatpush2.bf16.msra.mxu0 %v8675_v59 }
 0x962   :  { %3946 = vmatprep.subr.bf16.mxu0 %v8680_v3 }
 0x965   :  { %3947 = vmatpush2.bf16.msra.mxu0 %v8678_v1 }
 0x966   :  { %3948 = vmatprep.subr.bf16.mxu0 %v8683_v20 }
 0x969   :  { %3949 = vmatpush2.bf16.msra.mxu0 %v8681_v42 }
 0x9a4   :  { %v2924_v62 = vpop.f32.mrf.mxu1 }
 0x9a5   :  { %2933 = vrot.lane.b32.xlu0 %v2924_v62, %s9209_s6 }
 0x9a6   :  { %v8086_v32 = vpop.f32.mrf.mxu1 }
 0x9a8   :  { %v3259_v63 = vpop.xlane.xlu1 %3258  ;;  %v2927_v4 = vpop.f32.mrf.mxu1 }
 0x9a9   :  { %9004 = vrcp.f32 %v3259_v63 }
 0x9aa   :  { %v8087_v61 = vpop.f32.mrf.mxu1 }
 0x9ab   :  { %v3262_v30 = vpop.xlane.xlu0 %3261 }
 0x9ac   :  { %v3381_v7 = vpop.xlane.xlu1 %3380  ;;  %9006 = vrcp.f32 %v3262_v30  ;;  %v3052_v51 = vpop.f32.mrf.mxu1 }
 0x9ad   :  { %3059 = vst.msk [vmem:[#allocation2 + $0x8] sm:$0xff] %vm2690_vm8, %v3052_v51 }
 0x9ae   :  { %v8098_v56 = vpop.f32.mrf.mxu1 }
 0x9af   :  { %v3384_v2 = vpop.xlane.xlu0 %3383 }
 0x9b0   :  { %9008 = vrcp.f32 %v3384_v2  ;;  %v3055_v14 = vpop.f32.mrf.mxu1  ;;  %v3512_v26 = vpop.xlane.xlu1 %3511 }
 0x9b1   :  { %3060 = vst.msk [vmem:[#allocation2 + $0x18] sm:$0xff] %vm2690_vm8, %v3055_v14  ;;  %9010 = vrcp.f32 %v3381_v7 }
 0x9b2   :  { %v8099_v5 = vpop.f32.mrf.mxu1 }
 0x9b3   :  { %v3515_v31 = vpop.xlane.xlu0 %3514 }
 0x9b4   :  { %v3178_v28 = vpop.f32.mrf.mxu1  ;;  %v3634_v45 = vpop.xlane.xlu1 %3633  ;;  %9012 = vrcp.f32 %v3515_v31 }
 0x9b5   :  { %3187 = vrot.lane.b32.xlu1 %v3178_v28, %s9209_s6  ;;  %9014 = vrcp.f32 %v3512_v26 }
 0x9b6   :  { %v8110_v34 = vpop.f32.mrf.mxu1  ;;  %v9005_v36 = vpop.eup %9004 }
 0x9b7   :  { %v3265_v50 = vmul.f32 %v9005_v36, %v9644_v8  ;;  %v3637_v6 = vpop.xlane.xlu0 %3636  ;;  %v3746_v36 = vld [vmem:[#allocation3 + $0x63] ss:$8 sm:$0x3] }
 0x9b8   :  { %v3181_v25 = vpop.f32.mrf.mxu1  ;;  %v3392_v52 = vpop.permute.xlu1 %3391  ;;  %9016 = vrcp.f32 %v3637_v6 }
 0x9b9   :  { %v9007_v47 = vpop.eup %9006  ;;  %3189 = vrot.lane.b32.xlu1 %v3181_v25, %s9209_s6  ;;  %9018 = vrcp.f32 %v3634_v45  ;;  %v9720_v45 = vrot.slane %v3746_v36, %v9288_v49  ;;  %v9723_v25 = vrot.slane %v3746_v36, %v9334_v39  ;;  %v8699_v36 = vld [vmem:[#allocation6 + $0x7b8] ss:$24 sps:$4 sm:$0xff]  }
 0x9ba   :  { %v8111_v22 = vpop.f32.mrf.mxu1  ;;  %v3266_v41 = vmul.f32 %v9007_v47, %v9648_v60 }
 0x9bb   :  { %v3645_v38 = vpop.permute.xlu0 %3644 }
 0x9bc   :  { %v3267_v53 = vpack.c.bf16 %v3266_v41, %v3265_v50 }
 0x9bd   :  { %v9009_v54 = vpop.eup %9008  ;;  %2935 = vrot.lane.b32.xlu1 %v2927_v4, %s9209_s6 }
 0x9be   :  { %8121 = vmatmul.mubr.msk.bf16.vlgmr.msra.gmra.mxu1 %vm250_vm6, %v3267_v53  ;;  %v9011_v27 = vpop.eup %9010  ;;  %v3388_v8 = vmul.f32 %v9009_v54, %v9656_v9 }
 0x9bf   :  { %8131 = vmatpush3.bf16.msra.mxu1 %v3392_v52  ;;  %8132 = vmatprep.mubr.msk.bf16.mxu1 %vm9208_vm7, %v9207_v11  ;;  %v3387_v60 = vmul.f32 %v9011_v27, %v9650_v12 }
 0x9c0   :  { %8142 = vmatprep.subr.bf16.mxu1 %v9207_v11 }
 0x9c1   :  { %v3389_v55 = vpack.c.bf16 %v3388_v8, %v3387_v60  ;;  %v9013_v29 = vpop.eup %9012 }
 0x9c2   :  { %v9015_v57 = vpop.eup %9014  ;;  %v3519_v48 = vmul.f32 %v9013_v29, %v9664_v16 }
 0x9c3   :  { %v3518_v58 = vmul.f32 %v9015_v57, %v9658_v13 }
 0x9c5   :  { %v3520_v9 = vpack.c.bf16 %v3519_v48, %v3518_v58  ;;  %v9017_v33 = vpop.eup %9016 }
 0x9c6   :  { %8133 = vmatmul.mubr.msk.bf16.vlgmr.msra.gmra.mxu1 %vm250_vm6, %v3389_v55  ;;  %v9019_v12 = vpop.eup %9018 }
 0x9c7   :  { %8143 = vmatpush3.bf16.msra.mxu1 %v9504_v18  ;;  %8144 = vmatprep.mubr.msk.bf16.mxu1 %vm9208_vm7, %v9207_v11  ;;  %v3641_v18 = vmul.f32 %v9017_v33, %v9672_v24  ;;  %v3640_v62 = vmul.f32 %v9019_v12, %v9666_v19 }
 0x9c8   :  { %8154 = vmatprep.subr.bf16.mxu1 %v9207_v11 }
 0x9c9   :  { %v3642_v32 = vpack.c.bf16 %v3641_v18, %v3640_v62  ;;  %v8684_v18 = vld [vmem:[#allocation6 + $0xa88] ss:$24 sps:$4 sm:$0xff]  }
 0x9ce   :  { %8145 = vmatmul.mubr.msk.bf16.vlgmr.msra.gmra.mxu1 %vm250_vm6, %v3520_v9 }
 0x9cf   :  { %8155 = vmatpush3.bf16.msra.mxu1 %v3645_v38  ;;  %8156 = vmatprep.mubr.msk.bf16.mxu1 %vm9208_vm7, %v9207_v11 }
 0x9d0   :  { %7970 = vmatprep.subr.bf16.mxu1 %v8684_v18 }
 0x9d6   :  { %8157 = vmatmul.mubr.msk.bf16.vlgmr.msra.gmra.mxu1 %vm250_vm6, %v3642_v32 }
 0xa17   :  { %v2934_v16 = vpop.permute.xlu0 %2933 }
 0xa18   :  { %2940 = vst.msk [vmem:[#allocation2] sm:$0xff] %vm2939_vm9, %v2934_v16 }
 0xa1f   :  { %v3733_v19 = vld [vmem:[#allocation2] sm:$0xff] }
 0xa27   :  { %v3188_v13 = vpop.permute.xlu1 %3187 }
 0xa28   :  { %3193 = vst.msk [vmem:[#allocation2 + $0x8] sm:$0xff] %vm2939_vm9, %v3188_v13 }
 0xa2b   :  { %v3190_v63 = vpop.permute.xlu1 %3189 }
 0xa2c   :  { %3194 = vst.msk [vmem:[#allocation2 + $0x18] sm:$0xff] %vm2939_vm9, %v3190_v63 }
 0xa2f   :  { %v2936_v4 = vpop.permute.xlu1 %2935  ;;  %v3734_v46 = vld [vmem:[#allocation2 + $0x8] sm:$0xff] }
 0xa30   :  { %2941 = vst.msk [vmem:[#allocation2 + $0x10] sm:$0xff] %vm2939_vm9, %v2936_v4 }
 0xa33   :  { %v3736_v24 = vld [vmem:[#allocation2 + $0x18] sm:$0xff] }
 0xa34   :  { %v3742_v40 = vpack.c.bf16 %v3736_v24, %v3734_v46 }
 0xa36   :  { %3950 = vmatprep.mubr.bf16.mxu0 %v3742_v40 }
 0xa37   :  { %v3735_v61 = vld [vmem:[#allocation2 + $0x10] sm:$0xff] }
 0xa38   :  { %v3741_v30 = vpack.c.bf16 %v3735_v61, %v3733_v19 }
 0xa3a   :  { %3951 = vmatmul.mubr.bf16.vlgmr.msra.gmra.mxu0 %v3741_v30 }
 0xa7e   :  { %v3305_v7 = vpop.f32.mrf.mxu1 }
 0xa7f   :  { %3312 = vst.msk [vmem:[#allocation2 + $0x20] sm:$0xff] %vm2690_vm8, %v3305_v7 }
 0xa80   :  { %v8122_v51 = vpop.f32.mrf.mxu1 }
 0xa82   :  { %v3308_v59 = vpop.f32.mrf.mxu1 }
 0xa83   :  { %3313 = vst.msk [vmem:[#allocation2 + $0x30] sm:$0xff] %vm2690_vm8, %v3308_v59  ;;  %v8685_v59 = vld [vmem:[#allocation6 + $0x908] ss:$24 sps:$4 sm:$0xff]  }
 0xa84   :  { %v8123_v10 = vpop.f32.mrf.mxu1  ;;  %7971 = vmatpush3.bf16.msra.mxu1 %v8685_v59 }
 0xa85   :  { %v8686_v10 = vld [vmem:[#allocation6 + $0xa58] ss:$24 sps:$4 sm:$0xff]  }
 0xa86   :  { %v3431_v56 = vpop.f32.mrf.mxu1  ;;  %7972 = vmatprep.subr.bf16.mxu1 %v8686_v10 }
 0xa88   :  { %v8134_v2 = vpop.f32.mrf.mxu1 }
 0xa89   :  { %v8688_v2 = vld [vmem:[#allocation6 + $0xa28] ss:$24 sps:$4 sm:$0xff]  }
 0xa8a   :  { %v3434_v14 = vpop.f32.mrf.mxu1 }
 0xa8c   :  { %v8135_v1 = vpop.f32.mrf.mxu1 }
 0xa8d   :  { %v8690_v1 = vld [vmem:[#allocation6 + $0x9f8] ss:$24 sps:$4 sm:$0xff]  }
 0xa8e   :  { %v3558_v3 = vpop.f32.mrf.mxu1 }
 0xa8f   :  { %3565 = vst.msk [vmem:[#allocation2 + $0x28] sm:$0xff] %vm2690_vm8, %v3558_v3  ;;  %v8691_v3 = vld [vmem:[#allocation6 + $0x878] ss:$24 sps:$4 sm:$0xff]  }
 0xa90   :  { %v8146_v20 = vpop.f32.mrf.mxu1 }
 0xa91   :  { %v8692_v20 = vld [vmem:[#allocation6 + $0x9c8] ss:$24 sps:$4 sm:$0xff]  }
 0xa92   :  { %v3561_v26 = vpop.f32.mrf.mxu1 }
 0xa93   :  { %3566 = vst.msk [vmem:[#allocation2 + $0x38] sm:$0xff] %vm2690_vm8, %v3561_v26  ;;  %v8693_v26 = vld [vmem:[#allocation6 + $0x848] ss:$24 sps:$4 sm:$0xff]  }
 0xa94   :  { %v8147_v5 = vpop.f32.mrf.mxu1 }
 0xa95   :  { %v8694_v5 = vld [vmem:[#allocation6 + $0x998] ss:$24 sps:$4 sm:$0xff]  }
 0xa96   :  { %v3684_v42 = vpop.f32.mrf.mxu1 }
 0xa97   :  { %3693 = vrot.lane.b32.xlu0 %v3684_v42, %s9209_s6  ;;  %v8695_v42 = vld [vmem:[#allocation6 + $0x818] ss:$24 sps:$4 sm:$0xff]  }
 0xa98   :  { %v8158_v28 = vpop.f32.mrf.mxu1 }
 0xa99   :  { %v8696_v28 = vld [vmem:[#allocation6 + $0x968] ss:$24 sps:$4 sm:$0xff]  }
 0xa9a   :  { %v3687_v31 = vpop.f32.mrf.mxu1 }
 0xa9b   :  { %3440 = vrot.lane.b32.xlu0 %v3431_v56, %s9209_s6  ;;  %3695 = vrot.lane.b32.xlu1 %v3687_v31, %s9209_s6  ;;  %v8687_v56 = vld [vmem:[#allocation6 + $0x8d8] ss:$24 sps:$4 sm:$0xff]   ;;  %v8697_v31 = vld [vmem:[#allocation6 + $0x7e8] ss:$24 sps:$4 sm:$0xff]  }
 0xa9c   :  { %v8159_v34 = vpop.f32.mrf.mxu1  ;;  %7973 = vmatpush3.bf16.msra.mxu1 %v8687_v56 }
 0xa9d   :  { %7974 = vmatprep.subr.bf16.mxu1 %v8688_v2  ;;  %v8698_v34 = vld [vmem:[#allocation6 + $0x938] ss:$24 sps:$4 sm:$0xff]  }
 0xa9f   :  { %3442 = vrot.lane.b32.xlu1 %v3434_v14, %s9209_s6  ;;  %v8689_v14 = vld [vmem:[#allocation6 + $0x8a8] ss:$24 sps:$4 sm:$0xff]  }
 0xaa0   :  { %7975 = vmatpush3.bf16.msra.mxu1 %v8689_v14 }
 0xaa1   :  { %7976 = vmatprep.subr.bf16.mxu1 %v8690_v1 }
 0xaa4   :  { %7977 = vmatpush3.bf16.msra.mxu1 %v8691_v3 }
 0xaa5   :  { %7978 = vmatprep.subr.bf16.mxu1 %v8692_v20 }
 0xaa8   :  { %7979 = vmatpush3.bf16.msra.mxu1 %v8693_v26 }
 0xaa9   :  { %7980 = vmatprep.subr.bf16.mxu1 %v8694_v5 }
 0xaac   :  { %7981 = vmatpush3.bf16.msra.mxu1 %v8695_v42 }
 0xaad   :  { %7982 = vmatprep.subr.bf16.mxu1 %v8696_v28  ;;  %v8702_v28 = vld [vmem:[#allocation6 + $0x910] ss:$24 sps:$4 sm:$0xff]  }
 0xab0   :  { %7983 = vmatpush3.bf16.msra.mxu1 %v8697_v31  ;;  %v8700_v31 = vld [vmem:[#allocation6 + $0x90c] ss:$24 sps:$4 sm:$0xff]  }
 0xab1   :  { %7984 = vmatprep.subr.bf16.mxu1 %v8698_v34  ;;  %v8703_v34 = vld [vmem:[#allocation6 + $0x8dc] ss:$24 sps:$4 sm:$0xff]  }
 0xab4   :  { %7985 = vmatpush3.bf16.msra.mxu1 %v8699_v36  ;;  %v8705_v36 = vld [vmem:[#allocation6 + $0x8e0] ss:$24 sps:$4 sm:$0xff]  }
 0xab5   :  { %4390 = vmatprep.subr.bf16.mxu1 %v8702_v28 }
 0xafa   :  { %v3952_v47 = vpop.f32.mrf.mxu0 }
 0xafb   :  { %v3953_v22 = vadd.f32 %v3952_v47, %v9720_v45 }
 0xafc   :  { %v3954_v50 = vpop.f32.mrf.mxu0 }
 0xafd   :  { %v3955_v41 = vadd.f32 %v3954_v50, %v9723_v25  ;;  %v3971_v54 = vadd.f32 %v3953_v22, %v9428_v15 }
 0xafe   :  { %v3956_v53 = vpop.f32.mrf.mxu0 }
 0xaff   :  { %v3972_v6 = vadd.f32 %v3955_v41, %v9423_v21  ;;  %v3957_v52 = vadd.f32 %v3956_v53, %v9720_v45 }
 0xb00   :  { %v3958_v27 = vpop.f32.mrf.mxu0 }
 0xb01   :  { %v3959_v8 = vadd.f32 %v3958_v27, %v9723_v25  ;;  %v3983_v60 = vadd.f32 %v3972_v6, %v3971_v54  ;;  %v3973_v55 = vadd.f32 %v3957_v52, %v9421_v17 }
 0xb03   :  { %v3974_v29 = vadd.f32 %v3959_v8, %v9425_v23  ;;  %3984 = vadd.xlane.f32.xlu0 %v3983_v60 }
 0xb05   :  { %v3986_v57 = vadd.f32 %v3974_v29, %v3973_v55 }
 0xb07   :  { %3987 = vadd.xlane.f32.xlu1 %v3986_v57 }
 0xb09   :  { %v3694_v48 = vpop.permute.xlu0 %3693 }
 0xb0a   :  { %3699 = vst.msk [vmem:[#allocation2 + $0x28] sm:$0xff] %vm2939_vm9, %v3694_v48 }
 0xb0d   :  { %v3441_v58 = vpop.permute.xlu0 %3440  ;;  %v3696_v15 = vpop.permute.xlu1 %3695 }
 0xb0e   :  { %3446 = vst.msk [vmem:[#allocation2 + $0x20] sm:$0xff] %vm2939_vm9, %v3441_v58  ;;  %3700 = vst.msk [vmem:[#allocation2 + $0x38] sm:$0xff] %vm2939_vm9, %v3696_v15 }
 0xb11   :  { %v3443_v21 = vpop.permute.xlu1 %3442  ;;  %v3738_v9 = vld [vmem:[#allocation2 + $0x28] sm:$0xff] }
 0xb12   :  { %3447 = vst.msk [vmem:[#allocation2 + $0x30] sm:$0xff] %vm2939_vm9, %v3443_v21 }
 0xb15   :  { %v3740_v33 = vld [vmem:[#allocation2 + $0x38] sm:$0xff]  ;;  %v3737_v23 = vld [vmem:[#allocation2 + $0x20] sm:$0xff] }
 0xb16   :  { %v3744_v17 = vpack.c.bf16 %v3740_v33, %v3738_v9  ;;  %v3982_v33 = vld [vmem:[#allocation3 + $0x67] ss:$8 sm:$0x3] }
 0xb18   :  { %3960 = vmatprep.mubr.bf16.mxu0 %v3744_v17 }
 0xb19   :  { %v3739_v38 = vld [vmem:[#allocation2 + $0x30] sm:$0xff] }
 0xb1a   :  { %v3743_v12 = vpack.c.bf16 %v3739_v38, %v3737_v23  ;;  %v9770_v38 = vrot.slane %v3982_v33, %v9288_v49 }
 0xb1c   :  { %3961 = vmatmul.mubr.bf16.gmra.mxu0 %v3743_v12  ;;  %v9773_v12 = vrot.slane %v3982_v33, %v9334_v39 }
 0xb8c   :  { %v3985_v62 = vpop.xlane.xlu0 %3984 }
 0xb8d   :  { %v3996_v32 = vmul.f32 0.00390625, %v3985_v62 }
 0xb8f   :  { %v9737_v16 = vsub.f32 %v3971_v54, %v3996_v32  ;;  %v9739_v13 = vsub.f32 %v3972_v6, %v3996_v32 }
 0xb90   :  { %v3988_v63 = vpop.xlane.xlu1 %3987 }
 0xb91   :  { %v3997_v4 = vmul.f32 0.00390625, %v3988_v63  ;;  %v4008_v46 = vmul.f32 %v9737_v16, %v9737_v16  ;;  %v4009_v24 = vmul.f32 %v9739_v13, %v9739_v13 }
 0xb93   :  { %v9745_v40 = vsub.f32 %v3973_v55, %v3997_v4  ;;  %v9747_v19 = vsub.f32 %v3974_v29, %v3997_v4  ;;  %v4016_v61 = vadd.f32 %v4009_v24, %v4008_v46 }
 0xb95   :  { %4017 = vadd.xlane.f32.xlu0 %v4016_v61  ;;  %v4010_v30 = vmul.f32 %v9745_v40, %v9745_v40  ;;  %v4011_v7 = vmul.f32 %v9747_v19, %v9747_v19 }
 0xb97   :  { %v4019_v51 = vadd.f32 %v4011_v7, %v4010_v30 }
 0xb99   :  { %4020 = vadd.xlane.f32.xlu0 %v4019_v51 }
 0xbdc   :  { %v3962_v47 = vpop.f32.mrf.mxu0 }
 0xbdd   :  { %v3963_v22 = vadd.f32 %v3962_v47, %v9720_v45  ;;  %v8708_v47 = vld [vmem:[#allocation6 + $0x8b0] ss:$24 sps:$4 sm:$0xff]  }
 0xbde   :  { %v3964_v50 = vpop.f32.mrf.mxu0 }
 0xbdf   :  { %v3965_v41 = vadd.f32 %v3964_v50, %v9723_v25  ;;  %v3975_v54 = vadd.f32 %v3963_v22, %v9447_v43  ;;  %v8706_v22 = vld [vmem:[#allocation6 + $0x8ac] ss:$24 sps:$4 sm:$0xff]   ;;  %v8711_v50 = vld [vmem:[#allocation6 + $0x880] ss:$24 sps:$4 sm:$0xff]  }
 0xbe0   :  { %v3966_v53 = vpop.f32.mrf.mxu0 }
 0xbe1   :  { %v3976_v6 = vadd.f32 %v3965_v41, %v9437_v35  ;;  %v3967_v52 = vadd.f32 %v3966_v53, %v9720_v45  ;;  %v3980_v45 = vld [vmem:[#allocation3 + $0x66] ss:$8 sm:$0x3]  ;;  %v8709_v41 = vld [vmem:[#allocation6 + $0x87c] ss:$24 sps:$4 sm:$0xff]  }
 0xbe2   :  { %v3968_v27 = vpop.f32.mrf.mxu0  ;;  %v8714_v53 = vld [vmem:[#allocation6 + $0x850] ss:$24 sps:$4 sm:$0xff]  }
 0xbe3   :  { %v3969_v8 = vadd.f32 %v3968_v27, %v9723_v25  ;;  %v3989_v60 = vadd.f32 %v3976_v6, %v3975_v54  ;;  %v3977_v55 = vadd.f32 %v3967_v52, %v9449_v44  ;;  %v9763_v44 = vrot.slane %v3980_v45, %v9288_v49  ;;  %v8715_v52 = vld [vmem:[#allocation6 + $0x81c] ss:$24 sps:$4 sm:$0xff]   ;;  %v8720_v27 = vld [vmem:[#allocation6 + $0x7f0] ss:$24 sps:$4 sm:$0xff]  }
 0xbe5   :  { %v3978_v29 = vadd.f32 %v3969_v8, %v9441_v37  ;;  %3990 = vadd.xlane.f32.xlu1 %v3989_v60  ;;  %v9766_v37 = vrot.slane %v3980_v45, %v9334_v39  ;;  %v8718_v8 = vld [vmem:[#allocation6 + $0x7ec] ss:$24 sps:$4 sm:$0xff]   ;;  %v8723_v60 = vld [vmem:[#allocation6 + $0x7c0] ss:$24 sps:$4 sm:$0xff]  }
 0xbe7   :  { %v3992_v57 = vadd.f32 %v3978_v29, %v3977_v55 }
 0xbe9   :  { %3993 = vadd.xlane.f32.xlu0 %v3992_v57 }
 0xc1e   :  { %v4018_v48 = vpop.xlane.xlu0 %4017 }
 0xc1f   :  { %v4028_v58 = vmul.f32 0.00390625, %v4018_v48 }
 0xc21   :  { %v4032_v15 = vadd.f32 1e-05, %v4028_v58 }
 0xc22   :  { %v4021_v21 = vpop.xlane.xlu0 %4020 }
 0xc23   :  { %9020 = vrsqrt.f32 %v4032_v15  ;;  %v4029_v43 = vmul.f32 0.00390625, %v4021_v21 }
 0xc25   :  { %v4033_v35 = vadd.f32 1e-05, %v4029_v43 }
 0xc27   :  { %9022 = vrsqrt.f32 %v4033_v35 }
 0xc30   :  { %v9021_v9 = vpop.eup %9020 }
 0xc31   :  { %v4041_v25 = vmul.f32 %v9021_v9, %v9739_v13  ;;  %v4040_v17 = vmul.f32 %v9021_v9, %v9737_v16 }
 0xc33   :  { %v4060_v62 = vmul.f32 %v9766_v37, %v4041_v25  ;;  %v4059_v13 = vmul.f32 %v9763_v44, %v4040_v17 }
 0xc34   :  { %v9023_v23 = vpop.eup %9022 }
 0xc35   :  { %v4043_v18 = vmul.f32 %v9023_v23, %v9747_v19  ;;  %v4042_v32 = vmul.f32 %v9023_v23, %v9745_v40  ;;  %v9782_v16 = vadd.f32 %v9773_v12, %v4060_v62  ;;  %v9788_v24 = vadd.f32 %v9770_v38, %v4059_v13 }
 0xc37   :  { %v4062_v63 = vmul.f32 %v9766_v37, %v4043_v18  ;;  %v4061_v4 = vmul.f32 %v9763_v44, %v4042_v32 }
 0xc39   :  { %v9785_v46 = vadd.f32 %v9773_v12, %v4062_v63  ;;  %v9791_v19 = vadd.f32 %v9770_v38, %v4061_v4  ;;  %v4139_v63 = vld [vmem:[#allocation3 + $0x64] ss:$8 sm:$0x3] }
 0xc3b   :  { %v4135_v40 = vpack.c.bf16 %v9785_v46, %v9782_v16  ;;  %v4134_v61 = vpack.c.bf16 %v9791_v19, %v9788_v24 }
 0xc3d   :  { %4274 = vmatprep.mubr.bf16.mxu1 %v4135_v40 }
 0xc3e   :  { %4275 = vmatmul.mubr.bf16.vlgmr.msra.gmra.mxu1 %v4134_v61 }
 0xc3f   :  { %4391 = vmatpush1.bf16.msra.mxu1 %v8700_v31 }
 0xc40   :  { %4392 = vmatprep.subr.bf16.mxu1 %v8705_v36 }
 0xc43   :  { %4393 = vmatpush1.bf16.msra.mxu1 %v8703_v34 }
 0xc44   :  { %4394 = vmatprep.subr.bf16.mxu1 %v8708_v47 }
 0xc47   :  { %4395 = vmatpush1.bf16.msra.mxu1 %v8706_v22 }
 0xc48   :  { %4396 = vmatprep.subr.bf16.mxu1 %v8711_v50 }
 0xc4b   :  { %4397 = vmatpush1.bf16.msra.mxu1 %v8709_v41 }
 0xc4c   :  { %4398 = vmatprep.subr.bf16.mxu1 %v8714_v53 }
 0xc6e   :  { %v3991_v30 = vpop.xlane.xlu1 %3990 }
 0xc6f   :  { %v3998_v7 = vmul.f32 0.00390625, %v3991_v30 }
 0xc71   :  { %v4004_v51 = vsub.f32 %v3975_v54, %v3998_v7  ;;  %v4005_v59 = vsub.f32 %v3976_v6, %v3998_v7  ;;  %v8712_v54 = vld [vmem:[#allocation6 + $0x84c] ss:$24 sps:$4 sm:$0xff]   ;;  %v8717_v6 = vld [vmem:[#allocation6 + $0x820] ss:$24 sps:$4 sm:$0xff]  }
 0xc72   :  { %v3994_v10 = vpop.xlane.xlu0 %3993  ;;  %4399 = vmatpush1.bf16.msra.mxu1 %v8712_v54 }
 0xc73   :  { %v3999_v56 = vmul.f32 0.00390625, %v3994_v10  ;;  %v4012_v2 = vmul.f32 %v4004_v51, %v4004_v51  ;;  %v4013_v14 = vmul.f32 %v4005_v59, %v4005_v59  ;;  %4400 = vmatprep.subr.bf16.mxu1 %v8717_v6  ;;  %v4144_v10 = vrot.slane %v4139_v63, %v9288_v49  ;;  %v8745_v63 = vld [vmem:[#allocation6 + $0xb78] ss:$24 sps:$4 sm:$0xff]  }
 0xc75   :  { %v4006_v1 = vsub.f32 %v3977_v55, %v3999_v56  ;;  %v4007_v3 = vsub.f32 %v3978_v29, %v3999_v56  ;;  %v4022_v20 = vadd.f32 %v4013_v14, %v4012_v2  ;;  %v8721_v55 = vld [vmem:[#allocation6 + $0x7bc] ss:$24 sps:$4 sm:$0xff]  }
 0xc76   :  { %4401 = vmatpush1.bf16.msra.mxu1 %v8715_v52 }
 0xc77   :  { %4023 = vadd.xlane.f32.xlu1 %v4022_v20  ;;  %v4014_v26 = vmul.f32 %v4006_v1, %v4006_v1  ;;  %v4015_v5 = vmul.f32 %v4007_v3, %v4007_v3  ;;  %4402 = vmatprep.subr.bf16.mxu1 %v8720_v27 }
 0xc79   :  { %v4025_v42 = vadd.f32 %v4015_v5, %v4014_v26  ;;  %v4298_v26 = vld [vmem:[#allocation3 + $0x65] ss:$8 sm:$0x3] }
 0xc7a   :  { %4403 = vmatpush1.bf16.msra.mxu1 %v8718_v8  ;;  %v9821_v28 = vrot.slane %v4298_v26, %v9288_v49  ;;  %v9824_v47 = vrot.slane %v4298_v26, %v9334_v39  ;;  %v8766_v26 = vld [vmem:[#allocation6 + $0xab0] ss:$24 sps:$4 sm:$0xff]  }
 0xc7b   :  { %4026 = vadd.xlane.f32.xlu0 %v4025_v42  ;;  %4404 = vmatprep.subr.bf16.mxu1 %v8723_v60 }
 0xc7e   :  { %4405 = vmatpush1.bf16.msra.mxu1 %v8721_v55 }
 0xcfe   :  { %v7986_v43 = vpop.f32.mrf.mxu1 }
 0xd00   :  { %v4024_v29 = vpop.xlane.xlu1 %4023  ;;  %v7987_v35 = vpop.f32.mrf.mxu1 }
 0xd01   :  { %v4030_v57 = vmul.f32 0.00390625, %v4024_v29  ;;  %v7988_v56 = vadd.f32 %v7987_v35, %v7986_v43  ;;  %v8726_v43 = vld [vmem:[#allocation6 + $0xc04] ss:$24 sps:$4 sm:$0xff]   ;;  %v8727_v35 = vld [vmem:[#allocation6 + $0xc08] ss:$24 sps:$4 sm:$0xff]  }
 0xd02   :  { %v7989_v9 = vpop.f32.mrf.mxu1  ;;  %5137 = vmatprep.subr.bf16.mxu0 %v8726_v43  ;;  %v8781_v43 = vld [vmem:[#allocation6 + $0xd58] ss:$24 sps:$4 sm:$0xff]  }
 0xd03   :  { %v4034_v48 = vadd.f32 1e-05, %v4030_v57  ;;  %v4277_v14 = vadd.f32 %v7988_v56, %v4144_v10  ;;  %v8756_v56 = vld [vmem:[#allocation6 + $0xb14] ss:$24 sps:$4 sm:$0xff]  }
 0xd04   :  { %v4027_v58 = vpop.xlane.xlu0 %4026  ;;  %v7990_v23 = vpop.f32.mrf.mxu1 }
 0xd05   :  { %9024 = vrsqrt.f32 %v4034_v48  ;;  %v4031_v15 = vmul.f32 0.00390625, %v4027_v58  ;;  %v7991_v61 = vadd.f32 %v7990_v23, %v7989_v9  ;;  %v8732_v9 = vld [vmem:[#allocation6 + $0xbd4] ss:$24 sps:$4 sm:$0xff]   ;;  %v8736_v23 = vld [vmem:[#allocation6 + $0xba0] ss:$24 sps:$4 sm:$0xff]  }
 0xd07   :  { %v4035_v21 = vadd.f32 1e-05, %v4031_v15  ;;  %v4280_v2 = vadd.f32 %v7991_v61, %v4144_v10  ;;  %v8748_v61 = vld [vmem:[#allocation6 + $0xb40] ss:$24 sps:$4 sm:$0xff]  }
 0xd09   :  { %9026 = vrsqrt.f32 %v4035_v21 }
 0xd12   :  { %v9025_v45 = vpop.eup %9024 }
 0xd13   :  { %v4045_v33 = vmul.f32 %v9025_v45, %v4005_v59  ;;  %v4044_v25 = vmul.f32 %v9025_v45, %v4004_v51  ;;  %v8729_v45 = vld [vmem:[#allocation6 + $0xc0c] ss:$24 sps:$4 sm:$0xff]  }
 0xd14   :  { %5190 = vmatprep.subr.bf16.mxu1 %v8729_v45  ;;  %v8787_v45 = vld [vmem:[#allocation6 + $0xd28] ss:$24 sps:$4 sm:$0xff]  }
 0xd15   :  { %v4064_v62 = vmul.f32 %v9766_v37, %v4045_v33  ;;  %v4063_v13 = vmul.f32 %v9763_v44, %v4044_v25  ;;  %v8735_v33 = vld [vmem:[#allocation6 + $0xbdc] ss:$24 sps:$4 sm:$0xff]   ;;  %v8730_v25 = vld [vmem:[#allocation6 + $0xbd0] ss:$24 sps:$4 sm:$0xff]  }
 0xd16   :  { %v9027_v17 = vpop.eup %9026 }
 0xd17   :  { %v4047_v18 = vmul.f32 %v9027_v17, %v4007_v3  ;;  %v4046_v32 = vmul.f32 %v9027_v17, %v4006_v1  ;;  %v9802_v30 = vadd.f32 %v9773_v12, %v4064_v62  ;;  %v9808_v51 = vadd.f32 %v9770_v38, %v4063_v13  ;;  %v8741_v17 = vld [vmem:[#allocation6 + $0xbac] ss:$24 sps:$4 sm:$0xff]   ;;  %v8742_v13 = vld [vmem:[#allocation6 + $0xb70] ss:$24 sps:$4 sm:$0xff]  }
 0xd18   :  { %v4291_v1 = vmax.f32 %v4277_v14, 0.0  ;;  %v8744_v62 = vld [vmem:[#allocation6 + $0xb74] ss:$24 sps:$4 sm:$0xff]   ;;  %v8762_v14 = vld [vmem:[#allocation6 + $0xae4] ss:$24 sps:$4 sm:$0xff]  }
 0xd19   :  { %v4066_v4 = vmul.f32 %v9766_v37, %v4047_v18  ;;  %v4065_v40 = vmul.f32 %v9763_v44, %v4046_v32  ;;  %v8739_v18 = vld [vmem:[#allocation6 + $0xba8] ss:$24 sps:$4 sm:$0xff]   ;;  %v8747_v32 = vld [vmem:[#allocation6 + $0xb7c] ss:$24 sps:$4 sm:$0xff]  }
 0xd1b   :  { %v9805_v7 = vadd.f32 %v9773_v12, %v4066_v4  ;;  %v9811_v59 = vadd.f32 %v9770_v38, %v4065_v40  ;;  %v4292_v12 = vmax.f32 %v4280_v2, 0.0  ;;  %v8750_v4 = vld [vmem:[#allocation6 + $0xb44] ss:$24 sps:$4 sm:$0xff]   ;;  %v8757_v2 = vld [vmem:[#allocation6 + $0xb18] ss:$24 sps:$4 sm:$0xff]  }
 0xd1c   :  { %v8753_v40 = vld [vmem:[#allocation6 + $0xb4c] ss:$24 sps:$4 sm:$0xff]  }
 0xd1d   :  { %v4137_v37 = vpack.c.bf16 %v9805_v7, %v9802_v30  ;;  %v4136_v44 = vpack.c.bf16 %v9811_v59, %v9808_v51  ;;  %v4295_v3 = vpack.c.bf16 %v4292_v12, %v4291_v1  ;;  %v8765_v12 = vld [vmem:[#allocation6 + $0xaec] ss:$24 sps:$4 sm:$0xff]   ;;  %v8760_v1 = vld [vmem:[#allocation6 + $0xae0] ss:$24 sps:$4 sm:$0xff]  }
 0xd1f   :  { %4282 = vmatprep.mubr.bf16.mxu1 %v4137_v37  ;;  %v8759_v37 = vld [vmem:[#allocation6 + $0xb1c] ss:$24 sps:$4 sm:$0xff]  }
 0xd20   :  { %4283 = vmatmul.mubr.bf16.gmra.mxu1 %v4136_v44  ;;  %v8754_v44 = vld [vmem:[#allocation6 + $0xb10] ss:$24 sps:$4 sm:$0xff]  }
 0xd21   :  { %4422 = vmatprep.mubr.bf16.mxu1 %v9204_v0 }
 0xd28   :  { %4423 = vmatmul.mubr.bf16.vlgmr.msra.gmra.mxu1 %v4295_v3  ;;  %v8763_v3 = vld [vmem:[#allocation6 + $0xae8] ss:$24 sps:$4 sm:$0xff]  }
 0xd29   :  { %4432 = vmatprep.mubr.bf16.mxu1 %v9204_v0  ;;  %5191 = vmatpush1.bf16.msra.mxu1 %v8727_v35  ;;  %v8784_v35 = vld [vmem:[#allocation6 + $0xd20] ss:$24 sps:$4 sm:$0xff]  }
 0xd2a   :  { %5192 = vmatprep.subr.bf16.mxu1 %v8735_v33  ;;  %v8795_v33 = vld [vmem:[#allocation6 + $0xcfc] ss:$24 sps:$4 sm:$0xff]  }
 0xde0   :  { %v7992_v38 = vpop.f32.mrf.mxu1 }
 0xde2   :  { %v7993_v20 = vpop.f32.mrf.mxu1 }
 0xde3   :  { %v7994_v5 = vadd.f32 %v7993_v20, %v7992_v38  ;;  %v8768_v38 = vld [vmem:[#allocation6 + $0xab4] ss:$24 sps:$4 sm:$0xff]  }
 0xde4   :  { %v7995_v42 = vpop.f32.mrf.mxu1  ;;  %v8771_v20 = vld [vmem:[#allocation6 + $0xabc] ss:$24 sps:$4 sm:$0xff]  }
 0xde5   :  { %v4285_v34 = vadd.f32 %v7994_v5, %v4144_v10  ;;  %v8769_v5 = vld [vmem:[#allocation6 + $0xab8] ss:$24 sps:$4 sm:$0xff]  }
 0xde6   :  { %v7996_v31 = vpop.f32.mrf.mxu1 }
 0xde7   :  { %v7997_v36 = vadd.f32 %v7996_v31, %v7995_v42  ;;  %v4293_v54 = vmax.f32 %v4285_v34, 0.0  ;;  %v8774_v42 = vld [vmem:[#allocation6 + $0xd84] ss:$24 sps:$4 sm:$0xff]   ;;  %v8772_v34 = vld [vmem:[#allocation6 + $0xd80] ss:$24 sps:$4 sm:$0xff]  }
 0xde8   :  { %v4424_v22 = vpop.f32.mrf.mxu1  ;;  %v8777_v31 = vld [vmem:[#allocation6 + $0xd8c] ss:$24 sps:$4 sm:$0xff]  }
 0xde9   :  { %v4288_v50 = vadd.f32 %v7997_v36, %v4144_v10  ;;  %v4425_v41 = vadd.f32 %v4424_v22, %v9821_v28  ;;  %v8751_v10 = vld [vmem:[#allocation6 + $0xb48] ss:$24 sps:$4 sm:$0xff]  }
 0xdea   :  { %v4426_v53 = vpop.f32.mrf.mxu1  ;;  %v8775_v36 = vld [vmem:[#allocation6 + $0xd88] ss:$24 sps:$4 sm:$0xff]  }
 0xdeb   :  { %v4294_v6 = vmax.f32 %v4288_v50, 0.0  ;;  %v4427_v52 = vadd.f32 %v4426_v53, %v9824_v47  ;;  %v9829_v8 = vadd.f32 %v4425_v41, %v9788_v24  ;;  %v8724_v24 = vld [vmem:[#allocation6 + $0xc00] ss:$24 sps:$4 sm:$0xff]  }
 0xdec   :  { %v4428_v27 = vpop.f32.mrf.mxu1  ;;  %5138 = vmatpush1.bf16.msra.mxu0 %v8724_v24  ;;  %v8778_v24 = vld [vmem:[#allocation6 + $0xd50] ss:$24 sps:$4 sm:$0xff]  }
 0xded   :  { %v9832_v60 = vadd.f32 %v4427_v52, %v9782_v16  ;;  %v4429_v55 = vadd.f32 %v4428_v27, %v9821_v28  ;;  %v4296_v29 = vpack.c.bf16 %v4294_v6, %v4293_v54  ;;  %5139 = vmatprep.subr.bf16.mxu0 %v8732_v9  ;;  %v8792_v9 = vld [vmem:[#allocation6 + $0xcf4] ss:$24 sps:$4 sm:$0xff]  }
 0xdee   :  { %v4430_v57 = vpop.f32.mrf.mxu1 }
 0xdef   :  { %v4431_v48 = vadd.f32 %v4430_v57, %v9824_v47  ;;  %4433 = vmatmul.mubr.bf16.gmra.mxu1 %v4296_v29  ;;  %v4455_v58 = vadd.f32 %v9832_v60, %v9829_v8  ;;  %v9839_v15 = vadd.f32 %v4429_v55, %v9791_v19  ;;  %v8733_v19 = vld [vmem:[#allocation6 + $0xbd8] ss:$24 sps:$4 sm:$0xff]  }
 0xdf0   :  { %5140 = vmatpush1.bf16.msra.mxu0 %v8730_v25  ;;  %5193 = vmatpush1.bf16.msra.mxu1 %v8733_v19  ;;  %v8790_v25 = vld [vmem:[#allocation6 + $0xcf0] ss:$24 sps:$4 sm:$0xff]  }
 0xdf1   :  { %v9842_v21 = vadd.f32 %v4431_v48, %v9785_v46  ;;  %4456 = vadd.xlane.f32.xlu1 %v4455_v58  ;;  %v8738_v46 = vld [vmem:[#allocation6 + $0xba4] ss:$24 sps:$4 sm:$0xff]   ;;  %5194 = vmatprep.subr.bf16.mxu1 %v8741_v17  ;;  %v8780_v58 = vld [vmem:[#allocation6 + $0xd54] ss:$24 sps:$4 sm:$0xff]   ;;  %v8793_v19 = vld [vmem:[#allocation6 + $0xcf8] ss:$24 sps:$4 sm:$0xff]  }
 0xdf2   :  { %5141 = vmatprep.subr.bf16.mxu0 %v8738_v46  ;;  %v8798_v46 = vld [vmem:[#allocation6 + $0xcc4] ss:$24 sps:$4 sm:$0xff]  }
 0xdf3   :  { %v4458_v16 = vadd.f32 %v9842_v21, %v9839_v15  ;;  %v8801_v17 = vld [vmem:[#allocation6 + $0xccc] ss:$24 sps:$4 sm:$0xff]  }
 0xdf4   :  { %5142 = vmatpush1.bf16.msra.mxu0 %v8736_v23  ;;  %5195 = vmatpush1.bf16.msra.mxu1 %v8739_v18  ;;  %v8796_v23 = vld [vmem:[#allocation6 + $0xcc0] ss:$24 sps:$4 sm:$0xff]  }
 0xdf5   :  { %4459 = vadd.xlane.f32.xlu0 %v4458_v16  ;;  %5143 = vmatprep.subr.bf16.mxu0 %v8744_v62  ;;  %v8783_v16 = vld [vmem:[#allocation6 + $0xd5c] ss:$24 sps:$4 sm:$0xff]   ;;  %v8799_v18 = vld [vmem:[#allocation6 + $0xcc8] ss:$24 sps:$4 sm:$0xff]  }
 0xdf6   :  { %5196 = vmatprep.subr.bf16.mxu1 %v8747_v32  ;;  %v8804_v62 = vld [vmem:[#allocation6 + $0xc94] ss:$24 sps:$4 sm:$0xff]  }
 0xdf7   :  { %v8807_v32 = vld [vmem:[#allocation6 + $0xc9c] ss:$24 sps:$4 sm:$0xff]  }
 0xdf8   :  { %5144 = vmatpush1.bf16.msra.mxu0 %v8742_v13  ;;  %5197 = vmatpush1.bf16.msra.mxu1 %v8745_v63  ;;  %v8802_v13 = vld [vmem:[#allocation6 + $0xc90] ss:$24 sps:$4 sm:$0xff]  }
 0xdf9   :  { %5145 = vmatprep.subr.bf16.mxu0 %v8750_v4  ;;  %5198 = vmatprep.subr.bf16.mxu1 %v8753_v40  ;;  %v8805_v63 = vld [vmem:[#allocation6 + $0xc98] ss:$24 sps:$4 sm:$0xff]   ;;  %v8810_v40 = vld [vmem:[#allocation6 + $0xc64] ss:$24 sps:$4 sm:$0xff]  }
 0xdfa   :  { %v8808_v4 = vld [vmem:[#allocation6 + $0xc60] ss:$24 sps:$4 sm:$0xff]  }
 0xdfc   :  { %5146 = vmatpush1.bf16.msra.mxu0 %v8748_v61  ;;  %5199 = vmatpush1.bf16.msra.mxu1 %v8751_v10  ;;  %v8811_v61 = vld [vmem:[#allocation6 + $0xc68] ss:$24 sps:$4 sm:$0xff]   ;;  %v8813_v10 = vld [vmem:[#allocation6 + $0xc6c] ss:$24 sps:$4 sm:$0xff]  }
 0xdfd   :  { %5147 = vmatprep.subr.bf16.mxu0 %v8756_v56  ;;  %5200 = vmatprep.subr.bf16.mxu1 %v8759_v37  ;;  %v8816_v56 = vld [vmem:[#allocation6 + $0xc34] ss:$24 sps:$4 sm:$0xff]  }
 0xdfe   :  { %v8819_v37 = vld [vmem:[#allocation6 + $0xc3c] ss:$24 sps:$4 sm:$0xff]  }
 0xe00   :  { %5148 = vmatpush1.bf16.msra.mxu0 %v8754_v44  ;;  %5201 = vmatpush1.bf16.msra.mxu1 %v8757_v2  ;;  %v8814_v44 = vld [vmem:[#allocation6 + $0xc30] ss:$24 sps:$4 sm:$0xff]  }
 0xe01   :  { %5149 = vmatprep.subr.bf16.mxu0 %v8762_v14  ;;  %5202 = vmatprep.subr.bf16.mxu1 %v8765_v12  ;;  %v8817_v2 = vld [vmem:[#allocation6 + $0xc38] ss:$24 sps:$4 sm:$0xff]  }
 0xe04   :  { %5150 = vmatpush1.bf16.msra.mxu0 %v8760_v1  ;;  %5203 = vmatpush1.bf16.msra.mxu1 %v8763_v3 }
 0xe05   :  { %5151 = vmatprep.subr.bf16.mxu0 %v8768_v38  ;;  %5204 = vmatprep.subr.bf16.mxu1 %v8771_v20 }
 0xe08   :  { %5152 = vmatpush1.bf16.msra.mxu0 %v8766_v26  ;;  %5205 = vmatpush1.bf16.msra.mxu1 %v8769_v5 }
 0xe09   :  { %5153 = vmatprep.subr.bf16.mxu0 %v8774_v42  ;;  %5206 = vmatprep.subr.bf16.mxu1 %v8777_v31 }
 0xe0c   :  { %5154 = vmatpush2.bf16.msra.mxu0 %v8772_v34  ;;  %5207 = vmatpush2.bf16.msra.mxu1 %v8775_v36 }
 0xe0d   :  { %5155 = vmatprep.subr.bf16.mxu0 %v8780_v58  ;;  %5208 = vmatprep.subr.bf16.mxu1 %v8783_v16 }
 0xe10   :  { %5156 = vmatpush2.bf16.msra.mxu0 %v8778_v24  ;;  %5209 = vmatpush2.bf16.msra.mxu1 %v8781_v43 }
 0xe7a   :  { %v4457_v22 = vpop.xlane.xlu1 %4456 }
 0xe7b   :  { %v4467_v50 = vmul.f32 0.00390625, %v4457_v22 }
 0xe7d   :  { %v9847_v41 = vsub.f32 %v9829_v8, %v4467_v50  ;;  %v9850_v53 = vsub.f32 %v9832_v60, %v4467_v50 }
 0xe7e   :  { %v4460_v54 = vpop.xlane.xlu0 %4459 }
 0xe7f   :  { %v4468_v6 = vmul.f32 0.00390625, %v4460_v54  ;;  %v4479_v52 = vmul.f32 %v9847_v41, %v9847_v41  ;;  %v4480_v27 = vmul.f32 %v9850_v53, %v9850_v53 }
 0xe81   :  { %v9857_v55 = vsub.f32 %v9839_v15, %v4468_v6  ;;  %v9860_v29 = vsub.f32 %v9842_v21, %v4468_v6  ;;  %v4487_v57 = vadd.f32 %v4480_v27, %v4479_v52  ;;  %v8786_v15 = vld [vmem:[#allocation6 + $0xd24] ss:$24 sps:$4 sm:$0xff]  }
 0xe82   :  { %v8789_v21 = vld [vmem:[#allocation6 + $0xd2c] ss:$24 sps:$4 sm:$0xff]   ;;  %5157 = vmatprep.subr.bf16.mxu0 %v8786_v15 }
 0xe83   :  { %4488 = vadd.xlane.f32.xlu1 %v4487_v57  ;;  %v4481_v8 = vmul.f32 %v9857_v55, %v9857_v55  ;;  %v4482_v60 = vmul.f32 %v9860_v29, %v9860_v29  ;;  %5210 = vmatprep.subr.bf16.mxu1 %v8789_v21  ;;  %v4454_v57 = vld [vmem:[#allocation3 + $0x71] ss:$8 sm:$0x3] }
 0xe84   :  { %5158 = vmatpush2.bf16.msra.mxu0 %v8784_v35  ;;  %5211 = vmatpush2.bf16.msra.mxu1 %v8787_v45  ;;  %v9896_v16 = vrot.slane %v4454_v57, %v9288_v49  ;;  %v9899_v24 = vrot.slane %v4454_v57, %v9334_v39  ;;  %v8864_v57 = vld [vmem:[#allocation6 + $0xc74] ss:$24 sps:$4 sm:$0xff]  }
 0xe85   :  { %v4490_v48 = vadd.f32 %v4482_v60, %v4481_v8  ;;  %5159 = vmatprep.subr.bf16.mxu0 %v8792_v9  ;;  %5212 = vmatprep.subr.bf16.mxu1 %v8795_v33 }
 0xe87   :  { %4491 = vadd.xlane.f32.xlu0 %v4490_v48 }
 0xe88   :  { %5160 = vmatpush2.bf16.msra.mxu0 %v8790_v25  ;;  %5213 = vmatpush2.bf16.msra.mxu1 %v8793_v19  ;;  %v8820_v19 = vld [vmem:[#allocation6 + $0xc10] ss:$24 sps:$4 sm:$0xff]  }
 0xe89   :  { %5161 = vmatprep.subr.bf16.mxu0 %v8798_v46  ;;  %5214 = vmatprep.subr.bf16.mxu1 %v8801_v17  ;;  %v8825_v46 = vld [vmem:[#allocation6 + $0xbe4] ss:$24 sps:$4 sm:$0xff]   ;;  %v8823_v17 = vld [vmem:[#allocation6 + $0xbe0] ss:$24 sps:$4 sm:$0xff]  }
 0xe8c   :  { %5162 = vmatpush2.bf16.msra.mxu0 %v8796_v23  ;;  %5215 = vmatpush2.bf16.msra.mxu1 %v8799_v18  ;;  %v8828_v23 = vld [vmem:[#allocation6 + $0xbb4] ss:$24 sps:$4 sm:$0xff]   ;;  %v8826_v18 = vld [vmem:[#allocation6 + $0xbb0] ss:$24 sps:$4 sm:$0xff]  }
 0xe8d   :  { %5163 = vmatprep.subr.bf16.mxu0 %v8804_v62  ;;  %5216 = vmatprep.subr.bf16.mxu1 %v8807_v32  ;;  %v8831_v62 = vld [vmem:[#allocation6 + $0xb84] ss:$24 sps:$4 sm:$0xff]   ;;  %v8829_v32 = vld [vmem:[#allocation6 + $0xb80] ss:$24 sps:$4 sm:$0xff]  }
 0xe90   :  { %5164 = vmatpush2.bf16.msra.mxu0 %v8802_v13  ;;  %5217 = vmatpush2.bf16.msra.mxu1 %v8805_v63  ;;  %v8834_v13 = vld [vmem:[#allocation6 + $0xb54] ss:$24 sps:$4 sm:$0xff]   ;;  %v8832_v63 = vld [vmem:[#allocation6 + $0xb50] ss:$24 sps:$4 sm:$0xff]  }
 0xe91   :  { %5165 = vmatprep.subr.bf16.mxu0 %v8810_v40  ;;  %5218 = vmatprep.subr.bf16.mxu1 %v8813_v10  ;;  %v8835_v40 = vld [vmem:[#allocation6 + $0xb20] ss:$24 sps:$4 sm:$0xff]  }
 0xe94   :  { %5166 = vmatpush2.bf16.msra.mxu0 %v8808_v4  ;;  %5219 = vmatpush2.bf16.msra.mxu1 %v8811_v61  ;;  %v8837_v4 = vld [vmem:[#allocation6 + $0xb24] ss:$24 sps:$4 sm:$0xff]   ;;  %v8840_v61 = vld [vmem:[#allocation6 + $0xaf4] ss:$24 sps:$4 sm:$0xff]  }
 0xe95   :  { %5167 = vmatprep.subr.bf16.mxu0 %v8816_v56  ;;  %5220 = vmatprep.subr.bf16.mxu1 %v8819_v37  ;;  %v8838_v56 = vld [vmem:[#allocation6 + $0xaf0] ss:$24 sps:$4 sm:$0xff]  }
 0xe98   :  { %5168 = vmatpush2.bf16.msra.mxu0 %v8814_v44  ;;  %5221 = vmatpush2.bf16.msra.mxu1 %v8817_v2 }
 0xe99   :  { %8160 = vmatprep.subr.bf16.mxu1 %v9207_v11 }
 0xeaf   :  { %v4434_v14 = vpop.f32.mrf.mxu1 }
 0xeb0   :  { %v4435_v12 = vadd.f32 %v4434_v14, %v9821_v28 }
 0xeb1   :  { %v4436_v1 = vpop.f32.mrf.mxu1 }
 0xeb2   :  { %v4437_v3 = vadd.f32 %v4436_v1, %v9824_v47  ;;  %v9870_v20 = vadd.f32 %v4435_v12, %v9808_v51 }
 0xeb3   :  { %v4438_v38 = vpop.f32.mrf.mxu1 }
 0xeb4   :  { %v9873_v26 = vadd.f32 %v4437_v3, %v9802_v30  ;;  %v4439_v5 = vadd.f32 %v4438_v38, %v9821_v28  ;;  %v8822_v30 = vld [vmem:[#allocation6 + $0xc14] ss:$24 sps:$4 sm:$0xff]  }
 0xeb5   :  { %v4440_v42 = vpop.f32.mrf.mxu1  ;;  %5243 = vmatprep.subr.bf16.mxu0 %v8822_v30  ;;  %v8843_v30 = vld [vmem:[#allocation6 + $0xac4] ss:$24 sps:$4 sm:$0xff]  }
 0xeb6   :  { %v4441_v31 = vadd.f32 %v4440_v42, %v9824_v47  ;;  %v4461_v34 = vadd.f32 %v9873_v26, %v9870_v20  ;;  %v9880_v36 = vadd.f32 %v4439_v5, %v9811_v59  ;;  %v4452_v59 = vld [vmem:[#allocation3 + $0x70] ss:$8 sm:$0x3] }
 0xeb7   :  { %v9890_v60 = vrot.slane %v4452_v59, %v9288_v49  ;;  %v9893_v48 = vrot.slane %v4452_v59, %v9334_v39  ;;  %v8856_v59 = vld [vmem:[#allocation6 + $0xcd0] ss:$24 sps:$4 sm:$0xff]  }
 0xeb8   :  { %v9883_v22 = vadd.f32 %v4441_v31, %v9805_v7  ;;  %4462 = vadd.xlane.f32.xlu1 %v4461_v34 }
 0xeba   :  { %v4464_v51 = vadd.f32 %v9883_v22, %v9880_v36 }
 0xebc   :  { %4465 = vadd.xlane.f32.xlu0 %v4464_v51 }
 0xf0c   :  { %v4489_v28 = vpop.xlane.xlu1 %4488 }
 0xf0d   :  { %v4499_v50 = vmul.f32 0.00390625, %v4489_v28  ;;  %v8841_v28 = vld [vmem:[#allocation6 + $0xac0] ss:$24 sps:$4 sm:$0xff]  }
 0xf0f   :  { %v4503_v54 = vadd.f32 1e-05, %v4499_v50  ;;  %v8849_v50 = vld [vmem:[#allocation6 + $0xd64] ss:$24 sps:$4 sm:$0xff]  }
 0xf10   :  { %v4492_v47 = vpop.xlane.xlu0 %4491 }
 0xf11   :  { %9028 = vrsqrt.f32 %v4503_v54  ;;  %v4500_v6 = vmul.f32 0.00390625, %v4492_v47  ;;  %v8847_v54 = vld [vmem:[#allocation6 + $0xd60] ss:$24 sps:$4 sm:$0xff]   ;;  %v8855_v47 = vld [vmem:[#allocation6 + $0xd04] ss:$24 sps:$4 sm:$0xff]  }
 0xf13   :  { %v4504_v52 = vadd.f32 1e-05, %v4500_v6  ;;  %v8853_v6 = vld [vmem:[#allocation6 + $0xd00] ss:$24 sps:$4 sm:$0xff]  }
 0xf15   :  { %9030 = vrsqrt.f32 %v4504_v52  ;;  %v8858_v52 = vld [vmem:[#allocation6 + $0xcd4] ss:$24 sps:$4 sm:$0xff]  }
 0xf1e   :  { %v9029_v27 = vpop.eup %9028 }
 0xf1f   :  { %v4511_v7 = vmul.f32 %v9029_v27, %v9847_v41  ;;  %v4512_v8 = vmul.f32 %v9029_v27, %v9850_v53  ;;  %v8861_v27 = vld [vmem:[#allocation6 + $0xca4] ss:$24 sps:$4 sm:$0xff]  }
 0xf21   :  { %v4531_v15 = vmul.f32 %v9893_v48, %v4512_v8  ;;  %v4530_v53 = vmul.f32 %v9890_v60, %v4511_v7  ;;  %v8859_v7 = vld [vmem:[#allocation6 + $0xca0] ss:$24 sps:$4 sm:$0xff]   ;;  %v8862_v8 = vld [vmem:[#allocation6 + $0xc70] ss:$24 sps:$4 sm:$0xff]  }
 0xf22   :  { %v9031_v58 = vpop.eup %9030 }
 0xf23   :  { %v4513_v43 = vmul.f32 %v9031_v58, %v9857_v55  ;;  %v4514_v41 = vmul.f32 %v9031_v58, %v9860_v29  ;;  %v9908_v45 = vadd.f32 %v9899_v24, %v4531_v15  ;;  %v9914_v33 = vadd.f32 %v9896_v16, %v4530_v53  ;;  %v8865_v58 = vld [vmem:[#allocation6 + $0xc40] ss:$24 sps:$4 sm:$0xff]  }
 0xf25   :  { %v4533_v21 = vmul.f32 %v9893_v48, %v4514_v41  ;;  %v4532_v35 = vmul.f32 %v9890_v60, %v4513_v43  ;;  %v8867_v43 = vld [vmem:[#allocation6 + $0xc44] ss:$24 sps:$4 sm:$0xff]  }
 0xf27   :  { %v9911_v9 = vadd.f32 %v9899_v24, %v4533_v21  ;;  %v9917_v55 = vadd.f32 %v9896_v16, %v4532_v35 }
 0xf29   :  { %v9921_v29 = vpack.c.bf16 %v9911_v9, %v9908_v45  ;;  %v9925_v25 = vpack.c.bf16 %v9917_v55, %v9914_v33 }
 0xf2b   :  { %5169 = vmatprep.mubr.bf16.mxu0 %v9921_v29  ;;  %5222 = vmatprep.mubr.bf16.mxu1 %v9921_v29 }
 0xf2c   :  { %5170 = vmatmul.mubr.bf16.vlgmr.msra.gmra.mxu0 %v9925_v25  ;;  %5223 = vmatmul.mubr.bf16.vlgmr.msra.gmra.mxu1 %v9925_v25 }
 0xf2d   :  { %5244 = vmatpush1.bf16.msra.mxu0 %v8820_v19 }
 0xf2e   :  { %5245 = vmatprep.subr.bf16.mxu0 %v8825_v46 }
 0xf31   :  { %5246 = vmatpush1.bf16.msra.mxu0 %v8823_v17 }
 0xf32   :  { %5247 = vmatprep.subr.bf16.mxu0 %v8828_v23 }
 0xf35   :  { %5248 = vmatpush1.bf16.msra.mxu0 %v8826_v18 }
 0xf36   :  { %5249 = vmatprep.subr.bf16.mxu0 %v8831_v62  ;;  %v5318_v62 = vld [vmem:[#allocation3 + $0x81] ss:$8 sm:$0x3] }
 0xf39   :  { %5250 = vmatpush1.bf16.msra.mxu0 %v8829_v32 }
 0xf3a   :  { %5251 = vmatprep.subr.bf16.mxu0 %v8834_v13 }
 0xf3d   :  { %5252 = vmatpush1.bf16.msra.mxu0 %v8832_v63 }
 0xf3e   :  { %5253 = vmatprep.subr.bf16.mxu0 %v8837_v4 }
 0xf41   :  { %v4463_v10 = vpop.xlane.xlu1 %4462  ;;  %5254 = vmatpush1.bf16.msra.mxu0 %v8835_v40  ;;  %v5327_v40 = vrot.slane %v5318_v62, %v9334_v39 }
 0xf42   :  { %v4469_v37 = vmul.f32 0.00390625, %v4463_v10  ;;  %5255 = vmatprep.subr.bf16.mxu0 %v8840_v61 }
 0xf44   :  { %v4475_v44 = vsub.f32 %v9870_v20, %v4469_v37  ;;  %v4476_v2 = vsub.f32 %v9873_v26, %v4469_v37  ;;  %v8846_v20 = vld [vmem:[#allocation6 + $0xd94] ss:$24 sps:$4 sm:$0xff]   ;;  %v8844_v26 = vld [vmem:[#allocation6 + $0xd90] ss:$24 sps:$4 sm:$0xff]  }
 0xf45   :  { %v4466_v14 = vpop.xlane.xlu0 %4465  ;;  %5256 = vmatpush1.bf16.msra.mxu0 %v8838_v56 }
 0xf46   :  { %v4470_v12 = vmul.f32 0.00390625, %v4466_v14  ;;  %v4483_v1 = vmul.f32 %v4475_v44, %v4475_v44  ;;  %v4484_v3 = vmul.f32 %v4476_v2, %v4476_v2  ;;  %5257 = vmatprep.subr.bf16.mxu0 %v8843_v30  ;;  %v5323_v14 = vrot.slane %v5318_v62, %v9288_v49 }
 0xf48   :  { %v4477_v38 = vsub.f32 %v9880_v36, %v4470_v12  ;;  %v4478_v5 = vsub.f32 %v9883_v22, %v4470_v12  ;;  %v4493_v42 = vadd.f32 %v4484_v3, %v4483_v1  ;;  %v8852_v36 = vld [vmem:[#allocation6 + $0xd34] ss:$24 sps:$4 sm:$0xff]   ;;  %v8850_v22 = vld [vmem:[#allocation6 + $0xd30] ss:$24 sps:$4 sm:$0xff]  }
 0xf49   :  { %5258 = vmatpush1.bf16.msra.mxu0 %v8841_v28 }
 0xf4a   :  { %4494 = vadd.xlane.f32.xlu1 %v4493_v42  ;;  %v4485_v31 = vmul.f32 %v4477_v38, %v4477_v38  ;;  %v4486_v34 = vmul.f32 %v4478_v5, %v4478_v5  ;;  %5259 = vmatprep.subr.bf16.mxu0 %v8846_v20 }
 0xf4c   :  { %v4496_v51 = vadd.f32 %v4486_v34, %v4485_v31 }
 0xf4d   :  { %5260 = vmatpush2.bf16.msra.mxu0 %v8844_v26 }
 0xf4e   :  { %4497 = vadd.xlane.f32.xlu0 %v4496_v51  ;;  %5261 = vmatprep.subr.bf16.mxu0 %v8849_v50 }
 0xf51   :  { %5262 = vmatpush2.bf16.msra.mxu0 %v8847_v54 }
 0xf52   :  { %5263 = vmatprep.subr.bf16.mxu0 %v8852_v36 }
 0xf55   :  { %5264 = vmatpush2.bf16.msra.mxu0 %v8850_v22 }
 0xf56   :  { %5265 = vmatprep.subr.bf16.mxu0 %v8855_v47 }
 0xf59   :  { %5266 = vmatpush2.bf16.msra.mxu0 %v8853_v6 }
 0xf5a   :  { %5267 = vmatprep.subr.bf16.mxu0 %v8858_v52 }
 0xf5d   :  { %5268 = vmatpush2.bf16.msra.mxu0 %v8856_v59 }
 0xf5e   :  { %5269 = vmatprep.subr.bf16.mxu0 %v8861_v27 }
 0xf61   :  { %5270 = vmatpush2.bf16.msra.mxu0 %v8859_v7 }
 0xf62   :  { %5271 = vmatprep.subr.bf16.mxu0 %v8864_v57 }
 0xf65   :  { %5272 = vmatpush2.bf16.msra.mxu0 %v8862_v8 }
 0xf66   :  { %5273 = vmatprep.subr.bf16.mxu0 %v8867_v43 }
 0xf69   :  { %5274 = vmatpush2.bf16.msra.mxu0 %v8865_v58 }
 0xf6a   :  { %8208 = vmatprep.subr.bf16.mxu0 %v9207_v11 }
 0xfd3   :  { %v4495_v41 = vpop.xlane.xlu1 %4494 }
 0xfd4   :  { %v4501_v15 = vmul.f32 0.00390625, %v4495_v41  ;;  %v5339_v41 = vld [vmem:[#allocation3 + $0x82] ss:$8 sm:$0x3] }
 0xfd6   :  { %v4505_v53 = vadd.f32 1e-05, %v4501_v15 }
 0xfd7   :  { %v4498_v21 = vpop.xlane.xlu0 %4497 }
 0xfd8   :  { %9032 = vrsqrt.f32 %v4505_v53  ;;  %v4502_v35 = vmul.f32 0.00390625, %v4498_v21 }
 0xfda   :  { %v4506_v19 = vadd.f32 1e-05, %v4502_v35  ;;  %v5348_v35 = vrot.slane %v5339_v41, %v9334_v39 }
 0xfdc   :  { %9034 = vrsqrt.f32 %v4506_v19 }
 0xfe5   :  { %v9033_v46 = vpop.eup %9032 }
 0xfe6   :  { %v4516_v17 = vmul.f32 %v9033_v46, %v4476_v2  ;;  %v4515_v23 = vmul.f32 %v9033_v46, %v4475_v44 }
 0xfe8   :  { %v4535_v13 = vmul.f32 %v9893_v48, %v4516_v17  ;;  %v4534_v4 = vmul.f32 %v9890_v60, %v4515_v23 }
 0xfe9   :  { %v9035_v18 = vpop.eup %9034 }
 0xfea   :  { %v4518_v32 = vmul.f32 %v9035_v18, %v4478_v5  ;;  %v4517_v63 = vmul.f32 %v9035_v18, %v4477_v38  ;;  %v9943_v44 = vadd.f32 %v9899_v24, %v4535_v13  ;;  %v9949_v1 = vadd.f32 %v9896_v16, %v4534_v4 }
 0xfeb   :  { %v5344_v18 = vrot.slane %v5339_v41, %v9288_v49 }
 0xfec   :  { %v5171_v61 = vpop.f32.mrf.mxu0  ;;  %v5224_v10 = vpop.f32.mrf.mxu1  ;;  %v4537_v56 = vmul.f32 %v9893_v48, %v4518_v32  ;;  %v4536_v37 = vmul.f32 %v9890_v60, %v4517_v63 }
 0xfed   :  { %v5330_v31 = vadd.f32 %v5323_v14, %v5224_v10 }
 0xfee   :  { %v5226_v2 = vpop.f32.mrf.mxu1  ;;  %v9946_v12 = vadd.f32 %v9899_v24, %v4537_v56  ;;  %v9952_v3 = vadd.f32 %v9896_v16, %v4536_v37  ;;  %v9954_v5 = vpop.f32.mrf.mxu0  ;;  %v5297_v24 = vld [vmem:[#allocation3 + $0x80] ss:$8 sm:$0x3] }
 0xfef   :  { %v5331_v38 = vadd.f32 %v5327_v40, %v5226_v2  ;;  %v5302_v20 = vrot.slane %v5297_v24, %v9288_v49 }
 0xff0   :  { %v5228_v48 = vpop.f32.mrf.mxu1  ;;  %v4656_v60 = vpack.c.bf16 %v9946_v12, %v9943_v44  ;;  %v4655_v42 = vpack.c.bf16 %v9952_v3, %v9949_v1  ;;  %v5175_v28 = vpop.f32.mrf.mxu0 }
 0xff1   :  { %v5332_v34 = vadd.f32 %v5323_v14, %v5228_v48  ;;  %v5311_v54 = vadd.f32 %v5302_v20, %v5175_v28  ;;  %v5309_v36 = vadd.f32 %v5302_v20, %v5171_v61 }
 0xff2   :  { %5179 = vmatprep.mubr.bf16.mxu0 %v4656_v60  ;;  %v5230_v51 = vpop.f32.mrf.mxu1  ;;  %5232 = vmatprep.mubr.bf16.mxu1 %v4656_v60 }
 0xff3   :  { %v9960_v30 = vpack.c.bf16 %v5332_v34, %v5330_v31  ;;  %v5333_v16 = vadd.f32 %v5327_v40, %v5230_v51  ;;  %5180 = vmatmul.mubr.bf16.gmra.mxu0 %v4655_v42  ;;  %5233 = vmatmul.mubr.bf16.gmra.mxu1 %v4655_v42  ;;  %v9971_v22 = vpack.c.bf16 %v5311_v54, %v5309_v36 }
 0xff4   :  { %5275 = vmatprep.mubr.bf16.mxu0 %v9921_v29  ;;  %8162 = vmatprep.mubr.msk.bf16.mxu1 %vm9208_vm7, %v9207_v11  ;;  %v9980_v29 = vpop.f32.mrf.mxu0 }
 0xff5   :  { %v9964_v26 = vpack.c.bf16 %v5333_v16, %v5331_v38  ;;  %v5366_v50 = vsel %vm2690_vm8, %v9960_v30, 0 }
 0xff6   :  { %8161 = vmatpush3.bf16.xpose.msra.mxu1 %v5366_v50 }
 0xff7   :  { %8166 = vmatprep.subr.bf16.mxu1 %v9207_v11 }
 0xffb   :  { %5276 = vmatmul.mubr.bf16.vlgmr.msra.gmra.mxu0 %v9925_v25  ;;  %v9983_v25 = vrot.slane %v5297_v24, %v9334_v39 }
 0xffc   :  { %5285 = vmatprep.mubr.bf16.mxu0 %v4656_v60 }
 0xffd   :  { %8163 = vmatmul.mubr.msk.bf16.vlgmr.msra.gmra.mxu1 %vm2690_vm8, %v9971_v22 }
 0xffe   :  { %8168 = vmatprep.mubr.msk.bf16.mxu1 %vm9208_vm7, %v9207_v11 }
0x1003   :  { %5286 = vmatmul.mubr.bf16.gmra.mxu0 %v4655_v42 }
0x1004   :  { %8210 = vmatprep.mubr.msk.bf16.mxu0 %vm9208_vm7, %v9207_v11 }
0x10b3   :  { %v5181_v47 = vpop.f32.mrf.mxu0  ;;  %v5234_v6 = vpop.f32.mrf.mxu1 }
0x10b4   :  { %v5334_v8 = vadd.f32 %v5323_v14, %v5234_v6  ;;  %v5313_v2 = vadd.f32 %v5302_v20, %v5181_v47 }
0x10b5   :  { %v5183_v52 = vpop.f32.mrf.mxu0  ;;  %v5236_v59 = vpop.f32.mrf.mxu1 }
0x10b6   :  { %v5335_v27 = vadd.f32 %v5327_v40, %v5236_v59  ;;  %v5314_v15 = vadd.f32 %v9983_v25, %v5183_v52 }
0x10b7   :  { %v5185_v7 = vpop.f32.mrf.mxu0  ;;  %v5238_v57 = vpop.f32.mrf.mxu1 }
0x10b8   :  { %v5336_v58 = vadd.f32 %v5323_v14, %v5238_v57  ;;  %v5315_v10 = vadd.f32 %v5302_v20, %v5185_v7 }
0x10b9   :  { %v5187_v43 = vpop.f32.mrf.mxu0  ;;  %v5240_v21 = vpop.f32.mrf.mxu1 }
0x10ba   :  { %v5316_v53 = vadd.f32 %v9983_v25, %v5187_v43  ;;  %v9988_v19 = vpack.c.bf16 %v5336_v58, %v5334_v8  ;;  %v5337_v46 = vadd.f32 %v5327_v40, %v5240_v21  ;;  %v10002_v34 = vpack.c.bf16 %v5315_v10, %v5313_v2 }
0x10bb   :  { %v5277_v17 = vpop.f32.mrf.mxu0 }
0x10bc   :  { %v9990_v23 = vpack.c.bf16 %v5316_v53, %v5314_v15  ;;  %v9993_v62 = vpack.c.bf16 %v5337_v46, %v5335_v27  ;;  %v5872_v63 = vsel %vm2690_vm8, %v9988_v19, 0  ;;  %v5351_v37 = vadd.f32 %v5344_v18, %v5277_v17 }
0x10bd   :  { %v5279_v32 = vpop.f32.mrf.mxu0  ;;  %v5402_v13 = vpop.f32.mrf.mxu1  ;;  %8209 = vmatpush3.bf16.xpose.msra.mxu0 %v5872_v63 }
0x10be   :  { %v5352_v4 = vadd.f32 %v5348_v35, %v5279_v32  ;;  %v5409_v61 = vsel %vm250_vm6, %v5402_v13, -inf  ;;  %8220 = vmatprep.subr.bf16.mxu0 %v9207_v11 }
0x10bf   :  { %5410 = vmax.xlane.f32.xlu1 %v5409_v61  ;;  %v5281_v56 = vpop.f32.mrf.mxu0  ;;  %v8164_v40 = vpop.f32.mrf.mxu1 }
0x10c0   :  { %v5353_v14 = vadd.f32 %v5344_v18, %v5281_v56 }
0x10c1   :  { %v5283_v38 = vpop.f32.mrf.mxu0  ;;  %v5405_v48 = vpop.f32.mrf.mxu1 }
0x10c2   :  { %v9999_v60 = vpack.c.bf16 %v5353_v14, %v5351_v37  ;;  %v5354_v42 = vadd.f32 %v5348_v35, %v5283_v38  ;;  %v5412_v31 = vsel %vm250_vm6, %v5405_v48, -inf }
0x10c3   :  { %5413 = vmax.xlane.f32.xlu0 %v5412_v31  ;;  %v5287_v24 = vpop.f32.mrf.mxu0  ;;  %v8165_v51 = vpop.f32.mrf.mxu1 }
0x10c4   :  { %v10004_v16 = vpack.c.bf16 %v5354_v42, %v5352_v4  ;;  %v5355_v28 = vadd.f32 %v5344_v18, %v5287_v24  ;;  %8167 = vmatpush3.bf16.msra.mxu1 %v9999_v60  ;;  %8211 = vmatmul.mubr.msk.bf16.vlgmr.msra.gmra.mxu0 %vm2690_vm8, %v10002_v34 }
0x10c5   :  { %v5289_v20 = vpop.f32.mrf.mxu0  ;;  %8172 = vmatprep.subr.bf16.mxu1 %v9207_v11  ;;  %8222 = vmatprep.mubr.msk.bf16.mxu0 %vm9208_vm7, %v9207_v11 }
0x10c6   :  { %v5356_v50 = vadd.f32 %v5348_v35, %v5289_v20 }
0x10c7   :  { %v5291_v54 = vpop.f32.mrf.mxu0 }
0x10c8   :  { %v5357_v36 = vadd.f32 %v5344_v18, %v5291_v54 }
0x10c9   :  { %v5293_v47 = vpop.f32.mrf.mxu0 }
0x10ca   :  { %v10012_v6 = vpack.c.bf16 %v5357_v36, %v5355_v28  ;;  %v5358_v52 = vadd.f32 %v5348_v35, %v5293_v47 }
0x10cc   :  { %v10014_v59 = vpack.c.bf16 %v5358_v52, %v5356_v50 }
0x1148   :  { %v5411_v27 = vpop.xlane.xlu1 %5410 }
0x1149   :  { %v5415_v7 = vsub.f32 %v5402_v13, %v5411_v27 }
0x114b   :  { %v5417_v57 = vmul.f32 1.442695, %v5415_v7 }
0x114c   :  { %v5414_v8 = vpop.xlane.xlu0 %5413 }
0x114d   :  { %9036 = vpow2.f32 %v5417_v57  ;;  %v5416_v58 = vsub.f32 %v5405_v48, %v5414_v8 }
0x114f   :  { %v5419_v43 = vmul.f32 1.442695, %v5416_v58 }
0x1151   :  { %9038 = vpow2.f32 %v5419_v43 }
0x115a   :  { %v9037_v41 = vpop.eup %9036 }
0x115b   :  { %v5421_v15 = vsel %vm250_vm6, %v9037_v41, 0.0 }
0x115c   :  { %5422 = vadd.xlane.f32.xlu1 %v5421_v15 }
0x115e   :  { %v9039_v53 = vpop.eup %9038 }
0x115f   :  { %v5424_v21 = vsel %vm250_vm6, %v9039_v53, 0.0 }
0x1160   :  { %5425 = vadd.xlane.f32.xlu0 %v5424_v21 }
0x116d   :  { %5482 = vrot.lane.b32.xlu1 %v9960_v30, %s9209_s6 }
0x1176   :  { %5479 = vrot.lane.b32.xlu0 %v9971_v22, %s9209_s6 }
0x1184   :  { %v10022_v35 = vpop.f32.mrf.mxu0 }
0x1186   :  { %v8212_v46 = vpop.f32.mrf.mxu0 }
0x1188   :  { %v10024_v17 = vpop.f32.mrf.mxu0 }
0x118a   :  { %v8213_v18 = vpop.f32.mrf.mxu0 }
0x11e5   :  { %v5423_v32 = vpop.xlane.xlu1 %5422 }
0x11e6   :  { %9040 = vrcp.f32 %v5423_v32 }
0x11e9   :  { %v5426_v13 = vpop.xlane.xlu0 %5425  ;;  %v5483_v56 = vpop.permute.xlu1 %5482 }
0x11ea   :  { %9042 = vrcp.f32 %v5426_v13  ;;  %v5488_v30 = vsel %vm2690_vm8, %v5483_v56, 0  ;;  %v6125_v13 = vsel %vm2690_vm8, %v9993_v62, 0 }
0x11ed   :  { %v5480_v22 = vpop.permute.xlu0 %5479 }
0x11f3   :  { %v9041_v63 = vpop.eup %9040 }
0x11f4   :  { %v5429_v61 = vmul.f32 %v9041_v63, %v9037_v41  ;;  %v5619_v63 = vsel %vm2690_vm8, %v9964_v26, 0 }
0x11f7   :  { %v9043_v4 = vpop.eup %9042 }
0x11f8   :  { %v5430_v10 = vmul.f32 %v9043_v4, %v9039_v53  ;;  %v5312_v4 = vadd.f32 %v9983_v25, %v9980_v29 }
0x11fa   :  { %v5431_v40 = vpack.c.bf16 %v5430_v10, %v5429_v61  ;;  %v5310_v61 = vadd.f32 %v9983_v25, %v9954_v5 }
0x11fc   :  { %8169 = vmatmul.mubr.msk.bf16.vlgmr.msra.gmra.mxu1 %vm250_vm6, %v5431_v40  ;;  %v5612_v10 = vpack.c.bf16 %v5312_v4, %v5310_v61 }
0x11fd   :  { %8173 = vmatpush3.bf16.xpose.msra.mxu1 %v5488_v30  ;;  %8174 = vmatprep.mubr.msk.bf16.mxu1 %vm9208_vm7, %v9207_v11 }
0x11fe   :  { %8178 = vmatprep.subr.bf16.mxu1 %v9207_v11 }
0x1204   :  { %8175 = vmatmul.mubr.msk.bf16.vlgmr.msra.gmra.mxu1 %vm2690_vm8, %v5480_v22 }
0x1205   :  { %8180 = vmatprep.mubr.msk.bf16.mxu1 %vm9208_vm7, %v9207_v11 }
0x12bc   :  { %v5469_v37 = vpop.f32.mrf.mxu1 }
0x12bd   :  { %5476 = vst.msk [vmem:[#allocation2] sm:$0xff] %vm2690_vm8, %v5469_v37 }
0x12be   :  { %v8170_v14 = vpop.f32.mrf.mxu1 }
0x12c0   :  { %v5472_v2 = vpop.f32.mrf.mxu1 }
0x12c1   :  { %5477 = vst.msk [vmem:[#allocation2 + $0x10] sm:$0xff] %vm2690_vm8, %v5472_v2 }
0x12c2   :  { %v8171_v38 = vpop.f32.mrf.mxu1 }
0x12c4   :  { %v5524_v48 = vpop.f32.mrf.mxu1 }
0x12c5   :  { %v5531_v42 = vsel %vm250_vm6, %v5524_v48, -inf }
0x12c6   :  { %5532 = vmax.xlane.f32.xlu1 %v5531_v42  ;;  %v8176_v31 = vpop.f32.mrf.mxu1 }
0x12c8   :  { %v5527_v24 = vpop.f32.mrf.mxu1 }
0x12c9   :  { %v5534_v51 = vsel %vm250_vm6, %v5527_v24, -inf }
0x12ca   :  { %5535 = vmax.xlane.f32.xlu0 %v5534_v51  ;;  %v8177_v28 = vpop.f32.mrf.mxu1 }
0x134f   :  { %v5533_v20 = vpop.xlane.xlu1 %5532 }
0x1350   :  { %v5537_v50 = vsub.f32 %v5524_v48, %v5533_v20 }
0x1352   :  { %v5539_v54 = vmul.f32 1.442695, %v5537_v50 }
0x1353   :  { %v5536_v36 = vpop.xlane.xlu0 %5535 }
0x1354   :  { %9044 = vpow2.f32 %v5539_v54  ;;  %v5538_v47 = vsub.f32 %v5527_v24, %v5536_v36 }
0x1356   :  { %v5541_v52 = vmul.f32 1.442695, %v5538_v47 }
0x1358   :  { %9046 = vpow2.f32 %v5541_v52 }
0x1361   :  { %v9045_v27 = vpop.eup %9044 }
0x1362   :  { %v5543_v7 = vsel %vm250_vm6, %v9045_v27, 0.0 }
0x1363   :  { %5544 = vadd.xlane.f32.xlu1 %v5543_v7 }
0x1365   :  { %v9047_v57 = vpop.eup %9046 }
0x1366   :  { %v5546_v8 = vsel %vm250_vm6, %v9047_v57, 0.0 }
0x1367   :  { %5547 = vadd.xlane.f32.xlu0 %v5546_v8 }
0x1374   :  { %5555 = vrot.lane.b32.xlu1 %v9999_v60, %s9209_s6 }
0x1378   :  { %5735 = vrot.lane.b32.xlu1 %v9964_v26, %s9209_s6 }
0x137c   :  { %5988 = vrot.lane.b32.xlu1 %v9988_v19, %s9209_s6 }
0x1380   :  { %5985 = vrot.lane.b32.xlu1 %v10002_v34, %s9209_s6 }
0x1384   :  { %6241 = vrot.lane.b32.xlu1 %v9993_v62, %s9209_s6 }
0x1388   :  { %6238 = vrot.lane.b32.xlu1 %v9990_v23, %s9209_s6 }
0x13ec   :  { %v5545_v58 = vpop.xlane.xlu1 %5544 }
0x13ed   :  { %9048 = vrcp.f32 %v5545_v58 }
0x13f0   :  { %v5556_v43 = vpop.permute.xlu1 %5555  ;;  %v5548_v41 = vpop.xlane.xlu0 %5547 }
0x13f1   :  { %9050 = vrcp.f32 %v5548_v41  ;;  %8179 = vmatpush3.bf16.msra.mxu1 %v5556_v43 }
0x13f2   :  { %8184 = vmatprep.subr.bf16.mxu1 %v9207_v11 }
0x13f4   :  { %v10053_v60 = vpop.permute.xlu1 %5735 }
0x13f8   :  { %v5989_v19 = vpop.permute.xlu1 %5988 }
0x13f9   :  { %v5994_v15 = vsel %vm2690_vm8, %v5989_v19, 0 }
0x13fa   :  { %8221 = vmatpush3.bf16.xpose.msra.mxu0 %v5994_v15  ;;  %v9049_v34 = vpop.eup %9048 }
0x13fb   :  { %8232 = vmatprep.subr.bf16.mxu0 %v9207_v11  ;;  %v5551_v21 = vmul.f32 %v9049_v34, %v9045_v27 }
0x13fc   :  { %v5986_v18 = vpop.permute.xlu1 %5985 }
0x13fe   :  { %v9051_v53 = vpop.eup %9050 }
0x13ff   :  { %v5552_v46 = vmul.f32 %v9051_v53, %v9047_v57 }
0x1400   :  { %v6242_v62 = vpop.permute.xlu1 %6241 }
0x1401   :  { %v5553_v32 = vpack.c.bf16 %v5552_v46, %v5551_v21  ;;  %8223 = vmatmul.mubr.msk.bf16.vlgmr.msra.gmra.mxu0 %vm2690_vm8, %v5986_v18  ;;  %v6247_v56 = vsel %vm2690_vm8, %v6242_v62, 0 }
0x1402   :  { %8233 = vmatpush3.bf16.xpose.msra.mxu0 %v6125_v13  ;;  %8234 = vmatprep.mubr.msk.bf16.mxu0 %vm9208_vm7, %v9207_v11 }
0x1403   :  { %8181 = vmatmul.mubr.msk.bf16.vlgmr.msra.gmra.mxu1 %vm250_vm6, %v5553_v32  ;;  %8244 = vmatprep.subr.bf16.mxu0 %v9207_v11 }
0x1404   :  { %8185 = vmatpush3.bf16.xpose.msra.mxu1 %v5619_v63  ;;  %8186 = vmatprep.mubr.msk.bf16.mxu1 %vm9208_vm7, %v9207_v11  ;;  %v6239_v5 = vpop.permute.xlu1 %6238  ;;  %v5741_v63 = vsel %vm2690_vm8, %v10053_v60, 0 }
0x1405   :  { %8190 = vmatprep.subr.bf16.mxu1 %v9207_v11 }
0x1409   :  { %8235 = vmatmul.mubr.msk.bf16.vlgmr.msra.gmra.mxu0 %vm2690_vm8, %v9990_v23 }
0x140a   :  { %8245 = vmatpush3.bf16.xpose.msra.mxu0 %v6247_v56  ;;  %8246 = vmatprep.mubr.msk.bf16.mxu0 %vm9208_vm7, %v9207_v11 }
0x140b   :  { %8187 = vmatmul.mubr.msk.bf16.vlgmr.msra.gmra.mxu1 %vm2690_vm8, %v5612_v10 }
0x140c   :  { %8191 = vmatpush3.bf16.msra.mxu1 %v10004_v16  ;;  %8192 = vmatprep.mubr.msk.bf16.mxu1 %vm9208_vm7, %v9207_v11 }
0x140d   :  { %8196 = vmatprep.subr.bf16.mxu1 %v9207_v11 }
0x1411   :  { %8247 = vmatmul.mubr.msk.bf16.vlgmr.msra.gmra.mxu0 %vm2690_vm8, %v6239_v5 }
0x14c1   :  { %v10084_v26 = vpop.f32.mrf.mxu0 }
0x14c3   :  { %v10086_v29 = vpop.f32.mrf.mxu1  ;;  %v8224_v25 = vpop.f32.mrf.mxu0 }
0x14c5   :  { %v8182_v23 = vpop.f32.mrf.mxu1  ;;  %v10088_v40 = vpop.f32.mrf.mxu0 }
0x14c7   :  { %v10090_v30 = vpop.f32.mrf.mxu1  ;;  %v8225_v22 = vpop.f32.mrf.mxu0 }
0x14c9   :  { %v8183_v37 = vpop.f32.mrf.mxu1  ;;  %v10092_v14 = vpop.f32.mrf.mxu0 }
0x14ca   :  { %v5918_v37 = vsel %vm250_vm6, %v10024_v17, -inf }
0x14cb   :  { %v5655_v2 = vpop.f32.mrf.mxu1  ;;  %v8236_v38 = vpop.f32.mrf.mxu0 }
0x14cc   :  { %v5662_v48 = vsel %vm250_vm6, %v5655_v2, -inf  ;;  %v5915_v38 = vsel %vm250_vm6, %v10022_v35, -inf }
0x14cd   :  { %5663 = vmax.xlane.f32.xlu0 %v5662_v48  ;;  %v8188_v42 = vpop.f32.mrf.mxu1  ;;  %v10095_v31 = vpop.f32.mrf.mxu0  ;;  %v6040_v48 = vsel %vm250_vm6, %v10088_v40, -inf }
0x14ce   :  { %v6037_v42 = vsel %vm250_vm6, %v10084_v26, -inf }
0x14cf   :  { %v5658_v24 = vpop.f32.mrf.mxu1  ;;  %v8237_v51 = vpop.f32.mrf.mxu0 }
0x14d0   :  { %v5665_v28 = vsel %vm250_vm6, %v5658_v24, -inf  ;;  %v6168_v51 = vsel %vm250_vm6, %v10092_v14, -inf }
0x14d1   :  { %5666 = vmax.xlane.f32.xlu0 %v5665_v28  ;;  %v8189_v20 = vpop.f32.mrf.mxu1  ;;  %v10098_v50 = vpop.f32.mrf.mxu0 }
0x14d2   :  { %v6290_v20 = vsel %vm250_vm6, %v10098_v50, -inf }
0x14d3   :  { %v8248_v54 = vpop.f32.mrf.mxu0 }
0x14d5   :  { %v10100_v36 = vpop.f32.mrf.mxu0 }
0x14d6   :  { %v6293_v28 = vsel %vm250_vm6, %v10100_v36, -inf }
0x14d7   :  { %v8249_v47 = vpop.f32.mrf.mxu0 }
0x1556   :  { %v5664_v52 = vpop.xlane.xlu0 %5663 }
0x1557   :  { %v5668_v27 = vsub.f32 %v5655_v2, %v5664_v52 }
0x1559   :  { %v5670_v7 = vmul.f32 1.442695, %v5668_v27 }
0x155a   :  { %v5667_v57 = vpop.xlane.xlu0 %5666 }
0x155b   :  { %9052 = vpow2.f32 %v5670_v7  ;;  %v5669_v8 = vsub.f32 %v5658_v24, %v5667_v57  ;;  %v6171_v24 = vsel %vm250_vm6, %v10095_v31, -inf }
0x155d   :  { %v5672_v58 = vmul.f32 1.442695, %v5669_v8 }
0x155f   :  { %9054 = vpow2.f32 %v5672_v58 }
0x1568   :  { %v9053_v43 = vpop.eup %9052 }
0x1569   :  { %v5674_v41 = vsel %vm250_vm6, %v9053_v43, 0.0 }
0x156a   :  { %5675 = vadd.xlane.f32.xlu0 %v5674_v41 }
0x156c   :  { %v9055_v19 = vpop.eup %9054 }
0x156d   :  { %v5677_v15 = vsel %vm250_vm6, %v9055_v19, 0.0 }
0x156e   :  { %5678 = vadd.xlane.f32.xlu0 %v5677_v15 }
0x1584   :  { %5732 = vrot.lane.b32.xlu0 %v5612_v10, %s9209_s6 }
0x15f3   :  { %v5676_v34 = vpop.xlane.xlu0 %5675 }
0x15f4   :  { %9056 = vrcp.f32 %v5676_v34 }
0x15f7   :  { %v5679_v53 = vpop.xlane.xlu0 %5678 }
0x15f8   :  { %9058 = vrcp.f32 %v5679_v53 }
0x15fb   :  { %v5733_v4 = vpop.permute.xlu0 %5732 }
0x1601   :  { %v9057_v21 = vpop.eup %9056 }
0x1602   :  { %v5682_v18 = vmul.f32 %v9057_v21, %v9053_v43 }
0x1605   :  { %v9059_v46 = vpop.eup %9058 }
0x1606   :  { %v5683_v32 = vmul.f32 %v9059_v46, %v9055_v19 }
0x1608   :  { %v5684_v13 = vpack.c.bf16 %v5683_v32, %v5682_v18 }
0x160a   :  { %8193 = vmatmul.mubr.msk.bf16.vlgmr.msra.gmra.mxu1 %vm250_vm6, %v5684_v13 }
0x160b   :  { %8197 = vmatpush3.bf16.xpose.msra.mxu1 %v5741_v63  ;;  %8198 = vmatprep.mubr.msk.bf16.mxu1 %vm9208_vm7, %v9207_v11 }
0x160c   :  { %8202 = vmatprep.subr.bf16.mxu1 %v9207_v11 }
0x1612   :  { %8199 = vmatmul.mubr.msk.bf16.vlgmr.msra.gmra.mxu1 %vm2690_vm8, %v5733_v4 }
0x1613   :  { %8204 = vmatprep.mubr.msk.bf16.mxu1 %vm9208_vm7, %v9207_v11 }
0x16ca   :  { %v5722_v62 = vpop.f32.mrf.mxu1 }
0x16cb   :  { %5729 = vst.msk [vmem:[#allocation2 + $0x8] sm:$0xff] %vm2690_vm8, %v5722_v62 }
0x16cc   :  { %v8194_v61 = vpop.f32.mrf.mxu1 }
0x16ce   :  { %v5725_v10 = vpop.f32.mrf.mxu1 }
0x16cf   :  { %5730 = vst.msk [vmem:[#allocation2 + $0x18] sm:$0xff] %vm2690_vm8, %v5725_v10 }
0x16d0   :  { %v8195_v60 = vpop.f32.mrf.mxu1 }
0x16d2   :  { %v5777_v56 = vpop.f32.mrf.mxu1 }
0x16d3   :  { %v5784_v5 = vsel %vm250_vm6, %v5777_v56, -inf }
0x16d4   :  { %5785 = vmax.xlane.f32.xlu1 %v5784_v5  ;;  %v8200_v25 = vpop.f32.mrf.mxu1 }
0x16d6   :  { %v5780_v23 = vpop.f32.mrf.mxu1 }
0x16d7   :  { %v5787_v22 = vsel %vm250_vm6, %v5780_v23, -inf }
0x16d8   :  { %5788 = vmax.xlane.f32.xlu0 %v5787_v22  ;;  %v8201_v2 = vpop.f32.mrf.mxu1  ;;  %5919 = vmax.xlane.f32.xlu1 %v5918_v37 }
0x16dc   :  { %5916 = vmax.xlane.f32.xlu0 %v5915_v38  ;;  %6041 = vmax.xlane.f32.xlu1 %v6040_v48 }
0x16e0   :  { %6038 = vmax.xlane.f32.xlu0 %v6037_v42  ;;  %6172 = vmax.xlane.f32.xlu1 %v6171_v24 }
0x16e4   :  { %6169 = vmax.xlane.f32.xlu0 %v6168_v51  ;;  %6294 = vmax.xlane.f32.xlu1 %v6293_v28 }
0x16e8   :  { %6291 = vmax.xlane.f32.xlu0 %v6290_v20 }
0x175d   :  { %v5786_v54 = vpop.xlane.xlu1 %5785 }
0x1761   :  { %v5789_v47 = vpop.xlane.xlu0 %5788  ;;  %v5920_v52 = vpop.xlane.xlu1 %5919 }
0x1762   :  { %v5922_v27 = vsub.f32 %v10024_v17, %v5920_v52  ;;  %v5791_v15 = vsub.f32 %v5780_v23, %v5789_v47  ;;  %v5790_v17 = vsub.f32 %v5777_v56, %v5786_v54 }
0x1764   :  { %v5925_v7 = vmul.f32 1.442695, %v5922_v27  ;;  %v5794_v13 = vmul.f32 1.442695, %v5791_v15  ;;  %v5792_v4 = vmul.f32 1.442695, %v5790_v17 }
0x1765   :  { %v5917_v57 = vpop.xlane.xlu0 %5916  ;;  %v6042_v8 = vpop.xlane.xlu1 %6041 }
0x1766   :  { %v5921_v58 = vsub.f32 %v10022_v35, %v5917_v57  ;;  %v6044_v43 = vsub.f32 %v10088_v40, %v6042_v8  ;;  %9060 = vpow2.f32 %v5925_v7 }
0x1768   :  { %v5923_v41 = vmul.f32 1.442695, %v5921_v58  ;;  %v6047_v19 = vmul.f32 1.442695, %v6044_v43 }
0x1769   :  { %v6039_v34 = vpop.xlane.xlu0 %6038  ;;  %v6173_v53 = vpop.xlane.xlu1 %6172 }
0x176a   :  { %9062 = vpow2.f32 %v5923_v41  ;;  %v6043_v21 = vsub.f32 %v10084_v26, %v6039_v34  ;;  %v6175_v46 = vsub.f32 %v10095_v31, %v6173_v53 }
0x176b   :  { %9064 = vpow2.f32 %v6047_v19 }
0x176c   :  { %v6045_v18 = vmul.f32 1.442695, %v6043_v21  ;;  %v6178_v32 = vmul.f32 1.442695, %v6175_v46 }
0x176d   :  { %v6170_v63 = vpop.xlane.xlu0 %6169  ;;  %v6295_v40 = vpop.xlane.xlu1 %6294 }
0x176e   :  { %9066 = vpow2.f32 %v6045_v18  ;;  %v6174_v35 = vsub.f32 %v10092_v14, %v6170_v63  ;;  %v6297_v61 = vsub.f32 %v10100_v36, %v6295_v40 }
0x176f   :  { %9068 = vpow2.f32 %v6178_v32 }
0x1770   :  { %v6176_v62 = vmul.f32 1.442695, %v6174_v35  ;;  %9070 = vpow2.f32 %v5794_v13  ;;  %v6300_v56 = vmul.f32 1.442695, %v6297_v61 }
0x1771   :  { %v6292_v10 = vpop.xlane.xlu0 %6291 }
0x1772   :  { %9072 = vpow2.f32 %v6176_v62  ;;  %v6296_v26 = vsub.f32 %v10098_v50, %v6292_v10 }
0x1773   :  { %v10142_v31 = vpop.eup %9060  ;;  %9074 = vpow2.f32 %v5792_v4 }
0x1774   :  { %v6298_v60 = vmul.f32 1.442695, %v6296_v26  ;;  %v5930_v5 = vsel %vm250_vm6, %v10142_v31, 0.0 }
0x1775   :  { %5931 = vadd.xlane.f32.xlu1 %v5930_v5 }
0x1776   :  { %9076 = vpow2.f32 %v6298_v60 }
0x1777   :  { %v9063_v14 = vpop.eup %9062  ;;  %9078 = vpow2.f32 %v6300_v56 }
0x1778   :  { %v10146_v25 = vpop.eup %9064  ;;  %v5927_v23 = vsel %vm250_vm6, %v9063_v14, 0.0 }
0x1779   :  { %5928 = vadd.xlane.f32.xlu0 %v5927_v23  ;;  %v6052_v50 = vsel %vm250_vm6, %v10146_v25, 0.0 }
0x177a   :  { %6053 = vadd.xlane.f32.xlu1 %v6052_v50 }
0x177b   :  { %v10151_v36 = vpop.eup %9066 }
0x177c   :  { %v10153_v22 = vpop.eup %9068  ;;  %v6049_v37 = vsel %vm250_vm6, %v10151_v36, 0.0 }
0x177d   :  { %6050 = vadd.xlane.f32.xlu0 %v6049_v37  ;;  %v6183_v2 = vsel %vm250_vm6, %v10153_v22, 0.0  ;;  %v9071_v38 = vpop.eup %9070 }
0x177e   :  { %6184 = vadd.xlane.f32.xlu1 %v6183_v2  ;;  %v5799_v51 = vsel %vm250_vm6, %v9071_v38, 0.0  ;;  %v8868_v2 = vld [vmem:[#allocation6 + $0xf00] ss:$24 sps:$4 sm:$0xff]  }
0x177f   :  { %v10159_v48 = vpop.eup %9072 }
0x1780   :  { %v6180_v42 = vsel %vm250_vm6, %v10159_v48, 0.0  ;;  %v9075_v24 = vpop.eup %9074 }
0x1781   :  { %6181 = vadd.xlane.f32.xlu0 %v6180_v42  ;;  %v5796_v20 = vsel %vm250_vm6, %v9075_v24, 0.0  ;;  %v8876_v42 = vld [vmem:[#allocation6 + $0xea4] ss:$24 sps:$4 sm:$0xff]  }
0x1782   :  { %5800 = vadd.xlane.f32.xlu1 %v5799_v51  ;;  %v8879_v51 = vld [vmem:[#allocation6 + $0xe74] ss:$24 sps:$4 sm:$0xff]  }
0x1783   :  { %v10164_v28 = vpop.eup %9076 }
0x1784   :  { %v6302_v54 = vsel %vm250_vm6, %v10164_v28, 0.0  ;;  %v10169_v47 = vpop.eup %9078 }
0x1785   :  { %5797 = vadd.xlane.f32.xlu0 %v5796_v20  ;;  %v6305_v52 = vsel %vm250_vm6, %v10169_v47, 0.0  ;;  %v8882_v20 = vld [vmem:[#allocation6 + $0xe44] ss:$24 sps:$4 sm:$0xff]  }
0x1786   :  { %6303 = vadd.xlane.f32.xlu1 %v6302_v54  ;;  %v8885_v54 = vld [vmem:[#allocation6 + $0xe14] ss:$24 sps:$4 sm:$0xff]  }
0x178a   :  { %6306 = vadd.xlane.f32.xlu1 %v6305_v52  ;;  %v8888_v52 = vld [vmem:[#allocation6 + $0xde4] ss:$24 sps:$4 sm:$0xff]  }
0x179b   :  { %6061 = vrot.lane.b32.xlu1 %v10012_v6, %s9209_s6  ;;  %5808 = vrot.lane.b32.xlu0 %v10004_v16, %s9209_s6 }
0x179f   :  { %6314 = vrot.lane.b32.xlu0 %v10014_v59, %s9209_s6 }
0x17fe   :  { %v5932_v27 = vpop.xlane.xlu1 %5931 }
0x1802   :  { %v5929_v7 = vpop.xlane.xlu0 %5928 }
0x1803   :  { %v6054_v57 = vpop.xlane.xlu1 %6053 }
0x1806   :  { %v6051_v8 = vpop.xlane.xlu0 %6050 }
0x1807   :  { %v6185_v58 = vpop.xlane.xlu1 %6184 }
0x180a   :  { %v6182_v43 = vpop.xlane.xlu0 %6181 }
0x180b   :  { %v5801_v41 = vpop.xlane.xlu1 %5800 }
0x180c   :  { %9080 = vrcp.f32 %v5801_v41  ;;  %v8895_v41 = vld [vmem:[#allocation6 + $0x1050] ss:$24 sps:$4 sm:$0xff]  }
0x180e   :  { %v5798_v19 = vpop.xlane.xlu0 %5797 }
0x180f   :  { %9082 = vrcp.f32 %v5798_v19  ;;  %v6304_v46 = vpop.xlane.xlu1 %6303  ;;  %v8900_v19 = vld [vmem:[#allocation6 + $0x1024] ss:$24 sps:$4 sm:$0xff]  }
0x1810   :  { %9084 = vrcp.f32 %v5929_v7  ;;  %v8891_v7 = vld [vmem:[#allocation6 + $0xdb4] ss:$24 sps:$4 sm:$0xff]  }
0x1811   :  { %9086 = vrcp.f32 %v5932_v27  ;;  %v8886_v27 = vld [vmem:[#allocation6 + $0xde0] ss:$24 sps:$4 sm:$0xff]  }
0x1812   :  { %v5809_v15 = vpop.permute.xlu0 %5808  ;;  %9088 = vrcp.f32 %v6051_v8  ;;  %v8894_v8 = vld [vmem:[#allocation6 + $0x1084] ss:$24 sps:$4 sm:$0xff]  }
0x1813   :  { %8203 = vmatpush3.bf16.msra.mxu1 %v5809_v15  ;;  %9090 = vrcp.f32 %v6054_v57  ;;  %v6307_v63 = vpop.xlane.xlu1 %6306  ;;  %v8889_v57 = vld [vmem:[#allocation6 + $0xdb0] ss:$24 sps:$4 sm:$0xff]   ;;  %v8898_v15 = vld [vmem:[#allocation6 + $0x1020] ss:$24 sps:$4 sm:$0xff]  }
0x1814   :  { %8214 = vmatprep.subr.bf16.mxu1 %v9207_v11  ;;  %9092 = vrcp.f32 %v6182_v43  ;;  %v8897_v43 = vld [vmem:[#allocation6 + $0x1054] ss:$24 sps:$4 sm:$0xff]  }
0x1815   :  { %9094 = vrcp.f32 %v6185_v58  ;;  %v8892_v58 = vld [vmem:[#allocation6 + $0x1080] ss:$24 sps:$4 sm:$0xff]  }
0x1816   :  { %9096 = vrcp.f32 %v6307_v63  ;;  %v8913_v63 = vld [vmem:[#allocation6 + $0xf30] ss:$24 sps:$4 sm:$0xff]  }
0x1817   :  { %v6062_v62 = vpop.permute.xlu1 %6061  ;;  %9098 = vrcp.f32 %v6304_v46  ;;  %v8907_v46 = vld [vmem:[#allocation6 + $0xf90] ss:$24 sps:$4 sm:$0xff]  }
0x1819   :  { %v9081_v16 = vpop.eup %9080 }
0x181a   :  { %v5805_v53 = vmul.f32 %v9081_v16, %v9071_v38  ;;  %v8870_v38 = vld [vmem:[#allocation6 + $0xf04] ss:$24 sps:$4 sm:$0xff]   ;;  %v8903_v16 = vld [vmem:[#allocation6 + $0xff4] ss:$24 sps:$4 sm:$0xff]  }
0x181b   :  { %6588 = vmatprep.subr.bf16.mxu0 %v8870_v38 }
0x181c   :  { %v9083_v34 = vpop.eup %9082  ;;  %6589 = vmatpush1.bf16.msra.mxu0 %v8868_v2 }
0x181d   :  { %v5804_v21 = vmul.f32 %v9083_v34, %v9075_v24  ;;  %v9085_v18 = vpop.eup %9084  ;;  %v8874_v24 = vld [vmem:[#allocation6 + $0xea0] ss:$24 sps:$4 sm:$0xff]   ;;  %v8901_v34 = vld [vmem:[#allocation6 + $0xff0] ss:$24 sps:$4 sm:$0xff]  }
0x181e   :  { %v9087_v32 = vpop.eup %9086  ;;  %v5935_v13 = vmul.f32 %v9085_v18, %v9063_v14  ;;  %v8910_v18 = vld [vmem:[#allocation6 + $0xf60] ss:$24 sps:$4 sm:$0xff]  }
0x181f   :  { %v5806_v17 = vpack.c.bf16 %v5805_v53, %v5804_v21  ;;  %v5936_v35 = vmul.f32 %v9087_v32, %v10142_v31  ;;  %v9089_v4 = vpop.eup %9088  ;;  %v8904_v53 = vld [vmem:[#allocation6 + $0xfc0] ss:$24 sps:$4 sm:$0xff]   ;;  %v8906_v21 = vld [vmem:[#allocation6 + $0xfc4] ss:$24 sps:$4 sm:$0xff]  }
0x1820   :  { %v9091_v61 = vpop.eup %9090  ;;  %v8912_v32 = vld [vmem:[#allocation6 + $0xf64] ss:$24 sps:$4 sm:$0xff]  }
0x1821   :  { %8205 = vmatmul.mubr.msk.bf16.vlgmr.msra.gmra.mxu1 %vm250_vm6, %v5806_v17  ;;  %v5937_v40 = vpack.c.bf16 %v5936_v35, %v5935_v13  ;;  %v6058_v10 = vmul.f32 %v9091_v61, %v10146_v25  ;;  %v9093_v31 = vpop.eup %9092  ;;  %v6315_v25 = vpop.permute.xlu0 %6314  ;;  %v8909_v17 = vld [vmem:[#allocation6 + $0xf94] ss:$24 sps:$4 sm:$0xff]  }
0x1822   :  { %8215 = vmatpush3.bf16.msra.mxu1 %v10012_v6  ;;  %8216 = vmatprep.mubr.msk.bf16.mxu1 %vm9208_vm7, %v9207_v11  ;;  %v6057_v6 = vmul.f32 %v9089_v4, %v10151_v36  ;;  %v9095_v60 = vpop.eup %9094  ;;  %v6188_v56 = vmul.f32 %v9093_v31, %v10159_v48  ;;  %v8871_v48 = vld [vmem:[#allocation6 + $0xed0] ss:$24 sps:$4 sm:$0xff]   ;;  %v8915_v13 = vld [vmem:[#allocation6 + $0xf34] ss:$24 sps:$4 sm:$0xff]  }
0x1823   :  { %8226 = vmatprep.subr.bf16.mxu1 %v9207_v11  ;;  %v6189_v5 = vmul.f32 %v9095_v60, %v10153_v22  ;;  %v9097_v23 = vpop.eup %9096  ;;  %v8873_v22 = vld [vmem:[#allocation6 + $0xed4] ss:$24 sps:$4 sm:$0xff]  }
0x1824   :  { %v6059_v26 = vpack.c.bf16 %v6058_v10, %v6057_v6  ;;  %v9099_v50 = vpop.eup %9098  ;;  %6590 = vmatprep.subr.bf16.mxu0 %v8873_v22 }
0x1825   :  { %v6190_v14 = vpack.c.bf16 %v6189_v5, %v6188_v56  ;;  %v6310_v36 = vmul.f32 %v9099_v50, %v10164_v28  ;;  %6591 = vmatpush1.bf16.msra.mxu0 %v8871_v48  ;;  %v8880_v28 = vld [vmem:[#allocation6 + $0xe40] ss:$24 sps:$4 sm:$0xff]  }
0x1826   :  { %6592 = vmatprep.subr.bf16.mxu0 %v8876_v42 }
0x1829   :  { %8217 = vmatmul.mubr.msk.bf16.vlgmr.msra.gmra.mxu1 %vm250_vm6, %v5937_v40  ;;  %6593 = vmatpush1.bf16.msra.mxu0 %v8874_v24 }
0x182a   :  { %8227 = vmatpush3.bf16.msra.mxu1 %v6062_v62  ;;  %8228 = vmatprep.mubr.msk.bf16.mxu1 %vm9208_vm7, %v9207_v11 }
0x182b   :  { %8238 = vmatprep.subr.bf16.mxu1 %v9207_v11  ;;  %6594 = vmatprep.subr.bf16.mxu0 %v8879_v51 }
0x1831   :  { %8229 = vmatmul.mubr.msk.bf16.vlgmr.msra.gmra.mxu1 %vm250_vm6, %v6059_v26 }
0x1832   :  { %8239 = vmatpush3.bf16.msra.mxu1 %v10014_v59  ;;  %8240 = vmatprep.mubr.msk.bf16.mxu1 %vm9208_vm7, %v9207_v11  ;;  %v6311_v59 = vmul.f32 %v9097_v23, %v10169_v47  ;;  %v8883_v47 = vld [vmem:[#allocation6 + $0xe10] ss:$24 sps:$4 sm:$0xff]  }
0x1833   :  { %8250 = vmatprep.subr.bf16.mxu1 %v9207_v11 }
0x1834   :  { %v6312_v37 = vpack.c.bf16 %v6311_v59, %v6310_v36 }
0x1839   :  { %8241 = vmatmul.mubr.msk.bf16.vlgmr.msra.gmra.mxu1 %vm250_vm6, %v6190_v14 }
0x183a   :  { %8251 = vmatpush3.bf16.msra.mxu1 %v6315_v25  ;;  %8252 = vmatprep.mubr.msk.bf16.mxu1 %vm9208_vm7, %v9207_v11  ;;  %v8877_v11 = vld [vmem:[#allocation6 + $0xe70] ss:$24 sps:$4 sm:$0xff]  }
0x183b   :  { %6595 = vmatpush1.bf16.msra.mxu0 %v8877_v11 }
0x183c   :  { %6596 = vmatprep.subr.bf16.mxu0 %v8882_v20 }
0x183f   :  { %6597 = vmatpush1.bf16.msra.mxu0 %v8880_v28 }
0x1840   :  { %6598 = vmatprep.subr.bf16.mxu0 %v8885_v54 }
0x1841   :  { %8253 = vmatmul.mubr.msk.bf16.vlgmr.msra.gmra.mxu1 %vm250_vm6, %v6312_v37 }
0x1843   :  { %6599 = vmatpush1.bf16.msra.mxu0 %v8883_v47 }
0x1844   :  { %6600 = vmatprep.subr.bf16.mxu0 %v8888_v52 }
0x1847   :  { %6601 = vmatpush1.bf16.msra.mxu0 %v8886_v27 }
0x1848   :  { %6602 = vmatprep.subr.bf16.mxu0 %v8891_v7 }
0x184b   :  { %6603 = vmatpush1.bf16.msra.mxu0 %v8889_v57 }
0x184c   :  { %6604 = vmatprep.subr.bf16.mxu0 %v8894_v8 }
0x184f   :  { %6605 = vmatpush2.bf16.msra.mxu0 %v8892_v58 }
0x1850   :  { %6606 = vmatprep.subr.bf16.mxu0 %v8897_v43 }
0x1853   :  { %6607 = vmatpush2.bf16.msra.mxu0 %v8895_v41  ;;  %v6416_v41 = vld [vmem:[#allocation3 + $0x83] ss:$8 sm:$0x3] }
0x1854   :  { %6608 = vmatprep.subr.bf16.mxu0 %v8900_v19  ;;  %v6421_v19 = vrot.slane %v6416_v41, %v9288_v49 }
0x1857   :  { %6609 = vmatpush2.bf16.msra.mxu0 %v8898_v15  ;;  %v6425_v15 = vrot.slane %v6416_v41, %v9334_v39 }
0x1858   :  { %6610 = vmatprep.subr.bf16.mxu0 %v8903_v16 }
0x185b   :  { %6611 = vmatpush2.bf16.msra.mxu0 %v8901_v34 }
0x185c   :  { %6612 = vmatprep.subr.bf16.mxu0 %v8906_v21 }
0x185f   :  { %6613 = vmatpush2.bf16.msra.mxu0 %v8904_v53 }
0x1860   :  { %6614 = vmatprep.subr.bf16.mxu0 %v8909_v17 }
0x1863   :  { %6615 = vmatpush2.bf16.msra.mxu0 %v8907_v46 }
0x1864   :  { %6616 = vmatprep.subr.bf16.mxu0 %v8912_v32 }
0x1867   :  { %6617 = vmatpush2.bf16.msra.mxu0 %v8910_v18 }
0x1868   :  { %6618 = vmatprep.subr.bf16.mxu0 %v8915_v13 }
0x186b   :  { %6619 = vmatpush2.bf16.msra.mxu0 %v8913_v63 }
0x18e1   :  { %v5848_v35 = vpop.f32.mrf.mxu1 }
0x18e2   :  { %5857 = vrot.lane.b32.xlu0 %v5848_v35, %s9209_s6 }
0x18e3   :  { %v8206_v40 = vpop.f32.mrf.mxu1 }
0x18e5   :  { %v5851_v4 = vpop.f32.mrf.mxu1 }
0x18e6   :  { %5859 = vrot.lane.b32.xlu1 %v5851_v4, %s9209_s6  ;;  %5604 = vrot.lane.b32.xlu0 %v10086_v29, %s9209_s6 }
0x18e7   :  { %v8207_v62 = vpop.f32.mrf.mxu1 }
0x18e9   :  { %v5975_v61 = vpop.f32.mrf.mxu1 }
0x18ea   :  { %5982 = vst.msk [vmem:[#allocation2 + $0x20] sm:$0xff] %vm2690_vm8, %v5975_v61  ;;  %5606 = vrot.lane.b32.xlu1 %v10090_v30, %s9209_s6 }
0x18eb   :  { %v8218_v6 = vpop.f32.mrf.mxu1 }
0x18ed   :  { %v5978_v10 = vpop.f32.mrf.mxu1 }
0x18ee   :  { %5983 = vst.msk [vmem:[#allocation2 + $0x30] sm:$0xff] %vm2690_vm8, %v5978_v10 }
0x18ef   :  { %v8219_v26 = vpop.f32.mrf.mxu1 }
0x18f1   :  { %v6101_v31 = vpop.f32.mrf.mxu1 }
0x18f3   :  { %v8230_v60 = vpop.f32.mrf.mxu1 }
0x18f5   :  { %v6104_v56 = vpop.f32.mrf.mxu1 }
0x18f7   :  { %v8231_v5 = vpop.f32.mrf.mxu1 }
0x18f9   :  { %v6228_v14 = vpop.f32.mrf.mxu1 }
0x18fa   :  { %6235 = vst.msk [vmem:[#allocation2 + $0x28] sm:$0xff] %vm2690_vm8, %v6228_v14 }
0x18fb   :  { %v8242_v29 = vpop.f32.mrf.mxu1 }
0x18fd   :  { %v6231_v23 = vpop.f32.mrf.mxu1 }
0x18fe   :  { %6236 = vst.msk [vmem:[#allocation2 + $0x38] sm:$0xff] %vm2690_vm8, %v6231_v23  ;;  %v8916_v23 = vld [vmem:[#allocation6 + $0x1088] ss:$24 sps:$4 sm:$0xff]  }
0x18ff   :  { %v8243_v25 = vpop.f32.mrf.mxu1  ;;  %8030 = vmatprep.subr.bf16.mxu1 %v8916_v23 }
0x1901   :  { %v6354_v50 = vpop.f32.mrf.mxu1 }
0x1902   :  { %6363 = vrot.lane.b32.xlu0 %v6354_v50, %s9209_s6 }
0x1903   :  { %v8254_v30 = vpop.f32.mrf.mxu1 }
0x1905   :  { %v6357_v59 = vpop.f32.mrf.mxu1 }
0x1906   :  { %6110 = vrot.lane.b32.xlu0 %v6101_v31, %s9209_s6  ;;  %6365 = vrot.lane.b32.xlu1 %v6357_v59, %s9209_s6 }
0x1907   :  { %v8255_v36 = vpop.f32.mrf.mxu1 }
0x190a   :  { %6112 = vrot.lane.b32.xlu1 %v6104_v56, %s9209_s6 }
0x1954   :  { %v5858_v37 = vpop.permute.xlu0 %5857 }
0x1955   :  { %5863 = vst.msk [vmem:[#allocation2 + $0x8] sm:$0xff] %vm2939_vm9, %v5858_v37 }
0x1958   :  { %v5860_v2 = vpop.permute.xlu1 %5859  ;;  %v5605_v38 = vpop.permute.xlu0 %5604 }
0x1959   :  { %5864 = vst.msk [vmem:[#allocation2 + $0x18] sm:$0xff] %vm2939_vm9, %v5860_v2  ;;  %5610 = vst.msk [vmem:[#allocation2] sm:$0xff] %vm2939_vm9, %v5605_v38 }
0x195c   :  { %v5607_v22 = vpop.permute.xlu1 %5606  ;;  %v6404_v48 = vld [vmem:[#allocation2 + $0x8] sm:$0xff] }
0x195d   :  { %5611 = vst.msk [vmem:[#allocation2 + $0x10] sm:$0xff] %vm2939_vm9, %v5607_v22 }
0x1960   :  { %v6406_v42 = vld [vmem:[#allocation2 + $0x18] sm:$0xff]  ;;  %v6403_v51 = vld [vmem:[#allocation2] sm:$0xff] }
0x1961   :  { %v6412_v24 = vpack.c.bf16 %v6406_v42, %v6404_v48  ;;  %v8917_v42 = vld [vmem:[#allocation6 + $0xf08] ss:$24 sps:$4 sm:$0xff]  }
0x1962   :  { %8031 = vmatpush3.bf16.msra.mxu1 %v8917_v42 }
0x1963   :  { %6620 = vmatprep.mubr.bf16.mxu0 %v6412_v24  ;;  %v8918_v24 = vld [vmem:[#allocation6 + $0x1058] ss:$24 sps:$4 sm:$0xff]  }
0x1964   :  { %v6405_v11 = vld [vmem:[#allocation2 + $0x10] sm:$0xff]  ;;  %8032 = vmatprep.subr.bf16.mxu1 %v8918_v24 }
0x1965   :  { %v6411_v20 = vpack.c.bf16 %v6405_v11, %v6403_v51  ;;  %v8919_v51 = vld [vmem:[#allocation6 + $0xed8] ss:$24 sps:$4 sm:$0xff]   ;;  %v8920_v11 = vld [vmem:[#allocation6 + $0x1028] ss:$24 sps:$4 sm:$0xff]   ;;  %v8935_v24 = vld [vmem:[#allocation6 + $0xedc] ss:$24 sps:$4 sm:$0xff]  }
0x1966   :  { %8033 = vmatpush3.bf16.msra.mxu1 %v8919_v51  ;;  %v8940_v51 = vld [vmem:[#allocation6 + $0xeb0] ss:$24 sps:$4 sm:$0xff]  }
0x1967   :  { %6621 = vmatmul.mubr.bf16.vlgmr.msra.gmra.mxu0 %v6411_v20  ;;  %v8921_v20 = vld [vmem:[#allocation6 + $0xea8] ss:$24 sps:$4 sm:$0xff]   ;;  %8034 = vmatprep.subr.bf16.mxu1 %v8920_v11 }
0x196a   :  { %8035 = vmatpush3.bf16.msra.mxu1 %v8921_v20 }
0x1974   :  { %v6364_v28 = vpop.permute.xlu0 %6363 }
0x1975   :  { %6369 = vst.msk [vmem:[#allocation2 + $0x28] sm:$0xff] %vm2939_vm9, %v6364_v28  ;;  %v8922_v28 = vld [vmem:[#allocation6 + $0xff8] ss:$24 sps:$4 sm:$0xff]  }
0x1976   :  { %8036 = vmatprep.subr.bf16.mxu1 %v8922_v28 }
0x1978   :  { %v6111_v54 = vpop.permute.xlu0 %6110  ;;  %v6366_v47 = vpop.permute.xlu1 %6365 }
0x1979   :  { %6116 = vst.msk [vmem:[#allocation2 + $0x20] sm:$0xff] %vm2939_vm9, %v6111_v54  ;;  %6370 = vst.msk [vmem:[#allocation2 + $0x38] sm:$0xff] %vm2939_vm9, %v6366_v47  ;;  %v8923_v54 = vld [vmem:[#allocation6 + $0xe78] ss:$24 sps:$4 sm:$0xff]  }
0x197a   :  { %8037 = vmatpush3.bf16.msra.mxu1 %v8923_v54  ;;  %v8938_v54 = vld [vmem:[#allocation6 + $0xeac] ss:$24 sps:$4 sm:$0xff]  }
0x197c   :  { %v6113_v52 = vpop.permute.xlu1 %6112  ;;  %v6408_v27 = vld [vmem:[#allocation2 + $0x28] sm:$0xff] }
0x197d   :  { %6117 = vst.msk [vmem:[#allocation2 + $0x30] sm:$0xff] %vm2939_vm9, %v6113_v52 }
0x1980   :  { %v6410_v7 = vld [vmem:[#allocation2 + $0x38] sm:$0xff]  ;;  %v6407_v8 = vld [vmem:[#allocation2 + $0x20] sm:$0xff] }
0x1981   :  { %v6414_v57 = vpack.c.bf16 %v6410_v7, %v6408_v27  ;;  %v8924_v27 = vld [vmem:[#allocation6 + $0xfc8] ss:$24 sps:$4 sm:$0xff]  }
0x1982   :  { %v8925_v7 = vld [vmem:[#allocation6 + $0xe48] ss:$24 sps:$4 sm:$0xff]   ;;  %8038 = vmatprep.subr.bf16.mxu1 %v8924_v27  ;;  %v8941_v27 = vld [vmem:[#allocation6 + $0xe7c] ss:$24 sps:$4 sm:$0xff]  }
0x1983   :  { %6630 = vmatprep.mubr.bf16.mxu0 %v6414_v57  ;;  %8039 = vmatpush3.bf16.msra.mxu1 %v8925_v7  ;;  %v8946_v7 = vld [vmem:[#allocation6 + $0xe50] ss:$24 sps:$4 sm:$0xff]  }
0x1984   :  { %v6409_v58 = vld [vmem:[#allocation2 + $0x30] sm:$0xff] }
0x1985   :  { %v6413_v43 = vpack.c.bf16 %v6409_v58, %v6407_v8 }
0x1987   :  { %6631 = vmatmul.mubr.bf16.gmra.mxu0 %v6413_v43 }
0x1a27   :  { %v6622_v16 = vpop.f32.mrf.mxu0 }
0x1a28   :  { %v6623_v34 = vadd.f32 %v6622_v16, %v6421_v19  ;;  %v8927_v16 = vld [vmem:[#allocation6 + $0xe18] ss:$24 sps:$4 sm:$0xff]  }
0x1a29   :  { %v6624_v53 = vpop.f32.mrf.mxu0 }
0x1a2a   :  { %v6625_v21 = vadd.f32 %v6624_v53, %v6425_v15  ;;  %v6641_v17 = vadd.f32 %v6623_v34, %v9914_v33 }
0x1a2b   :  { %v6626_v46 = vpop.f32.mrf.mxu0 }
0x1a2c   :  { %v6642_v18 = vadd.f32 %v6625_v21, %v9908_v45  ;;  %v6627_v32 = vadd.f32 %v6626_v46, %v6421_v19 }
0x1a2d   :  { %v6628_v13 = vpop.f32.mrf.mxu0 }
0x1a2e   :  { %v6629_v63 = vadd.f32 %v6628_v13, %v6425_v15  ;;  %v6653_v35 = vadd.f32 %v6642_v18, %v6641_v17  ;;  %v6643_v40 = vadd.f32 %v6627_v32, %v9917_v55  ;;  %v8929_v32 = vld [vmem:[#allocation6 + $0xde8] ss:$24 sps:$4 sm:$0xff]   ;;  %v8930_v13 = vld [vmem:[#allocation6 + $0xf38] ss:$24 sps:$4 sm:$0xff]  }
0x1a30   :  { %v6644_v4 = vadd.f32 %v6629_v63, %v9911_v9  ;;  %6654 = vadd.xlane.f32.xlu0 %v6653_v35  ;;  %v8931_v35 = vld [vmem:[#allocation6 + $0xdb8] ss:$24 sps:$4 sm:$0xff]  }
0x1a32   :  { %v6656_v62 = vadd.f32 %v6644_v4, %v6643_v40 }
0x1a34   :  { %6657 = vadd.xlane.f32.xlu1 %v6656_v62 }
0x1a47   :  { %v6632_v61 = vpop.f32.mrf.mxu0 }
0x1a48   :  { %v6633_v6 = vadd.f32 %v6632_v61, %v6421_v19 }
0x1a49   :  { %v6634_v10 = vpop.f32.mrf.mxu0 }
0x1a4a   :  { %v6635_v26 = vadd.f32 %v6634_v10, %v6425_v15  ;;  %v6645_v33 = vadd.f32 %v6633_v6, %v9949_v1 }
0x1a4b   :  { %v6636_v31 = vpop.f32.mrf.mxu0 }
0x1a4c   :  { %v6646_v45 = vadd.f32 %v6635_v26, %v9943_v44  ;;  %v6637_v60 = vadd.f32 %v6636_v31, %v6421_v19  ;;  %v6650_v31 = vld [vmem:[#allocation3 + $0x86] ss:$8 sm:$0x3] }
0x1a4d   :  { %v6638_v56 = vpop.f32.mrf.mxu0 }
0x1a4e   :  { %v6639_v5 = vadd.f32 %v6638_v56, %v6425_v15  ;;  %v6659_v14 = vadd.f32 %v6646_v45, %v6645_v33  ;;  %v6647_v55 = vadd.f32 %v6637_v60, %v9952_v3  ;;  %v8926_v15 = vld [vmem:[#allocation6 + $0xf98] ss:$24 sps:$4 sm:$0xff]   ;;  %v6652_v60 = vld [vmem:[#allocation3 + $0x87] ss:$8 sm:$0x3] }
0x1a4f   :  { %8040 = vmatprep.subr.bf16.mxu1 %v8926_v15 }
0x1a50   :  { %v6648_v9 = vadd.f32 %v6639_v5, %v9946_v12  ;;  %6660 = vadd.xlane.f32.xlu0 %v6659_v14  ;;  %8041 = vmatpush3.bf16.msra.mxu1 %v8927_v16  ;;  %v6721_v5 = vrot.slane %v6650_v31, %v9288_v49  ;;  %v6725_v14 = vrot.slane %v6650_v31, %v9334_v39 }
0x1a52   :  { %v6662_v29 = vadd.f32 %v6648_v9, %v6647_v55 }
0x1a54   :  { %6663 = vadd.xlane.f32.xlu0 %v6662_v29  ;;  %v6744_v29 = vrot.slane %v6652_v60, %v9334_v39 }
0x1ab9   :  { %v6655_v25 = vpop.xlane.xlu0 %6654 }
0x1aba   :  { %v6665_v50 = vmul.f32 0.00390625, %v6655_v25 }
0x1abc   :  { %v10237_v30 = vsub.f32 %v6641_v17, %v6665_v50  ;;  %v10239_v1 = vsub.f32 %v6642_v18, %v6665_v50  ;;  %v8928_v18 = vld [vmem:[#allocation6 + $0xf68] ss:$24 sps:$4 sm:$0xff]  }
0x1abd   :  { %v6658_v44 = vpop.xlane.xlu1 %6657  ;;  %8042 = vmatprep.subr.bf16.mxu1 %v8928_v18 }
0x1abe   :  { %v6677_v59 = vmul.f32 %v10237_v30, %v10237_v30  ;;  %v6678_v3 = vmul.f32 %v10239_v1, %v10239_v1  ;;  %v6666_v36 = vmul.f32 0.00390625, %v6658_v44  ;;  %8043 = vmatpush3.bf16.msra.mxu1 %v8929_v32 }
0x1abf   :  { %8044 = vmatprep.subr.bf16.mxu1 %v8930_v13 }
0x1ac0   :  { %v10245_v12 = vsub.f32 %v6643_v40, %v6666_v36  ;;  %v10247_v37 = vsub.f32 %v6644_v4, %v6666_v36  ;;  %v6685_v2 = vadd.f32 %v6678_v3, %v6677_v59  ;;  %v8934_v40 = vld [vmem:[#allocation6 + $0xf10] ss:$24 sps:$4 sm:$0xff]  }
0x1ac2   :  { %v6679_v38 = vmul.f32 %v10245_v12, %v10245_v12  ;;  %v6680_v22 = vmul.f32 %v10247_v37, %v10247_v37  ;;  %6686 = vadd.xlane.f32.xlu1 %v6685_v2  ;;  %8045 = vmatpush3.bf16.msra.mxu1 %v8931_v35 }
0x1ac3   :  { %7059 = vmatprep.subr.bf16.mxu1 %v8934_v40 }
0x1ac4   :  { %v6688_v48 = vadd.f32 %v6680_v22, %v6679_v38  ;;  %v8932_v22 = vld [vmem:[#allocation6 + $0xf0c] ss:$24 sps:$4 sm:$0xff]  }
0x1ac6   :  { %6689 = vadd.xlane.f32.xlu0 %v6688_v48 }
0x1ad9   :  { %v6661_v47 = vpop.xlane.xlu0 %6660 }
0x1ada   :  { %v6667_v52 = vmul.f32 0.00390625, %v6661_v47  ;;  %v8943_v47 = vld [vmem:[#allocation6 + $0xe80] ss:$24 sps:$4 sm:$0xff]  }
0x1adc   :  { %v10253_v57 = vsub.f32 %v6645_v33, %v6667_v52  ;;  %v10255_v8 = vsub.f32 %v6646_v45, %v6667_v52 }
0x1add   :  { %v6664_v58 = vpop.xlane.xlu0 %6663 }
0x1ade   :  { %v6681_v43 = vmul.f32 %v10253_v57, %v10253_v57  ;;  %v6682_v41 = vmul.f32 %v10255_v8, %v10255_v8  ;;  %v6668_v19 = vmul.f32 0.00390625, %v6664_v58  ;;  %v8944_v58 = vld [vmem:[#allocation6 + $0xe4c] ss:$24 sps:$4 sm:$0xff]  }
0x1ae0   :  { %v10261_v34 = vsub.f32 %v6647_v55, %v6668_v19  ;;  %v10263_v53 = vsub.f32 %v6648_v9, %v6668_v19  ;;  %v6691_v21 = vadd.f32 %v6682_v41, %v6681_v43  ;;  %v6740_v9 = vrot.slane %v6652_v60, %v9288_v49 }
0x1ae2   :  { %v6683_v46 = vmul.f32 %v10261_v34, %v10261_v34  ;;  %v6684_v17 = vmul.f32 %v10263_v53, %v10263_v53  ;;  %6692 = vadd.xlane.f32.xlu1 %v6691_v21 }
0x1ae4   :  { %v6694_v63 = vadd.f32 %v6684_v17, %v6683_v46 }
0x1ae6   :  { %6695 = vadd.xlane.f32.xlu0 %v6694_v63 }
0x1b4b   :  { %v6687_v4 = vpop.xlane.xlu1 %6686 }
0x1b4c   :  { %v6697_v62 = vmul.f32 0.00390625, %v6687_v4  ;;  %v8952_v4 = vld [vmem:[#allocation6 + $0xdf0] ss:$24 sps:$4 sm:$0xff]  }
0x1b4e   :  { %v6701_v61 = vadd.f32 1e-05, %v6697_v62  ;;  %v8950_v62 = vld [vmem:[#allocation6 + $0xdec] ss:$24 sps:$4 sm:$0xff]  }
0x1b4f   :  { %v6690_v6 = vpop.xlane.xlu0 %6689 }
0x1b50   :  { %9100 = vrsqrt.f32 %v6701_v61  ;;  %v6698_v10 = vmul.f32 0.00390625, %v6690_v6  ;;  %v8955_v61 = vld [vmem:[#allocation6 + $0xdc0] ss:$24 sps:$4 sm:$0xff]   ;;  %v8953_v6 = vld [vmem:[#allocation6 + $0xdbc] ss:$24 sps:$4 sm:$0xff]  }
0x1b52   :  { %v6702_v26 = vadd.f32 1e-05, %v6698_v10 }
0x1b54   :  { %9102 = vrsqrt.f32 %v6702_v26  ;;  %v6808_v26 = vld [vmem:[#allocation3 + $0x84] ss:$8 sm:$0x3] }
0x1b5d   :  { %v9101_v33 = vpop.eup %9100 }
0x1b5e   :  { %v6709_v45 = vmul.f32 %v9101_v33, %v10237_v30  ;;  %v6710_v56 = vmul.f32 %v9101_v33, %v10239_v1  ;;  %v6813_v33 = vrot.slane %v6808_v26, %v9288_v49 }
0x1b60   :  { %v6729_v50 = vmul.f32 %v6725_v14, %v6710_v56  ;;  %v6728_v44 = vmul.f32 %v6721_v5, %v6709_v45 }
0x1b61   :  { %v9103_v55 = vpop.eup %9102 }
0x1b62   :  { %v6711_v23 = vmul.f32 %v9103_v55, %v10245_v12  ;;  %v6712_v25 = vmul.f32 %v9103_v55, %v10247_v37  ;;  %v10277_v3 = vadd.f32 %v6744_v29, %v6729_v50  ;;  %v10281_v36 = vadd.f32 %v6740_v9, %v6728_v44  ;;  %v8937_v37 = vld [vmem:[#allocation6 + $0xee0] ss:$24 sps:$4 sm:$0xff]  }
0x1b64   :  { %v6731_v59 = vmul.f32 %v6725_v14, %v6712_v25  ;;  %v6730_v30 = vmul.f32 %v6721_v5, %v6711_v23 }
0x1b66   :  { %v10279_v1 = vadd.f32 %v6744_v29, %v6731_v59  ;;  %v10283_v2 = vadd.f32 %v6740_v9, %v6730_v30 }
0x1b68   :  { %v6804_v38 = vpack.c.bf16 %v10279_v1, %v10277_v3  ;;  %v6803_v12 = vpack.c.bf16 %v10283_v2, %v10281_v36 }
0x1b6a   :  { %6943 = vmatprep.mubr.bf16.mxu1 %v6804_v38 }
0x1b6b   :  { %6944 = vmatmul.mubr.bf16.vlgmr.msra.gmra.mxu1 %v6803_v12  ;;  %v6693_v48 = vpop.xlane.xlu1 %6692 }
0x1b6c   :  { %v6699_v42 = vmul.f32 0.00390625, %v6693_v48  ;;  %7060 = vmatpush1.bf16.msra.mxu1 %v8932_v22 }
0x1b6d   :  { %7061 = vmatprep.subr.bf16.mxu1 %v8937_v37 }
0x1b6e   :  { %v6703_v11 = vadd.f32 1e-05, %v6699_v42 }
0x1b6f   :  { %v6696_v20 = vpop.xlane.xlu0 %6695 }
0x1b70   :  { %9104 = vrsqrt.f32 %v6703_v11  ;;  %v6700_v28 = vmul.f32 0.00390625, %v6696_v20  ;;  %7062 = vmatpush1.bf16.msra.mxu1 %v8935_v24  ;;  %v6967_v20 = vld [vmem:[#allocation3 + $0x85] ss:$8 sm:$0x3] }
0x1b71   :  { %7063 = vmatprep.subr.bf16.mxu1 %v8940_v51 }
0x1b72   :  { %v6704_v52 = vadd.f32 1e-05, %v6700_v28 }
0x1b74   :  { %9106 = vrsqrt.f32 %v6704_v52  ;;  %7064 = vmatpush1.bf16.msra.mxu1 %v8938_v54  ;;  %v6972_v54 = vrot.slane %v6967_v20, %v9288_v49 }
0x1b75   :  { %7065 = vmatprep.subr.bf16.mxu1 %v8943_v47 }
0x1b78   :  { %7066 = vmatpush1.bf16.msra.mxu1 %v8941_v27 }
0x1b79   :  { %7067 = vmatprep.subr.bf16.mxu1 %v8946_v7 }
0x1b7c   :  { %7068 = vmatpush1.bf16.msra.mxu1 %v8944_v58 }
0x1b7d   :  { %v9105_v43 = vpop.eup %9104 }
0x1b7e   :  { %v6714_v41 = vmul.f32 %v9105_v43, %v10255_v8  ;;  %v6713_v19 = vmul.f32 %v9105_v43, %v10253_v57 }
0x1b80   :  { %v6733_v21 = vmul.f32 %v6725_v14, %v6714_v41  ;;  %v6732_v17 = vmul.f32 %v6721_v5, %v6713_v19 }
0x1b81   :  { %v9107_v15 = vpop.eup %9106 }
0x1b82   :  { %v6716_v16 = vmul.f32 %v9107_v15, %v10263_v53  ;;  %v6715_v46 = vmul.f32 %v9107_v15, %v10261_v34  ;;  %v10293_v13 = vadd.f32 %v6744_v29, %v6733_v21  ;;  %v6751_v35 = vadd.f32 %v6740_v9, %v6732_v17  ;;  %v8949_v34 = vld [vmem:[#allocation6 + $0xe20] ss:$24 sps:$4 sm:$0xff]   ;;  %v8947_v53 = vld [vmem:[#allocation6 + $0xe1c] ss:$24 sps:$4 sm:$0xff]  }
0x1b83   :  { %7069 = vmatprep.subr.bf16.mxu1 %v8949_v34 }
0x1b84   :  { %v6735_v18 = vmul.f32 %v6725_v14, %v6716_v16  ;;  %v6734_v32 = vmul.f32 %v6721_v5, %v6715_v46  ;;  %7070 = vmatpush1.bf16.msra.mxu1 %v8947_v53 }
0x1b85   :  { %7071 = vmatprep.subr.bf16.mxu1 %v8952_v4 }
0x1b86   :  { %v10295_v63 = vadd.f32 %v6744_v29, %v6735_v18  ;;  %v10297_v40 = vadd.f32 %v6740_v9, %v6734_v32 }
0x1b88   :  { %v6806_v8 = vpack.c.bf16 %v10295_v63, %v10293_v13  ;;  %v6805_v57 = vpack.c.bf16 %v10297_v40, %v6751_v35  ;;  %7072 = vmatpush1.bf16.msra.mxu1 %v8950_v62 }
0x1b89   :  { %7073 = vmatprep.subr.bf16.mxu1 %v8955_v61 }
0x1b8a   :  { %6951 = vmatprep.mubr.bf16.mxu1 %v6806_v8 }
0x1b8b   :  { %6952 = vmatmul.mubr.bf16.gmra.mxu1 %v6805_v57 }
0x1b8c   :  { %7091 = vmatprep.mubr.bf16.mxu1 %v9204_v0  ;;  %7074 = vmatpush1.bf16.msra.mxu1 %v8953_v6 }
0x1c2b   :  { %v8046_v10 = vpop.f32.mrf.mxu1 }
0x1c2d   :  { %v8047_v31 = vpop.f32.mrf.mxu1 }
0x1c2e   :  { %v8048_v45 = vadd.f32 %v8047_v31, %v8046_v10 }
0x1c2f   :  { %v8049_v60 = vpop.f32.mrf.mxu1 }
0x1c30   :  { %v6946_v5 = vadd.f32 %v8048_v45, %v6813_v33 }
0x1c31   :  { %v8050_v56 = vpop.f32.mrf.mxu1 }
0x1c32   :  { %v8051_v14 = vadd.f32 %v8050_v56, %v8049_v60  ;;  %v6960_v9 = vmax.f32 %v6946_v5, 0.0 }
0x1c34   :  { %v6949_v55 = vadd.f32 %v8051_v14, %v6813_v33 }
0x1c36   :  { %v6961_v29 = vmax.f32 %v6949_v55, 0.0 }
0x1c38   :  { %v6964_v23 = vpack.c.bf16 %v6961_v29, %v6960_v9 }
0x1c3a   :  { %7092 = vmatmul.mubr.bf16.vlgmr.msra.gmra.mxu1 %v6964_v23 }
0x1c3b   :  { %7101 = vmatprep.mubr.bf16.mxu1 %v9204_v0  ;;  %v6976_v0 = vrot.slane %v6967_v20, %v9334_v39 }
0x1c4b   :  { %v8052_v25 = vpop.f32.mrf.mxu1 }
0x1c4d   :  { %v8053_v50 = vpop.f32.mrf.mxu1 }
0x1c4e   :  { %v8054_v44 = vadd.f32 %v8053_v50, %v8052_v25 }
0x1c4f   :  { %v8055_v59 = vpop.f32.mrf.mxu1 }
0x1c50   :  { %v6954_v38 = vadd.f32 %v8054_v44, %v6813_v33 }
0x1c51   :  { %v8056_v30 = vpop.f32.mrf.mxu1 }
0x1c52   :  { %v8057_v12 = vadd.f32 %v8056_v30, %v8055_v59  ;;  %v6962_v37 = vmax.f32 %v6954_v38, 0.0 }
0x1c54   :  { %v6957_v22 = vadd.f32 %v8057_v12, %v6813_v33 }
0x1c56   :  { %v6963_v48 = vmax.f32 %v6957_v22, 0.0 }
0x1c58   :  { %v6965_v42 = vpack.c.bf16 %v6963_v48, %v6962_v37 }
0x1c5a   :  { %7102 = vmatmul.mubr.bf16.gmra.mxu1 %v6965_v42 }
0x1cfa   :  { %v7093_v24 = vpop.f32.mrf.mxu1 }
0x1cfb   :  { %v7094_v41 = vadd.f32 %v7093_v24, %v6972_v54 }
0x1cfc   :  { %v7095_v51 = vpop.f32.mrf.mxu1 }
0x1cfd   :  { %v7096_v7 = vadd.f32 %v7095_v51, %v6976_v0  ;;  %v7112_v8 = vadd.f32 %v7094_v41, %v10281_v36 }
0x1cfe   :  { %v7097_v11 = vpop.f32.mrf.mxu1 }
0x1cff   :  { %v7113_v46 = vadd.f32 %v7096_v7, %v10277_v3  ;;  %v7098_v57 = vadd.f32 %v7097_v11, %v6972_v54  ;;  %v7123_v7 = vld [vmem:[#allocation3 + $0x91] ss:$8 sm:$0x3] }
0x1d00   :  { %v7099_v28 = vpop.f32.mrf.mxu1 }
0x1d01   :  { %v7100_v17 = vadd.f32 %v7099_v28, %v6976_v0  ;;  %v7124_v62 = vadd.f32 %v7113_v46, %v7112_v8 }
0x1d03   :  { %v7115_v4 = vadd.f32 %v7100_v17, %v10279_v1 }
0x1d1a   :  { %v7103_v47 = vpop.f32.mrf.mxu1 }
0x1d1b   :  { %v7104_v52 = vadd.f32 %v7103_v47, %v6972_v54 }
0x1d1c   :  { %v7105_v27 = vpop.f32.mrf.mxu1 }
0x1d1d   :  { %v7106_v58 = vadd.f32 %v7105_v27, %v6976_v0  ;;  %v7116_v19 = vadd.f32 %v7104_v52, %v6751_v35  ;;  %v7121_v27 = vld [vmem:[#allocation3 + $0x90] ss:$8 sm:$0x3] }
0x1d1e   :  { %v7107_v43 = vpop.f32.mrf.mxu1 }
0x1d1f   :  { %v7117_v15 = vadd.f32 %v7106_v58, %v10293_v13  ;;  %v7108_v16 = vadd.f32 %v7107_v43, %v6972_v54  ;;  %v7114_v13 = vadd.f32 %v7098_v57, %v10283_v2  ;;  %v7192_v58 = vrot.slane %v7121_v27, %v9288_v49 }
0x1d20   :  { %v7109_v21 = vpop.f32.mrf.mxu1  ;;  %v7196_v43 = vrot.slane %v7121_v27, %v9334_v39 }
0x1d21   :  { %v7110_v18 = vadd.f32 %v7109_v21, %v6976_v0  ;;  %v7130_v32 = vadd.f32 %v7117_v15, %v7116_v19  ;;  %v7118_v34 = vadd.f32 %v7108_v16, %v10297_v40  ;;  %v7127_v3 = vadd.f32 %v7115_v4, %v7114_v13 }
0x1d22   :  { %v7211_v16 = vrot.slane %v7123_v7, %v9288_v49  ;;  %v7215_v21 = vrot.slane %v7123_v7, %v9334_v39 }
0x1d23   :  { %v7119_v53 = vadd.f32 %v7110_v18, %v10295_v63  ;;  %7131 = vadd.xlane.f32.xlu1 %v7130_v32 }
0x1d25   :  { %v7133_v35 = vadd.f32 %v7119_v53, %v7118_v34 }
0x1d27   :  { %7134 = vadd.xlane.f32.xlu0 %v7133_v35  ;;  %7125 = vadd.xlane.f32.xlu1 %v7124_v62 }
0x1d2b   :  { %7128 = vadd.xlane.f32.xlu0 %v7127_v3 }
0x1dac   :  { %v7132_v61 = vpop.xlane.xlu1 %7131 }
0x1dad   :  { %v7138_v6 = vmul.f32 0.00390625, %v7132_v61 }
0x1daf   :  { %v7144_v10 = vsub.f32 %v7116_v19, %v7138_v6  ;;  %v7145_v36 = vsub.f32 %v7117_v15, %v7138_v6 }
0x1db0   :  { %v7135_v26 = vpop.xlane.xlu0 %7134  ;;  %v7126_v31 = vpop.xlane.xlu1 %7125 }
0x1db1   :  { %v7152_v40 = vmul.f32 %v7144_v10, %v7144_v10  ;;  %v7153_v33 = vmul.f32 %v7145_v36, %v7145_v36  ;;  %v7139_v63 = vmul.f32 0.00390625, %v7135_v26  ;;  %v7136_v45 = vmul.f32 0.00390625, %v7126_v31 }
0x1db3   :  { %v7146_v60 = vsub.f32 %v7118_v34, %v7139_v63  ;;  %v7147_v1 = vsub.f32 %v7119_v53, %v7139_v63  ;;  %v7140_v56 = vsub.f32 %v7112_v8, %v7136_v45  ;;  %v7141_v5 = vsub.f32 %v7113_v46, %v7136_v45 }
0x1db4   :  { %v7129_v14 = vpop.xlane.xlu0 %7128  ;;  %v7162_v2 = vadd.f32 %v7153_v33, %v7152_v40 }
0x1db5   :  { %v7154_v55 = vmul.f32 %v7146_v60, %v7146_v60  ;;  %v7155_v9 = vmul.f32 %v7147_v1, %v7147_v1  ;;  %v7148_v29 = vmul.f32 %v7140_v56, %v7140_v56  ;;  %v7149_v23 = vmul.f32 %v7141_v5, %v7141_v5 }
0x1db6   :  { %v7137_v25 = vmul.f32 0.00390625, %v7129_v14  ;;  %7163 = vadd.xlane.f32.xlu1 %v7162_v2 }
0x1db7   :  { %v7165_v50 = vadd.f32 %v7155_v9, %v7154_v55  ;;  %v7156_v44 = vadd.f32 %v7149_v23, %v7148_v29 }
0x1db8   :  { %v7142_v59 = vsub.f32 %v7114_v13, %v7137_v25  ;;  %v7143_v30 = vsub.f32 %v7115_v4, %v7137_v25 }
0x1db9   :  { %7166 = vadd.xlane.f32.xlu0 %v7165_v50 }
0x1dba   :  { %v7150_v38 = vmul.f32 %v7142_v59, %v7142_v59  ;;  %v7151_v12 = vmul.f32 %v7143_v30, %v7143_v30  ;;  %7157 = vadd.xlane.f32.xlu1 %v7156_v44 }
0x1dbc   :  { %v7159_v22 = vadd.f32 %v7151_v12, %v7150_v38 }
0x1dbe   :  { %7160 = vadd.xlane.f32.xlu0 %v7159_v22 }
0x1e3f   :  { %v7164_v37 = vpop.xlane.xlu1 %7163 }
0x1e40   :  { %v7170_v48 = vmul.f32 0.00390625, %v7164_v37 }
0x1e42   :  { %v7174_v42 = vadd.f32 1e-05, %v7170_v48  ;;  %v7167_v24 = vpop.xlane.xlu0 %7166 }
0x1e43   :  { %v7171_v51 = vmul.f32 0.00390625, %v7167_v24  ;;  %v7158_v11 = vpop.xlane.xlu1 %7157 }
0x1e44   :  { %9108 = vrsqrt.f32 %v7174_v42  ;;  %v7168_v20 = vmul.f32 0.00390625, %v7158_v11 }
0x1e45   :  { %v7175_v28 = vadd.f32 1e-05, %v7171_v51 }
0x1e46   :  { %v7172_v54 = vadd.f32 1e-05, %v7168_v20 }
0x1e47   :  { %9110 = vrsqrt.f32 %v7175_v28  ;;  %v7161_v0 = vpop.xlane.xlu0 %7160 }
0x1e48   :  { %9112 = vrsqrt.f32 %v7172_v54  ;;  %v7169_v47 = vmul.f32 0.00390625, %v7161_v0 }
0x1e4a   :  { %v7173_v52 = vadd.f32 1e-05, %v7169_v47 }
0x1e4c   :  { %9114 = vrsqrt.f32 %v7173_v52 }
0x1e51   :  { %v9109_v41 = vpop.eup %9108 }
0x1e52   :  { %v7184_v19 = vmul.f32 %v9109_v41, %v7144_v10  ;;  %v7185_v15 = vmul.f32 %v9109_v41, %v7145_v36 }
0x1e54   :  { %v9111_v46 = vpop.eup %9110  ;;  %v7203_v17 = vmul.f32 %v7192_v58, %v7184_v19  ;;  %v7204_v18 = vmul.f32 %v7196_v43, %v7185_v15 }
0x1e55   :  { %v9113_v32 = vpop.eup %9112  ;;  %v7186_v8 = vmul.f32 %v9111_v46, %v7146_v60  ;;  %v7187_v57 = vmul.f32 %v9111_v46, %v7147_v1 }
0x1e56   :  { %v7222_v34 = vadd.f32 %v7211_v16, %v7203_v17  ;;  %v7223_v53 = vadd.f32 %v7215_v21, %v7204_v18  ;;  %v7180_v4 = vmul.f32 %v9113_v32, %v7140_v56  ;;  %v7181_v35 = vmul.f32 %v9113_v32, %v7141_v5 }
0x1e57   :  { %v7205_v62 = vmul.f32 %v7192_v58, %v7186_v8  ;;  %v7206_v13 = vmul.f32 %v7196_v43, %v7187_v57 }
0x1e58   :  { %v7236_v3 = vadd.f32 %v7223_v53, %v7222_v34  ;;  %v7199_v61 = vmul.f32 %v7192_v58, %v7180_v4  ;;  %v7200_v6 = vmul.f32 %v7196_v43, %v7181_v35  ;;  %v7229_v4 = vld [vmem:[#allocation3 + $0x46] ss:$8 sm:$0x3] }
0x1e59   :  { %v9115_v10 = vpop.eup %9114  ;;  %v7224_v36 = vadd.f32 %v7211_v16, %v7205_v62  ;;  %v7225_v26 = vadd.f32 %v7215_v21, %v7206_v13 }
0x1e5a   :  { %7237 = vadd.xlane.f32.xlu1 %v7236_v3  ;;  %v7218_v31 = vadd.f32 %v7211_v16, %v7199_v61  ;;  %v7219_v40 = vadd.f32 %v7215_v21, %v7200_v6  ;;  %v7182_v33 = vmul.f32 %v9115_v10, %v7142_v59  ;;  %v7183_v63 = vmul.f32 %v9115_v10, %v7143_v30 }
0x1e5b   :  { %v7239_v45 = vadd.f32 %v7225_v26, %v7224_v36  ;;  %v7317_v6 = vrot.slane %v7229_v4, %v9288_v49  ;;  %v7321_v10 = vrot.slane %v7229_v4, %v9334_v39 }
0x1e5c   :  { %v7230_v60 = vadd.f32 %v7219_v40, %v7218_v31  ;;  %v7201_v1 = vmul.f32 %v7192_v58, %v7182_v33  ;;  %v7202_v14 = vmul.f32 %v7196_v43, %v7183_v63 }
0x1e5d   :  { %7240 = vadd.xlane.f32.xlu0 %v7239_v45 }
0x1e5e   :  { %7231 = vadd.xlane.f32.xlu1 %v7230_v60  ;;  %v7220_v56 = vadd.f32 %v7211_v16, %v7201_v1  ;;  %v7221_v5 = vadd.f32 %v7215_v21, %v7202_v14 }
0x1e60   :  { %v7233_v2 = vadd.f32 %v7221_v5, %v7220_v56 }
0x1e62   :  { %7234 = vadd.xlane.f32.xlu0 %v7233_v2 }
0x1ee3   :  { %v7238_v55 = vpop.xlane.xlu1 %7237 }
0x1ee4   :  { %v7244_v9 = vmul.f32 0.00390625, %v7238_v55 }
0x1ee6   :  { %v7250_v29 = vsub.f32 %v7222_v34, %v7244_v9  ;;  %v7251_v23 = vsub.f32 %v7223_v53, %v7244_v9  ;;  %v7241_v25 = vpop.xlane.xlu0 %7240  ;;  %v7227_v53 = vld [vmem:[#allocation3 + $0x45] ss:$8 sm:$0x3] }
0x1ee7   :  { %v7245_v50 = vmul.f32 0.00390625, %v7241_v25  ;;  %v7232_v44 = vpop.xlane.xlu1 %7231  ;;  %v7298_v35 = vrot.slane %v7227_v53, %v9288_v49  ;;  %v7302_v62 = vrot.slane %v7227_v53, %v9334_v39 }
0x1ee8   :  { %v7258_v38 = vmul.f32 %v7250_v29, %v7250_v29  ;;  %v7259_v59 = vmul.f32 %v7251_v23, %v7251_v23  ;;  %v7242_v30 = vmul.f32 0.00390625, %v7232_v44 }
0x1ee9   :  { %v7252_v12 = vsub.f32 %v7224_v36, %v7245_v50  ;;  %v7253_v22 = vsub.f32 %v7225_v26, %v7245_v50 }
0x1eea   :  { %v7246_v37 = vsub.f32 %v7218_v31, %v7242_v30  ;;  %v7247_v48 = vsub.f32 %v7219_v40, %v7242_v30  ;;  %v7268_v42 = vadd.f32 %v7259_v59, %v7258_v38 }
0x1eeb   :  { %v7260_v24 = vmul.f32 %v7252_v12, %v7252_v12  ;;  %v7261_v51 = vmul.f32 %v7253_v22, %v7253_v22  ;;  %v7235_v11 = vpop.xlane.xlu0 %7234 }
0x1eec   :  { %v7254_v20 = vmul.f32 %v7246_v37, %v7246_v37  ;;  %v7255_v28 = vmul.f32 %v7247_v48, %v7247_v48  ;;  %v7243_v54 = vmul.f32 0.00390625, %v7235_v11  ;;  %7269 = vadd.xlane.f32.xlu1 %v7268_v42  ;;  %v7349_v11 = vld [vmem:[#allocation3 + $0xb0] sm:$0xff] }
0x1eed   :  { %v7271_v0 = vadd.f32 %v7261_v51, %v7260_v24  ;;  %v7348_v24 = vld [vmem:[#allocation3 + $0xa0] sm:$0xff] }
0x1eee   :  { %v7248_v47 = vsub.f32 %v7220_v56, %v7243_v54  ;;  %v7249_v52 = vsub.f32 %v7221_v5, %v7243_v54  ;;  %v7262_v27 = vadd.f32 %v7255_v28, %v7254_v20 }
0x1eef   :  { %7272 = vadd.xlane.f32.xlu0 %v7271_v0 }
0x1ef0   :  { %v7256_v7 = vmul.f32 %v7248_v47, %v7248_v47  ;;  %v7257_v58 = vmul.f32 %v7249_v52, %v7249_v52  ;;  %7263 = vadd.xlane.f32.xlu1 %v7262_v27 }
0x1ef2   :  { %v7265_v43 = vadd.f32 %v7257_v58, %v7256_v7 }
0x1ef4   :  { %7266 = vadd.xlane.f32.xlu0 %v7265_v43 }
0x1f75   :  { %v7270_v41 = vpop.xlane.xlu1 %7269 }
0x1f76   :  { %v7276_v19 = vmul.f32 0.00390625, %v7270_v41 }
0x1f78   :  { %v7280_v15 = vadd.f32 1e-05, %v7276_v19  ;;  %v7273_v16 = vpop.xlane.xlu0 %7272 }
0x1f79   :  { %v7277_v21 = vmul.f32 0.00390625, %v7273_v16  ;;  %v7264_v46 = vpop.xlane.xlu1 %7263 }
0x1f7a   :  { %9116 = vrsqrt.f32 %v7280_v15  ;;  %v7274_v17 = vmul.f32 0.00390625, %v7264_v46 }
0x1f7b   :  { %v7281_v18 = vadd.f32 1e-05, %v7277_v21 }
0x1f7c   :  { %v7278_v32 = vadd.f32 1e-05, %v7274_v17 }
0x1f7d   :  { %9118 = vrsqrt.f32 %v7281_v18  ;;  %v7267_v8 = vpop.xlane.xlu0 %7266 }
0x1f7e   :  { %9120 = vrsqrt.f32 %v7278_v32  ;;  %v7275_v57 = vmul.f32 0.00390625, %v7267_v8 }
0x1f80   :  { %v7279_v34 = vadd.f32 1e-05, %v7275_v57 }
0x1f82   :  { %9122 = vrsqrt.f32 %v7279_v34 }
0x1f87   :  { %v9117_v13 = vpop.eup %9116 }
0x1f88   :  { %v7290_v3 = vmul.f32 %v9117_v13, %v7250_v29  ;;  %v7291_v61 = vmul.f32 %v9117_v13, %v7251_v23 }
0x1f8a   :  { %v9119_v36 = vpop.eup %9118  ;;  %v7309_v26 = vmul.f32 %v7298_v35, %v7290_v3  ;;  %v7310_v31 = vmul.f32 %v7302_v62, %v7291_v61  ;;  %v7350_v61 = vld [vmem:[#allocation3 + $0x47] ss:$0 sm:$0xff] }
0x1f8b   :  { %v9121_v40 = vpop.eup %9120  ;;  %v7292_v33 = vmul.f32 %v9119_v36, %v7252_v12  ;;  %v7293_v63 = vmul.f32 %v9119_v36, %v7253_v22 }
0x1f8c   :  { %v7328_v45 = vadd.f32 %v7317_v6, %v7309_v26  ;;  %v7329_v60 = vadd.f32 %v7321_v10, %v7310_v31  ;;  %v7286_v1 = vmul.f32 %v9121_v40, %v7246_v37  ;;  %v7287_v14 = vmul.f32 %v9121_v40, %v7247_v48 }
0x1f8d   :  { %v7311_v56 = vmul.f32 %v7298_v35, %v7292_v33  ;;  %v7312_v5 = vmul.f32 %v7302_v62, %v7293_v63 }
0x1f8e   :  { %v7338_v2 = vadd.f32 %v7329_v60, %v7328_v45  ;;  %v7305_v55 = vmul.f32 %v7298_v35, %v7286_v1  ;;  %v7306_v9 = vmul.f32 %v7302_v62, %v7287_v14 }
0x1f8f   :  { %v9123_v29 = vpop.eup %9122  ;;  %v7330_v23 = vadd.f32 %v7317_v6, %v7311_v56  ;;  %v7331_v49 = vadd.f32 %v7321_v10, %v7312_v5 }
0x1f90   :  { %7339 = vadd.xlane.f32.xlu1 %v7338_v2  ;;  %v7324_v39 = vadd.f32 %v7317_v6, %v7305_v55  ;;  %v7325_v25 = vadd.f32 %v7321_v10, %v7306_v9  ;;  %v7288_v50 = vmul.f32 %v9123_v29, %v7248_v47  ;;  %v7289_v44 = vmul.f32 %v9123_v29, %v7249_v52 }
0x1f91   :  { %v7341_v38 = vadd.f32 %v7331_v49, %v7330_v23 }
0x1f92   :  { %v7332_v59 = vadd.f32 %v7325_v25, %v7324_v39  ;;  %v7307_v30 = vmul.f32 %v7298_v35, %v7288_v50  ;;  %v7308_v12 = vmul.f32 %v7302_v62, %v7289_v44 }
0x1f93   :  { %7342 = vadd.xlane.f32.xlu0 %v7341_v38 }
0x1f94   :  { %7333 = vadd.xlane.f32.xlu1 %v7332_v59  ;;  %v7326_v22 = vadd.f32 %v7317_v6, %v7307_v30  ;;  %v7327_v37 = vadd.f32 %v7321_v10, %v7308_v12 }
0x1f96   :  { %v7335_v48 = vadd.f32 %v7327_v37, %v7326_v22 }
0x1f98   :  { %7336 = vadd.xlane.f32.xlu0 %v7335_v48 }
0x2019   :  { %v7340_v42 = vpop.xlane.xlu1 %7339 }
0x201a   :  { %v7346_v51 = vmul.f32 0.00390625, %v7340_v42 }
0x201c   :  { %v7343_v20 = vpop.xlane.xlu0 %7342  ;;  %v7382_v28 = vmul.f32 %v7348_v24, %v7346_v51 }
0x201d   :  { %v7347_v54 = vmul.f32 0.00390625, %v7343_v20  ;;  %v7334_v0 = vpop.xlane.xlu1 %7333 }
0x201e   :  { %v7344_v47 = vmul.f32 0.00390625, %v7334_v0  ;;  %v7384_v27 = vsel %vm250_vm6, %v7382_v28, 0.0 }
0x201f   :  { %v7383_v52 = vmul.f32 %v7349_v11, %v7347_v54 }
0x2020   :  { %v7351_v41 = vmul.f32 %v7348_v24, %v7344_v47 }
0x2021   :  { %v7385_v7 = vsel %vm250_vm6, %v7383_v52, 0.0  ;;  %v7337_v58 = vpop.xlane.xlu0 %7336 }
0x2022   :  { %v7386_v43 = vadd.f32 %v7385_v7, %v7384_v27  ;;  %v7345_v19 = vmul.f32 0.00390625, %v7337_v58  ;;  %v7353_v46 = vsel %vm250_vm6, %v7351_v41, 0.0 }
0x2024   :  { %v7387_v15 = vrot.slane %v7386_v43, 4  ;;  %v7352_v16 = vmul.f32 %v7349_v11, %v7345_v19 }
0x2026   :  { %v7388_v21 = vadd.f32 %v7387_v15, %v7386_v43  ;;  %v7354_v17 = vsel %vm250_vm6, %v7352_v16, 0.0 }
0x2027   :  { %v7355_v18 = vadd.f32 %v7354_v17, %v7353_v46 }
0x2028   :  { %v7389_v32 = vrot.slane %v7388_v21, 2 }
0x2029   :  { %v7356_v8 = vrot.slane %v7355_v18, 4 }
0x202a   :  { %v7390_v57 = vadd.f32 %v7389_v32, %v7388_v21 }
0x202b   :  { %v7357_v34 = vadd.f32 %v7356_v8, %v7355_v18 }
0x202c   :  { %v7391_v35 = vrot.slane %v7390_v57, 1 }
0x202d   :  { %v7358_v53 = vrot.slane %v7357_v34, 2 }
0x202e   :  { %v7392_v3 = vadd.f32 %v7391_v35, %v7390_v57 }
0x202f   :  { %v7359_v4 = vadd.f32 %v7358_v53, %v7357_v34 }
0x2030   :  { %v7393_v36 = vadd.f32 %v7392_v3, %v7350_v61 }
0x2031   :  { %v7360_v62 = vrot.slane %v7359_v4, 1 }
0x2032   :  { %v7394_v26 = vsel %vm7363_vm10, %v7393_v36, -inf }
0x2033   :  { %v7361_v13 = vadd.f32 %v7360_v62, %v7359_v4 }
0x2035   :  { %v7362_v6 = vadd.f32 %v7361_v13, %v7350_v61 }
0x2037   :  { %v7364_v10 = vsel %vm7363_vm10, %v7362_v6, -inf }
0x2038   :  { %7365 = vmax.xlane.f32.xlu1 %v7364_v10 }
0x203c   :  { %7395 = vmax.xlane.f32.xlu1 %v7394_v26 }
0x20c1   :  { %v7366_v31 = vpop.xlane.xlu1 %7365 }
0x20c2   :  { %v7367_v40 = vsub.f32 %v7362_v6, %v7366_v31 }
0x20c4   :  { %v7368_v33 = vmul.f32 1.442695, %v7367_v40 }
0x20c5   :  { %v7396_v45 = vpop.xlane.xlu1 %7395 }
0x20c6   :  { %9124 = vpow2.f32 %v7368_v33  ;;  %v7397_v60 = vsub.f32 %v7393_v36, %v7396_v45 }
0x20c8   :  { %v7398_v14 = vmul.f32 1.442695, %v7397_v60 }
0x20ca   :  { %9126 = vpow2.f32 %v7398_v14 }
0x20d3   :  { %v9125_v63 = vpop.eup %9124 }
0x20d4   :  { %7371 = vrot.lane.b32.xlu0 %v9125_v63, %s9210_s7 }
0x20d7   :  { %v9127_v5 = vpop.eup %9126 }
0x2146   :  { %v7372_v1 = vpop.permute.xlu0 %7371 }
0x2147   :  { %v7375_v56 = vsel %vm7374_vm11, %v7372_v1, 0.0 }
0x2148   :  { %7376 = vadd.xlane.f32.xlu1 %v7375_v56 }
0x2159   :  { %7401 = vrot.lane.b32.xlu1 %v9127_v5, %s9210_s7 }
0x21d1   :  { %v7377_v2 = vpop.xlane.xlu1 %7376 }
0x21d2   :  { %9128 = vrcp.f32 %v7377_v2 }
0x21d5   :  { %v7402_v55 = vpop.permute.xlu1 %7401 }
0x21d6   :  { %v7404_v9 = vsel %vm7374_vm11, %v7402_v55, 0.0 }
0x21d7   :  { %7405 = vadd.xlane.f32.xlu0 %v7404_v9 }
0x21df   :  { %v9129_v23 = vpop.eup %9128 }
0x21e0   :  { %v7379_v39 = vmul.f32 %v9129_v23, %v9125_v63 }
0x21e2   :  { %v7381_v38 = vsel %vm7380_vm12, %v7362_v6, %v7379_v39 }
0x2260   :  { %v7406_v29 = vpop.xlane.xlu0 %7405 }
0x2261   :  { %9130 = vrcp.f32 %v7406_v29 }
0x226e   :  { %v9131_v49 = vpop.eup %9130 }
0x226f   :  { %v7408_v25 = vmul.f32 %v9131_v49, %v9127_v5 }
0x2271   :  { %v7409_v50 = vsel %vm7380_vm12, %v7393_v36, %v7408_v25 }
0x2272   :  { %v7411_v44 = vrot.slane %v7409_v50, 7 }
0x2274   :  { %v7413_v59 = vsel %vm79_vm1, %v7381_v38, %v7411_v44 }
0x2275   :  { %7415 = vst.msk [vmem:[#allocation8] sm:$0x3] %vm7414_vm13, %v7413_v59 }
0x2276   :  { %9183 = shalt.err (!%p9180_p0)
}
0x2277   :  { %7425 = dma.vmem_to_hbm [thread:$0]  %s7423_s9, 32, %s10333_s3, [#allocation5]  }
0x2278   :  { %9196 = dma.done.wait [#allocation5], 32  }
0x2279   :  { %9197 = vsyncadd [#allocation5], 4294967264 }
0x227a   :  { %7429 = vsyncpa [#allocation4], 1 }
0x227b   :  { %7430 = vsyncpa [#allocation7], 1 }
0x227c   :  { %7431 = vsyncpa [#allocation5], 1 }

</bundles_post_ra>
